<compile_context>
chip_gen: v7x
topology: tpu7x:2x2x1
jax: 0.10.0
libtpu: 0.0.40
codegen_flags: <defaults>
</compile_context>

<pallas_src>
import jax
import jax.numpy as jnp
from jax.experimental import pallas as pl
from jax.experimental.pallas import tpu as pltpu

DIM = 32                     # GIN hidden dim
EMBED_DIM = 128              # protein embedding dim == Conv1d "length" axis
OUTPUT_DIM = 128
N_FILTERS = 32
KERNEL_SIZE = 8
KO = KERNEL_SIZE * N_FILTERS            # 256 stacked conv-weight rows
SEQ_LEN = 1000               # protein sequence length == Conv1d in_channels
CONV_OUT_LEN = EMBED_DIM - KERNEL_SIZE + 1      # 121
NUM_FEATURES_XD = 78
XD_PAD = 128                 # node features zero-padded to a lane-dense 128
NUM_FEATURES_XT = 25
VOCAB_PAD = 32               # 26 token ids zero-padded to 32
BN_EPS = 1e-5
NUM_GIN_LAYERS = 5
HID1 = 1024
HID2 = 256
VMEM_LIMIT = 32 * 1024 * 1024   # explicit scoped-VMEM budget (v5e default is only 16 MiB)


# ----------------------- Kernel A: fused graph branch -----------------------

def _graph_branch_kernel(ahat_ref, x_ref,
                         w1a_ref, b1a_ref, w2a_ref, b2a_ref, sa_ref, ta_ref,
                         w1s_ref, b1s_ref, w2s_ref, b2s_ref, ss_ref, ts_ref,
                         pool_ref, wxd_ref, bxd_ref,
                         u_ref):
    ahat = ahat_ref[...]                                          # (N, N) bf16, loaded once

    def gin_bn(u_bf16, w1, b1, w2, b2, scale, shift):
        # GINConv(eps=0): nn((A+I) @ u) with nn = Linear-ReLU-Linear, then the outer ReLU,
        # then BatchNorm1d (eval) pre-folded to an affine h*scale + shift.
        agg = jnp.dot(ahat, u_bf16, preferred_element_type=jnp.float32)
        h = jnp.dot(agg.astype(jnp.bfloat16), w1, preferred_element_type=jnp.float32) + b1
        h = jnp.maximum(h, 0.0)
        h = jnp.dot(h.astype(jnp.bfloat16), w2, preferred_element_type=jnp.float32) + b2
        h = jnp.maximum(h, 0.0)
        return h * scale + shift                                  # f32 (N, DIM)

    u = gin_bn(x_ref[...], w1a_ref[...], b1a_ref[...], w2a_ref[...], b2a_ref[...],
               sa_ref[...], ta_ref[...])
    for k in range(NUM_GIN_LAYERS - 1):                           # static unroll: layers 2..5
        u = gin_bn(u.astype(jnp.bfloat16),
                   w1s_ref[k], b1s_ref[k], w2s_ref[k], b2s_ref[k],
                   ss_ref[k], ts_ref[k])

    # global_add_pool (one-hot graph-assignment matmul) + fc1_xd + ReLU (dropout = identity)
    pooled = jnp.dot(pool_ref[...], u.astype(jnp.bfloat16), preferred_element_type=jnp.float32)
    u_ref[...] = jnp.maximum(
        jnp.dot(pooled.astype(jnp.bfloat16), wxd_ref[...],
                preferred_element_type=jnp.float32) + bxd_ref[...], 0.0)


def graph_branch(ahat, x, pool_mat, pk):
    # TODO(synk): for production-size graphs, tile the (N,N) aggregation (grid over node
    # row-blocks or scalar-prefetch segment-sum) instead of whole-array VMEM residency.
    bsz = pool_mat.shape[0]
    return pl.pallas_call(
        _graph_branch_kernel,
        out_shape=jax.ShapeDtypeStruct((bsz, OUTPUT_DIM), jnp.float32),
        compiler_params=pltpu.CompilerParams(vmem_limit_bytes=VMEM_LIMIT),
    )(ahat, x,
      pk["gin0_w1"], pk["gin0_b1"], pk["gin0_w2"], pk["gin0_b2"],
      pk["gin0_scale"], pk["gin0_shift"],
      pk["gin_w1s"], pk["gin_b1s"], pk["gin_w2s"], pk["gin_b2s"],
      pk["gin_scales"], pk["gin_shifts"],
      pool_mat, pk["fc1_xd_w"], pk["fc1_xd_b"])


# ----------------- Kernel B: fused protein branch + MLP head -----------------

def _protein_head_kernel(oh_ref, u_ref,
                         wc_ref, tbl_ref, wxt_ref, bxt_ref,
                         w1u_ref, w1t_ref, b1_ref, w2_ref, b2_ref, w3_ref, b3_ref,
                         out_ref, acc_ref):
    tb = oh_ref.shape[0]
    wc = wc_ref[...]                                              # (256, 1000) bf16 (hoisted)
    tbl = tbl_ref[...]                                            # (32, 128) bf16

    # ---- Conv1d(in=1000, out=32, k=8), embedding lookup folded in ----
    # m[k*32+o, l] = sum_c W[o,c,k] * emb[c, l], computed as (Wstk @ onehot) @ table.
    # conv[o, l] = sum_k m[k*32+o, l+k]: roll each (32,128) tap chunk by -k and sum.
    # Lanes l >= 121 hold circular-wrap garbage and are nulled by zero rows of wxt.
    for b in range(tb):                                           # static unroll (tb small)
        oh = oh_ref[b]                                            # (1000, 32) bf16 one-hot
        wo = jnp.dot(wc, oh, preferred_element_type=jnp.float32)  # (256, 32)
        m = jnp.dot(wo.astype(jnp.bfloat16), tbl,
                    preferred_element_type=jnp.float32)           # (256, 128)
        conv = m[0:N_FILTERS, :]
        for k in range(1, KERNEL_SIZE):
            chunk = m[k * N_FILTERS:(k + 1) * N_FILTERS, :]
            conv = conv + pltpu.roll(chunk, shift=EMBED_DIM - k, axis=1)
        acc_ref[b] = conv.astype(jnp.bfloat16)                    # one unmasked (32,128) store

    # ---- fc1_xt as a per-filter block contraction over the whole batch tile ----
    # xt[b, :] = sum_o acc[b, o, :] @ Wxt[o]  (+ bias with the conv bias pre-folded in)
    xt = jnp.zeros((tb, OUTPUT_DIM), jnp.float32)
    for o in range(N_FILTERS):
        a_o = acc_ref[:, o, :]                                    # (tb, 128) bf16
        xt = xt + jnp.dot(a_o, wxt_ref[o], preferred_element_type=jnp.float32)
    xt = xt + bxt_ref[...]

    # ---- cat((u, xt), 1) -> fc1 -> ReLU -> fc2 -> ReLU -> out  (dropout = identity) ----
    # concat folded into the split fc1 weight: xc @ W1 == u @ W1[:128] + xt @ W1[128:]
    h = (jnp.dot(u_ref[...].astype(jnp.bfloat16), w1u_ref[...],
                 preferred_element_type=jnp.float32)
         + jnp.dot(xt.astype(jnp.bfloat16), w1t_ref[...],
                   preferred_element_type=jnp.float32)
         + b1_ref[...])
    h = jnp.maximum(h, 0.0)
    h = jnp.maximum(jnp.dot(h.astype(jnp.bfloat16), w2_ref[...],
                            preferred_element_type=jnp.float32) + b2_ref[...], 0.0)
    # output projection padded to 128 lanes (real output in column 0) -> unmasked store
    out_ref[...] = jnp.dot(h.astype(jnp.bfloat16), w3_ref[...],
                           preferred_element_type=jnp.float32) + b3_ref[...]


def _const_spec(a):
    nd = a.ndim
    return pl.BlockSpec(a.shape, lambda i: (0,) * nd)


def protein_head(onehot, u, pk, *, block_b=None):
    bsz = onehot.shape[0]
    tb = bsz if block_b is None else block_b
    assert bsz % tb == 0, "batch must be divisible by the batch tile"

    weights = (pk["conv_xt_w"], pk["embed_table"], pk["fc1_xt_w"], pk["fc1_xt_b"],
               pk["head_w1u"], pk["head_w1t"], pk["head_b1"],
               pk["head_w2"], pk["head_b2"], pk["head_w3"], pk["head_b3"])

    flops = 2 * bsz * (KO * SEQ_LEN * VOCAB_PAD
                       + KO * VOCAB_PAD * EMBED_DIM
                       + N_FILTERS * EMBED_DIM * OUTPUT_DIM
                       + OUTPUT_DIM * HID1 * 2
                       + HID1 * HID2
                       + HID2 * OUTPUT_DIM)
    weight_bytes = sum(int(w.size) * w.dtype.itemsize for w in weights)
    bytes_accessed = (int(onehot.size) * onehot.dtype.itemsize
                      + int(u.size) * 4 + bsz * OUTPUT_DIM * 4 + weight_bytes)

    return pl.pallas_call(
        _protein_head_kernel,
        out_shape=jax.ShapeDtypeStruct((bsz, OUTPUT_DIM), jnp.float32),
        grid=(bsz // tb,),
        in_specs=[pl.BlockSpec((tb, SEQ_LEN, VOCAB_PAD), lambda i: (i, 0, 0)),
                  pl.BlockSpec((tb, OUTPUT_DIM), lambda i: (i, 0))]
                 + [_const_spec(w) for w in weights],
        out_specs=pl.BlockSpec((tb, OUTPUT_DIM), lambda i: (i, 0)),
        scratch_shapes=[pltpu.VMEM((tb, N_FILTERS, EMBED_DIM), jnp.bfloat16)],
        compiler_params=pltpu.CompilerParams(
            dimension_semantics=("parallel",),          # megacore sharding on v7x
            vmem_limit_bytes=VMEM_LIMIT),
        cost_estimate=pl.CostEstimate(flops=flops, transcendentals=0,
                                      bytes_accessed=bytes_accessed),
    )(onehot, u, *weights)


# ------------------------------ forward glue --------------------------------

def gin_convnet_forward(pk, x, edge_index, batch, target, *, num_graphs):
    n = x.shape[0]
    src, dst = edge_index[0], edge_index[1]
    # dense (A + I): GINConv with eps=0 sums neighbor features plus the node's own.
    a = jnp.zeros((n, n), jnp.float32).at[dst, src].add(1.0)
    ahat = (a + jnp.eye(n, dtype=jnp.float32)).astype(jnp.bfloat16)
    pool_mat = (batch[None, :] == jnp.arange(num_graphs)[:, None]).astype(jnp.bfloat16)
    x_pad = jnp.pad(x, ((0, 0), (0, XD_PAD - NUM_FEATURES_XD))).astype(jnp.bfloat16)

    # TODO(synk): kernels A and B could be merged (keep u resident in VMEM) to save one
    # pallas_call launch and a (B,128) HBM round-trip; kept separate for clarity here.
    u = graph_branch(ahat, x_pad, pool_mat, pk)                            # (B, 128) f32

    # token one-hot (exact) instead of materializing the (B,1000,128) embedding in HBM;
    # the embedding matmul happens on the MXU inside kernel B.
    onehot = (target[..., None] ==
              jnp.arange(VOCAB_PAD, dtype=target.dtype)).astype(jnp.bfloat16)  # (B,1000,32)
    out_pad = protein_head(onehot, u, pk)                                  # (B, 128)
    return out_pad[:, :1]                                                  # (B, 1)


# ------------------------------ parameter init ------------------------------

def init_params(key):
    keys = iter(jax.random.split(key, 64))

    def nrm(shape, scale=0.1):
        return scale * jax.random.normal(next(keys), shape, jnp.float32)

    gin = []
    in_dim = NUM_FEATURES_XD
    for _ in range(NUM_GIN_LAYERS):
        gin.append(dict(
            w1=nrm((in_dim, DIM)), b1=nrm((1, DIM)),
            w2=nrm((DIM, DIM)),    b2=nrm((1, DIM)),
            gamma=1.0 + nrm((1, DIM)), beta=nrm((1, DIM)),
            mean=nrm((1, DIM)),
            var=0.5 + jax.random.uniform(next(keys), (1, DIM), jnp.float32),
        ))
        in_dim = DIM

    return dict(
        gin=gin,
        fc1_xd_w=nrm((DIM, OUTPUT_DIM)), fc1_xd_b=nrm((1, OUTPUT_DIM)),
        embedding=nrm((NUM_FEATURES_XT + 1, EMBED_DIM), scale=1.0),
        conv_xt_w=nrm((N_FILTERS, SEQ_LEN, KERNEL_SIZE), scale=0.02),   # PyTorch (O, C, K)
        conv_xt_b=nrm((N_FILTERS,)),
        fc1_xt_w=nrm((N_FILTERS * CONV_OUT_LEN, OUTPUT_DIM), scale=0.02),
        fc1_xt_b=nrm((1, OUTPUT_DIM)),
        head=dict(
            w1=nrm((2 * OUTPUT_DIM, HID1), scale=0.05), b1=nrm((1, HID1)),
            w2=nrm((HID1, HID2), scale=0.05),           b2=nrm((1, HID2)),
            w3=nrm((HID2, 1), scale=0.05),              b3=nrm((1, 1)),
        ),
    )


def pack_params(p):
    """Repack natural-layout params into kernel-ready layouts (done once, outside kernels)."""
    bf = lambda a: a.astype(jnp.bfloat16)
    gin = p["gin"]

    def bn_fold(g):
        scale = g["gamma"] / jnp.sqrt(g["var"] + BN_EPS)
        return scale, g["beta"] - g["mean"] * scale

    s0, t0 = bn_fold(gin[0])
    scales = jnp.stack([bn_fold(g)[0] for g in gin[1:]], axis=0)
    shifts = jnp.stack([bn_fold(g)[1] for g in gin[1:]], axis=0)
    stk = lambda k: jnp.stack([g[k] for g in gin[1:]], axis=0)

    # first GIN layer: zero-pad 78 input features to a lane-dense 128
    w1_0 = jnp.pad(gin[0]["w1"], ((0, XD_PAD - NUM_FEATURES_XD), (0, 0)))

    # Conv1d weight (O=32, C=1000, K=8) -> one stacked (K*O=256, C=1000) matrix,
    # rows [k*32:(k+1)*32] hold tap k.
    wc = bf(jnp.transpose(p["conv_xt_w"], (2, 0, 1)).reshape(KO, SEQ_LEN))

    # fc1_xt weight (32*121, 128) -> per-filter blocks (32, 128, 128), zero-padded over l;
    # the conv bias is linear through fc1_xt, so fold it into the fc1_xt bias.
    wxt = p["fc1_xt_w"].reshape(N_FILTERS, CONV_OUT_LEN, OUTPUT_DIM)
    bxt = p["fc1_xt_b"] + jnp.einsum("o,olr->r", p["conv_xt_b"], wxt)[None, :]
    wxt = bf(jnp.pad(wxt, ((0, 0), (0, EMBED_DIM - CONV_OUT_LEN), (0, 0))))

    table = bf(jnp.pad(p["embedding"],
                       ((0, VOCAB_PAD - (NUM_FEATURES_XT + 1)), (0, 0))))   # (32, 128)

    # head: split fc1 over the cat(u, xt) boundary; pad the (256,1) output layer to 128 lanes
    w3 = jnp.pad(p["head"]["w3"], ((0, 0), (0, OUTPUT_DIM - p["head"]["w3"].shape[1])))
    b3 = jnp.pad(p["head"]["b3"], ((0, 0), (0, OUTPUT_DIM - p["head"]["b3"].shape[1])))

    return dict(
        gin0_w1=bf(w1_0), gin0_b1=gin[0]["b1"],
        gin0_w2=bf(gin[0]["w2"]), gin0_b2=gin[0]["b2"],
        gin0_scale=s0, gin0_shift=t0,
        gin_w1s=bf(stk("w1")), gin_b1s=stk("b1"),
        gin_w2s=bf(stk("w2")), gin_b2s=stk("b2"),
        gin_scales=scales, gin_shifts=shifts,
        fc1_xd_w=bf(p["fc1_xd_w"]), fc1_xd_b=p["fc1_xd_b"],
        embed_table=table,
        conv_xt_w=wc,
        fc1_xt_w=wxt, fc1_xt_b=bxt,
        head_w1u=bf(p["head"]["w1"][:OUTPUT_DIM]),
        head_w1t=bf(p["head"]["w1"][OUTPUT_DIM:]),
        head_b1=p["head"]["b1"],
        head_w2=bf(p["head"]["w2"]), head_b2=p["head"]["b2"],
        head_w3=bf(w3), head_b3=b3,
    )


# ----------------------------------- main -----------------------------------

if __name__ == "__main__":
    key = jax.random.PRNGKey(0)
    k_par, k_x, k_tgt = jax.random.split(key, 3)

    num_graphs = 2
    nodes_per_graph = 8
    n_nodes = num_graphs * nodes_per_graph

    params = init_params(k_par)
    pk = pack_params(params)

    # node features
    x = jax.random.normal(k_x, (n_nodes, NUM_FEATURES_XD), jnp.float32)

    # undirected ring within each graph
    src_list, dst_list = [], []
    for g in range(num_graphs):
        base = g * nodes_per_graph
        for i in range(nodes_per_graph):
            j = (i + 1) % nodes_per_graph
            src_list += [base + i, base + j]
            dst_list += [base + j, base + i]
    edge_index = jnp.array([src_list, dst_list], dtype=jnp.int32)
    batch = jnp.repeat(jnp.arange(num_graphs, dtype=jnp.int32), nodes_per_graph)

    # protein token sequences (indices in [0, 25])
    target = jax.random.randint(k_tgt, (num_graphs, SEQ_LEN), 0, NUM_FEATURES_XT + 1,
                                dtype=jnp.int32)

    # TODO(synk): dropout and batch-statistics BatchNorm (training mode) are not modeled;
    # this forward matches module.eval() semantics.
    forward = jax.jit(gin_convnet_forward, static_argnames=("num_graphs",))
    out = forward(pk, x, edge_index, batch, target, num_graphs=num_graphs)
    out = jax.block_until_ready(out)
    assert out.shape == (num_graphs, 1) and out.dtype == jnp.float32
    assert bool(jnp.all(jnp.isfinite(out)))
    print("KERNEL_OK")
</pallas_src>

<mosaic_0001>
module attributes {stable_mosaic.version = 11 : i64} {
  func.func private @main(%arg0: i32) attributes {dimension_semantics = [#tpu.dimension_semantics<core_parallel>], iteration_bounds = array<i64: 2>, tpu.core_type = #tpu.core_type<sc_scalar_subcore>, window_params = []} {
    return
  }
}

module attributes {stable_mosaic.version = 11 : i64} {
  func.func private @main(%arg0: i32) attributes {dimension_semantics = [#tpu.dimension_semantics<core_parallel>], iteration_bounds = array<i64: 2>, tpu.core_type = #tpu.core_type<sc_scalar_subcore>, window_params = []} {
    return
  }
}

module attributes {stable_mosaic.version = 11 : i64} {
  func.func @_graph_branch_kernel(%arg0: memref<16x16xbf16, #tpu.memory_space<vmem>>, %arg1: memref<16x128xbf16, #tpu.memory_space<vmem>>, %arg2: memref<128x32xbf16, #tpu.memory_space<vmem>>, %arg3: memref<1x32xf32, #tpu.memory_space<vmem>>, %arg4: memref<32x32xbf16, #tpu.memory_space<vmem>>, %arg5: memref<1x32xf32, #tpu.memory_space<vmem>>, %arg6: memref<1x32xf32, #tpu.memory_space<vmem>>, %arg7: memref<1x32xf32, #tpu.memory_space<vmem>>, %arg8: memref<4x32x32xbf16, #tpu.memory_space<vmem>>, %arg9: memref<4x1x32xf32, #tpu.memory_space<vmem>>, %arg10: memref<4x32x32xbf16, #tpu.memory_space<vmem>>, %arg11: memref<4x1x32xf32, #tpu.memory_space<vmem>>, %arg12: memref<4x1x32xf32, #tpu.memory_space<vmem>>, %arg13: memref<4x1x32xf32, #tpu.memory_space<vmem>>, %arg14: memref<2x16xbf16, #tpu.memory_space<vmem>>, %arg15: memref<32x128xbf16, #tpu.memory_space<vmem>>, %arg16: memref<1x128xf32, #tpu.memory_space<vmem>>, %arg17: memref<2x128xf32, #tpu.memory_space<vmem>>) attributes {dimension_semantics = [], scalar_prefetch = 0 : i64, scratch_operands = 0 : i64, tpu.core_type = #tpu.core_type<tc>} {
    %c0 = arith.constant 0 : index
    %c0_0 = arith.constant 0 : index
    %0 = vector.load %arg0[%c0, %c0_0] : memref<16x16xbf16, #tpu.memory_space<vmem>>, vector<16x16xbf16>
    %c0_1 = arith.constant 0 : index
    %c0_2 = arith.constant 0 : index
    %1 = vector.load %arg1[%c0_1, %c0_2] : memref<16x128xbf16, #tpu.memory_space<vmem>>, vector<16x128xbf16>
    %c0_3 = arith.constant 0 : index
    %c0_4 = arith.constant 0 : index
    %2 = vector.load %arg2[%c0_3, %c0_4] : memref<128x32xbf16, #tpu.memory_space<vmem>>, vector<128x32xbf16>
    %c0_5 = arith.constant 0 : index
    %c0_6 = arith.constant 0 : index
    %3 = vector.load %arg3[%c0_5, %c0_6] : memref<1x32xf32, #tpu.memory_space<vmem>>, vector<1x32xf32>
    %c0_7 = arith.constant 0 : index
    %c0_8 = arith.constant 0 : index
    %4 = vector.load %arg4[%c0_7, %c0_8] : memref<32x32xbf16, #tpu.memory_space<vmem>>, vector<32x32xbf16>
    %c0_9 = arith.constant 0 : index
    %c0_10 = arith.constant 0 : index
    %5 = vector.load %arg5[%c0_9, %c0_10] : memref<1x32xf32, #tpu.memory_space<vmem>>, vector<1x32xf32>
    %c0_11 = arith.constant 0 : index
    %c0_12 = arith.constant 0 : index
    %6 = vector.load %arg6[%c0_11, %c0_12] : memref<1x32xf32, #tpu.memory_space<vmem>>, vector<1x32xf32>
    %c0_13 = arith.constant 0 : index
    %c0_14 = arith.constant 0 : index
    %7 = vector.load %arg7[%c0_13, %c0_14] : memref<1x32xf32, #tpu.memory_space<vmem>>, vector<1x32xf32>
    %cst = arith.constant dense<0.000000e+00> : vector<16x128xf32>
    %8 = tpu.matmul %0, %1, %cst {dimension_numbers = #tpu.dot_dimension_numbers<[1], [0], [0], [1], [0, 0, 1, 1], [], []>} : vector<16x16xbf16>, vector<16x128xbf16>, vector<16x128xf32> -> vector<16x128xf32>
    %9 = arith.truncf %8 : vector<16x128xf32> to vector<16x128xbf16>
    %cst_15 = arith.constant dense<0.000000e+00> : vector<16x32xf32>
    %10 = tpu.matmul %9, %2, %cst_15 {dimension_numbers = #tpu.dot_dimension_numbers<[1], [0], [0], [1], [0, 0, 1, 1], [], []>} : vector<16x128xbf16>, vector<128x32xbf16>, vector<16x32xf32> -> vector<16x32xf32>
    %11 = vector.broadcast %3 : vector<1x32xf32> to vector<16x32xf32>
    %12 = arith.addf %10, %11 : vector<16x32xf32>
    %cst_16 = arith.constant 0.000000e+00 : f32
    %13 = vector.broadcast %cst_16 : f32 to vector<16x32xf32>
    %14 = arith.maximumf %12, %13 : vector<16x32xf32>
    %15 = arith.truncf %14 : vector<16x32xf32> to vector<16x32xbf16>
    %cst_17 = arith.constant dense<0.000000e+00> : vector<16x32xf32>
    %16 = tpu.matmul %15, %4, %cst_17 {dimension_numbers = #tpu.dot_dimension_numbers<[1], [0], [0], [1], [0, 0, 1, 1], [], []>} : vector<16x32xbf16>, vector<32x32xbf16>, vector<16x32xf32> -> vector<16x32xf32>
    %17 = vector.broadcast %5 : vector<1x32xf32> to vector<16x32xf32>
    %18 = arith.addf %16, %17 : vector<16x32xf32>
    %cst_18 = arith.constant 0.000000e+00 : f32
    %19 = vector.broadcast %cst_18 : f32 to vector<16x32xf32>
    %20 = arith.maximumf %18, %19 : vector<16x32xf32>
    %21 = vector.broadcast %6 : vector<1x32xf32> to vector<16x32xf32>
    %22 = arith.mulf %20, %21 : vector<16x32xf32>
    %23 = vector.broadcast %7 : vector<1x32xf32> to vector<16x32xf32>
    %24 = arith.addf %22, %23 : vector<16x32xf32>
    %25 = arith.truncf %24 : vector<16x32xf32> to vector<16x32xbf16>
    %c0_19 = arith.constant 0 : index
    %c0_20 = arith.constant 0 : index
    %c0_21 = arith.constant 0 : index
    %26 = vector.load %arg8[%c0_19, %c0_20, %c0_21] : memref<4x32x32xbf16, #tpu.memory_space<vmem>>, vector<1x32x32xbf16>
    %27 = vector.shape_cast %26 : vector<1x32x32xbf16> to vector<32x32xbf16>
    %c0_22 = arith.constant 0 : index
    %c0_23 = arith.constant 0 : index
    %c0_24 = arith.constant 0 : index
    %28 = vector.load %arg9[%c0_22, %c0_23, %c0_24] : memref<4x1x32xf32, #tpu.memory_space<vmem>>, vector<1x1x32xf32>
    %29 = vector.shape_cast %28 : vector<1x1x32xf32> to vector<1x32xf32>
    %c0_25 = arith.constant 0 : index
    %c0_26 = arith.constant 0 : index
    %c0_27 = arith.constant 0 : index
    %30 = vector.load %arg10[%c0_25, %c0_26, %c0_27] : memref<4x32x32xbf16, #tpu.memory_space<vmem>>, vector<1x32x32xbf16>
    %31 = vector.shape_cast %30 : vector<1x32x32xbf16> to vector<32x32xbf16>
    %c0_28 = arith.constant 0 : index
    %c0_29 = arith.constant 0 : index
    %c0_30 = arith.constant 0 : index
    %32 = vector.load %arg11[%c0_28, %c0_29, %c0_30] : memref<4x1x32xf32, #tpu.memory_space<vmem>>, vector<1x1x32xf32>
    %33 = vector.shape_cast %32 : vector<1x1x32xf32> to vector<1x32xf32>
    %c0_31 = arith.constant 0 : index
    %c0_32 = arith.constant 0 : index
    %c0_33 = arith.constant 0 : index
    %34 = vector.load %arg12[%c0_31, %c0_32, %c0_33] : memref<4x1x32xf32, #tpu.memory_space<vmem>>, vector<1x1x32xf32>
    %35 = vector.shape_cast %34 : vector<1x1x32xf32> to vector<1x32xf32>
    %c0_34 = arith.constant 0 : index
    %c0_35 = arith.constant 0 : index
    %c0_36 = arith.constant 0 : index
    %36 = vector.load %arg13[%c0_34, %c0_35, %c0_36] : memref<4x1x32xf32, #tpu.memory_space<vmem>>, vector<1x1x32xf32>
    %37 = vector.shape_cast %36 : vector<1x1x32xf32> to vector<1x32xf32>
    %cst_37 = arith.constant dense<0.000000e+00> : vector<16x32xf32>
    %38 = tpu.matmul %0, %25, %cst_37 {dimension_numbers = #tpu.dot_dimension_numbers<[1], [0], [0], [1], [0, 0, 1, 1], [], []>} : vector<16x16xbf16>, vector<16x32xbf16>, vector<16x32xf32> -> vector<16x32xf32>
    %39 = arith.truncf %38 : vector<16x32xf32> to vector<16x32xbf16>
    %cst_38 = arith.constant dense<0.000000e+00> : vector<16x32xf32>
    %40 = tpu.matmul %39, %27, %cst_38 {dimension_numbers = #tpu.dot_dimension_numbers<[1], [0], [0], [1], [0, 0, 1, 1], [], []>} : vector<16x32xbf16>, vector<32x32xbf16>, vector<16x32xf32> -> vector<16x32xf32>
    %41 = vector.broadcast %29 : vector<1x32xf32> to vector<16x32xf32>
    %42 = arith.addf %40, %41 : vector<16x32xf32>
    %cst_39 = arith.constant 0.000000e+00 : f32
    %43 = vector.broadcast %cst_39 : f32 to vector<16x32xf32>
    %44 = arith.maximumf %42, %43 : vector<16x32xf32>
    %45 = arith.truncf %44 : vector<16x32xf32> to vector<16x32xbf16>
    %cst_40 = arith.constant dense<0.000000e+00> : vector<16x32xf32>
    %46 = tpu.matmul %45, %31, %cst_40 {dimension_numbers = #tpu.dot_dimension_numbers<[1], [0], [0], [1], [0, 0, 1, 1], [], []>} : vector<16x32xbf16>, vector<32x32xbf16>, vector<16x32xf32> -> vector<16x32xf32>
    %47 = vector.broadcast %33 : vector<1x32xf32> to vector<16x32xf32>
    %48 = arith.addf %46, %47 : vector<16x32xf32>
    %cst_41 = arith.constant 0.000000e+00 : f32
    %49 = vector.broadcast %cst_41 : f32 to vector<16x32xf32>
    %50 = arith.maximumf %48, %49 : vector<16x32xf32>
    %51 = vector.broadcast %35 : vector<1x32xf32> to vector<16x32xf32>
    %52 = arith.mulf %50, %51 : vector<16x32xf32>
    %53 = vector.broadcast %37 : vector<1x32xf32> to vector<16x32xf32>
    %54 = arith.addf %52, %53 : vector<16x32xf32>
    %55 = arith.truncf %54 : vector<16x32xf32> to vector<16x32xbf16>
    %c1 = arith.constant 1 : index
    %c0_42 = arith.constant 0 : index
    %c0_43 = arith.constant 0 : index
    %56 = vector.load %arg8[%c1, %c0_42, %c0_43] : memref<4x32x32xbf16, #tpu.memory_space<vmem>>, vector<1x32x32xbf16>
    %57 = vector.shape_cast %56 : vector<1x32x32xbf16> to vector<32x32xbf16>
    %c1_44 = arith.constant 1 : index
    %c0_45 = arith.constant 0 : index
    %c0_46 = arith.constant 0 : index
    %58 = vector.load %arg9[%c1_44, %c0_45, %c0_46] : memref<4x1x32xf32, #tpu.memory_space<vmem>>, vector<1x1x32xf32>
    %59 = vector.shape_cast %58 : vector<1x1x32xf32> to vector<1x32xf32>
    %c1_47 = arith.constant 1 : index
    %c0_48 = arith.constant 0 : index
    %c0_49 = arith.constant 0 : index
    %60 = vector.load %arg10[%c1_47, %c0_48, %c0_49] : memref<4x32x32xbf16, #tpu.memory_space<vmem>>, vector<1x32x32xbf16>
    %61 = vector.shape_cast %60 : vector<1x32x32xbf16> to vector<32x32xbf16>
    %c1_50 = arith.constant 1 : index
    %c0_51 = arith.constant 0 : index
    %c0_52 = arith.constant 0 : index
    %62 = vector.load %arg11[%c1_50, %c0_51, %c0_52] : memref<4x1x32xf32, #tpu.memory_space<vmem>>, vector<1x1x32xf32>
    %63 = vector.shape_cast %62 : vector<1x1x32xf32> to vector<1x32xf32>
    %c1_53 = arith.constant 1 : index
    %c0_54 = arith.constant 0 : index
    %c0_55 = arith.constant 0 : index
    %64 = vector.load %arg12[%c1_53, %c0_54, %c0_55] : memref<4x1x32xf32, #tpu.memory_space<vmem>>, vector<1x1x32xf32>
    %65 = vector.shape_cast %64 : vector<1x1x32xf32> to vector<1x32xf32>
    %c1_56 = arith.constant 1 : index
    %c0_57 = arith.constant 0 : index
    %c0_58 = arith.constant 0 : index
    %66 = vector.load %arg13[%c1_56, %c0_57, %c0_58] : memref<4x1x32xf32, #tpu.memory_space<vmem>>, vector<1x1x32xf32>
    %67 = vector.shape_cast %66 : vector<1x1x32xf32> to vector<1x32xf32>
    %cst_59 = arith.constant dense<0.000000e+00> : vector<16x32xf32>
    %68 = tpu.matmul %0, %55, %cst_59 {dimension_numbers = #tpu.dot_dimension_numbers<[1], [0], [0], [1], [0, 0, 1, 1], [], []>} : vector<16x16xbf16>, vector<16x32xbf16>, vector<16x32xf32> -> vector<16x32xf32>
    %69 = arith.truncf %68 : vector<16x32xf32> to vector<16x32xbf16>
    %cst_60 = arith.constant dense<0.000000e+00> : vector<16x32xf32>
    %70 = tpu.matmul %69, %57, %cst_60 {dimension_numbers = #tpu.dot_dimension_numbers<[1], [0], [0], [1], [0, 0, 1, 1], [], []>} : vector<16x32xbf16>, vector<32x32xbf16>, vector<16x32xf32> -> vector<16x32xf32>
    %71 = vector.broadcast %59 : vector<1x32xf32> to vector<16x32xf32>
    %72 = arith.addf %70, %71 : vector<16x32xf32>
    %cst_61 = arith.constant 0.000000e+00 : f32
    %73 = vector.broadcast %cst_61 : f32 to vector<16x32xf32>
    %74 = arith.maximumf %72, %73 : vector<16x32xf32>
    %75 = arith.truncf %74 : vector<16x32xf32> to vector<16x32xbf16>
    %cst_62 = arith.constant dense<0.000000e+00> : vector<16x32xf32>
    %76 = tpu.matmul %75, %61, %cst_62 {dimension_numbers = #tpu.dot_dimension_numbers<[1], [0], [0], [1], [0, 0, 1, 1], [], []>} : vector<16x32xbf16>, vector<32x32xbf16>, vector<16x32xf32> -> vector<16x32xf32>
    %77 = vector.broadcast %63 : vector<1x32xf32> to vector<16x32xf32>
    %78 = arith.addf %76, %77 : vector<16x32xf32>
    %cst_63 = arith.constant 0.000000e+00 : f32
    %79 = vector.broadcast %cst_63 : f32 to vector<16x32xf32>
    %80 = arith.maximumf %78, %79 : vector<16x32xf32>
    %81 = vector.broadcast %65 : vector<1x32xf32> to vector<16x32xf32>
    %82 = arith.mulf %80, %81 : vector<16x32xf32>
    %83 = vector.broadcast %67 : vector<1x32xf32> to vector<16x32xf32>
    %84 = arith.addf %82, %83 : vector<16x32xf32>
    %85 = arith.truncf %84 : vector<16x32xf32> to vector<16x32xbf16>
    %c2 = arith.constant 2 : index
    %c0_64 = arith.constant 0 : index
    %c0_65 = arith.constant 0 : index
    %86 = vector.load %arg8[%c2, %c0_64, %c0_65] : memref<4x32x32xbf16, #tpu.memory_space<vmem>>, vector<1x32x32xbf16>
    %87 = vector.shape_cast %86 : vector<1x32x32xbf16> to vector<32x32xbf16>
    %c2_66 = arith.constant 2 : index
    %c0_67 = arith.constant 0 : index
    %c0_68 = arith.constant 0 : index
    %88 = vector.load %arg9[%c2_66, %c0_67, %c0_68] : memref<4x1x32xf32, #tpu.memory_space<vmem>>, vector<1x1x32xf32>
    %89 = vector.shape_cast %88 : vector<1x1x32xf32> to vector<1x32xf32>
    %c2_69 = arith.constant 2 : index
    %c0_70 = arith.constant 0 : index
    %c0_71 = arith.constant 0 : index
    %90 = vector.load %arg10[%c2_69, %c0_70, %c0_71] : memref<4x32x32xbf16, #tpu.memory_space<vmem>>, vector<1x32x32xbf16>
    %91 = vector.shape_cast %90 : vector<1x32x32xbf16> to vector<32x32xbf16>
    %c2_72 = arith.constant 2 : index
    %c0_73 = arith.constant 0 : index
    %c0_74 = arith.constant 0 : index
    %92 = vector.load %arg11[%c2_72, %c0_73, %c0_74] : memref<4x1x32xf32, #tpu.memory_space<vmem>>, vector<1x1x32xf32>
    %93 = vector.shape_cast %92 : vector<1x1x32xf32> to vector<1x32xf32>
    %c2_75 = arith.constant 2 : index
    %c0_76 = arith.constant 0 : index
    %c0_77 = arith.constant 0 : index
    %94 = vector.load %arg12[%c2_75, %c0_76, %c0_77] : memref<4x1x32xf32, #tpu.memory_space<vmem>>, vector<1x1x32xf32>
    %95 = vector.shape_cast %94 : vector<1x1x32xf32> to vector<1x32xf32>
    %c2_78 = arith.constant 2 : index
    %c0_79 = arith.constant 0 : index
    %c0_80 = arith.constant 0 : index
    %96 = vector.load %arg13[%c2_78, %c0_79, %c0_80] : memref<4x1x32xf32, #tpu.memory_space<vmem>>, vector<1x1x32xf32>
    %97 = vector.shape_cast %96 : vector<1x1x32xf32> to vector<1x32xf32>
    %cst_81 = arith.constant dense<0.000000e+00> : vector<16x32xf32>
    %98 = tpu.matmul %0, %85, %cst_81 {dimension_numbers = #tpu.dot_dimension_numbers<[1], [0], [0], [1], [0, 0, 1, 1], [], []>} : vector<16x16xbf16>, vector<16x32xbf16>, vector<16x32xf32> -> vector<16x32xf32>
    %99 = arith.truncf %98 : vector<16x32xf32> to vector<16x32xbf16>
    %cst_82 = arith.constant dense<0.000000e+00> : vector<16x32xf32>
    %100 = tpu.matmul %99, %87, %cst_82 {dimension_numbers = #tpu.dot_dimension_numbers<[1], [0], [0], [1], [0, 0, 1, 1], [], []>} : vector<16x32xbf16>, vector<32x32xbf16>, vector<16x32xf32> -> vector<16x32xf32>
    %101 = vector.broadcast %89 : vector<1x32xf32> to vector<16x32xf32>
    %102 = arith.addf %100, %101 : vector<16x32xf32>
    %cst_83 = arith.constant 0.000000e+00 : f32
    %103 = vector.broadcast %cst_83 : f32 to vector<16x32xf32>
    %104 = arith.maximumf %102, %103 : vector<16x32xf32>
    %105 = arith.truncf %104 : vector<16x32xf32> to vector<16x32xbf16>
    %cst_84 = arith.constant dense<0.000000e+00> : vector<16x32xf32>
    %106 = tpu.matmul %105, %91, %cst_84 {dimension_numbers = #tpu.dot_dimension_numbers<[1], [0], [0], [1], [0, 0, 1, 1], [], []>} : vector<16x32xbf16>, vector<32x32xbf16>, vector<16x32xf32> -> vector<16x32xf32>
    %107 = vector.broadcast %93 : vector<1x32xf32> to vector<16x32xf32>
    %108 = arith.addf %106, %107 : vector<16x32xf32>
    %cst_85 = arith.constant 0.000000e+00 : f32
    %109 = vector.broadcast %cst_85 : f32 to vector<16x32xf32>
    %110 = arith.maximumf %108, %109 : vector<16x32xf32>
    %111 = vector.broadcast %95 : vector<1x32xf32> to vector<16x32xf32>
    %112 = arith.mulf %110, %111 : vector<16x32xf32>
    %113 = vector.broadcast %97 : vector<1x32xf32> to vector<16x32xf32>
    %114 = arith.addf %112, %113 : vector<16x32xf32>
    %115 = arith.truncf %114 : vector<16x32xf32> to vector<16x32xbf16>
    %c3 = arith.constant 3 : index
    %c0_86 = arith.constant 0 : index
    %c0_87 = arith.constant 0 : index
    %116 = vector.load %arg8[%c3, %c0_86, %c0_87] : memref<4x32x32xbf16, #tpu.memory_space<vmem>>, vector<1x32x32xbf16>
    %117 = vector.shape_cast %116 : vector<1x32x32xbf16> to vector<32x32xbf16>
    %c3_88 = arith.constant 3 : index
    %c0_89 = arith.constant 0 : index
    %c0_90 = arith.constant 0 : index
    %118 = vector.load %arg9[%c3_88, %c0_89, %c0_90] : memref<4x1x32xf32, #tpu.memory_space<vmem>>, vector<1x1x32xf32>
    %119 = vector.shape_cast %118 : vector<1x1x32xf32> to vector<1x32xf32>
    %c3_91 = arith.constant 3 : index
    %c0_92 = arith.constant 0 : index
    %c0_93 = arith.constant 0 : index
    %120 = vector.load %arg10[%c3_91, %c0_92, %c0_93] : memref<4x32x32xbf16, #tpu.memory_space<vmem>>, vector<1x32x32xbf16>
    %121 = vector.shape_cast %120 : vector<1x32x32xbf16> to vector<32x32xbf16>
    %c3_94 = arith.constant 3 : index
    %c0_95 = arith.constant 0 : index
    %c0_96 = arith.constant 0 : index
    %122 = vector.load %arg11[%c3_94, %c0_95, %c0_96] : memref<4x1x32xf32, #tpu.memory_space<vmem>>, vector<1x1x32xf32>
    %123 = vector.shape_cast %122 : vector<1x1x32xf32> to vector<1x32xf32>
    %c3_97 = arith.constant 3 : index
    %c0_98 = arith.constant 0 : index
    %c0_99 = arith.constant 0 : index
    %124 = vector.load %arg12[%c3_97, %c0_98, %c0_99] : memref<4x1x32xf32, #tpu.memory_space<vmem>>, vector<1x1x32xf32>
    %125 = vector.shape_cast %124 : vector<1x1x32xf32> to vector<1x32xf32>
    %c3_100 = arith.constant 3 : index
    %c0_101 = arith.constant 0 : index
    %c0_102 = arith.constant 0 : index
    %126 = vector.load %arg13[%c3_100, %c0_101, %c0_102] : memref<4x1x32xf32, #tpu.memory_space<vmem>>, vector<1x1x32xf32>
    %127 = vector.shape_cast %126 : vector<1x1x32xf32> to vector<1x32xf32>
    %cst_103 = arith.constant dense<0.000000e+00> : vector<16x32xf32>
    %128 = tpu.matmul %0, %115, %cst_103 {dimension_numbers = #tpu.dot_dimension_numbers<[1], [0], [0], [1], [0, 0, 1, 1], [], []>} : vector<16x16xbf16>, vector<16x32xbf16>, vector<16x32xf32> -> vector<16x32xf32>
    %129 = arith.truncf %128 : vector<16x32xf32> to vector<16x32xbf16>
    %cst_104 = arith.constant dense<0.000000e+00> : vector<16x32xf32>
    %130 = tpu.matmul %129, %117, %cst_104 {dimension_numbers = #tpu.dot_dimension_numbers<[1], [0], [0], [1], [0, 0, 1, 1], [], []>} : vector<16x32xbf16>, vector<32x32xbf16>, vector<16x32xf32> -> vector<16x32xf32>
    %131 = vector.broadcast %119 : vector<1x32xf32> to vector<16x32xf32>
    %132 = arith.addf %130, %131 : vector<16x32xf32>
    %cst_105 = arith.constant 0.000000e+00 : f32
    %133 = vector.broadcast %cst_105 : f32 to vector<16x32xf32>
    %134 = arith.maximumf %132, %133 : vector<16x32xf32>
    %135 = arith.truncf %134 : vector<16x32xf32> to vector<16x32xbf16>
    %cst_106 = arith.constant dense<0.000000e+00> : vector<16x32xf32>
    %136 = tpu.matmul %135, %121, %cst_106 {dimension_numbers = #tpu.dot_dimension_numbers<[1], [0], [0], [1], [0, 0, 1, 1], [], []>} : vector<16x32xbf16>, vector<32x32xbf16>, vector<16x32xf32> -> vector<16x32xf32>
    %137 = vector.broadcast %123 : vector<1x32xf32> to vector<16x32xf32>
    %138 = arith.addf %136, %137 : vector<16x32xf32>
    %cst_107 = arith.constant 0.000000e+00 : f32
    %139 = vector.broadcast %cst_107 : f32 to vector<16x32xf32>
    %140 = arith.maximumf %138, %139 : vector<16x32xf32>
    %141 = vector.broadcast %125 : vector<1x32xf32> to vector<16x32xf32>
    %142 = arith.mulf %140, %141 : vector<16x32xf32>
    %143 = vector.broadcast %127 : vector<1x32xf32> to vector<16x32xf32>
    %144 = arith.addf %142, %143 : vector<16x32xf32>
    %c0_108 = arith.constant 0 : index
    %c0_109 = arith.constant 0 : index
    %145 = vector.load %arg14[%c0_108, %c0_109] : memref<2x16xbf16, #tpu.memory_space<vmem>>, vector<2x16xbf16>
    %146 = arith.truncf %144 : vector<16x32xf32> to vector<16x32xbf16>
    %cst_110 = arith.constant dense<0.000000e+00> : vector<2x32xf32>
    %147 = tpu.matmul %145, %146, %cst_110 {dimension_numbers = #tpu.dot_dimension_numbers<[1], [0], [0], [1], [0, 0, 1, 1], [], []>} : vector<2x16xbf16>, vector<16x32xbf16>, vector<2x32xf32> -> vector<2x32xf32>
    %148 = arith.truncf %147 : vector<2x32xf32> to vector<2x32xbf16>
    %c0_111 = arith.constant 0 : index
    %c0_112 = arith.constant 0 : index
    %149 = vector.load %arg15[%c0_111, %c0_112] : memref<32x128xbf16, #tpu.memory_space<vmem>>, vector<32x128xbf16>
    %cst_113 = arith.constant dense<0.000000e+00> : vector<2x128xf32>
    %150 = tpu.matmul %148, %149, %cst_113 {dimension_numbers = #tpu.dot_dimension_numbers<[1], [0], [0], [1], [0, 0, 1, 1], [], []>} : vector<2x32xbf16>, vector<32x128xbf16>, vector<2x128xf32> -> vector<2x128xf32>
    %c0_114 = arith.constant 0 : index
    %c0_115 = arith.constant 0 : index
    %151 = vector.load %arg16[%c0_114, %c0_115] : memref<1x128xf32, #tpu.memory_space<vmem>>, vector<1x128xf32>
    %152 = vector.broadcast %151 : vector<1x128xf32> to vector<2x128xf32>
    %153 = arith.addf %150, %152 : vector<2x128xf32>
    %cst_116 = arith.constant 0.000000e+00 : f32
    %154 = vector.broadcast %cst_116 : f32 to vector<2x128xf32>
    %155 = arith.maximumf %153, %154 : vector<2x128xf32>
    %c0_117 = arith.constant 0 : index
    %c0_118 = arith.constant 0 : index
    %156 = vector.load %arg17[%c0_117, %c0_118] : memref<2x128xf32, #tpu.memory_space<vmem>>, vector<2x128xf32>
    tpu.vector_store %arg17[%c0_117, %c0_118], %155 {strides = array<i32>} : memref<2x128xf32, #tpu.memory_space<vmem>>, vector<2x128xf32>,
    return
  }
}

module attributes {stable_mosaic.version = 11 : i64} {
  func.func @_protein_head_kernel(%arg0: i32, %arg1: memref<2x1000x32xbf16, #tpu.memory_space<vmem>>, %arg2: memref<2x128xf32, #tpu.memory_space<vmem>>, %arg3: memref<256x1000xbf16, #tpu.memory_space<vmem>>, %arg4: memref<32x128xbf16, #tpu.memory_space<vmem>>, %arg5: memref<32x128x128xbf16, #tpu.memory_space<vmem>>, %arg6: memref<1x128xf32, #tpu.memory_space<vmem>>, %arg7: memref<128x1024xbf16, #tpu.memory_space<vmem>>, %arg8: memref<128x1024xbf16, #tpu.memory_space<vmem>>, %arg9: memref<1x1024xf32, #tpu.memory_space<vmem>>, %arg10: memref<1024x256xbf16, #tpu.memory_space<vmem>>, %arg11: memref<1x256xf32, #tpu.memory_space<vmem>>, %arg12: memref<256x128xbf16, #tpu.memory_space<vmem>>, %arg13: memref<1x128xf32, #tpu.memory_space<vmem>>, %arg14: memref<2x128xf32, #tpu.memory_space<vmem>>, %arg15: memref<2x32x128xbf16, #tpu.memory_space<vmem>>) attributes {dimension_semantics = [#tpu.dimension_semantics<parallel>], iteration_bounds = array<i64: 1>, scalar_prefetch = 0 : i64, scratch_operands = 1 : i64, tpu.core_type = #tpu.core_type<tc>, window_params = [{transform_indices = @transform_0, window_bounds = array<i64: 2, 1000, 32>}, {transform_indices = @transform_1, window_bounds = array<i64: 2, 128>}, {pipeline_mode = #tpu.pipeline_mode<synchronous>, transform_indices = @transform_2, window_bounds = array<i64: 256, 1000>}, {pipeline_mode = #tpu.pipeline_mode<synchronous>, transform_indices = @transform_3, window_bounds = array<i64: 32, 128>}, {pipeline_mode = #tpu.pipeline_mode<synchronous>, transform_indices = @transform_4, window_bounds = array<i64: 32, 128, 128>}, {pipeline_mode = #tpu.pipeline_mode<synchronous>, transform_indices = @transform_5, window_bounds = array<i64: 1, 128>}, {pipeline_mode = #tpu.pipeline_mode<synchronous>, transform_indices = @transform_6, window_bounds = array<i64: 128, 1024>}, {pipeline_mode = #tpu.pipeline_mode<synchronous>, transform_indices = @transform_7, window_bounds = array<i64: 128, 1024>}, {pipeline_mode = #tpu.pipeline_mode<synchronous>, transform_indices = @transform_8, window_bounds = array<i64: 1, 1024>}, {pipeline_mode = #tpu.pipeline_mode<synchronous>, transform_indices = @transform_9, window_bounds = array<i64: 1024, 256>}, {pipeline_mode = #tpu.pipeline_mode<synchronous>, transform_indices = @transform_10, window_bounds = array<i64: 1, 256>}, {pipeline_mode = #tpu.pipeline_mode<synchronous>, transform_indices = @transform_11, window_bounds = array<i64: 256, 128>}, {pipeline_mode = #tpu.pipeline_mode<synchronous>, transform_indices = @transform_12, window_bounds = array<i64: 1, 128>}, {transform_indices = @transform_13, window_bounds = array<i64: 2, 128>}]} {
    %c0 = arith.constant 0 : index
    %c0_0 = arith.constant 0 : index
    %0 = vector.load %arg3[%c0, %c0_0] : memref<256x1000xbf16, #tpu.memory_space<vmem>>, vector<256x1000xbf16>
    %c0_1 = arith.constant 0 : index
    %c0_2 = arith.constant 0 : index
    %1 = vector.load %arg4[%c0_1, %c0_2] : memref<32x128xbf16, #tpu.memory_space<vmem>>, vector<32x128xbf16>
    %c0_3 = arith.constant 0 : index
    %c0_4 = arith.constant 0 : index
    %c0_5 = arith.constant 0 : index
    %2 = vector.load %arg1[%c0_3, %c0_4, %c0_5] : memref<2x1000x32xbf16, #tpu.memory_space<vmem>>, vector<1x1000x32xbf16>
    %3 = vector.shape_cast %2 : vector<1x1000x32xbf16> to vector<1000x32xbf16>
    %cst = arith.constant dense<0.000000e+00> : vector<256x32xf32>
    %4 = tpu.matmul %0, %3, %cst {dimension_numbers = #tpu.dot_dimension_numbers<[1], [0], [0], [1], [0, 0, 1, 1], [], []>} : vector<256x1000xbf16>, vector<1000x32xbf16>, vector<256x32xf32> -> vector<256x32xf32>
    %5 = arith.truncf %4 : vector<256x32xf32> to vector<256x32xbf16>
    %cst_6 = arith.constant dense<0.000000e+00> : vector<256x128xf32>
    %6 = tpu.matmul %5, %1, %cst_6 {dimension_numbers = #tpu.dot_dimension_numbers<[1], [0], [0], [1], [0, 0, 1, 1], [], []>} : vector<256x32xbf16>, vector<32x128xbf16>, vector<256x128xf32> -> vector<256x128xf32>
    %7 = vector.extract_strided_slice %6 {offsets = [0, 0], sizes = [32, 128], strides = [1, 1]} : vector<256x128xf32> to vector<32x128xf32>
    %8 = vector.extract_strided_slice %6 {offsets = [32, 0], sizes = [32, 128], strides = [1, 1]} : vector<256x128xf32> to vector<32x128xf32>
    %c127_i32 = arith.constant 127 : i32
    %9 = tpu.dynamic_rotate %8 by %c127_i32 dim 1 : vector<32x128xf32>, i32 -> vector<32x128xf32>
    %10 = arith.addf %7, %9 : vector<32x128xf32>
    %11 = vector.extract_strided_slice %6 {offsets = [64, 0], sizes = [32, 128], strides = [1, 1]} : vector<256x128xf32> to vector<32x128xf32>
    %c126_i32 = arith.constant 126 : i32
    %12 = tpu.dynamic_rotate %11 by %c126_i32 dim 1 : vector<32x128xf32>, i32 -> vector<32x128xf32>
    %13 = arith.addf %10, %12 : vector<32x128xf32>
    %14 = vector.extract_strided_slice %6 {offsets = [96, 0], sizes = [32, 128], strides = [1, 1]} : vector<256x128xf32> to vector<32x128xf32>
    %c125_i32 = arith.constant 125 : i32
    %15 = tpu.dynamic_rotate %14 by %c125_i32 dim 1 : vector<32x128xf32>, i32 -> vector<32x128xf32>
    %16 = arith.addf %13, %15 : vector<32x128xf32>
    %17 = vector.extract_strided_slice %6 {offsets = [128, 0], sizes = [32, 128], strides = [1, 1]} : vector<256x128xf32> to vector<32x128xf32>
    %c124_i32 = arith.constant 124 : i32
    %18 = tpu.dynamic_rotate %17 by %c124_i32 dim 1 : vector<32x128xf32>, i32 -> vector<32x128xf32>
    %19 = arith.addf %16, %18 : vector<32x128xf32>
    %20 = vector.extract_strided_slice %6 {offsets = [160, 0], sizes = [32, 128], strides = [1, 1]} : vector<256x128xf32> to vector<32x128xf32>
    %c123_i32 = arith.constant 123 : i32
    %21 = tpu.dynamic_rotate %20 by %c123_i32 dim 1 : vector<32x128xf32>, i32 -> vector<32x128xf32>
    %22 = arith.addf %19, %21 : vector<32x128xf32>
    %23 = vector.extract_strided_slice %6 {offsets = [192, 0], sizes = [32, 128], strides = [1, 1]} : vector<256x128xf32> to vector<32x128xf32>
    %c122_i32 = arith.constant 122 : i32
    %24 = tpu.dynamic_rotate %23 by %c122_i32 dim 1 : vector<32x128xf32>, i32 -> vector<32x128xf32>
    %25 = arith.addf %22, %24 : vector<32x128xf32>
    %26 = vector.extract_strided_slice %6 {offsets = [224, 0], sizes = [32, 128], strides = [1, 1]} : vector<256x128xf32> to vector<32x128xf32>
    %c121_i32 = arith.constant 121 : i32
    %27 = tpu.dynamic_rotate %26 by %c121_i32 dim 1 : vector<32x128xf32>, i32 -> vector<32x128xf32>
    %28 = arith.addf %25, %27 : vector<32x128xf32>
    %29 = arith.truncf %28 : vector<32x128xf32> to vector<32x128xbf16>
    %c0_7 = arith.constant 0 : index
    %c0_8 = arith.constant 0 : index
    %c0_9 = arith.constant 0 : index
    %30 = vector.load %arg15[%c0_7, %c0_8, %c0_9] : memref<2x32x128xbf16, #tpu.memory_space<vmem>>, vector<1x32x128xbf16>
    %31 = vector.shape_cast %30 : vector<1x32x128xbf16> to vector<32x128xbf16>
    %32 = vector.shape_cast %29 : vector<32x128xbf16> to vector<1x32x128xbf16>
    tpu.vector_store %arg15[%c0_7, %c0_8, %c0_9], %32 {strides = array<i32>} : memref<2x32x128xbf16, #tpu.memory_space<vmem>>, vector<1x32x128xbf16>,
    %c1 = arith.constant 1 : index
    %c0_10 = arith.constant 0 : index
    %c0_11 = arith.constant 0 : index
    %33 = vector.load %arg1[%c1, %c0_10, %c0_11] : memref<2x1000x32xbf16, #tpu.memory_space<vmem>>, vector<1x1000x32xbf16>
    %34 = vector.shape_cast %33 : vector<1x1000x32xbf16> to vector<1000x32xbf16>
    %cst_12 = arith.constant dense<0.000000e+00> : vector<256x32xf32>
    %35 = tpu.matmul %0, %34, %cst_12 {dimension_numbers = #tpu.dot_dimension_numbers<[1], [0], [0], [1], [0, 0, 1, 1], [], []>} : vector<256x1000xbf16>, vector<1000x32xbf16>, vector<256x32xf32> -> vector<256x32xf32>
    %36 = arith.truncf %35 : vector<256x32xf32> to vector<256x32xbf16>
    %cst_13 = arith.constant dense<0.000000e+00> : vector<256x128xf32>
    %37 = tpu.matmul %36, %1, %cst_13 {dimension_numbers = #tpu.dot_dimension_numbers<[1], [0], [0], [1], [0, 0, 1, 1], [], []>} : vector<256x32xbf16>, vector<32x128xbf16>, vector<256x128xf32> -> vector<256x128xf32>
    %38 = vector.extract_strided_slice %37 {offsets = [0, 0], sizes = [32, 128], strides = [1, 1]} : vector<256x128xf32> to vector<32x128xf32>
    %39 = vector.extract_strided_slice %37 {offsets = [32, 0], sizes = [32, 128], strides = [1, 1]} : vector<256x128xf32> to vector<32x128xf32>
    %c127_i32_14 = arith.constant 127 : i32
    %40 = tpu.dynamic_rotate %39 by %c127_i32_14 dim 1 : vector<32x128xf32>, i32 -> vector<32x128xf32>
    %41 = arith.addf %38, %40 : vector<32x128xf32>
    %42 = vector.extract_strided_slice %37 {offsets = [64, 0], sizes = [32, 128], strides = [1, 1]} : vector<256x128xf32> to vector<32x128xf32>
    %c126_i32_15 = arith.constant 126 : i32
    %43 = tpu.dynamic_rotate %42 by %c126_i32_15 dim 1 : vector<32x128xf32>, i32 -> vector<32x128xf32>
    %44 = arith.addf %41, %43 : vector<32x128xf32>
    %45 = vector.extract_strided_slice %37 {offsets = [96, 0], sizes = [32, 128], strides = [1, 1]} : vector<256x128xf32> to vector<32x128xf32>
    %c125_i32_16 = arith.constant 125 : i32
    %46 = tpu.dynamic_rotate %45 by %c125_i32_16 dim 1 : vector<32x128xf32>, i32 -> vector<32x128xf32>
    %47 = arith.addf %44, %46 : vector<32x128xf32>
    %48 = vector.extract_strided_slice %37 {offsets = [128, 0], sizes = [32, 128], strides = [1, 1]} : vector<256x128xf32> to vector<32x128xf32>
    %c124_i32_17 = arith.constant 124 : i32
    %49 = tpu.dynamic_rotate %48 by %c124_i32_17 dim 1 : vector<32x128xf32>, i32 -> vector<32x128xf32>
    %50 = arith.addf %47, %49 : vector<32x128xf32>
    %51 = vector.extract_strided_slice %37 {offsets = [160, 0], sizes = [32, 128], strides = [1, 1]} : vector<256x128xf32> to vector<32x128xf32>
    %c123_i32_18 = arith.constant 123 : i32
    %52 = tpu.dynamic_rotate %51 by %c123_i32_18 dim 1 : vector<32x128xf32>, i32 -> vector<32x128xf32>
    %53 = arith.addf %50, %52 : vector<32x128xf32>
    %54 = vector.extract_strided_slice %37 {offsets = [192, 0], sizes = [32, 128], strides = [1, 1]} : vector<256x128xf32> to vector<32x128xf32>
    %c122_i32_19 = arith.constant 122 : i32
    %55 = tpu.dynamic_rotate %54 by %c122_i32_19 dim 1 : vector<32x128xf32>, i32 -> vector<32x128xf32>
    %56 = arith.addf %53, %55 : vector<32x128xf32>
    %57 = vector.extract_strided_slice %37 {offsets = [224, 0], sizes = [32, 128], strides = [1, 1]} : vector<256x128xf32> to vector<32x128xf32>
    %c121_i32_20 = arith.constant 121 : i32
    %58 = tpu.dynamic_rotate %57 by %c121_i32_20 dim 1 : vector<32x128xf32>, i32 -> vector<32x128xf32>
    %59 = arith.addf %56, %58 : vector<32x128xf32>
    %60 = arith.truncf %59 : vector<32x128xf32> to vector<32x128xbf16>
    %c1_21 = arith.constant 1 : index
    %c0_22 = arith.constant 0 : index
    %c0_23 = arith.constant 0 : index
    %61 = vector.load %arg15[%c1_21, %c0_22, %c0_23] : memref<2x32x128xbf16, #tpu.memory_space<vmem>>, vector<1x32x128xbf16>
    %62 = vector.shape_cast %61 : vector<1x32x128xbf16> to vector<32x128xbf16>
    %63 = vector.shape_cast %60 : vector<32x128xbf16> to vector<1x32x128xbf16>
    tpu.vector_store %arg15[%c1_21, %c0_22, %c0_23], %63 {strides = array<i32>} : memref<2x32x128xbf16, #tpu.memory_space<vmem>>, vector<1x32x128xbf16>,
    %cst_24 = arith.constant 0.000000e+00 : f32
    %64 = vector.broadcast %cst_24 : f32 to vector<2x128xf32>
    %c0_25 = arith.constant 0 : index
    %c0_26 = arith.constant 0 : index
    %c0_27 = arith.constant 0 : index
    %65 = vector.load %arg15[%c0_25, %c0_26, %c0_27] : memref<2x32x128xbf16, #tpu.memory_space<vmem>>, vector<2x1x128xbf16>
    %66 = vector.shape_cast %65 : vector<2x1x128xbf16> to vector<2x128xbf16>
    %c0_28 = arith.constant 0 : index
    %c0_29 = arith.constant 0 : index
    %c0_30 = arith.constant 0 : index
    %67 = vector.load %arg5[%c0_28, %c0_29, %c0_30] : memref<32x128x128xbf16, #tpu.memory_space<vmem>>, vector<1x128x128xbf16>
    %68 = vector.shape_cast %67 : vector<1x128x128xbf16> to vector<128x128xbf16>
    %cst_31 = arith.constant dense<0.000000e+00> : vector<2x128xf32>
    %69 = tpu.matmul %66, %68, %cst_31 {dimension_numbers = #tpu.dot_dimension_numbers<[1], [0], [0], [1], [0, 0, 1, 1], [], []>} : vector<2x128xbf16>, vector<128x128xbf16>, vector<2x128xf32> -> vector<2x128xf32>
    %70 = arith.addf %64, %69 : vector<2x128xf32>
    %c0_32 = arith.constant 0 : index
    %c1_33 = arith.constant 1 : index
    %c0_34 = arith.constant 0 : index
    %71 = vector.load %arg15[%c0_32, %c1_33, %c0_34] : memref<2x32x128xbf16, #tpu.memory_space<vmem>>, vector<2x1x128xbf16>
    %72 = vector.shape_cast %71 : vector<2x1x128xbf16> to vector<2x128xbf16>
    %c1_35 = arith.constant 1 : index
    %c0_36 = arith.constant 0 : index
    %c0_37 = arith.constant 0 : index
    %73 = vector.load %arg5[%c1_35, %c0_36, %c0_37] : memref<32x128x128xbf16, #tpu.memory_space<vmem>>, vector<1x128x128xbf16>
    %74 = vector.shape_cast %73 : vector<1x128x128xbf16> to vector<128x128xbf16>
    %cst_38 = arith.constant dense<0.000000e+00> : vector<2x128xf32>
    %75 = tpu.matmul %72, %74, %cst_38 {dimension_numbers = #tpu.dot_dimension_numbers<[1], [0], [0], [1], [0, 0, 1, 1], [], []>} : vector<2x128xbf16>, vector<128x128xbf16>, vector<2x128xf32> -> vector<2x128xf32>
    %76 = arith.addf %70, %75 : vector<2x128xf32>
    %c0_39 = arith.constant 0 : index
    %c2 = arith.constant 2 : index
    %c0_40 = arith.constant 0 : index
    %77 = vector.load %arg15[%c0_39, %c2, %c0_40] : memref<2x32x128xbf16, #tpu.memory_space<vmem>>, vector<2x1x128xbf16>
    %78 = vector.shape_cast %77 : vector<2x1x128xbf16> to vector<2x128xbf16>
    %c2_41 = arith.constant 2 : index
    %c0_42 = arith.constant 0 : index
    %c0_43 = arith.constant 0 : index
    %79 = vector.load %arg5[%c2_41, %c0_42, %c0_43] : memref<32x128x128xbf16, #tpu.memory_space<vmem>>, vector<1x128x128xbf16>
    %80 = vector.shape_cast %79 : vector<1x128x128xbf16> to vector<128x128xbf16>
    %cst_44 = arith.constant dense<0.000000e+00> : vector<2x128xf32>
    %81 = tpu.matmul %78, %80, %cst_44 {dimension_numbers = #tpu.dot_dimension_numbers<[1], [0], [0], [1], [0, 0, 1, 1], [], []>} : vector<2x128xbf16>, vector<128x128xbf16>, vector<2x128xf32> -> vector<2x128xf32>
    %82 = arith.addf %76, %81 : vector<2x128xf32>
    %c0_45 = arith.constant 0 : index
    %c3 = arith.constant 3 : index
    %c0_46 = arith.constant 0 : index
    %83 = vector.load %arg15[%c0_45, %c3, %c0_46] : memref<2x32x128xbf16, #tpu.memory_space<vmem>>, vector<2x1x128xbf16>
    %84 = vector.shape_cast %83 : vector<2x1x128xbf16> to vector<2x128xbf16>
    %c3_47 = arith.constant 3 : index
    %c0_48 = arith.constant 0 : index
    %c0_49 = arith.constant 0 : index
    %85 = vector.load %arg5[%c3_47, %c0_48, %c0_49] : memref<32x128x128xbf16, #tpu.memory_space<vmem>>, vector<1x128x128xbf16>
    %86 = vector.shape_cast %85 : vector<1x128x128xbf16> to vector<128x128xbf16>
    %cst_50 = arith.constant dense<0.000000e+00> : vector<2x128xf32>
    %87 = tpu.matmul %84, %86, %cst_50 {dimension_numbers = #tpu.dot_dimension_numbers<[1], [0], [0], [1], [0, 0, 1, 1], [], []>} : vector<2x128xbf16>, vector<128x128xbf16>, vector<2x128xf32> -> vector<2x128xf32>
    %88 = arith.addf %82, %87 : vector<2x128xf32>
    %c0_51 = arith.constant 0 : index
    %c4 = arith.constant 4 : index
    %c0_52 = arith.constant 0 : index
    %89 = vector.load %arg15[%c0_51, %c4, %c0_52] : memref<2x32x128xbf16, #tpu.memory_space<vmem>>, vector<2x1x128xbf16>
    %90 = vector.shape_cast %89 : vector<2x1x128xbf16> to vector<2x128xbf16>
    %c4_53 = arith.constant 4 : index
    %c0_54 = arith.constant 0 : index
    %c0_55 = arith.constant 0 : index
    %91 = vector.load %arg5[%c4_53, %c0_54, %c0_55] : memref<32x128x128xbf16, #tpu.memory_space<vmem>>, vector<1x128x128xbf16>
    %92 = vector.shape_cast %91 : vector<1x128x128xbf16> to vector<128x128xbf16>
    %cst_56 = arith.constant dense<0.000000e+00> : vector<2x128xf32>
    %93 = tpu.matmul %90, %92, %cst_56 {dimension_numbers = #tpu.dot_dimension_numbers<[1], [0], [0], [1], [0, 0, 1, 1], [], []>} : vector<2x128xbf16>, vector<128x128xbf16>, vector<2x128xf32> -> vector<2x128xf32>
    %94 = arith.addf %88, %93 : vector<2x128xf32>
    %c0_57 = arith.constant 0 : index
    %c5 = arith.constant 5 : index
    %c0_58 = arith.constant 0 : index
    %95 = vector.load %arg15[%c0_57, %c5, %c0_58] : memref<2x32x128xbf16, #tpu.memory_space<vmem>>, vector<2x1x128xbf16>
    %96 = vector.shape_cast %95 : vector<2x1x128xbf16> to vector<2x128xbf16>
    %c5_59 = arith.constant 5 : index
    %c0_60 = arith.constant 0 : index
    %c0_61 = arith.constant 0 : index
    %97 = vector.load %arg5[%c5_59, %c0_60, %c0_61] : memref<32x128x128xbf16, #tpu.memory_space<vmem>>, vector<1x128x128xbf16>
    %98 = vector.shape_cast %97 : vector<1x128x128xbf16> to vector<128x128xbf16>
    %cst_62 = arith.constant dense<0.000000e+00> : vector<2x128xf32>
    %99 = tpu.matmul %96, %98, %cst_62 {dimension_numbers = #tpu.dot_dimension_numbers<[1], [0], [0], [1], [0, 0, 1, 1], [], []>} : vector<2x128xbf16>, vector<128x128xbf16>, vector<2x128xf32> -> vector<2x128xf32>
    %100 = arith.addf %94, %99 : vector<2x128xf32>
    %c0_63 = arith.constant 0 : index
    %c6 = arith.constant 6 : index
    %c0_64 = arith.constant 0 : index
    %101 = vector.load %arg15[%c0_63, %c6, %c0_64] : memref<2x32x128xbf16, #tpu.memory_space<vmem>>, vector<2x1x128xbf16>
    %102 = vector.shape_cast %101 : vector<2x1x128xbf16> to vector<2x128xbf16>
    %c6_65 = arith.constant 6 : index
    %c0_66 = arith.constant 0 : index
    %c0_67 = arith.constant 0 : index
    %103 = vector.load %arg5[%c6_65, %c0_66, %c0_67] : memref<32x128x128xbf16, #tpu.memory_space<vmem>>, vector<1x128x128xbf16>
    %104 = vector.shape_cast %103 : vector<1x128x128xbf16> to vector<128x128xbf16>
    %cst_68 = arith.constant dense<0.000000e+00> : vector<2x128xf32>
    %105 = tpu.matmul %102, %104, %cst_68 {dimension_numbers = #tpu.dot_dimension_numbers<[1], [0], [0], [1], [0, 0, 1, 1], [], []>} : vector<2x128xbf16>, vector<128x128xbf16>, vector<2x128xf32> -> vector<2x128xf32>
    %106 = arith.addf %100, %105 : vector<2x128xf32>
    %c0_69 = arith.constant 0 : index
    %c7 = arith.constant 7 : index
    %c0_70 = arith.constant 0 : index
    %107 = vector.load %arg15[%c0_69, %c7, %c0_70] : memref<2x32x128xbf16, #tpu.memory_space<vmem>>, vector<2x1x128xbf16>
    %108 = vector.shape_cast %107 : vector<2x1x128xbf16> to vector<2x128xbf16>
    %c7_71 = arith.constant 7 : index
    %c0_72 = arith.constant 0 : index
    %c0_73 = arith.constant 0 : index
    %109 = vector.load %arg5[%c7_71, %c0_72, %c0_73] : memref<32x128x128xbf16, #tpu.memory_space<vmem>>, vector<1x128x128xbf16>
    %110 = vector.shape_cast %109 : vector<1x128x128xbf16> to vector<128x128xbf16>
    %cst_74 = arith.constant dense<0.000000e+00> : vector<2x128xf32>
    %111 = tpu.matmul %108, %110, %cst_74 {dimension_numbers = #tpu.dot_dimension_numbers<[1], [0], [0], [1], [0, 0, 1, 1], [], []>} : vector<2x128xbf16>, vector<128x128xbf16>, vector<2x128xf32> -> vector<2x128xf32>
    %112 = arith.addf %106, %111 : vector<2x128xf32>
    %c0_75 = arith.constant 0 : index
    %c8 = arith.constant 8 : index
    %c0_76 = arith.constant 0 : index
    %113 = vector.load %arg15[%c0_75, %c8, %c0_76] : memref<2x32x128xbf16, #tpu.memory_space<vmem>>, vector<2x1x128xbf16>
    %114 = vector.shape_cast %113 : vector<2x1x128xbf16> to vector<2x128xbf16>
    %c8_77 = arith.constant 8 : index
    %c0_78 = arith.constant 0 : index
    %c0_79 = arith.constant 0 : index
    %115 = vector.load %arg5[%c8_77, %c0_78, %c0_79] : memref<32x128x128xbf16, #tpu.memory_space<vmem>>, vector<1x128x128xbf16>
    %116 = vector.shape_cast %115 : vector<1x128x128xbf16> to vector<128x128xbf16>
    %cst_80 = arith.constant dense<0.000000e+00> : vector<2x128xf32>
    %117 = tpu.matmul %114, %116, %cst_80 {dimension_numbers = #tpu.dot_dimension_numbers<[1], [0], [0], [1], [0, 0, 1, 1], [], []>} : vector<2x128xbf16>, vector<128x128xbf16>, vector<2x128xf32> -> vector<2x128xf32>
    %118 = arith.addf %112, %117 : vector<2x128xf32>
    %c0_81 = arith.constant 0 : index
    %c9 = arith.constant 9 : index
    %c0_82 = arith.constant 0 : index
    %119 = vector.load %arg15[%c0_81, %c9, %c0_82] : memref<2x32x128xbf16, #tpu.memory_space<vmem>>, vector<2x1x128xbf16>
    %120 = vector.shape_cast %119 : vector<2x1x128xbf16> to vector<2x128xbf16>
    %c9_83 = arith.constant 9 : index
    %c0_84 = arith.constant 0 : index
    %c0_85 = arith.constant 0 : index
    %121 = vector.load %arg5[%c9_83, %c0_84, %c0_85] : memref<32x128x128xbf16, #tpu.memory_space<vmem>>, vector<1x128x128xbf16>
    %122 = vector.shape_cast %121 : vector<1x128x128xbf16> to vector<128x128xbf16>
    %cst_86 = arith.constant dense<0.000000e+00> : vector<2x128xf32>
    %123 = tpu.matmul %120, %122, %cst_86 {dimension_numbers = #tpu.dot_dimension_numbers<[1], [0], [0], [1], [0, 0, 1, 1], [], []>} : vector<2x128xbf16>, vector<128x128xbf16>, vector<2x128xf32> -> vector<2x128xf32>
    %124 = arith.addf %118, %123 : vector<2x128xf32>
    %c0_87 = arith.constant 0 : index
    %c10 = arith.constant 10 : index
    %c0_88 = arith.constant 0 : index
    %125 = vector.load %arg15[%c0_87, %c10, %c0_88] : memref<2x32x128xbf16, #tpu.memory_space<vmem>>, vector<2x1x128xbf16>
    %126 = vector.shape_cast %125 : vector<2x1x128xbf16> to vector<2x128xbf16>
    %c10_89 = arith.constant 10 : index
    %c0_90 = arith.constant 0 : index
    %c0_91 = arith.constant 0 : index
    %127 = vector.load %arg5[%c10_89, %c0_90, %c0_91] : memref<32x128x128xbf16, #tpu.memory_space<vmem>>, vector<1x128x128xbf16>
    %128 = vector.shape_cast %127 : vector<1x128x128xbf16> to vector<128x128xbf16>
    %cst_92 = arith.constant dense<0.000000e+00> : vector<2x128xf32>
    %129 = tpu.matmul %126, %128, %cst_92 {dimension_numbers = #tpu.dot_dimension_numbers<[1], [0], [0], [1], [0, 0, 1, 1], [], []>} : vector<2x128xbf16>, vector<128x128xbf16>, vector<2x128xf32> -> vector<2x128xf32>
    %130 = arith.addf %124, %129 : vector<2x128xf32>
    %c0_93 = arith.constant 0 : index
    %c11 = arith.constant 11 : index
    %c0_94 = arith.constant 0 : index
    %131 = vector.load %arg15[%c0_93, %c11, %c0_94] : memref<2x32x128xbf16, #tpu.memory_space<vmem>>, vector<2x1x128xbf16>
    %132 = vector.shape_cast %131 : vector<2x1x128xbf16> to vector<2x128xbf16>
    %c11_95 = arith.constant 11 : index
    %c0_96 = arith.constant 0 : index
    %c0_97 = arith.constant 0 : index
    %133 = vector.load %arg5[%c11_95, %c0_96, %c0_97] : memref<32x128x128xbf16, #tpu.memory_space<vmem>>, vector<1x128x128xbf16>
    %134 = vector.shape_cast %133 : vector<1x128x128xbf16> to vector<128x128xbf16>
    %cst_98 = arith.constant dense<0.000000e+00> : vector<2x128xf32>
    %135 = tpu.matmul %132, %134, %cst_98 {dimension_numbers = #tpu.dot_dimension_numbers<[1], [0], [0], [1], [0, 0, 1, 1], [], []>} : vector<2x128xbf16>, vector<128x128xbf16>, vector<2x128xf32> -> vector<2x128xf32>
    %136 = arith.addf %130, %135 : vector<2x128xf32>
    %c0_99 = arith.constant 0 : index
    %c12 = arith.constant 12 : index
    %c0_100 = arith.constant 0 : index
    %137 = vector.load %arg15[%c0_99, %c12, %c0_100] : memref<2x32x128xbf16, #tpu.memory_space<vmem>>, vector<2x1x128xbf16>
    %138 = vector.shape_cast %137 : vector<2x1x128xbf16> to vector<2x128xbf16>
    %c12_101 = arith.constant 12 : index
    %c0_102 = arith.constant 0 : index
    %c0_103 = arith.constant 0 : index
    %139 = vector.load %arg5[%c12_101, %c0_102, %c0_103] : memref<32x128x128xbf16, #tpu.memory_space<vmem>>, vector<1x128x128xbf16>
    %140 = vector.shape_cast %139 : vector<1x128x128xbf16> to vector<128x128xbf16>
    %cst_104 = arith.constant dense<0.000000e+00> : vector<2x128xf32>
    %141 = tpu.matmul %138, %140, %cst_104 {dimension_numbers = #tpu.dot_dimension_numbers<[1], [0], [0], [1], [0, 0, 1, 1], [], []>} : vector<2x128xbf16>, vector<128x128xbf16>, vector<2x128xf32> -> vector<2x128xf32>
    %142 = arith.addf %136, %141 : vector<2x128xf32>
    %c0_105 = arith.constant 0 : index
    %c13 = arith.constant 13 : index
    %c0_106 = arith.constant 0 : index
    %143 = vector.load %arg15[%c0_105, %c13, %c0_106] : memref<2x32x128xbf16, #tpu.memory_space<vmem>>, vector<2x1x128xbf16>
    %144 = vector.shape_cast %143 : vector<2x1x128xbf16> to vector<2x128xbf16>
    %c13_107 = arith.constant 13 : index
    %c0_108 = arith.constant 0 : index
    %c0_109 = arith.constant 0 : index
    %145 = vector.load %arg5[%c13_107, %c0_108, %c0_109] : memref<32x128x128xbf16, #tpu.memory_space<vmem>>, vector<1x128x128xbf16>
    %146 = vector.shape_cast %145 : vector<1x128x128xbf16> to vector<128x128xbf16>
    %cst_110 = arith.constant dense<0.000000e+00> : vector<2x128xf32>
    %147 = tpu.matmul %144, %146, %cst_110 {dimension_numbers = #tpu.dot_dimension_numbers<[1], [0], [0], [1], [0, 0, 1, 1], [], []>} : vector<2x128xbf16>, vector<128x128xbf16>, vector<2x128xf32> -> vector<2x128xf32>
    %148 = arith.addf %142, %147 : vector<2x128xf32>
    %c0_111 = arith.constant 0 : index
    %c14 = arith.constant 14 : index
    %c0_112 = arith.constant 0 : index
    %149 = vector.load %arg15[%c0_111, %c14, %c0_112] : memref<2x32x128xbf16, #tpu.memory_space<vmem>>, vector<2x1x128xbf16>
    %150 = vector.shape_cast %149 : vector<2x1x128xbf16> to vector<2x128xbf16>
    %c14_113 = arith.constant 14 : index
    %c0_114 = arith.constant 0 : index
    %c0_115 = arith.constant 0 : index
    %151 = vector.load %arg5[%c14_113, %c0_114, %c0_115] : memref<32x128x128xbf16, #tpu.memory_space<vmem>>, vector<1x128x128xbf16>
    %152 = vector.shape_cast %151 : vector<1x128x128xbf16> to vector<128x128xbf16>
    %cst_116 = arith.constant dense<0.000000e+00> : vector<2x128xf32>
    %153 = tpu.matmul %150, %152, %cst_116 {dimension_numbers = #tpu.dot_dimension_numbers<[1], [0], [0], [1], [0, 0, 1, 1], [], []>} : vector<2x128xbf16>, vector<128x128xbf16>, vector<2x128xf32> -> vector<2x128xf32>
    %154 = arith.addf %148, %153 : vector<2x128xf32>
    %c0_117 = arith.constant 0 : index
    %c15 = arith.constant 15 : index
    %c0_118 = arith.constant 0 : index
    %155 = vector.load %arg15[%c0_117, %c15, %c0_118] : memref<2x32x128xbf16, #tpu.memory_space<vmem>>, vector<2x1x128xbf16>
    %156 = vector.shape_cast %155 : vector<2x1x128xbf16> to vector<2x128xbf16>
    %c15_119 = arith.constant 15 : index
    %c0_120 = arith.constant 0 : index
    %c0_121 = arith.constant 0 : index
    %157 = vector.load %arg5[%c15_119, %c0_120, %c0_121] : memref<32x128x128xbf16, #tpu.memory_space<vmem>>, vector<1x128x128xbf16>
    %158 = vector.shape_cast %157 : vector<1x128x128xbf16> to vector<128x128xbf16>
    %cst_122 = arith.constant dense<0.000000e+00> : vector<2x128xf32>
    %159 = tpu.matmul %156, %158, %cst_122 {dimension_numbers = #tpu.dot_dimension_numbers<[1], [0], [0], [1], [0, 0, 1, 1], [], []>} : vector<2x128xbf16>, vector<128x128xbf16>, vector<2x128xf32> -> vector<2x128xf32>
    %160 = arith.addf %154, %159 : vector<2x128xf32>
    %c0_123 = arith.constant 0 : index
    %c16 = arith.constant 16 : index
    %c0_124 = arith.constant 0 : index
    %161 = vector.load %arg15[%c0_123, %c16, %c0_124] : memref<2x32x128xbf16, #tpu.memory_space<vmem>>, vector<2x1x128xbf16>
    %162 = vector.shape_cast %161 : vector<2x1x128xbf16> to vector<2x128xbf16>
    %c16_125 = arith.constant 16 : index
    %c0_126 = arith.constant 0 : index
    %c0_127 = arith.constant 0 : index
    %163 = vector.load %arg5[%c16_125, %c0_126, %c0_127] : memref<32x128x128xbf16, #tpu.memory_space<vmem>>, vector<1x128x128xbf16>
    %164 = vector.shape_cast %163 : vector<1x128x128xbf16> to vector<128x128xbf16>
    %cst_128 = arith.constant dense<0.000000e+00> : vector<2x128xf32>
    %165 = tpu.matmul %162, %164, %cst_128 {dimension_numbers = #tpu.dot_dimension_numbers<[1], [0], [0], [1], [0, 0, 1, 1], [], []>} : vector<2x128xbf16>, vector<128x128xbf16>, vector<2x128xf32> -> vector<2x128xf32>
    %166 = arith.addf %160, %165 : vector<2x128xf32>
    %c0_129 = arith.constant 0 : index
    %c17 = arith.constant 17 : index
    %c0_130 = arith.constant 0 : index
    %167 = vector.load %arg15[%c0_129, %c17, %c0_130] : memref<2x32x128xbf16, #tpu.memory_space<vmem>>, vector<2x1x128xbf16>
    %168 = vector.shape_cast %167 : vector<2x1x128xbf16> to vector<2x128xbf16>
    %c17_131 = arith.constant 17 : index
    %c0_132 = arith.constant 0 : index
    %c0_133 = arith.constant 0 : index
    %169 = vector.load %arg5[%c17_131, %c0_132, %c0_133] : memref<32x128x128xbf16, #tpu.memory_space<vmem>>, vector<1x128x128xbf16>
    %170 = vector.shape_cast %169 : vector<1x128x128xbf16> to vector<128x128xbf16>
    %cst_134 = arith.constant dense<0.000000e+00> : vector<2x128xf32>
    %171 = tpu.matmul %168, %170, %cst_134 {dimension_numbers = #tpu.dot_dimension_numbers<[1], [0], [0], [1], [0, 0, 1, 1], [], []>} : vector<2x128xbf16>, vector<128x128xbf16>, vector<2x128xf32> -> vector<2x128xf32>
    %172 = arith.addf %166, %171 : vector<2x128xf32>
    %c0_135 = arith.constant 0 : index
    %c18 = arith.constant 18 : index
    %c0_136 = arith.constant 0 : index
    %173 = vector.load %arg15[%c0_135, %c18, %c0_136] : memref<2x32x128xbf16, #tpu.memory_space<vmem>>, vector<2x1x128xbf16>
    %174 = vector.shape_cast %173 : vector<2x1x128xbf16> to vector<2x128xbf16>
    %c18_137 = arith.constant 18 : index
    %c0_138 = arith.constant 0 : index
    %c0_139 = arith.constant 0 : index
    %175 = vector.load %arg5[%c18_137, %c0_138, %c0_139] : memref<32x128x128xbf16, #tpu.memory_space<vmem>>, vector<1x128x128xbf16>
    %176 = vector.shape_cast %175 : vector<1x128x128xbf16> to vector<128x128xbf16>
    %cst_140 = arith.constant dense<0.000000e+00> : vector<2x128xf32>
    %177 = tpu.matmul %174, %176, %cst_140 {dimension_numbers = #tpu.dot_dimension_numbers<[1], [0], [0], [1], [0, 0, 1, 1], [], []>} : vector<2x128xbf16>, vector<128x128xbf16>, vector<2x128xf32> -> vector<2x128xf32>
    %178 = arith.addf %172, %177 : vector<2x128xf32>
    %c0_141 = arith.constant 0 : index
    %c19 = arith.constant 19 : index
    %c0_142 = arith.constant 0 : index
    %179 = vector.load %arg15[%c0_141, %c19, %c0_142] : memref<2x32x128xbf16, #tpu.memory_space<vmem>>, vector<2x1x128xbf16>
    %180 = vector.shape_cast %179 : vector<2x1x128xbf16> to vector<2x128xbf16>
    %c19_143 = arith.constant 19 : index
    %c0_144 = arith.constant 0 : index
    %c0_145 = arith.constant 0 : index
    %181 = vector.load %arg5[%c19_143, %c0_144, %c0_145] : memref<32x128x128xbf16, #tpu.memory_space<vmem>>, vector<1x128x128xbf16>
    %182 = vector.shape_cast %181 : vector<1x128x128xbf16> to vector<128x128xbf16>
    %cst_146 = arith.constant dense<0.000000e+00> : vector<2x128xf32>
    %183 = tpu.matmul %180, %182, %cst_146 {dimension_numbers = #tpu.dot_dimension_numbers<[1], [0], [0], [1], [0, 0, 1, 1], [], []>} : vector<2x128xbf16>, vector<128x128xbf16>, vector<2x128xf32> -> vector<2x128xf32>
    %184 = arith.addf %178, %183 : vector<2x128xf32>
    %c0_147 = arith.constant 0 : index
    %c20 = arith.constant 20 : index
    %c0_148 = arith.constant 0 : index
    %185 = vector.load %arg15[%c0_147, %c20, %c0_148] : memref<2x32x128xbf16, #tpu.memory_space<vmem>>, vector<2x1x128xbf16>
    %186 = vector.shape_cast %185 : vector<2x1x128xbf16> to vector<2x128xbf16>
    %c20_149 = arith.constant 20 : index
    %c0_150 = arith.constant 0 : index
    %c0_151 = arith.constant 0 : index
    %187 = vector.load %arg5[%c20_149, %c0_150, %c0_151] : memref<32x128x128xbf16, #tpu.memory_space<vmem>>, vector<1x128x128xbf16>
    %188 = vector.shape_cast %187 : vector<1x128x128xbf16> to vector<128x128xbf16>
    %cst_152 = arith.constant dense<0.000000e+00> : vector<2x128xf32>
    %189 = tpu.matmul %186, %188, %cst_152 {dimension_numbers = #tpu.dot_dimension_numbers<[1], [0], [0], [1], [0, 0, 1, 1], [], []>} : vector<2x128xbf16>, vector<128x128xbf16>, vector<2x128xf32> -> vector<2x128xf32>
    %190 = arith.addf %184, %189 : vector<2x128xf32>
    %c0_153 = arith.constant 0 : index
    %c21 = arith.constant 21 : index
    %c0_154 = arith.constant 0 : index
    %191 = vector.load %arg15[%c0_153, %c21, %c0_154] : memref<2x32x128xbf16, #tpu.memory_space<vmem>>, vector<2x1x128xbf16>
    %192 = vector.shape_cast %191 : vector<2x1x128xbf16> to vector<2x128xbf16>
    %c21_155 = arith.constant 21 : index
    %c0_156 = arith.constant 0 : index
    %c0_157 = arith.constant 0 : index
    %193 = vector.load %arg5[%c21_155, %c0_156, %c0_157] : memref<32x128x128xbf16, #tpu.memory_space<vmem>>, vector<1x128x128xbf16>
    %194 = vector.shape_cast %193 : vector<1x128x128xbf16> to vector<128x128xbf16>
    %cst_158 = arith.constant dense<0.000000e+00> : vector<2x128xf32>
    %195 = tpu.matmul %192, %194, %cst_158 {dimension_numbers = #tpu.dot_dimension_numbers<[1], [0], [0], [1], [0, 0, 1, 1], [], []>} : vector<2x128xbf16>, vector<128x128xbf16>, vector<2x128xf32> -> vector<2x128xf32>
    %196 = arith.addf %190, %195 : vector<2x128xf32>
    %c0_159 = arith.constant 0 : index
    %c22 = arith.constant 22 : index
    %c0_160 = arith.constant 0 : index
    %197 = vector.load %arg15[%c0_159, %c22, %c0_160] : memref<2x32x128xbf16, #tpu.memory_space<vmem>>, vector<2x1x128xbf16>
    %198 = vector.shape_cast %197 : vector<2x1x128xbf16> to vector<2x128xbf16>
    %c22_161 = arith.constant 22 : index
    %c0_162 = arith.constant 0 : index
    %c0_163 = arith.constant 0 : index
    %199 = vector.load %arg5[%c22_161, %c0_162, %c0_163] : memref<32x128x128xbf16, #tpu.memory_space<vmem>>, vector<1x128x128xbf16>
    %200 = vector.shape_cast %199 : vector<1x128x128xbf16> to vector<128x128xbf16>
    %cst_164 = arith.constant dense<0.000000e+00> : vector<2x128xf32>
    %201 = tpu.matmul %198, %200, %cst_164 {dimension_numbers = #tpu.dot_dimension_numbers<[1], [0], [0], [1], [0, 0, 1, 1], [], []>} : vector<2x128xbf16>, vector<128x128xbf16>, vector<2x128xf32> -> vector<2x128xf32>
    %202 = arith.addf %196, %201 : vector<2x128xf32>
    %c0_165 = arith.constant 0 : index
    %c23 = arith.constant 23 : index
    %c0_166 = arith.constant 0 : index
    %203 = vector.load %arg15[%c0_165, %c23, %c0_166] : memref<2x32x128xbf16, #tpu.memory_space<vmem>>, vector<2x1x128xbf16>
    %204 = vector.shape_cast %203 : vector<2x1x128xbf16> to vector<2x128xbf16>
    %c23_167 = arith.constant 23 : index
    %c0_168 = arith.constant 0 : index
    %c0_169 = arith.constant 0 : index
    %205 = vector.load %arg5[%c23_167, %c0_168, %c0_169] : memref<32x128x128xbf16, #tpu.memory_space<vmem>>, vector<1x128x128xbf16>
    %206 = vector.shape_cast %205 : vector<1x128x128xbf16> to vector<128x128xbf16>
    %cst_170 = arith.constant dense<0.000000e+00> : vector<2x128xf32>
    %207 = tpu.matmul %204, %206, %cst_170 {dimension_numbers = #tpu.dot_dimension_numbers<[1], [0], [0], [1], [0, 0, 1, 1], [], []>} : vector<2x128xbf16>, vector<128x128xbf16>, vector<2x128xf32> -> vector<2x128xf32>
    %208 = arith.addf %202, %207 : vector<2x128xf32>
    %c0_171 = arith.constant 0 : index
    %c24 = arith.constant 24 : index
    %c0_172 = arith.constant 0 : index
    %209 = vector.load %arg15[%c0_171, %c24, %c0_172] : memref<2x32x128xbf16, #tpu.memory_space<vmem>>, vector<2x1x128xbf16>
    %210 = vector.shape_cast %209 : vector<2x1x128xbf16> to vector<2x128xbf16>
    %c24_173 = arith.constant 24 : index
    %c0_174 = arith.constant 0 : index
    %c0_175 = arith.constant 0 : index
    %211 = vector.load %arg5[%c24_173, %c0_174, %c0_175] : memref<32x128x128xbf16, #tpu.memory_space<vmem>>, vector<1x128x128xbf16>
    %212 = vector.shape_cast %211 : vector<1x128x128xbf16> to vector<128x128xbf16>
    %cst_176 = arith.constant dense<0.000000e+00> : vector<2x128xf32>
    %213 = tpu.matmul %210, %212, %cst_176 {dimension_numbers = #tpu.dot_dimension_numbers<[1], [0], [0], [1], [0, 0, 1, 1], [], []>} : vector<2x128xbf16>, vector<128x128xbf16>, vector<2x128xf32> -> vector<2x128xf32>
    %214 = arith.addf %208, %213 : vector<2x128xf32>
    %c0_177 = arith.constant 0 : index
    %c25 = arith.constant 25 : index
    %c0_178 = arith.constant 0 : index
    %215 = vector.load %arg15[%c0_177, %c25, %c0_178] : memref<2x32x128xbf16, #tpu.memory_space<vmem>>, vector<2x1x128xbf16>
    %216 = vector.shape_cast %215 : vector<2x1x128xbf16> to vector<2x128xbf16>
    %c25_179 = arith.constant 25 : index
    %c0_180 = arith.constant 0 : index
    %c0_181 = arith.constant 0 : index
    %217 = vector.load %arg5[%c25_179, %c0_180, %c0_181] : memref<32x128x128xbf16, #tpu.memory_space<vmem>>, vector<1x128x128xbf16>
    %218 = vector.shape_cast %217 : vector<1x128x128xbf16> to vector<128x128xbf16>
    %cst_182 = arith.constant dense<0.000000e+00> : vector<2x128xf32>
    %219 = tpu.matmul %216, %218, %cst_182 {dimension_numbers = #tpu.dot_dimension_numbers<[1], [0], [0], [1], [0, 0, 1, 1], [], []>} : vector<2x128xbf16>, vector<128x128xbf16>, vector<2x128xf32> -> vector<2x128xf32>
    %220 = arith.addf %214, %219 : vector<2x128xf32>
    %c0_183 = arith.constant 0 : index
    %c26 = arith.constant 26 : index
    %c0_184 = arith.constant 0 : index
    %221 = vector.load %arg15[%c0_183, %c26, %c0_184] : memref<2x32x128xbf16, #tpu.memory_space<vmem>>, vector<2x1x128xbf16>
    %222 = vector.shape_cast %221 : vector<2x1x128xbf16> to vector<2x128xbf16>
    %c26_185 = arith.constant 26 : index
    %c0_186 = arith.constant 0 : index
    %c0_187 = arith.constant 0 : index
    %223 = vector.load %arg5[%c26_185, %c0_186, %c0_187] : memref<32x128x128xbf16, #tpu.memory_space<vmem>>, vector<1x128x128xbf16>
    %224 = vector.shape_cast %223 : vector<1x128x128xbf16> to vector<128x128xbf16>
    %cst_188 = arith.constant dense<0.000000e+00> : vector<2x128xf32>
    %225 = tpu.matmul %222, %224, %cst_188 {dimension_numbers = #tpu.dot_dimension_numbers<[1], [0], [0], [1], [0, 0, 1, 1], [], []>} : vector<2x128xbf16>, vector<128x128xbf16>, vector<2x128xf32> -> vector<2x128xf32>
    %226 = arith.addf %220, %225 : vector<2x128xf32>
    %c0_189 = arith.constant 0 : index
    %c27 = arith.constant 27 : index
    %c0_190 = arith.constant 0 : index
    %227 = vector.load %arg15[%c0_189, %c27, %c0_190] : memref<2x32x128xbf16, #tpu.memory_space<vmem>>, vector<2x1x128xbf16>
    %228 = vector.shape_cast %227 : vector<2x1x128xbf16> to vector<2x128xbf16>
    %c27_191 = arith.constant 27 : index
    %c0_192 = arith.constant 0 : index
    %c0_193 = arith.constant 0 : index
    %229 = vector.load %arg5[%c27_191, %c0_192, %c0_193] : memref<32x128x128xbf16, #tpu.memory_space<vmem>>, vector<1x128x128xbf16>
    %230 = vector.shape_cast %229 : vector<1x128x128xbf16> to vector<128x128xbf16>
    %cst_194 = arith.constant dense<0.000000e+00> : vector<2x128xf32>
    %231 = tpu.matmul %228, %230, %cst_194 {dimension_numbers = #tpu.dot_dimension_numbers<[1], [0], [0], [1], [0, 0, 1, 1], [], []>} : vector<2x128xbf16>, vector<128x128xbf16>, vector<2x128xf32> -> vector<2x128xf32>
    %232 = arith.addf %226, %231 : vector<2x128xf32>
    %c0_195 = arith.constant 0 : index
    %c28 = arith.constant 28 : index
    %c0_196 = arith.constant 0 : index
    %233 = vector.load %arg15[%c0_195, %c28, %c0_196] : memref<2x32x128xbf16, #tpu.memory_space<vmem>>, vector<2x1x128xbf16>
    %234 = vector.shape_cast %233 : vector<2x1x128xbf16> to vector<2x128xbf16>
    %c28_197 = arith.constant 28 : index
    %c0_198 = arith.constant 0 : index
    %c0_199 = arith.constant 0 : index
    %235 = vector.load %arg5[%c28_197, %c0_198, %c0_199] : memref<32x128x128xbf16, #tpu.memory_space<vmem>>, vector<1x128x128xbf16>
    %236 = vector.shape_cast %235 : vector<1x128x128xbf16> to vector<128x128xbf16>
    %cst_200 = arith.constant dense<0.000000e+00> : vector<2x128xf32>
    %237 = tpu.matmul %234, %236, %cst_200 {dimension_numbers = #tpu.dot_dimension_numbers<[1], [0], [0], [1], [0, 0, 1, 1], [], []>} : vector<2x128xbf16>, vector<128x128xbf16>, vector<2x128xf32> -> vector<2x128xf32>
    %238 = arith.addf %232, %237 : vector<2x128xf32>
    %c0_201 = arith.constant 0 : index
    %c29 = arith.constant 29 : index
    %c0_202 = arith.constant 0 : index
    %239 = vector.load %arg15[%c0_201, %c29, %c0_202] : memref<2x32x128xbf16, #tpu.memory_space<vmem>>, vector<2x1x128xbf16>
    %240 = vector.shape_cast %239 : vector<2x1x128xbf16> to vector<2x128xbf16>
    %c29_203 = arith.constant 29 : index
    %c0_204 = arith.constant 0 : index
    %c0_205 = arith.constant 0 : index
    %241 = vector.load %arg5[%c29_203, %c0_204, %c0_205] : memref<32x128x128xbf16, #tpu.memory_space<vmem>>, vector<1x128x128xbf16>
    %242 = vector.shape_cast %241 : vector<1x128x128xbf16> to vector<128x128xbf16>
    %cst_206 = arith.constant dense<0.000000e+00> : vector<2x128xf32>
    %243 = tpu.matmul %240, %242, %cst_206 {dimension_numbers = #tpu.dot_dimension_numbers<[1], [0], [0], [1], [0, 0, 1, 1], [], []>} : vector<2x128xbf16>, vector<128x128xbf16>, vector<2x128xf32> -> vector<2x128xf32>
    %244 = arith.addf %238, %243 : vector<2x128xf32>
    %c0_207 = arith.constant 0 : index
    %c30 = arith.constant 30 : index
    %c0_208 = arith.constant 0 : index
    %245 = vector.load %arg15[%c0_207, %c30, %c0_208] : memref<2x32x128xbf16, #tpu.memory_space<vmem>>, vector<2x1x128xbf16>
    %246 = vector.shape_cast %245 : vector<2x1x128xbf16> to vector<2x128xbf16>
    %c30_209 = arith.constant 30 : index
    %c0_210 = arith.constant 0 : index
    %c0_211 = arith.constant 0 : index
    %247 = vector.load %arg5[%c30_209, %c0_210, %c0_211] : memref<32x128x128xbf16, #tpu.memory_space<vmem>>, vector<1x128x128xbf16>
    %248 = vector.shape_cast %247 : vector<1x128x128xbf16> to vector<128x128xbf16>
    %cst_212 = arith.constant dense<0.000000e+00> : vector<2x128xf32>
    %249 = tpu.matmul %246, %248, %cst_212 {dimension_numbers = #tpu.dot_dimension_numbers<[1], [0], [0], [1], [0, 0, 1, 1], [], []>} : vector<2x128xbf16>, vector<128x128xbf16>, vector<2x128xf32> -> vector<2x128xf32>
    %250 = arith.addf %244, %249 : vector<2x128xf32>
    %c0_213 = arith.constant 0 : index
    %c31 = arith.constant 31 : index
    %c0_214 = arith.constant 0 : index
    %251 = vector.load %arg15[%c0_213, %c31, %c0_214] : memref<2x32x128xbf16, #tpu.memory_space<vmem>>, vector<2x1x128xbf16>
    %252 = vector.shape_cast %251 : vector<2x1x128xbf16> to vector<2x128xbf16>
    %c31_215 = arith.constant 31 : index
    %c0_216 = arith.constant 0 : index
    %c0_217 = arith.constant 0 : index
    %253 = vector.load %arg5[%c31_215, %c0_216, %c0_217] : memref<32x128x128xbf16, #tpu.memory_space<vmem>>, vector<1x128x128xbf16>
    %254 = vector.shape_cast %253 : vector<1x128x128xbf16> to vector<128x128xbf16>
    %cst_218 = arith.constant dense<0.000000e+00> : vector<2x128xf32>
    %255 = tpu.matmul %252, %254, %cst_218 {dimension_numbers = #tpu.dot_dimension_numbers<[1], [0], [0], [1], [0, 0, 1, 1], [], []>} : vector<2x128xbf16>, vector<128x128xbf16>, vector<2x128xf32> -> vector<2x128xf32>
    %256 = arith.addf %250, %255 : vector<2x128xf32>
    %c0_219 = arith.constant 0 : index
    %c0_220 = arith.constant 0 : index
    %257 = vector.load %arg6[%c0_219, %c0_220] : memref<1x128xf32, #tpu.memory_space<vmem>>, vector<1x128xf32>
    %258 = vector.broadcast %257 : vector<1x128xf32> to vector<2x128xf32>
    %259 = arith.addf %256, %258 : vector<2x128xf32>
    %c0_221 = arith.constant 0 : index
    %c0_222 = arith.constant 0 : index
    %260 = vector.load %arg2[%c0_221, %c0_222] : memref<2x128xf32, #tpu.memory_space<vmem>>, vector<2x128xf32>
    %261 = arith.truncf %260 : vector<2x128xf32> to vector<2x128xbf16>
    %c0_223 = arith.constant 0 : index
    %c0_224 = arith.constant 0 : index
    %262 = vector.load %arg7[%c0_223, %c0_224] : memref<128x1024xbf16, #tpu.memory_space<vmem>>, vector<128x1024xbf16>
    %cst_225 = arith.constant dense<0.000000e+00> : vector<2x1024xf32>
    %263 = tpu.matmul %261, %262, %cst_225 {dimension_numbers = #tpu.dot_dimension_numbers<[1], [0], [0], [1], [0, 0, 1, 1], [], []>} : vector<2x128xbf16>, vector<128x1024xbf16>, vector<2x1024xf32> -> vector<2x1024xf32>
    %264 = arith.truncf %259 : vector<2x128xf32> to vector<2x128xbf16>
    %c0_226 = arith.constant 0 : index
    %c0_227 = arith.constant 0 : index
    %265 = vector.load %arg8[%c0_226, %c0_227] : memref<128x1024xbf16, #tpu.memory_space<vmem>>, vector<128x1024xbf16>
    %cst_228 = arith.constant dense<0.000000e+00> : vector<2x1024xf32>
    %266 = tpu.matmul %264, %265, %cst_228 {dimension_numbers = #tpu.dot_dimension_numbers<[1], [0], [0], [1], [0, 0, 1, 1], [], []>} : vector<2x128xbf16>, vector<128x1024xbf16>, vector<2x1024xf32> -> vector<2x1024xf32>
    %267 = arith.addf %263, %266 : vector<2x1024xf32>
    %c0_229 = arith.constant 0 : index
    %c0_230 = arith.constant 0 : index
    %268 = vector.load %arg9[%c0_229, %c0_230] : memref<1x1024xf32, #tpu.memory_space<vmem>>, vector<1x1024xf32>
    %269 = vector.broadcast %268 : vector<1x1024xf32> to vector<2x1024xf32>
    %270 = arith.addf %267, %269 : vector<2x1024xf32>
    %cst_231 = arith.constant 0.000000e+00 : f32
    %271 = vector.broadcast %cst_231 : f32 to vector<2x1024xf32>
    %272 = arith.maximumf %270, %271 : vector<2x1024xf32>
    %273 = arith.truncf %272 : vector<2x1024xf32> to vector<2x1024xbf16>
    %c0_232 = arith.constant 0 : index
    %c0_233 = arith.constant 0 : index
    %274 = vector.load %arg10[%c0_232, %c0_233] : memref<1024x256xbf16, #tpu.memory_space<vmem>>, vector<1024x256xbf16>
    %cst_234 = arith.constant dense<0.000000e+00> : vector<2x256xf32>
    %275 = tpu.matmul %273, %274, %cst_234 {dimension_numbers = #tpu.dot_dimension_numbers<[1], [0], [0], [1], [0, 0, 1, 1], [], []>} : vector<2x1024xbf16>, vector<1024x256xbf16>, vector<2x256xf32> -> vector<2x256xf32>
    %c0_235 = arith.constant 0 : index
    %c0_236 = arith.constant 0 : index
    %276 = vector.load %arg11[%c0_235, %c0_236] : memref<1x256xf32, #tpu.memory_space<vmem>>, vector<1x256xf32>
    %277 = vector.broadcast %276 : vector<1x256xf32> to vector<2x256xf32>
    %278 = arith.addf %275, %277 : vector<2x256xf32>
    %cst_237 = arith.constant 0.000000e+00 : f32
    %279 = vector.broadcast %cst_237 : f32 to vector<2x256xf32>
    %280 = arith.maximumf %278, %279 : vector<2x256xf32>
    %281 = arith.truncf %280 : vector<2x256xf32> to vector<2x256xbf16>
    %c0_238 = arith.constant 0 : index
    %c0_239 = arith.constant 0 : index
    %282 = vector.load %arg12[%c0_238, %c0_239] : memref<256x128xbf16, #tpu.memory_space<vmem>>, vector<256x128xbf16>
    %cst_240 = arith.constant dense<0.000000e+00> : vector<2x128xf32>
    %283 = tpu.matmul %281, %282, %cst_240 {dimension_numbers = #tpu.dot_dimension_numbers<[1], [0], [0], [1], [0, 0, 1, 1], [], []>} : vector<2x256xbf16>, vector<256x128xbf16>, vector<2x128xf32> -> vector<2x128xf32>
    %c0_241 = arith.constant 0 : index
    %c0_242 = arith.constant 0 : index
    %284 = vector.load %arg13[%c0_241, %c0_242] : memref<1x128xf32, #tpu.memory_space<vmem>>, vector<1x128xf32>
    %285 = vector.broadcast %284 : vector<1x128xf32> to vector<2x128xf32>
    %286 = arith.addf %283, %285 : vector<2x128xf32>
    %c0_243 = arith.constant 0 : index
    %c0_244 = arith.constant 0 : index
    %287 = vector.load %arg14[%c0_243, %c0_244] : memref<2x128xf32, #tpu.memory_space<vmem>>, vector<2x128xf32>
    tpu.vector_store %arg14[%c0_243, %c0_244], %286 {strides = array<i32>} : memref<2x128xf32, #tpu.memory_space<vmem>>, vector<2x128xf32>,
    return
  }
  func.func @transform_0(%arg0: i32) -> (i32, i32, i32) {
    %c0_i32 = arith.constant 0 : i32
    %c0_i32_0 = arith.constant 0 : i32
    %c0_i32_1 = arith.constant 0 : i32
    return %arg0, %c0_i32, %c0_i32_0 : i32, i32, i32
  }
  func.func @transform_1(%arg0: i32) -> (i32, i32) {
    %c0_i32 = arith.constant 0 : i32
    %c0_i32_0 = arith.constant 0 : i32
    return %arg0, %c0_i32 : i32, i32
  }
  func.func @transform_2(%arg0: i32) -> (i32, i32) {
    %c0_i32 = arith.constant 0 : i32
    %c0_i32_0 = arith.constant 0 : i32
    %c0_i32_1 = arith.constant 0 : i32
    return %c0_i32, %c0_i32_0 : i32, i32
  }
  func.func @transform_3(%arg0: i32) -> (i32, i32) {
    %c0_i32 = arith.constant 0 : i32
    %c0_i32_0 = arith.constant 0 : i32
    %c0_i32_1 = arith.constant 0 : i32
    return %c0_i32, %c0_i32_0 : i32, i32
  }
  func.func @transform_4(%arg0: i32) -> (i32, i32, i32) {
    %c0_i32 = arith.constant 0 : i32
    %c0_i32_0 = arith.constant 0 : i32
    %c0_i32_1 = arith.constant 0 : i32
    %c0_i32_2 = arith.constant 0 : i32
    return %c0_i32, %c0_i32_0, %c0_i32_1 : i32, i32, i32
  }
  func.func @transform_5(%arg0: i32) -> (i32, i32) {
    %c0_i32 = arith.constant 0 : i32
    %c0_i32_0 = arith.constant 0 : i32
    %c0_i32_1 = arith.constant 0 : i32
    return %c0_i32, %c0_i32_0 : i32, i32
  }
  func.func @transform_6(%arg0: i32) -> (i32, i32) {
    %c0_i32 = arith.constant 0 : i32
    %c0_i32_0 = arith.constant 0 : i32
    %c0_i32_1 = arith.constant 0 : i32
    return %c0_i32, %c0_i32_0 : i32, i32
  }
  func.func @transform_7(%arg0: i32) -> (i32, i32) {
    %c0_i32 = arith.constant 0 : i32
    %c0_i32_0 = arith.constant 0 : i32
    %c0_i32_1 = arith.constant 0 : i32
    return %c0_i32, %c0_i32_0 : i32, i32
  }
  func.func @transform_8(%arg0: i32) -> (i32, i32) {
    %c0_i32 = arith.constant 0 : i32
    %c0_i32_0 = arith.constant 0 : i32
    %c0_i32_1 = arith.constant 0 : i32
    return %c0_i32, %c0_i32_0 : i32, i32
  }
  func.func @transform_9(%arg0: i32) -> (i32, i32) {
    %c0_i32 = arith.constant 0 : i32
    %c0_i32_0 = arith.constant 0 : i32
    %c0_i32_1 = arith.constant 0 : i32
    return %c0_i32, %c0_i32_0 : i32, i32
  }
  func.func @transform_10(%arg0: i32) -> (i32, i32) {
    %c0_i32 = arith.constant 0 : i32
    %c0_i32_0 = arith.constant 0 : i32
    %c0_i32_1 = arith.constant 0 : i32
    return %c0_i32, %c0_i32_0 : i32, i32
  }
  func.func @transform_11(%arg0: i32) -> (i32, i32) {
    %c0_i32 = arith.constant 0 : i32
    %c0_i32_0 = arith.constant 0 : i32
    %c0_i32_1 = arith.constant 0 : i32
    return %c0_i32, %c0_i32_0 : i32, i32
  }
  func.func @transform_12(%arg0: i32) -> (i32, i32) {
    %c0_i32 = arith.constant 0 : i32
    %c0_i32_0 = arith.constant 0 : i32
    %c0_i32_1 = arith.constant 0 : i32
    return %c0_i32, %c0_i32_0 : i32, i32
  }
  func.func @transform_13(%arg0: i32) -> (i32, i32) {
    %c0_i32 = arith.constant 0 : i32
    %c0_i32_0 = arith.constant 0 : i32
    return %arg0, %c0_i32 : i32, i32
  }
}

</mosaic_0001>

<bundles_post_ra>
// kernel: gin_convnet_forward.2
= control target key start
LH: loop header
LB: loop body
LE: loop exit
PB: predicated region body
PF: predicated region fallthrough
CT: control target
= control target key end

     0   :  { %v1579_v0 = vmov 0.0   ;;  %vm1580_vm0 = vmmov 0   ;;  %vm96_vm1 = vcmask 130048   ;;  %vm258_vm2 = vcmask 261120   ;;  %s1921_s1 = inlined_call_operand.vmem [shape: bf16[16,128], index: 1, kind: input, shape index: {}]   ;;  %s1922_s0 = inlined_call_operand.vmem [shape: bf16[16,16], index: 0, kind: input, shape index: {}]   ;;  %s1923_s2 = inlined_call_operand.vmem [shape: bf16[128,32], index: 2, kind: input, shape index: {}]   ;;  %s1924_s4 = inlined_call_operand.vmem [shape: bf16[32,32], index: 4, kind: input, shape index: {}]   ;;  %s1925_s3 = inlined_call_operand.vmem [shape: f32[1,32], index: 3, kind: input, shape index: {}]   ;;  %s1926_s8 = inlined_call_operand.vmem [shape: bf16[4,32,32], index: 8, kind: input, shape index: {}]   ;;  %s1927_s5 = inlined_call_operand.vmem [shape: f32[1,32], index: 5, kind: input, shape index: {}]   ;;  %s1928_s6 = inlined_call_operand.vmem [shape: f32[1,32], index: 6, kind: input, shape index: {}]   ;;  %s1929_s7 = inlined_call_operand.vmem [shape: f32[1,32], index: 7, kind: input, shape index: {}]   ;;  %s1930_s10 = inlined_call_operand.vmem [shape: bf16[4,32,32], index: 10, kind: input, shape index: {}]   ;;  %s1931_s9 = inlined_call_operand.vmem [shape: f32[4,1,32], index: 9, kind: input, shape index: {}]   ;;  %s1932_s11 = inlined_call_operand.vmem [shape: f32[4,1,32], index: 11, kind: input, shape index: {}]   ;;  %s1933_s12 = inlined_call_operand.vmem [shape: f32[4,1,32], index: 12, kind: input, shape index: {}]   ;;  %s1934_s13 = inlined_call_operand.vmem [shape: f32[4,1,32], index: 13, kind: input, shape index: {}]   ;;  %s1935_s15 = inlined_call_operand.vmem [shape: bf16[32,128], index: 15, kind: input, shape index: {}]   ;;  %s1936_s14 = inlined_call_operand.vmem [shape: bf16[2,16], index: 14, kind: input, shape index: {}]   ;;  %s1937_s16 = inlined_call_operand.vmem [shape: f32[1,128], index: 16, kind: input, shape index: {}]   ;;  %s1938_s17 = inlined_call_operand.vmem [shape: f32[2,128], index: 17, kind: output, shape index: {}]  }
   0x1   :  { %1939 = sst [smem:[#allocation2_spill]] %s1921_s1  ;;  %1411 = vmatprep.subr.bf16.mxu0 %v1579_v0  ;;  %1413 = vmatprep.mubr.msk.bf16.mxu0 %vm1580_vm0, %v1579_v0  ;;  %v1551_v3 = vld [vmem:[%s1923_s2] sm:$0xff]   ;;  %v1552_v4 = vld [vmem:[%s1923_s2 + $0x8] sm:$0xff]   ;;  %v1553_v5 = vld [vmem:[%s1923_s2 + $0x10] sm:$0xff]  }
   0x2   :  { %1940 = sst [smem:[#allocation3_spill]] %s1922_s0  ;;  %s1941_s26 = sld [smem:[#allocation2_spill]]  ;;  %1417 = vmatprep.subr.bf16.mxu1 %v1579_v0  ;;  %1433 = vmatprep.mubr.msk.bf16.mxu1 %vm1580_vm0, %v1579_v0  ;;  %v1554_v6 = vld [vmem:[%s1923_s2 + $0x18] sm:$0xff]   ;;  %v1555_v7 = vld [vmem:[%s1923_s2 + $0x20] sm:$0xff]   ;;  %v1556_v8 = vld [vmem:[%s1923_s2 + $0x28] sm:$0xff]  }
   0x3   :  { %s1942_s29 = sld [smem:[#allocation3_spill]]  ;;  %1418 = vmatpush3.bf16.msra.mxu1 %v1551_v3  ;;  %v1557_v9 = vld [vmem:[%s1923_s2 + $0x30] sm:$0xff]   ;;  %v1558_v10 = vld [vmem:[%s1923_s2 + $0x38] sm:$0xff]   ;;  %v1559_v16 = vld [vmem:[%s1924_s4] sm:$0xff]  }
   0x4   :  { %1419 = vmatprep.subr.bf16.mxu1 %v1579_v0  ;;  %v1560_v17 = vld [vmem:[%s1924_s4 + $0x8] sm:$0xff]   ;;  %v1260_v18 = vld [vmem:[%s1925_s3] ss:$0 sm:$0xff]  ;;  %v1565_v63 = vld [vmem:[%s1926_s8 + $0x10] sm:$0xff]  }
   0x5   :  { %v1269_v28 = vld [vmem:[%s1927_s5] ss:$0 sm:$0xff]  ;;  %v1562_v45 = vld [vmem:[%s1926_s8 + $0x8] sm:$0xff]  }
   0x6   :  { %v1273_v32 = vld [vmem:[%s1928_s6] ss:$0 sm:$0xff]  ;;  %v1564_v52 = vld [vmem:[%s1930_s10 + $0x8] sm:$0xff]  }
   0x7   :  { %1420 = vmatpush3.bf16.msra.mxu1 %v1552_v4  ;;  %v1274_v39 = vld [vmem:[%s1929_s7] ss:$0 sm:$0xff] }
   0x8   :  { %v1549_v1 = vld [vmem:[%s1941_s26] sm:$0xff]   ;;  %1421 = vmatprep.subr.bf16.mxu1 %v1579_v0 }
   0x9   :  { %v1680_v2 = vld [vmem:[%s1942_s29] sm:$0xff]   ;;  %1412 = vmatpush3.bf16.msra.mxu0 %v1549_v1 }
   0xa   :  { %1437 = vmatprep.subr.bf16.mxu0 %v1579_v0  ;;  %v1561_v44 = vld [vmem:[%s1926_s8] sm:$0xff]  }
   0xb   :  { %1422 = vmatpush3.bf16.msra.mxu1 %v1553_v5  ;;  %v1563_v51 = vld [vmem:[%s1930_s10] sm:$0xff]  }
   0xc   :  { %1414 = vmatmul.mubr.msk.bf16.vlgmr.msra.gmra.mrb[0].mxu0 %vm96_vm1, %v1680_v2  ;;  %1423 = vmatprep.subr.bf16.mxu1 %v1579_v0  ;;  %v1276_v53 = vld [vmem:[%s1931_s9] ss:$0 sm:$0xff] }
   0xd   :  { %1441 = vmatprep.mubr.msk.bf16.mxu0 %vm1580_vm0, %v1579_v0  ;;  %1438 = vmatpush3.bf16.msra.mxu0 %v1559_v16  ;;  %v1280_v1 = vld [vmem:[%s1932_s11] ss:$0 sm:$0xff] }
   0xe   :  { %1439 = vmatprep.subr.bf16.mxu0 %v1579_v0 }
   0xf   :  { %1424 = vmatpush3.bf16.msra.mxu1 %v1554_v6  ;;  %v1284_v6 = vld [vmem:[%s1933_s12] ss:$0 sm:$0xff] }
  0x10   :  { %1425 = vmatprep.subr.bf16.mxu1 %v1579_v0 }
  0x11   :  { %1440 = vmatpush3.bf16.msra.mxu0 %v1560_v17 }
  0x12   :  { %1445 = vmatprep.subr.bf16.mxu0 %v1579_v0 }
  0x13   :  { %1426 = vmatpush3.bf16.msra.mxu1 %v1555_v7 }
  0x14   :  { %1427 = vmatprep.subr.bf16.mxu1 %v1579_v0 }
  0x17   :  { %1428 = vmatpush3.bf16.msra.mxu1 %v1556_v8 }
  0x18   :  { %1429 = vmatprep.subr.bf16.mxu1 %v1579_v0 }
  0x1b   :  { %1430 = vmatpush3.bf16.msra.mxu1 %v1557_v9 }
  0x1c   :  { %1431 = vmatprep.subr.bf16.mxu1 %v1579_v0 }
  0x1f   :  { %1432 = vmatpush3.bf16.msra.mxu1 %v1558_v10 }
  0x20   :  { %1467 = vmatprep.subr.bf16.mxu1 %v1579_v0 }
  0xdf   :  { %v134_v11 = vpop.f32.mrb[0].mxu0 }
  0xe0   :  { %v1415_v12 = vpop.f32.mrb[1].mxu0 }
  0xe1   :  { %v137_v13 = vpop.f32.mrb[2].mxu0 }
  0xe2   :  { %v141_v14 = vpack.c.bf16 %v137_v13, %v134_v11  ;;  %v1416_v15 = vpop.f32.mrb[3].mxu0  ;;  %v1285_v13 = vld [vmem:[%s1934_s13] ss:$0 sm:$0xff] }
  0xe4   :  { %1434 = vmatmul.mubr.bf16.vlgmr.msra.gmra.mrb[0].mxu1 %v141_v14 }
  0xe5   :  { %1469 = vmatprep.mubr.msk.bf16.mxu1 %vm1580_vm0, %v1579_v0 }
 0x1b7   :  { %v230_v19 = vpop.f32.mrb[0].mxu1 }
 0x1b8   :  { %v231_v20 = vadd.f32 %v1260_v18, %v230_v19  ;;  %v1435_v21 = vpop.f32.mrb[1].mxu1 }
 0x1b9   :  { %v233_v22 = vpop.f32.mrb[2].mxu1 }
 0x1ba   :  { %v234_v23 = vadd.f32 %v1260_v18, %v233_v22  ;;  %v1436_v24 = vpop.f32.mrb[3].mxu1  ;;  %v237_v25 = vmax.f32 %v231_v20, 0.0  ;;  %v1566_v18 = vld [vmem:[%s1926_s8 + $0x18] sm:$0xff]  }
 0x1bb   :  { %v1567_v24 = vld [vmem:[%s1930_s10 + $0x10] sm:$0xff]  }
 0x1bc   :  { %v238_v26 = vmax.f32 %v234_v23, 0.0 }
 0x1be   :  { %v239_v27 = vpack.c.bf16 %v238_v26, %v237_v25  ;;  %v1568_v25 = vld [vmem:[%s1930_s10 + $0x18] sm:$0xff]   ;;  %v1299_v26 = vld [vmem:[%s1931_s9 + $0x1] ss:$0 sm:$0xff] }
 0x1c0   :  { %1442 = vmatmul.mubr.msk.bf16.vlgmr.msra.gmra.mrb[4].mxu0 %vm258_vm2, %v239_v27 }
 0x1c1   :  { %1447 = vmatprep.mubr.msk.bf16.mxu0 %vm1580_vm0, %v1579_v0 }
 0x293   :  { %v296_v29 = vpop.f32.mrb[4].mxu0 }
 0x294   :  { %v297_v30 = vadd.f32 %v1269_v28, %v296_v29  ;;  %v1443_v31 = vpop.f32.mrb[5].mxu0 }
 0x295   :  { %v299_v33 = vpop.f32.mrb[6].mxu0 }
 0x296   :  { %v303_v34 = vmax.f32 %v297_v30, 0.0  ;;  %v300_v35 = vadd.f32 %v1269_v28, %v299_v33  ;;  %v1444_v36 = vpop.f32.mrb[7].mxu0 }
 0x297   :  { %v1569_v36 = vld [vmem:[%s1926_s8 + $0x20] sm:$0xff]  }
 0x298   :  { %v311_v37 = vmul.f32 %v1273_v32, %v303_v34  ;;  %v304_v38 = vmax.f32 %v300_v35, 0.0 }
 0x29a   :  { %v312_v40 = vmul.f32 %v1273_v32, %v304_v38  ;;  %v319_v41 = vadd.f32 %v1274_v39, %v311_v37  ;;  %v1303_v37 = vld [vmem:[%s1932_s11 + $0x1] ss:$0 sm:$0xff] }
 0x29c   :  { %v320_v42 = vadd.f32 %v1274_v39, %v312_v40 }
 0x29e   :  { %v321_v43 = vpack.c.bf16 %v320_v42, %v319_v41  ;;  %v1307_v41 = vld [vmem:[%s1933_s12 + $0x1] ss:$0 sm:$0xff] }
 0x2a0   :  { %1446 = vmatpush3.bf16.msra.mxu0 %v321_v43 }
 0x2a1   :  { %1451 = vmatprep.subr.bf16.mxu0 %v1579_v0 }
 0x2a3   :  { %1448 = vmatmul.mubr.msk.bf16.vlgmr.msra.gmra.mrb[8].mxu0 %vm96_vm1, %v1680_v2 }
 0x2a4   :  { %1452 = vmatpush3.bf16.msra.mxu0 %v1561_v44  ;;  %1455 = vmatprep.mubr.msk.bf16.mxu0 %vm1580_vm0, %v1579_v0 }
 0x2a5   :  { %1453 = vmatprep.subr.bf16.mxu0 %v1579_v0 }
 0x2a8   :  { %1454 = vmatpush3.bf16.msra.mxu0 %v1562_v45 }
 0x2a9   :  { %1459 = vmatprep.subr.bf16.mxu0 %v1579_v0 }
 0x376   :  { %v368_v46 = vpop.f32.mrb[8].mxu0 }
 0x377   :  { %v1449_v47 = vpop.f32.mrb[9].mxu0 }
 0x378   :  { %v371_v48 = vpop.f32.mrb[10].mxu0 }
 0x379   :  { %v375_v49 = vpack.c.bf16 %v371_v48, %v368_v46  ;;  %v1450_v50 = vpop.f32.mrb[11].mxu0  ;;  %v1308_v48 = vld [vmem:[%s1934_s13 + $0x1] ss:$0 sm:$0xff] }
 0x37b   :  { %1456 = vmatmul.mubr.msk.bf16.vlgmr.msra.gmra.mrb[12].mxu0 %vm258_vm2, %v375_v49 }
 0x37c   :  { %1463 = vmatprep.mubr.msk.bf16.mxu0 %vm1580_vm0, %v1579_v0  ;;  %1460 = vmatpush3.bf16.msra.mxu0 %v1563_v51 }
 0x37d   :  { %1461 = vmatprep.subr.bf16.mxu0 %v1579_v0 }
 0x380   :  { %1462 = vmatpush3.bf16.msra.mxu0 %v1564_v52 }
 0x381   :  { %1473 = vmatprep.subr.bf16.mxu0 %v1579_v0 }
 0x44e   :  { %v431_v54 = vpop.f32.mrb[12].mxu0 }
 0x44f   :  { %v432_v55 = vadd.f32 %v1276_v53, %v431_v54  ;;  %v1457_v56 = vpop.f32.mrb[13].mxu0 }
 0x450   :  { %v434_v57 = vpop.f32.mrb[14].mxu0 }
 0x451   :  { %v435_v58 = vadd.f32 %v1276_v53, %v434_v57  ;;  %v1458_v59 = vpop.f32.mrb[15].mxu0  ;;  %v438_v60 = vmax.f32 %v432_v55, 0.0  ;;  %v1570_v53 = vld [vmem:[%s1926_s8 + $0x28] sm:$0xff]  }
 0x452   :  { %v1571_v59 = vld [vmem:[%s1930_s10 + $0x20] sm:$0xff]  }
 0x453   :  { %v439_v61 = vmax.f32 %v435_v58, 0.0 }
 0x455   :  { %v440_v62 = vpack.c.bf16 %v439_v61, %v438_v60  ;;  %v1572_v60 = vld [vmem:[%s1930_s10 + $0x28] sm:$0xff]   ;;  %v1322_v61 = vld [vmem:[%s1931_s9 + $0x2] ss:$0 sm:$0xff] }
 0x457   :  { %1464 = vmatmul.mubr.msk.bf16.vlgmr.msra.gmra.mrb[16].mxu0 %vm258_vm2, %v440_v62 }
 0x458   :  { %1477 = vmatprep.mubr.msk.bf16.mxu0 %vm1580_vm0, %v1579_v0  ;;  %1474 = vmatpush3.bf16.msra.mxu0 %v1565_v63 }
 0x459   :  { %1475 = vmatprep.subr.bf16.mxu0 %v1579_v0 }
 0x45c   :  { %1476 = vmatpush3.bf16.msra.mxu0 %v1566_v18 }
 0x45d   :  { %1489 = vmatprep.subr.bf16.mxu0 %v1579_v0 }
 0x52a   :  { %v496_v3 = vpop.f32.mrb[16].mxu0 }
 0x52b   :  { %v497_v4 = vadd.f32 %v1280_v1, %v496_v3  ;;  %v1465_v5 = vpop.f32.mrb[17].mxu0 }
 0x52c   :  { %v499_v7 = vpop.f32.mrb[18].mxu0 }
 0x52d   :  { %v503_v8 = vmax.f32 %v497_v4, 0.0  ;;  %v500_v9 = vadd.f32 %v1280_v1, %v499_v7  ;;  %v1466_v10 = vpop.f32.mrb[19].mxu0 }
 0x52e   :  { %v1326_v10 = vld [vmem:[%s1932_s11 + $0x2] ss:$0 sm:$0xff] }
 0x52f   :  { %v511_v11 = vmul.f32 %v1284_v6, %v503_v8  ;;  %v504_v12 = vmax.f32 %v500_v9, 0.0  ;;  %v1573_v9 = vld [vmem:[%s1926_s8 + $0x30] sm:$0xff]  }
 0x531   :  { %v512_v14 = vmul.f32 %v1284_v6, %v504_v12  ;;  %v519_v15 = vadd.f32 %v1285_v13, %v511_v11 }
 0x533   :  { %v520_v16 = vadd.f32 %v1285_v13, %v512_v14  ;;  %v1330_v14 = vld [vmem:[%s1933_s12 + $0x2] ss:$0 sm:$0xff] }
 0x535   :  { %v521_v17 = vpack.c.bf16 %v520_v16, %v519_v15 }
 0x537   :  { %1468 = vmatpush3.bf16.msra.mxu1 %v521_v17 }
 0x538   :  { %1481 = vmatprep.subr.bf16.mxu1 %v1579_v0 }
 0x53a   :  { %1470 = vmatmul.mubr.msk.bf16.vlgmr.msra.gmra.mrb[4].mxu1 %vm96_vm1, %v1680_v2 }
 0x53b   :  { %1485 = vmatprep.mubr.msk.bf16.mxu1 %vm1580_vm0, %v1579_v0  ;;  %1482 = vmatpush3.bf16.msra.mxu1 %v1567_v24 }
 0x53c   :  { %1483 = vmatprep.subr.bf16.mxu1 %v1579_v0 }
 0x53f   :  { %1484 = vmatpush3.bf16.msra.mxu1 %v1568_v25 }
 0x540   :  { %1495 = vmatprep.subr.bf16.mxu1 %v1579_v0 }
 0x60d   :  { %v574_v19 = vpop.f32.mrb[4].mxu1 }
 0x60e   :  { %v1471_v20 = vpop.f32.mrb[5].mxu1 }
 0x60f   :  { %v577_v21 = vpop.f32.mrb[6].mxu1 }
 0x610   :  { %v581_v22 = vpack.c.bf16 %v577_v21, %v574_v19  ;;  %v1472_v23 = vpop.f32.mrb[7].mxu1  ;;  %v1331_v21 = vld [vmem:[%s1934_s13 + $0x2] ss:$0 sm:$0xff] }
 0x612   :  { %1478 = vmatmul.mubr.msk.bf16.vlgmr.msra.gmra.mrb[20].mxu0 %vm258_vm2, %v581_v22 }
 0x613   :  { %1491 = vmatprep.mubr.msk.bf16.mxu0 %vm1580_vm0, %v1579_v0 }
 0x6e5   :  { %v637_v27 = vpop.f32.mrb[20].mxu0 }
 0x6e6   :  { %v638_v28 = vadd.f32 %v1299_v26, %v637_v27  ;;  %v1479_v29 = vpop.f32.mrb[21].mxu0 }
 0x6e7   :  { %v640_v30 = vpop.f32.mrb[22].mxu0 }
 0x6e8   :  { %v641_v31 = vadd.f32 %v1299_v26, %v640_v30  ;;  %v1480_v32 = vpop.f32.mrb[23].mxu0  ;;  %v644_v33 = vmax.f32 %v638_v28, 0.0  ;;  %v1574_v26 = vld [vmem:[%s1926_s8 + $0x38] sm:$0xff]  }
 0x6e9   :  { %v1576_v32 = vld [vmem:[%s1930_s10 + $0x38] sm:$0xff]  }
 0x6ea   :  { %v645_v34 = vmax.f32 %v641_v31, 0.0 }
 0x6ec   :  { %v646_v35 = vpack.c.bf16 %v645_v34, %v644_v33  ;;  %v1345_v33 = vld [vmem:[%s1931_s9 + $0x3] ss:$0 sm:$0xff] }
 0x6ee   :  { %1486 = vmatmul.mubr.msk.bf16.vlgmr.msra.gmra.mrb[8].mxu1 %vm258_vm2, %v646_v35 }
 0x6ef   :  { %1499 = vmatprep.mubr.msk.bf16.mxu1 %vm1580_vm0, %v1579_v0  ;;  %1496 = vmatpush3.bf16.msra.mxu1 %v1569_v36 }
 0x6f0   :  { %1497 = vmatprep.subr.bf16.mxu1 %v1579_v0 }
 0x6f3   :  { %1498 = vmatpush3.bf16.msra.mxu1 %v1570_v53 }
 0x6f4   :  { %1511 = vmatprep.subr.bf16.mxu1 %v1579_v0 }
 0x7c1   :  { %v702_v38 = vpop.f32.mrb[8].mxu1 }
 0x7c2   :  { %v703_v39 = vadd.f32 %v1303_v37, %v702_v38  ;;  %v1487_v40 = vpop.f32.mrb[9].mxu1 }
 0x7c3   :  { %v705_v42 = vpop.f32.mrb[10].mxu1 }
 0x7c4   :  { %v709_v43 = vmax.f32 %v703_v39, 0.0  ;;  %v706_v44 = vadd.f32 %v1303_v37, %v705_v42  ;;  %v1488_v45 = vpop.f32.mrb[11].mxu1 }
 0x7c6   :  { %v717_v46 = vmul.f32 %v1307_v41, %v709_v43  ;;  %v710_v47 = vmax.f32 %v706_v44, 0.0  ;;  %v1577_v43 = vld [vmem:[%s1935_s15] sm:$0xff]  }
 0x7c7   :  { %v1349_v44 = vld [vmem:[%s1932_s11 + $0x3] ss:$0 sm:$0xff] }
 0x7c8   :  { %v718_v49 = vmul.f32 %v1307_v41, %v710_v47  ;;  %v725_v50 = vadd.f32 %v1308_v48, %v717_v46 }
 0x7ca   :  { %v726_v51 = vadd.f32 %v1308_v48, %v718_v49  ;;  %v1353_v48 = vld [vmem:[%s1933_s12 + $0x3] ss:$0 sm:$0xff] }
 0x7cc   :  { %v727_v52 = vpack.c.bf16 %v726_v51, %v725_v50 }
 0x7ce   :  { %1490 = vmatpush3.bf16.msra.mxu0 %v727_v52 }
 0x7cf   :  { %1503 = vmatprep.subr.bf16.mxu0 %v1579_v0 }
 0x7d1   :  { %1492 = vmatmul.mubr.msk.bf16.vlgmr.msra.gmra.mrb[24].mxu0 %vm96_vm1, %v1680_v2 }
 0x7d2   :  { %1507 = vmatprep.mubr.msk.bf16.mxu0 %vm1580_vm0, %v1579_v0  ;;  %1504 = vmatpush3.bf16.msra.mxu0 %v1571_v59  ;;  %v1139_v59 = vld [vmem:[%s1936_s14] sm:$0x1] }
 0x7d3   :  { %1505 = vmatprep.subr.bf16.mxu0 %v1579_v0 }
 0x7d6   :  { %1506 = vmatpush3.bf16.msra.mxu0 %v1572_v60  ;;  %v1578_v60 = vld [vmem:[%s1935_s15 + $0x8] sm:$0xff]  }
 0x7d7   :  { %1517 = vmatprep.subr.bf16.mxu0 %v1579_v0 }
 0x8a4   :  { %v780_v54 = vpop.f32.mrb[24].mxu0 }
 0x8a5   :  { %v1493_v55 = vpop.f32.mrb[25].mxu0 }
 0x8a6   :  { %v783_v56 = vpop.f32.mrb[26].mxu0 }
 0x8a7   :  { %v787_v57 = vpack.c.bf16 %v783_v56, %v780_v54  ;;  %v1494_v58 = vpop.f32.mrb[27].mxu0 }
 0x8a9   :  { %1500 = vmatmul.mubr.msk.bf16.vlgmr.msra.gmra.mrb[12].mxu1 %vm258_vm2, %v787_v57 }
 0x8aa   :  { %1513 = vmatprep.mubr.msk.bf16.mxu1 %vm1580_vm0, %v1579_v0 }
 0x97c   :  { %v843_v62 = vpop.f32.mrb[12].mxu1 }
 0x97d   :  { %v844_v63 = vadd.f32 %v1322_v61, %v843_v62  ;;  %v1501_v1 = vpop.f32.mrb[13].mxu1 }
 0x97e   :  { %v846_v3 = vpop.f32.mrb[14].mxu1 }
 0x97f   :  { %v847_v4 = vadd.f32 %v1322_v61, %v846_v3  ;;  %v1502_v5 = vpop.f32.mrb[15].mxu1  ;;  %v850_v6 = vmax.f32 %v844_v63, 0.0 }
 0x981   :  { %v851_v7 = vmax.f32 %v847_v4, 0.0  ;;  %v1356_v4 = vld [vmem:[%s1937_s16] ss:$0 sm:$0xff] }
 0x983   :  { %v852_v8 = vpack.c.bf16 %v851_v7, %v850_v6 }
 0x985   :  { %1508 = vmatmul.mubr.msk.bf16.vlgmr.msra.gmra.mrb[28].mxu0 %vm258_vm2, %v852_v8 }
 0x986   :  { %1521 = vmatprep.mubr.msk.bf16.mxu0 %vm1580_vm0, %v1579_v0  ;;  %1518 = vmatpush3.bf16.msra.mxu0 %v1573_v9 }
 0x987   :  { %1519 = vmatprep.subr.bf16.mxu0 %v1579_v0 }
 0x98a   :  { %1520 = vmatpush3.bf16.msra.mxu0 %v1574_v26 }
 0x98b   :  { %1533 = vmatprep.subr.bf16.mxu0 %v1579_v0 }
 0xa58   :  { %v908_v11 = vpop.f32.mrb[28].mxu0 }
 0xa59   :  { %v909_v12 = vadd.f32 %v1326_v10, %v908_v11  ;;  %v1509_v13 = vpop.f32.mrb[29].mxu0 }
 0xa5a   :  { %v911_v15 = vpop.f32.mrb[30].mxu0 }
 0xa5b   :  { %v915_v16 = vmax.f32 %v909_v12, 0.0  ;;  %v912_v17 = vadd.f32 %v1326_v10, %v911_v15  ;;  %v1510_v18 = vpop.f32.mrb[31].mxu0 }
 0xa5d   :  { %v923_v19 = vmul.f32 %v1330_v14, %v915_v16  ;;  %v916_v20 = vmax.f32 %v912_v17, 0.0 }
 0xa5f   :  { %v924_v22 = vmul.f32 %v1330_v14, %v916_v20  ;;  %v931_v23 = vadd.f32 %v1331_v21, %v923_v19 }
 0xa61   :  { %v932_v24 = vadd.f32 %v1331_v21, %v924_v22 }
 0xa63   :  { %v933_v25 = vpack.c.bf16 %v932_v24, %v931_v23 }
 0xa65   :  { %1512 = vmatpush3.bf16.msra.mxu1 %v933_v25 }
 0xa66   :  { %1525 = vmatprep.subr.bf16.mxu1 %v1579_v0 }
 0xa68   :  { %1514 = vmatmul.mubr.msk.bf16.vlgmr.msra.gmra.mrb[16].mxu1 %vm96_vm1, %v1680_v2  ;;  %v1575_v2 = vld [vmem:[%s1930_s10 + $0x30] sm:$0xff]  }
 0xa69   :  { %1529 = vmatprep.mubr.msk.bf16.mxu1 %vm1580_vm0, %v1579_v0  ;;  %1526 = vmatpush3.bf16.msra.mxu1 %v1575_v2 }
 0xa6a   :  { %1527 = vmatprep.subr.bf16.mxu1 %v1579_v0 }
 0xa6d   :  { %1528 = vmatpush3.bf16.msra.mxu1 %v1576_v32 }
 0xa6e   :  { %1539 = vmatprep.subr.bf16.mxu1 %v1579_v0 }
 0xb3b   :  { %v986_v27 = vpop.f32.mrb[16].mxu1 }
 0xb3c   :  { %v1515_v28 = vpop.f32.mrb[17].mxu1 }
 0xb3d   :  { %v989_v29 = vpop.f32.mrb[18].mxu1 }
 0xb3e   :  { %v993_v30 = vpack.c.bf16 %v989_v29, %v986_v27  ;;  %v1516_v31 = vpop.f32.mrb[19].mxu1 }
 0xb40   :  { %1522 = vmatmul.mubr.msk.bf16.vlgmr.msra.gmra.mrb[32].mxu0 %vm258_vm2, %v993_v30 }
 0xb41   :  { %1535 = vmatprep.mubr.msk.bf16.mxu0 %vm1580_vm0, %v1579_v0 }
 0xc13   :  { %v1049_v34 = vpop.f32.mrb[32].mxu0 }
 0xc14   :  { %v1050_v35 = vadd.f32 %v1345_v33, %v1049_v34  ;;  %v1523_v36 = vpop.f32.mrb[33].mxu0 }
 0xc15   :  { %v1052_v37 = vpop.f32.mrb[34].mxu0 }
 0xc16   :  { %v1053_v38 = vadd.f32 %v1345_v33, %v1052_v37  ;;  %v1524_v39 = vpop.f32.mrb[35].mxu0  ;;  %v1056_v40 = vmax.f32 %v1050_v35, 0.0 }
 0xc18   :  { %v1057_v41 = vmax.f32 %v1053_v38, 0.0 }
 0xc1a   :  { %v1058_v42 = vpack.c.bf16 %v1057_v41, %v1056_v40 }
 0xc1c   :  { %1530 = vmatmul.mubr.msk.bf16.vlgmr.msra.gmra.mrb[20].mxu1 %vm258_vm2, %v1058_v42 }
 0xc1d   :  { %1543 = vmatprep.mubr.msk.bf16.mxu1 %vm1580_vm0, %v1579_v0  ;;  %1540 = vmatpush3.bf16.msra.mxu1 %v1577_v43 }
 0xc1e   :  { %1541 = vmatprep.subr.bf16.mxu1 %v1579_v0  ;;  %v1354_v0 = vld [vmem:[%s1934_s13 + $0x3] ss:$0 sm:$0xff] }
 0xc21   :  { %1542 = vmatpush3.bf16.msra.mxu1 %v1578_v60 }
 0xcef   :  { %v1114_v45 = vpop.f32.mrb[20].mxu1 }
 0xcf0   :  { %v1115_v46 = vadd.f32 %v1349_v44, %v1114_v45  ;;  %v1531_v47 = vpop.f32.mrb[21].mxu1 }
 0xcf1   :  { %v1117_v49 = vpop.f32.mrb[22].mxu1 }
 0xcf2   :  { %v1121_v50 = vmax.f32 %v1115_v46, 0.0  ;;  %v1118_v51 = vadd.f32 %v1349_v44, %v1117_v49  ;;  %v1532_v52 = vpop.f32.mrb[23].mxu1 }
 0xcf4   :  { %v1129_v53 = vmul.f32 %v1353_v48, %v1121_v50  ;;  %v1122_v54 = vmax.f32 %v1118_v51, 0.0 }
 0xcf6   :  { %v1130_v55 = vmul.f32 %v1353_v48, %v1122_v54  ;;  %v1137_v56 = vadd.f32 %v1354_v0, %v1129_v53 }
 0xcf8   :  { %v1138_v57 = vadd.f32 %v1354_v0, %v1130_v55 }
 0xcfa   :  { %v1140_v58 = vpack.c.bf16 %v1138_v57, %v1137_v56 }
 0xcfc   :  { %1534 = vmatpush3.bf16.msra.mxu0 %v1140_v58 }
 0xcff   :  { %1536 = vmatmul.mubr.msk.bf16.vlgmr.msra.gmra.mrb[36].mxu0 %vm96_vm1, %v1139_v59 }
 0xdd2   :  { %v1178_v61 = vpop.f32.mrb[36].mxu0 }
 0xdd3   :  { %v1184_v62 = vpack.c.bf16 %v1178_v61, %v1178_v61  ;;  %v1537_v63 = vpop.f32.mrb[37].mxu0 }
 0xdd4   :  { %v1181_v1 = vpop.f32.mrb[38].mxu0 }
 0xdd5   :  { %v1538_v3 = vpop.f32.mrb[39].mxu0  ;;  %1544 = vmatmul.mubr.msk.bf16.vlgmr.msra.gmra.mrb[24].mxu1 %vm258_vm2, %v1184_v62 }
 0xea8   :  { %v1245_v5 = vpop.f32.mrb[24].mxu1 }
 0xea9   :  { %v1246_v6 = vadd.f32 %v1356_v4, %v1245_v5  ;;  %v1545_v7 = vpop.f32.mrb[25].mxu1 }
 0xeaa   :  { %v1248_v8 = vpop.f32.mrb[26].mxu1 }
 0xeab   :  { %v1251_v9 = vmax.f32 %v1246_v6, 0.0  ;;  %v1546_v10 = vpop.f32.mrb[27].mxu1 }
 0xead   :  { %1252 = vst [vmem:[%s1938_s17] sm:$0x3] %v1251_v9 }

// kernel: gin_convnet_forward.3
= control target key start
LH: loop header
LB: loop body
LE: loop exit
PB: predicated region body
PF: predicated region fallthrough
CT: control target
= control target key end

     0   :  { %vm1350_vm0 = vcmask 1043456   ;;  %vm1301_vm1 = vcmask 850944   ;;  %vm2026_vm2 = vcmask 261120   ;;  %s13560_s16 = smov 126   ;;  %s13562_s17 = smov 124   ;;  %vm13567_vm3 = vmmov 0   ;;  %s17771_s0 = inlined_call_operand.vmem [shape: bf16[2,1000,32], index: 0, kind: input, shape index: {}]   ;;  %s17772_s2 = inlined_call_operand.vmem [shape: bf16[256,1000], index: 2, kind: input, shape index: {}]   ;;  %s17773_s3 = inlined_call_operand.vmem [shape: bf16[32,128], index: 3, kind: input, shape index: {}]   ;;  %s17774_s4 = inlined_call_operand.vmem [shape: bf16[32,128,128], index: 4, kind: input, shape index: {}]   ;;  %s17775_s7 = inlined_call_operand.vmem [shape: bf16[128,1024], index: 7, kind: input, shape index: {}]   ;;  %s17776_s5 = inlined_call_operand.vmem [shape: f32[1,128], index: 5, kind: input, shape index: {}]   ;;  %s17777_s6 = inlined_call_operand.vmem [shape: bf16[128,1024], index: 6, kind: input, shape index: {}]   ;;  %s17778_s1 = inlined_call_operand.vmem [shape: f32[2,128], index: 1, kind: input, shape index: {}]   ;;  %s17779_s9 = inlined_call_operand.vmem [shape: bf16[1024,256], index: 9, kind: input, shape index: {}]   ;;  %s17780_s8 = inlined_call_operand.vmem [shape: f32[1,1024], index: 8, kind: input, shape index: {}]   ;;  %s17781_s11 = inlined_call_operand.vmem [shape: bf16[256,128], index: 11, kind: input, shape index: {}]   ;;  %s17782_s10 = inlined_call_operand.vmem [shape: f32[1,256], index: 10, kind: input, shape index: {}]   ;;  %s17783_s12 = inlined_call_operand.vmem [shape: f32[1,128], index: 12, kind: input, shape index: {}]   ;;  %s17784_s13 = inlined_call_operand.vmem [shape: f32[2,128], index: 13, kind: output, shape index: {}]  }
   0x1   :  { %v12966_v0 = vld [vmem:[%s17771_s0 + $0x40] sm:$0xff]   ;;  %v12970_v4 = vld [vmem:[%s17771_s0 + $0x48] sm:$0xff]   ;;  %v12974_v8 = vld [vmem:[%s17771_s0 + $0x50] sm:$0xff]   ;;  %s13563_s18 = smov 123   ;;  %s13564_s19 = smov 122   ;;  %vm3826_vm4 = vcmask 1041409  }
   0x2   :  { %v12967_v1 = vld [vmem:[%s17771_s0 + $0xc0] sm:$0xff]   ;;  %11196 = vmatprep.subr.bf16.mxu0 %v12966_v0  ;;  %v12971_v5 = vld [vmem:[%s17771_s0 + $0xc8] sm:$0xff]   ;;  %v12975_v9 = vld [vmem:[%s17771_s0 + $0xd0] sm:$0xff]   ;;  %s13565_s20 = smov 121  }
   0x3   :  { %v12968_v2 = vld [vmem:[%s17771_s0] sm:$0xff]   ;;  %11308 = vmatprep.subr.bf16.mxu1 %v12967_v1  ;;  %v12972_v6 = vld [vmem:[%s17771_s0 + $0x8] sm:$0xff]   ;;  %v12976_v10 = vld [vmem:[%s17771_s0 + $0x10] sm:$0xff]  }
   0x4   :  { %v12969_v3 = vld [vmem:[%s17771_s0 + $0x80] sm:$0xff]   ;;  %11197 = vmatpush3.bf16.msra.mxu0 %v12968_v2  ;;  %v12973_v7 = vld [vmem:[%s17771_s0 + $0x88] sm:$0xff]   ;;  %v12977_v11 = vld [vmem:[%s17771_s0 + $0x90] sm:$0xff]  }
   0x5   :  { %11309 = vmatpush3.bf16.msra.mxu1 %v12969_v3  ;;  %11198 = vmatprep.subr.bf16.mxu0 %v12970_v4  ;;  %v12978_v12 = vld [vmem:[%s17771_s0 + $0x58] sm:$0xff]   ;;  %v12982_v16 = vld [vmem:[%s17771_s0 + $0x60] sm:$0xff]   ;;  %v12986_v20 = vld [vmem:[%s17771_s0 + $0x68] sm:$0xff]  }
   0x6   :  { %11310 = vmatprep.subr.bf16.mxu1 %v12971_v5  ;;  %v12979_v13 = vld [vmem:[%s17771_s0 + $0xd8] sm:$0xff]   ;;  %v12983_v17 = vld [vmem:[%s17771_s0 + $0xe0] sm:$0xff]   ;;  %v12987_v21 = vld [vmem:[%s17771_s0 + $0xe8] sm:$0xff]  }
   0x7   :  { %v12980_v14 = vld [vmem:[%s17771_s0 + $0x18] sm:$0xff]   ;;  %v12984_v18 = vld [vmem:[%s17771_s0 + $0x20] sm:$0xff]   ;;  %v12988_v22 = vld [vmem:[%s17771_s0 + $0x28] sm:$0xff]  }
   0x8   :  { %11199 = vmatpush3.bf16.msra.mxu0 %v12972_v6  ;;  %v12981_v15 = vld [vmem:[%s17771_s0 + $0x98] sm:$0xff]   ;;  %v12985_v19 = vld [vmem:[%s17771_s0 + $0xa0] sm:$0xff]   ;;  %v12989_v23 = vld [vmem:[%s17771_s0 + $0xa8] sm:$0xff]  }
   0x9   :  { %11311 = vmatpush3.bf16.msra.mxu1 %v12973_v7  ;;  %11200 = vmatprep.subr.bf16.mxu0 %v12974_v8  ;;  %v12990_v24 = vld [vmem:[%s17771_s0 + $0x70] sm:$0xff]   ;;  %v12994_v28 = vld [vmem:[%s17771_s0 + $0x78] sm:$0xff]   ;;  %v45_v32 = vld [vmem:[%s17772_s2] sm:$0xff] }
   0xa   :  { %11312 = vmatprep.subr.bf16.mxu1 %v12975_v9  ;;  %v12991_v25 = vld [vmem:[%s17771_s0 + $0xf0] sm:$0xff]   ;;  %v12995_v29 = vld [vmem:[%s17771_s0 + $0xf8] sm:$0xff]   ;;  %v49_v33 = vld [vmem:[%s17772_s2 + $0x20] sm:$0xff] }
   0xb   :  { %v12992_v26 = vld [vmem:[%s17771_s0 + $0x30] sm:$0xff]   ;;  %v12996_v30 = vld [vmem:[%s17771_s0 + $0x38] sm:$0xff]   ;;  %v46_v34 = vld [vmem:[%s17772_s2 + $0x8] sm:$0xff]  ;;  %v13743_v35 = vcombine.low %v45_v32, %v49_v33  ;;  %v13745_v36 = vcombine.high %v45_v32, %v49_v33 }
   0xc   :  { %11201 = vmatpush3.bf16.msra.mxu0 %v12976_v10  ;;  %v12993_v27 = vld [vmem:[%s17771_s0 + $0xb0] sm:$0xff]   ;;  %v12997_v31 = vld [vmem:[%s17771_s0 + $0xb8] sm:$0xff]   ;;  %v50_v37 = vld [vmem:[%s17772_s2 + $0x28] sm:$0xff] }
   0xd   :  { %11313 = vmatpush3.bf16.msra.mxu1 %v12977_v11  ;;  %11202 = vmatprep.subr.bf16.mxu0 %v12978_v12  ;;  %v13750_v38 = vcombine.low %v46_v34, %v50_v37  ;;  %v13752_v39 = vcombine.high %v46_v34, %v50_v37  ;;  %v12998_v40 = vld [vmem:[%s17771_s0 + $0x140] sm:$0xff]   ;;  %v54_v45 = vld [vmem:[%s17772_s2 + $0x48] sm:$0xff]  ;;  %v13002_v58 = vld [vmem:[%s17771_s0 + $0x150] sm:$0xff]   ;;  %v17785_v34 = vmov 0  }
   0xe   :  { %11314 = vmatprep.subr.bf16.mxu1 %v12979_v13  ;;  %1386 = vmatprep.mubr.bf16.mxu0 %v13745_v36  ;;  %v12999_v41 = vld [vmem:[%s17771_s0 + $0x100] sm:$0xff]   ;;  %v58_v46 = vld [vmem:[%s17772_s2 + $0x68] sm:$0xff]  ;;  %v13003_v59 = vld [vmem:[%s17771_s0 + $0x110] sm:$0xff]  }
   0xf   :  { %17901 = vst [vmem:[#allocation3_spill] sm:$0xff] %v13750_v38  ;;  %17902 = vst [vmem:[#allocation4_spill] sm:$0xff] %v13752_v39  ;;  %v53_v42 = vld [vmem:[%s17772_s2 + $0x40] sm:$0xff]  ;;  %1547 = vmatprep.mubr.bf16.mxu1 %v13752_v39  ;;  %v13781_v48 = vcombine.high %v54_v45, %v58_v46  ;;  %v62_v50 = vld [vmem:[%s17772_s2 + $0x88] sm:$0xff]  ;;  %v13802_v55 = vcombine.low %v54_v45, %v58_v46 }
  0x10   :  { %11203 = vmatpush3.bf16.msra.mxu0 %v12980_v14  ;;  %v57_v43 = vld [vmem:[%s17772_s2 + $0x60] sm:$0xff]  ;;  %v66_v51 = vld [vmem:[%s17772_s2 + $0xa8] sm:$0xff]  ;;  %v13004_v1 = vld [vmem:[%s17771_s0 + $0x158] sm:$0xff]  }
  0x11   :  { %11315 = vmatpush3.bf16.msra.mxu1 %v12981_v15  ;;  %11204 = vmatprep.subr.bf16.mxu0 %v12982_v16  ;;  %v13769_v44 = vcombine.high %v53_v42, %v57_v43  ;;  %v61_v47 = vld [vmem:[%s17772_s2 + $0x80] sm:$0xff]  ;;  %17903 = vst [vmem:[#allocation5_spill] sm:$0xff] %v13781_v48  ;;  %v13000_v52 = vld [vmem:[%s17771_s0 + $0x148] sm:$0xff]   ;;  %v13800_v54 = vcombine.low %v53_v42, %v57_v43  ;;  %17904 = vst [vmem:[#allocation6_spill] sm:$0xff] %v13802_v55 }
  0x12   :  { %11316 = vmatprep.subr.bf16.mxu1 %v12983_v17  ;;  %v65_v49 = vld [vmem:[%s17772_s2 + $0xa0] sm:$0xff]  ;;  %v13001_v53 = vld [vmem:[%s17771_s0 + $0x108] sm:$0xff]   ;;  %v13806_v57 = vcombine.high %v62_v50, %v66_v51  ;;  %v13835_v2 = vcombine.low %v62_v50, %v66_v51  ;;  %v13005_v4 = vld [vmem:[%s17771_s0 + $0x118] sm:$0xff]  }
  0x13   :  { %v13804_v56 = vcombine.high %v61_v47, %v65_v49  ;;  %v69_v60 = vld [vmem:[%s17772_s2 + $0xc0] sm:$0xff]  ;;  %v70_v62 = vld [vmem:[%s17772_s2 + $0xc8] sm:$0xff]  ;;  %v13830_v0 = vcombine.low %v61_v47, %v65_v49 }
  0x14   :  { %11205 = vmatpush3.bf16.msra.mxu0 %v12984_v18  ;;  %17905 = vst [vmem:[#allocation7_spill] sm:$0xff] %v13806_v57  ;;  %v73_v61 = vld [vmem:[%s17772_s2 + $0xe0] sm:$0xff]  ;;  %v74_v63 = vld [vmem:[%s17772_s2 + $0xe8] sm:$0xff]  ;;  %17906 = vst [vmem:[#allocation8_spill] sm:$0xff] %v13835_v2 }
  0x15   :  { %11317 = vmatpush3.bf16.msra.mxu1 %v12985_v19  ;;  %11206 = vmatprep.subr.bf16.mxu0 %v12986_v20  ;;  %v13837_v3 = vcombine.high %v69_v60, %v73_v61  ;;  %v13842_v5 = vcombine.high %v70_v62, %v74_v63  ;;  %v13006_v6 = vld [vmem:[%s17771_s0 + $0x160] sm:$0xff]   ;;  %v78_v10 = vld [vmem:[%s17772_s2 + $0x108] sm:$0xff]  ;;  %v13866_v12 = vcombine.low %v69_v60, %v73_v61  ;;  %v13010_v20 = vld [vmem:[%s17771_s0 + $0x170] sm:$0xff]  }
  0x16   :  { %11318 = vmatprep.subr.bf16.mxu1 %v12987_v21  ;;  %v13007_v7 = vld [vmem:[%s17771_s0 + $0x120] sm:$0xff]   ;;  %v82_v11 = vld [vmem:[%s17772_s2 + $0x128] sm:$0xff]  ;;  %v13868_v13 = vcombine.low %v70_v62, %v74_v63 }
  0x17   :  { %17907 = vst [vmem:[#allocation9_spill] sm:$0xff] %v13842_v5  ;;  %v77_v8 = vld [vmem:[%s17772_s2 + $0x100] sm:$0xff]  ;;  %v13008_v15 = vld [vmem:[%s17771_s0 + $0x168] sm:$0xff]   ;;  %v13875_v16 = vcombine.high %v78_v10, %v82_v11 }
  0x18   :  { %11207 = vmatpush3.bf16.msra.mxu0 %v12988_v22  ;;  %v81_v9 = vld [vmem:[%s17772_s2 + $0x120] sm:$0xff]  ;;  %17908 = vst [vmem:[#allocation10_spill] sm:$0xff] %v13868_v13  ;;  %v13009_v17 = vld [vmem:[%s17771_s0 + $0x128] sm:$0xff]  }
  0x19   :  { %11319 = vmatpush3.bf16.msra.mxu1 %v12989_v23  ;;  %11208 = vmatprep.subr.bf16.mxu0 %v12990_v24  ;;  %v13870_v14 = vcombine.high %v77_v8, %v81_v9  ;;  %17909 = vst [vmem:[#allocation11_spill] sm:$0xff] %v13875_v16  ;;  %v85_v18 = vld [vmem:[%s17772_s2 + $0x140] sm:$0xff]  ;;  %v86_v21 = vld [vmem:[%s17772_s2 + $0x148] sm:$0xff]  ;;  %v13011_v23 = vld [vmem:[%s17771_s0 + $0x130] sm:$0xff]   ;;  %v13902_v24 = vcombine.low %v77_v8, %v81_v9 }
  0x1a   :  { %11320 = vmatprep.subr.bf16.mxu1 %v12991_v25  ;;  %v89_v19 = vld [vmem:[%s17772_s2 + $0x160] sm:$0xff]  ;;  %v90_v22 = vld [vmem:[%s17772_s2 + $0x168] sm:$0xff]  ;;  %v13904_v25 = vcombine.low %v78_v10, %v82_v11 }
  0x1b   :  { %v94_v32 = vld [vmem:[%s17772_s2 + $0x188] sm:$0xff]  ;;  %v13933_v37 = vcombine.low %v85_v18, %v89_v19  ;;  %v101_v43 = vld [vmem:[%s17772_s2 + $0x1c0] sm:$0xff] }
  0x1c   :  { %11209 = vmatpush3.bf16.msra.mxu0 %v12992_v26  ;;  %17910 = vst [vmem:[#allocation12_spill] sm:$0xff] %v13904_v25  ;;  %v13906_v26 = vcombine.high %v85_v18, %v89_v19  ;;  %v98_v33 = vld [vmem:[%s17772_s2 + $0x1a8] sm:$0xff]  ;;  %v105_v45 = vld [vmem:[%s17772_s2 + $0x1e0] sm:$0xff] }
  0x1d   :  { %11321 = vmatpush3.bf16.msra.mxu1 %v12993_v27  ;;  %11210 = vmatprep.subr.bf16.mxu0 %v12994_v28  ;;  %v13908_v27 = vcombine.high %v86_v21, %v90_v22  ;;  %v13012_v28 = vld [vmem:[%s17771_s0 + $0x178] sm:$0xff]   ;;  %v13939_v42 = vcombine.high %v94_v32, %v98_v33  ;;  %v102_v46 = vld [vmem:[%s17772_s2 + $0x1c8] sm:$0xff]  ;;  %v13959_v50 = vcombine.low %v94_v32, %v98_v33  ;;  %v129_v18 = vld [vmem:[%s17772_s2 + $0x2a0] sm:$0xff] }
  0x1e   :  { %11322 = vmatprep.subr.bf16.mxu1 %v12995_v29  ;;  %v13013_v29 = vld [vmem:[%s17771_s0 + $0x138] sm:$0xff]   ;;  %v106_v47 = vld [vmem:[%s17772_s2 + $0x1e8] sm:$0xff]  ;;  %v13961_v51 = vcombine.high %v101_v43, %v105_v45  ;;  %v13981_v61 = vcombine.low %v101_v43, %v105_v45 }
  0x1f   :  { %17911 = vst [vmem:[#allocation13_spill] sm:$0xff] %v13908_v27  ;;  %17913 = vst [vmem:[#allocation15_spill] sm:$0xff] %v13939_v42  ;;  %v114_v60 = vld [vmem:[%s17772_s2 + $0x228] sm:$0xff]  ;;  %v13983_v62 = vcombine.low %v102_v46, %v106_v47 }
  0x20   :  { %11211 = vmatpush3.bf16.msra.mxu0 %v12996_v30  ;;  %v93_v30 = vld [vmem:[%s17772_s2 + $0x180] sm:$0xff]  ;;  %17914 = vst [vmem:[#allocation16_spill] sm:$0xff] %v13959_v50  ;;  %v122_v8 = vld [vmem:[%s17772_s2 + $0x268] sm:$0xff] }
  0x21   :  { %11323 = vmatpush3.bf16.msra.mxu1 %v12997_v31  ;;  %11420 = vmatprep.subr.bf16.mxu0 %v12998_v40  ;;  %v97_v31 = vld [vmem:[%s17772_s2 + $0x1a0] sm:$0xff]  ;;  %17916 = vst [vmem:[#allocation18_spill] sm:$0xff] %v13983_v62  ;;  %v126_v19 = vld [vmem:[%s17772_s2 + $0x288] sm:$0xff] }
  0x22   :  { %12926 = vmatprep.subr.bf16.mxu1 %v12998_v40  ;;  %v13935_v40 = vcombine.low %v86_v21, %v90_v22  ;;  %v13957_v49 = vcombine.low %v93_v30, %v97_v31  ;;  %v138_v32 = vld [vmem:[%s17772_s2 + $0x2e8] sm:$0xff] }
  0x23   :  { %1387 = vmatmul.mubr.bf16.vlgmr.msra.gmra.mrb[0].mxu0 %v13743_v35 }
  0x24   :  { %1548 = vmatmul.mubr.bf16.vlgmr.msra.gmra.mrb[0].mxu1 %v13750_v38  ;;  %1394 = vmatprep.mubr.bf16.mxu0 %v13769_v44  ;;  %17912 = vst [vmem:[#allocation14_spill] sm:$0xff] %v13935_v40 }
  0x25   :  { %12934 = vmatpush3.bf16.msra.mxu1 %v12999_v41  ;;  %1555 = vmatprep.mubr.bf16.mxu1 %v13781_v48  ;;  %v135_v48 = vld [vmem:[%s17772_s2 + $0x2d0] sm:$0xff] }
  0x26   :  { %12927 = vmatprep.subr.bf16.mxu1 %v13000_v52  ;;  %11421 = vmatpush3.bf16.msra.mxu0 %v12999_v41  ;;  %v13937_v41 = vcombine.high %v93_v30, %v97_v31  ;;  %v137_v30 = vld [vmem:[%s17772_s2 + $0x2e0] sm:$0xff]  ;;  %v134_v31 = vld [vmem:[%s17772_s2 + $0x2c8] sm:$0xff] }
  0x27   :  { %11422 = vmatprep.subr.bf16.mxu0 %v13000_v52  ;;  %v13963_v52 = vcombine.high %v102_v46, %v106_v47  ;;  %v14059_v46 = vcombine.high %v134_v31, %v138_v32  ;;  %v141_v47 = vld [vmem:[%s17772_s2 + $0x300] sm:$0xff] }
  0x29   :  { %12935 = vmatpush3.bf16.msra.mxu1 %v13001_v53  ;;  %17915 = vst [vmem:[#allocation17_spill] sm:$0xff] %v13963_v52  ;;  %17929 = vst [vmem:[#allocation31_spill] sm:$0xff] %v14059_v46 }
  0x2a   :  { %12928 = vmatprep.subr.bf16.mxu1 %v13002_v58  ;;  %11423 = vmatpush3.bf16.msra.mxu0 %v13001_v53  ;;  %v109_v53 = vld [vmem:[%s17772_s2 + $0x200] sm:$0xff] }
  0x2b   :  { %1395 = vmatmul.mubr.bf16.gmra.mrb[4].mxu0 %v13800_v54  ;;  %11424 = vmatprep.subr.bf16.mxu0 %v13002_v58  ;;  %v113_v58 = vld [vmem:[%s17772_s2 + $0x220] sm:$0xff] }
  0x2c   :  { %1556 = vmatmul.mubr.bf16.gmra.mrb[4].mxu1 %v13802_v55  ;;  %1402 = vmatprep.mubr.bf16.mxu0 %v13804_v56  ;;  %v13985_v63 = vcombine.high %v109_v53, %v113_v58  ;;  %v14005_v9 = vcombine.low %v109_v53, %v113_v58  ;;  %v145_v53 = vld [vmem:[%s17772_s2 + $0x320] sm:$0xff]  ;;  %v142_v58 = vld [vmem:[%s17772_s2 + $0x308] sm:$0xff] }
  0x2d   :  { %1563 = vmatprep.mubr.bf16.mxu1 %v13806_v57  ;;  %12936 = vmatpush3.bf16.msra.mxu1 %v13003_v59 }
  0x2e   :  { %12929 = vmatprep.subr.bf16.mxu1 %v13004_v1  ;;  %11425 = vmatpush3.bf16.msra.mxu0 %v13003_v59  ;;  %v110_v59 = vld [vmem:[%s17772_s2 + $0x208] sm:$0xff]  ;;  %17918 = vst [vmem:[#allocation20_spill] sm:$0xff] %v14005_v9 }
  0x2f   :  { %11426 = vmatprep.subr.bf16.mxu0 %v13004_v1  ;;  %v13987_v1 = vcombine.high %v110_v59, %v114_v60  ;;  %v14007_v10 = vcombine.low %v110_v59, %v114_v60  ;;  %v146_v59 = vld [vmem:[%s17772_s2 + $0x328] sm:$0xff] }
  0x31   :  { %12937 = vmatpush3.bf16.msra.mxu1 %v13005_v4  ;;  %17917 = vst [vmem:[#allocation19_spill] sm:$0xff] %v13987_v1  ;;  %17919 = vst [vmem:[#allocation21_spill] sm:$0xff] %v14007_v10 }
  0x32   :  { %12930 = vmatprep.subr.bf16.mxu1 %v13006_v6  ;;  %11427 = vmatpush3.bf16.msra.mxu0 %v13005_v4  ;;  %v117_v4 = vld [vmem:[%s17772_s2 + $0x240] sm:$0xff] }
  0x33   :  { %1403 = vmatmul.mubr.bf16.gmra.mrb[8].mxu0 %v13830_v0  ;;  %11428 = vmatprep.subr.bf16.mxu0 %v13006_v6  ;;  %v121_v6 = vld [vmem:[%s17772_s2 + $0x260] sm:$0xff] }
  0x34   :  { %1564 = vmatmul.mubr.bf16.gmra.mrb[8].mxu1 %v13835_v2  ;;  %1410 = vmatprep.mubr.bf16.mxu0 %v13837_v3  ;;  %v14009_v11 = vcombine.high %v117_v4, %v121_v6  ;;  %v14029_v21 = vcombine.low %v117_v4, %v121_v6  ;;  %v14079_v4 = vcombine.low %v134_v31, %v138_v32  ;;  %v157_v32 = vld [vmem:[%s17772_s2 + $0x380] sm:$0xff]  ;;  %v13027_v2 = vld [vmem:[%s17771_s0 + $0x1e8] sm:$0xff]  }
  0x35   :  { %1571 = vmatprep.mubr.bf16.mxu1 %v13842_v5  ;;  %12938 = vmatpush3.bf16.msra.mxu1 %v13007_v7  ;;  %v14081_v6 = vcombine.high %v141_v47, %v145_v53 }
  0x36   :  { %12931 = vmatprep.subr.bf16.mxu1 %v13008_v15  ;;  %11429 = vmatpush3.bf16.msra.mxu0 %v13007_v7  ;;  %v118_v7 = vld [vmem:[%s17772_s2 + $0x248] sm:$0xff]  ;;  %17920 = vst [vmem:[#allocation22_spill] sm:$0xff] %v14009_v11  ;;  %17922 = vst [vmem:[#allocation24_spill] sm:$0xff] %v14029_v21 }
  0x37   :  { %11430 = vmatprep.subr.bf16.mxu0 %v13008_v15  ;;  %v14011_v15 = vcombine.high %v118_v7, %v122_v8  ;;  %v14031_v22 = vcombine.low %v118_v7, %v122_v8  ;;  %17931 = vst [vmem:[#allocation33_spill] sm:$0xff] %v14079_v4  ;;  %17932 = vst [vmem:[#allocation34_spill] sm:$0xff] %v14081_v6  ;;  %v14083_v7 = vcombine.high %v142_v58, %v146_v59  ;;  %v149_v8 = vld [vmem:[%s17772_s2 + $0x340] sm:$0xff] }
  0x39   :  { %12939 = vmatpush3.bf16.msra.mxu1 %v13009_v17  ;;  %17921 = vst [vmem:[#allocation23_spill] sm:$0xff] %v14011_v15  ;;  %17923 = vst [vmem:[#allocation25_spill] sm:$0xff] %v14031_v22 }
  0x3a   :  { %12932 = vmatprep.subr.bf16.mxu1 %v13010_v20  ;;  %11431 = vmatpush3.bf16.msra.mxu0 %v13009_v17  ;;  %v125_v17 = vld [vmem:[%s17772_s2 + $0x280] sm:$0xff]  ;;  %17933 = vst [vmem:[#allocation35_spill] sm:$0xff] %v14083_v7 }
  0x3b   :  { %1411 = vmatmul.mubr.bf16.gmra.mrb[12].mxu0 %v13866_v12  ;;  %11432 = vmatprep.subr.bf16.mxu0 %v13010_v20  ;;  %v130_v20 = vld [vmem:[%s17772_s2 + $0x2a8] sm:$0xff]  ;;  %v14053_v33 = vcombine.low %v125_v17, %v129_v18 }
  0x3c   :  { %1572 = vmatmul.mubr.bf16.gmra.mrb[12].mxu1 %v13868_v13  ;;  %1418 = vmatprep.mubr.bf16.mxu0 %v13870_v14  ;;  %v14055_v43 = vcombine.low %v126_v19, %v130_v20  ;;  %v13025_v13 = vld [vmem:[%s17771_s0 + $0x1d8] sm:$0xff]  }
  0x3d   :  { %1579 = vmatprep.mubr.bf16.mxu1 %v13875_v16  ;;  %12940 = vmatpush3.bf16.msra.mxu1 %v13011_v23  ;;  %17926 = vst [vmem:[#allocation28_spill] sm:$0xff] %v14053_v33 }
  0x3e   :  { %12933 = vmatprep.subr.bf16.mxu1 %v13012_v28  ;;  %11433 = vmatpush3.bf16.msra.mxu0 %v13011_v23  ;;  %v14033_v23 = vcombine.high %v125_v17, %v129_v18  ;;  %17927 = vst [vmem:[#allocation29_spill] sm:$0xff] %v14055_v43  ;;  %v153_v17 = vld [vmem:[%s17772_s2 + $0x360] sm:$0xff]  ;;  %v150_v18 = vld [vmem:[%s17772_s2 + $0x348] sm:$0xff] }
  0x3f   :  { %11434 = vmatprep.subr.bf16.mxu0 %v13012_v28  ;;  %v14035_v28 = vcombine.high %v126_v19, %v130_v20  ;;  %v154_v19 = vld [vmem:[%s17772_s2 + $0x368] sm:$0xff]  ;;  %v14101_v20 = vcombine.low %v141_v47, %v145_v53 }
  0x40   :  { %17924 = vst [vmem:[#allocation26_spill] sm:$0xff] %v14033_v23  ;;  %v14107_v31 = vcombine.high %v150_v18, %v154_v19  ;;  %v158_v47 = vld [vmem:[%s17772_s2 + $0x388] sm:$0xff] }
  0x41   :  { %12941 = vmatpush3.bf16.msra.mxu1 %v13013_v29  ;;  %17925 = vst [vmem:[#allocation27_spill] sm:$0xff] %v14035_v28  ;;  %17934 = vst [vmem:[#allocation36_spill] sm:$0xff] %v14101_v20  ;;  %v162_v53 = vld [vmem:[%s17772_s2 + $0x3a8] sm:$0xff] }
  0x42   :  { %1837 = vmatprep.subr.bf16.mxu1 %v17785_v34  ;;  %11435 = vmatpush3.bf16.msra.mxu0 %v13013_v29  ;;  %v133_v29 = vld [vmem:[%s17772_s2 + $0x2c0] sm:$0xff]  ;;  %17937 = vst [vmem:[#allocation39_spill] sm:$0xff] %v14107_v31 }
  0x43   :  { %1419 = vmatmul.mubr.bf16.gmra.mrb[16].mxu0 %v13902_v24  ;;  %v14057_v45 = vcombine.high %v133_v29, %v137_v30  ;;  %v14077_v60 = vcombine.low %v133_v29, %v137_v30  ;;  %v14103_v29 = vcombine.low %v142_v58, %v146_v59  ;;  %v14105_v30 = vcombine.high %v149_v8, %v153_v17  ;;  %v161_v34 = vld [vmem:[%s17772_s2 + $0x3a0] sm:$0xff] }
  0x44   :  { %1580 = vmatmul.mubr.bf16.gmra.mrb[16].mxu1 %v13904_v25  ;;  %1426 = vmatprep.mubr.bf16.mxu0 %v13906_v26  ;;  %v14125_v58 = vcombine.low %v149_v8, %v153_v17  ;;  %v14127_v59 = vcombine.low %v150_v18, %v154_v19  ;;  %v169_v8 = vld [vmem:[%s17772_s2 + $0x3e0] sm:$0xff]  ;;  %v166_v17 = vld [vmem:[%s17772_s2 + $0x3c8] sm:$0xff]  ;;  %v14149_v19 = vcombine.low %v157_v32, %v161_v34 }
  0x45   :  { %1587 = vmatprep.mubr.bf16.mxu1 %v13908_v27  ;;  %17928 = vst [vmem:[#allocation30_spill] sm:$0xff] %v14057_v45  ;;  %17930 = vst [vmem:[#allocation32_spill] sm:$0xff] %v14077_v60  ;;  %v170_v18 = vld [vmem:[%s17772_s2 + $0x3e8] sm:$0xff] }
  0x46   :  { %17935 = vst [vmem:[#allocation37_spill] sm:$0xff] %v14103_v29  ;;  %17936 = vst [vmem:[#allocation38_spill] sm:$0xff] %v14105_v30  ;;  %v13023_v25 = vld [vmem:[%s17771_s0 + $0x1c8] sm:$0xff]  }
  0x47   :  { %17938 = vst [vmem:[#allocation40_spill] sm:$0xff] %v14125_v58  ;;  %17939 = vst [vmem:[#allocation41_spill] sm:$0xff] %v14127_v59 }
  0x48   :  { %17942 = vst [vmem:[#allocation44_spill] sm:$0xff] %v14149_v19 }
  0x4b   :  { %1427 = vmatmul.mubr.bf16.gmra.mrb[20].mxu0 %v13933_v37 }
  0x4c   :  { %1588 = vmatmul.mubr.bf16.gmra.mrb[20].mxu1 %v13935_v40  ;;  %1434 = vmatprep.mubr.bf16.mxu0 %v13937_v41  ;;  %v13021_v40 = vld [vmem:[%s17771_s0 + $0x1b8] sm:$0xff]  }
  0x4d   :  { %1595 = vmatprep.mubr.bf16.mxu1 %v13939_v42 }
  0x53   :  { %1435 = vmatmul.mubr.bf16.gmra.mrb[24].mxu0 %v13957_v49 }
  0x54   :  { %1596 = vmatmul.mubr.bf16.gmra.mrb[24].mxu1 %v13959_v50  ;;  %1442 = vmatprep.mubr.bf16.mxu0 %v13961_v51  ;;  %v13019_v50 = vld [vmem:[%s17771_s0 + $0x1a8] sm:$0xff]  }
  0x55   :  { %1603 = vmatprep.mubr.bf16.mxu1 %v13963_v52  ;;  %v13016_v52 = vld [vmem:[%s17771_s0 + $0x190] sm:$0xff]  }
  0x5b   :  { %1443 = vmatmul.mubr.bf16.gmra.mrb[28].mxu0 %v13981_v61 }
  0x5c   :  { %1604 = vmatmul.mubr.bf16.gmra.mrb[28].mxu1 %v13983_v62  ;;  %1450 = vmatprep.mubr.bf16.mxu0 %v13985_v63 }
  0x5d   :  { %1611 = vmatprep.mubr.bf16.mxu1 %v13987_v1 }
  0x63   :  { %1451 = vmatmul.mubr.bf16.gmra.mrb[32].mxu0 %v14005_v9 }
  0x64   :  { %1612 = vmatmul.mubr.bf16.gmra.mrb[32].mxu1 %v14007_v10  ;;  %1458 = vmatprep.mubr.bf16.mxu0 %v14009_v11  ;;  %v13039_v11 = vld [vmem:[%s17771_s0 + $0x25c] sm:$0xff]  }
  0x65   :  { %1619 = vmatprep.mubr.bf16.mxu1 %v14011_v15  ;;  %v13014_v15 = vld [vmem:[%s17771_s0 + $0x180] sm:$0xff]  }
  0x6b   :  { %1459 = vmatmul.mubr.bf16.gmra.mrb[36].mxu0 %v14029_v21 }
  0x6c   :  { %1620 = vmatmul.mubr.bf16.gmra.mrb[36].mxu1 %v14031_v22  ;;  %1466 = vmatprep.mubr.bf16.mxu0 %v14033_v23  ;;  %v13035_v23 = vld [vmem:[%s17771_s0 + $0x24c] sm:$0xff]  }
  0x6d   :  { %1627 = vmatprep.mubr.bf16.mxu1 %v14035_v28  ;;  %v55_v28 = vld [vmem:[%s17772_s2 + $0x50] sm:$0xff] }
  0x73   :  { %1467 = vmatmul.mubr.bf16.gmra.mrb[40].mxu0 %v14053_v33 }
  0x74   :  { %1628 = vmatmul.mubr.bf16.gmra.mrb[40].mxu1 %v14055_v43  ;;  %1474 = vmatprep.mubr.bf16.mxu0 %v14057_v45  ;;  %v13031_v45 = vld [vmem:[%s17771_s0 + $0x23c] sm:$0xff]  }
  0x75   :  { %1635 = vmatprep.mubr.bf16.mxu1 %v14059_v46  ;;  %v47_v46 = vld [vmem:[%s17772_s2 + $0x10] sm:$0xff] }
  0x7b   :  { %1475 = vmatmul.mubr.bf16.gmra.mrb[44].mxu0 %v14077_v60 }
  0x7c   :  { %1636 = vmatmul.mubr.bf16.gmra.mrb[44].mxu1 %v14079_v4  ;;  %1482 = vmatprep.mubr.bf16.mxu0 %v14081_v6  ;;  %v14131_v4 = vcombine.high %v158_v47, %v162_v53 }
  0x7d   :  { %1643 = vmatprep.mubr.bf16.mxu1 %v14083_v7  ;;  %v14129_v7 = vcombine.high %v157_v32, %v161_v34  ;;  %v51_v34 = vld [vmem:[%s17772_s2 + $0x30] sm:$0xff] }
  0x7e   :  { %17941 = vst [vmem:[#allocation43_spill] sm:$0xff] %v14131_v4  ;;  %v63_v32 = vld [vmem:[%s17772_s2 + $0x90] sm:$0xff] }
  0x7f   :  { %17940 = vst [vmem:[#allocation42_spill] sm:$0xff] %v14129_v7 }
  0x83   :  { %1483 = vmatmul.mubr.bf16.gmra.mrb[48].mxu0 %v14101_v20 }
  0x84   :  { %1644 = vmatmul.mubr.bf16.gmra.mrb[48].mxu1 %v14103_v29  ;;  %1490 = vmatprep.mubr.bf16.mxu0 %v14105_v30  ;;  %v14155_v29 = vcombine.high %v166_v17, %v170_v18 }
  0x85   :  { %1651 = vmatprep.mubr.bf16.mxu1 %v14107_v31  ;;  %v165_v31 = vld [vmem:[%s17772_s2 + $0x3c0] sm:$0xff] }
  0x86   :  { %17945 = vst [vmem:[#allocation47_spill] sm:$0xff] %v14155_v29 }
  0x8b   :  { %1491 = vmatmul.mubr.bf16.gmra.mrb[52].mxu0 %v14125_v58 }
  0x8c   :  { %1652 = vmatmul.mubr.bf16.gmra.mrb[52].mxu1 %v14127_v59  ;;  %1498 = vmatprep.mubr.bf16.mxu0 %v14129_v7  ;;  %v14151_v59 = vcombine.low %v158_v47, %v162_v53  ;;  %v67_v47 = vld [vmem:[%s17772_s2 + $0xb0] sm:$0xff]  ;;  %v14173_v53 = vcombine.low %v165_v31, %v169_v8 }
  0x8d   :  { %1659 = vmatprep.mubr.bf16.mxu1 %v14131_v4  ;;  %v14153_v4 = vcombine.high %v165_v31, %v169_v8  ;;  %v14179_v43 = vcombine.high %v63_v32, %v67_v47  ;;  %v59_v31 = vld [vmem:[%s17772_s2 + $0x70] sm:$0xff] }
  0x8e   :  { %17943 = vst [vmem:[#allocation45_spill] sm:$0xff] %v14151_v59  ;;  %17946 = vst [vmem:[#allocation48_spill] sm:$0xff] %v14173_v53  ;;  %v71_v8 = vld [vmem:[%s17772_s2 + $0xd0] sm:$0xff]  ;;  %v14201_v22 = vcombine.high %v55_v28, %v59_v31  ;;  %v14222_v1 = vcombine.low %v55_v28, %v59_v31  ;;  %v13017_v28 = vld [vmem:[%s17771_s0 + $0x198] sm:$0xff]  }
  0x8f   :  { %17944 = vst [vmem:[#allocation46_spill] sm:$0xff] %v14153_v4  ;;  %17949 = vst [vmem:[#allocation51_spill] sm:$0xff] %v14179_v43  ;;  %v87_v31 = vld [vmem:[%s17772_s2 + $0x150] sm:$0xff] }
  0x90   :  { %17952 = vst [vmem:[#allocation54_spill] sm:$0xff] %v14201_v22  ;;  %17955 = vst [vmem:[#allocation56_spill] sm:$0xff] %v14222_v1 }
  0x93   :  { %1499 = vmatmul.mubr.bf16.gmra.mrb[56].mxu0 %v14149_v19 }
  0x94   :  { %1660 = vmatmul.mubr.bf16.gmra.mrb[56].mxu1 %v14151_v59  ;;  %1506 = vmatprep.mubr.bf16.mxu0 %v14153_v4  ;;  %v14175_v59 = vcombine.low %v166_v17, %v170_v18  ;;  %v75_v17 = vld [vmem:[%s17772_s2 + $0xf0] sm:$0xff]  ;;  %v14197_v18 = vcombine.low %v47_v46, %v51_v34 }
  0x95   :  { %1667 = vmatprep.mubr.bf16.mxu1 %v14155_v29  ;;  %v14177_v29 = vcombine.high %v47_v46, %v51_v34  ;;  %v14206_v10 = vcombine.high %v71_v8, %v75_v17  ;;  %v13015_v46 = vld [vmem:[%s17771_s0 + $0x188] sm:$0xff]   ;;  %v17954_v34 = vmov 0   ;;  %v14224_v62 = vcombine.low %v71_v8, %v75_v17  ;;  %v91_v8 = vld [vmem:[%s17772_s2 + $0x170] sm:$0xff] }
  0x96   :  { %17947 = vst [vmem:[#allocation49_spill] sm:$0xff] %v14175_v59  ;;  %17950 = vst [vmem:[#allocation52_spill] sm:$0xff] %v14197_v18 }
  0x97   :  { %17948 = vst [vmem:[#allocation50_spill] sm:$0xff] %v14177_v29  ;;  %17953 = vst [vmem:[#allocation55_spill] sm:$0xff] %v14206_v10 }
  0x98   :  { %17956 = vst [vmem:[#allocation57_spill] sm:$0xff] %v14224_v62 }
  0x9b   :  { %1507 = vmatmul.mubr.bf16.gmra.mrb[60].mxu0 %v14173_v53 }
  0x9c   :  { %1668 = vmatmul.mubr.bf16.gmra.mrb[60].mxu1 %v14175_v59  ;;  %1708 = vmatprep.mubr.bf16.mxu0 %v14177_v29  ;;  %v14199_v59 = vcombine.low %v63_v32, %v67_v47  ;;  %v79_v32 = vld [vmem:[%s17772_s2 + $0x110] sm:$0xff] }
  0x9d   :  { %1724 = vmatprep.mubr.bf16.mxu1 %v14179_v43  ;;  %v83_v47 = vld [vmem:[%s17772_s2 + $0x130] sm:$0xff] }
  0x9e   :  { %17951 = vst [vmem:[#allocation53_spill] sm:$0xff] %v14199_v59  ;;  %v14245_v17 = vcombine.low %v79_v32, %v83_v47 }
  0xa0   :  { %17958 = vst [vmem:[#allocation59_spill] sm:$0xff] %v14245_v17 }
  0xa3   :  { %1709 = vmatmul.mubr.bf16.vlgmr.msra.gmra.mrb[64].mxu0 %v14197_v18 }
  0xa4   :  { %1725 = vmatmul.mubr.bf16.vlgmr.msra.gmra.mrb[64].mxu1 %v14199_v59  ;;  %1716 = vmatprep.mubr.bf16.mxu0 %v14201_v22 }
  0xa5   :  { %1838 = vmatpush1.bf16.msra.mxu1 %v13014_v15  ;;  %1732 = vmatprep.mubr.bf16.mxu1 %v14206_v10  ;;  %v14226_v15 = vcombine.high %v79_v32, %v83_v47  ;;  %v95_v32 = vld [vmem:[%s17772_s2 + $0x190] sm:$0xff] }
  0xa6   :  { %1839 = vmatprep.subr.bf16.mxu1 %v17954_v34  ;;  %v99_v47 = vld [vmem:[%s17772_s2 + $0x1b0] sm:$0xff] }
  0xa7   :  { %17957 = vst [vmem:[#allocation58_spill] sm:$0xff] %v14226_v15  ;;  %v14267_v42 = vcombine.high %v95_v32, %v99_v47 }
  0xa9   :  { %1840 = vmatpush1.bf16.msra.mxu1 %v13015_v46  ;;  %v14247_v46 = vcombine.high %v87_v31, %v91_v8  ;;  %17961 = vst [vmem:[#allocation62_spill] sm:$0xff] %v14267_v42 }
  0xaa   :  { %1841 = vmatprep.subr.bf16.mxu1 %v17954_v34 }
  0xab   :  { %1717 = vmatmul.mubr.bf16.gmra.mrb[68].mxu0 %v14222_v1  ;;  %17959 = vst [vmem:[#allocation60_spill] sm:$0xff] %v14247_v46 }
  0xac   :  { %1733 = vmatmul.mubr.bf16.gmra.mrb[68].mxu1 %v14224_v62 }
  0xad   :  { %1740 = vmatprep.mubr.bf16.mxu1 %v14226_v15  ;;  %1842 = vmatpush1.bf16.msra.mxu1 %v13016_v52  ;;  %v13018_v52 = vld [vmem:[%s17771_s0 + $0x1a0] sm:$0xff]  }
  0xae   :  { %1843 = vmatprep.subr.bf16.mxu1 %v17954_v34 }
  0xb1   :  { %1844 = vmatpush1.bf16.msra.mxu1 %v13017_v28  ;;  %v14265_v28 = vcombine.low %v87_v31, %v91_v8  ;;  %v103_v31 = vld [vmem:[%s17772_s2 + $0x1d0] sm:$0xff]  ;;  %v14285_v8 = vcombine.low %v95_v32, %v99_v47 }
  0xb2   :  { %1845 = vmatprep.subr.bf16.mxu1 %v17954_v34  ;;  %v111_v32 = vld [vmem:[%s17772_s2 + $0x210] sm:$0xff] }
  0xb3   :  { %17960 = vst [vmem:[#allocation61_spill] sm:$0xff] %v14265_v28  ;;  %17962 = vst [vmem:[#allocation63_spill] sm:$0xff] %v14285_v8 }
  0xb4   :  { %1741 = vmatmul.mubr.bf16.gmra.mrb[72].mxu1 %v14245_v17 }
  0xb5   :  { %1748 = vmatprep.mubr.bf16.mxu1 %v14247_v46  ;;  %1846 = vmatpush1.bf16.msra.mxu1 %v13018_v52  ;;  %v13020_v52 = vld [vmem:[%s17771_s0 + $0x1b0] sm:$0xff]  }
  0xb6   :  { %1847 = vmatprep.subr.bf16.mxu1 %v17954_v34 }
  0xb9   :  { %1848 = vmatpush1.bf16.msra.mxu1 %v13019_v50  ;;  %v107_v50 = vld [vmem:[%s17772_s2 + $0x1f0] sm:$0xff] }
  0xba   :  { %1849 = vmatprep.subr.bf16.mxu1 %v17954_v34  ;;  %v14287_v27 = vcombine.high %v103_v31, %v107_v50  ;;  %v14305_v47 = vcombine.low %v103_v31, %v107_v50  ;;  %v119_v31 = vld [vmem:[%s17772_s2 + $0x250] sm:$0xff] }
  0xbc   :  { %1749 = vmatmul.mubr.bf16.gmra.mrb[76].mxu1 %v14265_v28  ;;  %17963 = vst [vmem:[#allocation64_spill] sm:$0xff] %v14287_v27  ;;  %17964 = vst [vmem:[#allocation65_spill] sm:$0xff] %v14305_v47 }
  0xbd   :  { %1756 = vmatprep.mubr.bf16.mxu1 %v14267_v42  ;;  %1850 = vmatpush1.bf16.msra.mxu1 %v13020_v52  ;;  %v13022_v52 = vld [vmem:[%s17771_s0 + $0x1c0] sm:$0xff]  }
  0xbe   :  { %1851 = vmatprep.subr.bf16.mxu1 %v17954_v34 }
  0xc1   :  { %1852 = vmatpush1.bf16.msra.mxu1 %v13021_v40  ;;  %v115_v40 = vld [vmem:[%s17772_s2 + $0x230] sm:$0xff] }
  0xc2   :  { %1853 = vmatprep.subr.bf16.mxu1 %v17954_v34  ;;  %v14307_v16 = vcombine.high %v111_v32, %v115_v40  ;;  %v14325_v50 = vcombine.low %v111_v32, %v115_v40  ;;  %v127_v32 = vld [vmem:[%s17772_s2 + $0x290] sm:$0xff] }
  0xc3   :  { %v13028_v40 = vld [vmem:[%s17771_s0 + $0x1f0] ss:$0 sps:$4 sm:$0xff]  }
  0xc4   :  { %1757 = vmatmul.mubr.bf16.gmra.mrb[80].mxu1 %v14285_v8  ;;  %17965 = vst [vmem:[#allocation66_spill] sm:$0xff] %v14307_v16  ;;  %17966 = vst [vmem:[#allocation67_spill] sm:$0xff] %v14325_v50  ;;  %v1352_v55 = vsel %vm1350_vm0, %v13028_v40, 0  ;;  %v147_v40 = vld [vmem:[%s17772_s2 + $0x330] sm:$0xff] }
  0xc5   :  { %1764 = vmatprep.mubr.bf16.mxu1 %v14287_v27  ;;  %1854 = vmatpush1.bf16.msra.mxu1 %v13022_v52  ;;  %v13024_v52 = vld [vmem:[%s17771_s0 + $0x1d0] sm:$0xff]  }
  0xc6   :  { %1855 = vmatprep.subr.bf16.mxu1 %v17954_v34 }
  0xc9   :  { %1856 = vmatpush1.bf16.msra.mxu1 %v13023_v25  ;;  %v123_v25 = vld [vmem:[%s17772_s2 + $0x270] sm:$0xff] }
  0xca   :  { %1857 = vmatprep.subr.bf16.mxu1 %v17954_v34  ;;  %v14327_v5 = vcombine.high %v119_v31, %v123_v25 }
  0xcc   :  { %1765 = vmatmul.mubr.bf16.gmra.mrb[84].mxu1 %v14305_v47  ;;  %17967 = vst [vmem:[#allocation68_spill] sm:$0xff] %v14327_v5 }
  0xcd   :  { %1772 = vmatprep.mubr.bf16.mxu1 %v14307_v16  ;;  %1858 = vmatpush1.bf16.msra.mxu1 %v13024_v52  ;;  %v13026_v52 = vld [vmem:[%s17771_s0 + $0x1e0] sm:$0xff]  }
  0xce   :  { %1859 = vmatprep.subr.bf16.mxu1 %v17954_v34 }
  0xd1   :  { %1860 = vmatpush1.bf16.msra.mxu1 %v13025_v13  ;;  %v131_v13 = vld [vmem:[%s17772_s2 + $0x2b0] sm:$0xff] }
  0xd2   :  { %1861 = vmatprep.subr.bf16.mxu1 %v17954_v34  ;;  %v14350_v57 = vcombine.high %v127_v32, %v131_v13 }
  0xd4   :  { %1773 = vmatmul.mubr.bf16.gmra.mrb[88].mxu1 %v14325_v50  ;;  %17969 = vst [vmem:[#allocation70_spill] sm:$0xff] %v14350_v57 }
  0xd5   :  { %1780 = vmatprep.mubr.bf16.mxu1 %v14327_v5  ;;  %1862 = vmatpush1.bf16.msra.mxu1 %v13026_v52  ;;  %v14348_v52 = vcombine.low %v119_v31, %v123_v25  ;;  %v139_v31 = vld [vmem:[%s17772_s2 + $0x2f0] sm:$0xff]  ;;  %v14362_v25 = vcombine.low %v127_v32, %v131_v13 }
  0xd6   :  { %1863 = vmatprep.subr.bf16.mxu1 %v17954_v34  ;;  %v14374_v38 = vcombine.low %v135_v48, %v139_v31  ;;  %v151_v32 = vld [vmem:[%s17772_s2 + $0x350] sm:$0xff] }
  0xd7   :  { %17968 = vst [vmem:[#allocation69_spill] sm:$0xff] %v14348_v52  ;;  %17970 = vst [vmem:[#allocation71_spill] sm:$0xff] %v14362_v25  ;;  %v155_v13 = vld [vmem:[%s17772_s2 + $0x370] sm:$0xff] }
  0xd8   :  { %17972 = vst [vmem:[#allocation73_spill] sm:$0xff] %v14374_v38  ;;  %v14398_v5 = vcombine.low %v151_v32, %v155_v13 }
  0xd9   :  { %1864 = vmatpush1.bf16.msra.mxu1 %v13027_v2  ;;  %v14364_v2 = vcombine.high %v135_v48, %v139_v31  ;;  %v159_v31 = vld [vmem:[%s17772_s2 + $0x390] sm:$0xff] }
  0xda   :  { %1865 = vmatprep.subr.bf16.mxu1 %v17954_v34  ;;  %17976 = vst [vmem:[#allocation77_spill] sm:$0xff] %v14398_v5 }
  0xdb   :  { %17971 = vst [vmem:[#allocation72_spill] sm:$0xff] %v14364_v2 }
  0xdc   :  { %1781 = vmatmul.mubr.bf16.gmra.mrb[92].mxu1 %v14348_v52 }
  0xdd   :  { %1788 = vmatprep.mubr.bf16.mxu1 %v14350_v57  ;;  %1866 = vmatpush1.bf16.msra.mxu1 %v1352_v55  ;;  %v143_v55 = vld [vmem:[%s17772_s2 + $0x310] sm:$0xff] }
  0xde   :  { %v14376_v39 = vcombine.high %v143_v55, %v147_v40 }
  0xe0   :  { %17973 = vst [vmem:[#allocation74_spill] sm:$0xff] %v14376_v39 }
  0xe4   :  { %1789 = vmatmul.mubr.bf16.gmra.mrb[96].mxu1 %v14362_v25  ;;  %v14388_v25 = vcombine.high %v151_v32, %v155_v13  ;;  %v171_v32 = vld [vmem:[%s17772_s2 + $0x3f0] sm:$0xff] }
  0xe5   :  { %1796 = vmatprep.mubr.bf16.mxu1 %v14364_v2  ;;  %v14386_v2 = vcombine.low %v143_v55, %v147_v40 }
  0xe6   :  { %17975 = vst [vmem:[#allocation76_spill] sm:$0xff] %v14388_v25 }
  0xe7   :  { %17974 = vst [vmem:[#allocation75_spill] sm:$0xff] %v14386_v2 }
  0xec   :  { %1797 = vmatmul.mubr.bf16.gmra.mrb[100].mxu1 %v14374_v38 }
  0xed   :  { %1804 = vmatprep.mubr.bf16.mxu1 %v14376_v39  ;;  %v163_v39 = vld [vmem:[%s17772_s2 + $0x3b0] sm:$0xff] }
  0xf4   :  { %1805 = vmatmul.mubr.bf16.gmra.mrb[104].mxu1 %v14386_v2 }
  0xf5   :  { %1812 = vmatprep.mubr.bf16.mxu1 %v14388_v25  ;;  %v14400_v25 = vcombine.high %v159_v31, %v163_v39 }
  0xf6   :  { %v11212_v48 = vpop.f32.mrb[0].mxu0 }
  0xf7   :  { %v11324_v38 = vpop.f32.mrb[0].mxu1  ;;  %v11213_v57 = vpop.f32.mrb[1].mxu0  ;;  %17977 = vst [vmem:[#allocation78_spill] sm:$0xff] %v14400_v25 }
  0xf8   :  { %v11214_v52 = vadd.f32 %v11213_v57, %v11212_v48  ;;  %v11325_v55 = vpop.f32.mrb[1].mxu1  ;;  %v11215_v40 = vpop.f32.mrb[2].mxu0 }
  0xf9   :  { %v11326_v50 = vadd.f32 %v11325_v55, %v11324_v38  ;;  %v11327_v2 = vpop.f32.mrb[2].mxu1  ;;  %v11216_v16 = vpop.f32.mrb[3].mxu0  ;;  %v167_v38 = vld [vmem:[%s17772_s2 + $0x3d0] sm:$0xff] }
  0xfa   :  { %v11217_v47 = vadd.f32 %v11216_v16, %v11215_v40  ;;  %v11328_v27 = vpop.f32.mrb[3].mxu1 }
  0xfb   :  { %v11329_v8 = vadd.f32 %v11328_v27, %v11327_v2  ;;  %v14402_v42 = vadd.f32 %v11326_v50, %v11214_v52  ;;  %v14414_v2 = vcombine.low %v159_v31, %v163_v39  ;;  %v48_v39 = vld [vmem:[%s17772_s2 + $0x18] sm:$0xff] }
  0xfc   :  { %1813 = vmatmul.mubr.bf16.gmra.mrb[108].mxu1 %v14398_v5  ;;  %v52_v31 = vld [vmem:[%s17772_s2 + $0x38] sm:$0xff] }
  0xfd   :  { %1820 = vmatprep.mubr.bf16.mxu1 %v14400_v25  ;;  %v14406_v28 = vadd.f32 %v11329_v8, %v11217_v47  ;;  %17978 = vst [vmem:[#allocation79_spill] sm:$0xff] %v14414_v2  ;;  %v14416_v47 = vcombine.high %v167_v38, %v171_v32 }
  0xfe   :  { %v11218_v57 = vpop.f32.mrb[4].mxu0 }
  0xff   :  { %v11330_v16 = vpop.f32.mrb[4].mxu1  ;;  %v11219_v13 = vpop.f32.mrb[5].mxu0  ;;  %17979 = vst [vmem:[#allocation80_spill] sm:$0xff] %v14416_v47 }
 0x100   :  { %v11220_v27 = vadd.f32 %v11219_v13, %v11218_v57  ;;  %v11331_v50 = vpop.f32.mrb[5].mxu1  ;;  %v11221_v52 = vpop.f32.mrb[6].mxu0 }
 0x101   :  { %v11332_v48 = vadd.f32 %v11331_v50, %v11330_v16  ;;  %v11333_v55 = vpop.f32.mrb[6].mxu1  ;;  %v11222_v8 = vpop.f32.mrb[7].mxu0 }
 0x102   :  { %v11223_v40 = vadd.f32 %v11222_v8, %v11221_v52  ;;  %v11334_v25 = vpop.f32.mrb[7].mxu1  ;;  %v14430_v52 = vcombine.low %v167_v38, %v171_v32  ;;  %v14432_v8 = vcombine.high %v48_v39, %v52_v31  ;;  %v56_v32 = vld [vmem:[%s17772_s2 + $0x58] sm:$0xff] }
 0x103   :  { %v11335_v5 = vadd.f32 %v11334_v25, %v11333_v55  ;;  %v14418_v46 = vadd.f32 %v11332_v48, %v11220_v27 }
 0x104   :  { %1821 = vmatmul.mubr.bf16.gmra.mrb[112].mxu1 %v14414_v2  ;;  %17980 = vst [vmem:[#allocation81_spill] sm:$0xff] %v14430_v52  ;;  %17981 = vst [vmem:[#allocation82_spill] sm:$0xff] %v14432_v8 }
 0x105   :  { %1828 = vmatprep.mubr.bf16.mxu1 %v14416_v47  ;;  %v14422_v17 = vadd.f32 %v11335_v5, %v11223_v40 }
 0x106   :  { %v11224_v57 = vpop.f32.mrb[8].mxu0 }
 0x107   :  { %v11336_v16 = vpop.f32.mrb[8].mxu1  ;;  %v11225_v13 = vpop.f32.mrb[9].mxu0 }
 0x108   :  { %v11226_v25 = vadd.f32 %v11225_v13, %v11224_v57  ;;  %v11337_v27 = vpop.f32.mrb[9].mxu1  ;;  %v11227_v50 = vpop.f32.mrb[10].mxu0  ;;  %v60_v57 = vld [vmem:[%s17772_s2 + $0x78] sm:$0xff] }
 0x109   :  { %v11338_v48 = vadd.f32 %v11337_v27, %v11336_v16  ;;  %v11339_v55 = vpop.f32.mrb[10].mxu1  ;;  %v11228_v5 = vpop.f32.mrb[11].mxu0 }
 0x10a   :  { %v11229_v40 = vadd.f32 %v11228_v5, %v11227_v50  ;;  %v11340_v47 = vpop.f32.mrb[11].mxu1  ;;  %v14447_v50 = vcombine.low %v48_v39, %v52_v31  ;;  %v14449_v5 = vcombine.high %v56_v32, %v60_v57  ;;  %v64_v39 = vld [vmem:[%s17772_s2 + $0x98] sm:$0xff] }
 0x10b   :  { %v14434_v2 = vadd.f32 %v11338_v48, %v11226_v25  ;;  %v11341_v15 = vadd.f32 %v11340_v47, %v11339_v55  ;;  %v68_v31 = vld [vmem:[%s17772_s2 + $0xb8] sm:$0xff] }
 0x10c   :  { %1829 = vmatmul.mubr.bf16.gmra.mrb[116].mxu1 %v14430_v52  ;;  %17982 = vst [vmem:[#allocation83_spill] sm:$0xff] %v14447_v50  ;;  %17983 = vst [vmem:[#allocation84_spill] sm:$0xff] %v14449_v5 }
 0x10d   :  { %v14437_v62 = vadd.f32 %v11341_v15, %v11229_v40  ;;  %9916 = vmatprep.mubr.msk.bf16.mxu1 %vm1301_vm1, %v14432_v8 }
 0x10e   :  { %v11230_v38 = vpop.f32.mrb[12].mxu0 }
 0x10f   :  { %v11342_v16 = vpop.f32.mrb[12].mxu1  ;;  %v11231_v13 = vpop.f32.mrb[13].mxu0 }
 0x110   :  { %v11232_v25 = vadd.f32 %v11231_v13, %v11230_v38  ;;  %v11343_v47 = vpop.f32.mrb[13].mxu1  ;;  %v11233_v27 = vpop.f32.mrb[14].mxu0 }
 0x111   :  { %v11344_v15 = vadd.f32 %v11343_v47, %v11342_v16  ;;  %v11345_v48 = vpop.f32.mrb[14].mxu1  ;;  %v11234_v55 = vpop.f32.mrb[15].mxu0 }
 0x112   :  { %v11235_v40 = vadd.f32 %v11234_v55, %v11233_v27  ;;  %v11346_v8 = vpop.f32.mrb[15].mxu1  ;;  %v14464_v27 = vcombine.low %v56_v32, %v60_v57  ;;  %v14466_v55 = vcombine.high %v64_v39, %v68_v31  ;;  %v72_v32 = vld [vmem:[%s17772_s2 + $0xd8] sm:$0xff] }
 0x113   :  { %v14451_v52 = vadd.f32 %v11344_v15, %v11232_v25  ;;  %v11347_v10 = vadd.f32 %v11346_v8, %v11345_v48  ;;  %v76_v57 = vld [vmem:[%s17772_s2 + $0xf8] sm:$0xff] }
 0x114   :  { %1870 = vmatmul.mubr.bf16.vlgmr.msra.gmra.mrb[120].mxu1 %v14447_v50  ;;  %17984 = vst [vmem:[#allocation85_spill] sm:$0xff] %v14464_v27  ;;  %17985 = vst [vmem:[#allocation86_spill] sm:$0xff] %v14466_v55 }
 0x115   :  { %v14454_v59 = vadd.f32 %v11347_v10, %v11235_v40  ;;  %9917 = vmatprep.mubr.msk.bf16.mxu1 %vm1301_vm1, %v14449_v5 }
 0x116   :  { %v11236_v38 = vpop.f32.mrb[16].mxu0 }
 0x117   :  { %v11348_v16 = vpop.f32.mrb[16].mxu1  ;;  %v11237_v13 = vpop.f32.mrb[17].mxu0 }
 0x118   :  { %v11238_v25 = vadd.f32 %v11237_v13, %v11236_v38  ;;  %v11349_v8 = vpop.f32.mrb[17].mxu1  ;;  %v11239_v47 = vpop.f32.mrb[18].mxu0 }
 0x119   :  { %v11350_v10 = vadd.f32 %v11349_v8, %v11348_v16  ;;  %v11351_v15 = vpop.f32.mrb[18].mxu1  ;;  %v11240_v48 = vpop.f32.mrb[19].mxu0 }
 0x11a   :  { %v11241_v40 = vadd.f32 %v11240_v48, %v11239_v47  ;;  %v11352_v5 = vpop.f32.mrb[19].mxu1  ;;  %v14481_v47 = vcombine.low %v64_v39, %v68_v31  ;;  %v14483_v48 = vcombine.high %v72_v32, %v76_v57  ;;  %v80_v39 = vld [vmem:[%s17772_s2 + $0x118] sm:$0xff] }
 0x11b   :  { %v14468_v50 = vadd.f32 %v11350_v10, %v11238_v25  ;;  %v11353_v43 = vadd.f32 %v11352_v5, %v11351_v15  ;;  %v84_v31 = vld [vmem:[%s17772_s2 + $0x138] sm:$0xff] }
 0x11c   :  { %1878 = vmatmul.mubr.bf16.gmra.mrb[124].mxu1 %v14464_v27  ;;  %17986 = vst [vmem:[#allocation87_spill] sm:$0xff] %v14481_v47  ;;  %17987 = vst [vmem:[#allocation88_spill] sm:$0xff] %v14483_v48 }
 0x11d   :  { %v14471_v1 = vadd.f32 %v11353_v43, %v11241_v40  ;;  %9918 = vmatprep.mubr.msk.bf16.mxu1 %vm1301_vm1, %v14466_v55 }
 0x11e   :  { %v11242_v38 = vpop.f32.mrb[20].mxu0 }
 0x11f   :  { %v11354_v16 = vpop.f32.mrb[20].mxu1  ;;  %v11243_v13 = vpop.f32.mrb[21].mxu0 }
 0x120   :  { %v11244_v25 = vadd.f32 %v11243_v13, %v11242_v38  ;;  %v11355_v5 = vpop.f32.mrb[21].mxu1  ;;  %v11245_v8 = vpop.f32.mrb[22].mxu0 }
 0x121   :  { %v11356_v43 = vadd.f32 %v11355_v5, %v11354_v16  ;;  %v11357_v10 = vpop.f32.mrb[22].mxu1  ;;  %v11246_v15 = vpop.f32.mrb[23].mxu0 }
 0x122   :  { %v11247_v40 = vadd.f32 %v11246_v15, %v11245_v8  ;;  %v11358_v55 = vpop.f32.mrb[23].mxu1  ;;  %v14498_v8 = vcombine.low %v72_v32, %v76_v57  ;;  %v14500_v15 = vcombine.high %v80_v39, %v84_v31  ;;  %v88_v32 = vld [vmem:[%s17772_s2 + $0x158] sm:$0xff] }
 0x123   :  { %v14485_v27 = vadd.f32 %v11356_v43, %v11244_v25  ;;  %v11359_v22 = vadd.f32 %v11358_v55, %v11357_v10  ;;  %v92_v57 = vld [vmem:[%s17772_s2 + $0x178] sm:$0xff] }
 0x124   :  { %1886 = vmatmul.mubr.bf16.gmra.mrb[128].mxu1 %v14481_v47  ;;  %17988 = vst [vmem:[#allocation89_spill] sm:$0xff] %v14498_v8  ;;  %17989 = vst [vmem:[#allocation90_spill] sm:$0xff] %v14500_v15 }
 0x125   :  { %v14488_v18 = vadd.f32 %v11359_v22, %v11247_v40  ;;  %9919 = vmatprep.mubr.msk.bf16.mxu1 %vm1301_vm1, %v14483_v48 }
 0x126   :  { %v11248_v38 = vpop.f32.mrb[24].mxu0 }
 0x127   :  { %v11360_v16 = vpop.f32.mrb[24].mxu1  ;;  %v11249_v13 = vpop.f32.mrb[25].mxu0 }
 0x128   :  { %v11250_v25 = vadd.f32 %v11249_v13, %v11248_v38  ;;  %v11361_v55 = vpop.f32.mrb[25].mxu1  ;;  %v11251_v5 = vpop.f32.mrb[26].mxu0 }
 0x129   :  { %v11362_v22 = vadd.f32 %v11361_v55, %v11360_v16  ;;  %v11363_v43 = vpop.f32.mrb[26].mxu1  ;;  %v11252_v10 = vpop.f32.mrb[27].mxu0 }
 0x12a   :  { %v11253_v40 = vadd.f32 %v11252_v10, %v11251_v5  ;;  %v11364_v48 = vpop.f32.mrb[27].mxu1  ;;  %v14515_v5 = vcombine.low %v80_v39, %v84_v31  ;;  %v14517_v10 = vcombine.high %v88_v32, %v92_v57  ;;  %v96_v39 = vld [vmem:[%s17772_s2 + $0x198] sm:$0xff] }
 0x12b   :  { %v14502_v47 = vadd.f32 %v11362_v22, %v11250_v25  ;;  %v11365_v34 = vadd.f32 %v11364_v48, %v11363_v43  ;;  %v100_v31 = vld [vmem:[%s17772_s2 + $0x1b8] sm:$0xff] }
 0x12c   :  { %1894 = vmatmul.mubr.bf16.gmra.mrb[132].mxu1 %v14498_v8  ;;  %17990 = vst [vmem:[#allocation91_spill] sm:$0xff] %v14515_v5  ;;  %17991 = vst [vmem:[#allocation92_spill] sm:$0xff] %v14517_v10 }
 0x12d   :  { %v14505_v29 = vadd.f32 %v11365_v34, %v11253_v40  ;;  %9920 = vmatprep.mubr.msk.bf16.mxu1 %vm1301_vm1, %v14500_v15 }
 0x12e   :  { %v11254_v38 = vpop.f32.mrb[28].mxu0 }
 0x12f   :  { %v11366_v16 = vpop.f32.mrb[28].mxu1  ;;  %v11255_v13 = vpop.f32.mrb[29].mxu0 }
 0x130   :  { %v11256_v25 = vadd.f32 %v11255_v13, %v11254_v38  ;;  %v11367_v48 = vpop.f32.mrb[29].mxu1  ;;  %v11257_v55 = vpop.f32.mrb[30].mxu0 }
 0x131   :  { %v11368_v34 = vadd.f32 %v11367_v48, %v11366_v16  ;;  %v11369_v22 = vpop.f32.mrb[30].mxu1  ;;  %v11258_v43 = vpop.f32.mrb[31].mxu0 }
 0x132   :  { %v11259_v40 = vadd.f32 %v11258_v43, %v11257_v55  ;;  %v11370_v15 = vpop.f32.mrb[31].mxu1  ;;  %v14532_v55 = vcombine.low %v88_v32, %v92_v57  ;;  %v14534_v43 = vcombine.high %v96_v39, %v100_v31  ;;  %v104_v32 = vld [vmem:[%s17772_s2 + $0x1d8] sm:$0xff] }
 0x133   :  { %v14519_v8 = vadd.f32 %v11368_v34, %v11256_v25  ;;  %v11371_v53 = vadd.f32 %v11370_v15, %v11369_v22  ;;  %v108_v57 = vld [vmem:[%s17772_s2 + $0x1f8] sm:$0xff] }
 0x134   :  { %1902 = vmatmul.mubr.bf16.gmra.mrb[136].mxu1 %v14515_v5  ;;  %17992 = vst [vmem:[#allocation93_spill] sm:$0xff] %v14532_v55  ;;  %17993 = vst [vmem:[#allocation94_spill] sm:$0xff] %v14534_v43 }
 0x135   :  { %v14522_v4 = vadd.f32 %v11371_v53, %v11259_v40  ;;  %9921 = vmatprep.mubr.msk.bf16.mxu1 %vm1301_vm1, %v14517_v10 }
 0x136   :  { %v11260_v38 = vpop.f32.mrb[32].mxu0 }
 0x137   :  { %v11372_v16 = vpop.f32.mrb[32].mxu1  ;;  %v11261_v13 = vpop.f32.mrb[33].mxu0 }
 0x138   :  { %v11262_v25 = vadd.f32 %v11261_v13, %v11260_v38  ;;  %v11373_v15 = vpop.f32.mrb[33].mxu1  ;;  %v11263_v48 = vpop.f32.mrb[34].mxu0 }
 0x139   :  { %v11374_v53 = vadd.f32 %v11373_v15, %v11372_v16  ;;  %v11375_v34 = vpop.f32.mrb[34].mxu1  ;;  %v11264_v22 = vpop.f32.mrb[35].mxu0 }
 0x13a   :  { %v11265_v40 = vadd.f32 %v11264_v22, %v11263_v48  ;;  %v11376_v10 = vpop.f32.mrb[35].mxu1  ;;  %v14549_v48 = vcombine.low %v96_v39, %v100_v31  ;;  %v14551_v22 = vcombine.high %v104_v32, %v108_v57  ;;  %v112_v39 = vld [vmem:[%s17772_s2 + $0x218] sm:$0xff] }
 0x13b   :  { %v14536_v5 = vadd.f32 %v11374_v53, %v11262_v25  ;;  %v11377_v19 = vadd.f32 %v11376_v10, %v11375_v34  ;;  %v116_v31 = vld [vmem:[%s17772_s2 + $0x238] sm:$0xff] }
 0x13c   :  { %1910 = vmatmul.mubr.bf16.gmra.mrb[140].mxu1 %v14532_v55  ;;  %17994 = vst [vmem:[#allocation95_spill] sm:$0xff] %v14549_v48  ;;  %17995 = vst [vmem:[#allocation96_spill] sm:$0xff] %v14551_v22 }
 0x13d   :  { %v14539_v7 = vadd.f32 %v11377_v19, %v11265_v40  ;;  %9922 = vmatprep.mubr.msk.bf16.mxu1 %vm1301_vm1, %v14534_v43 }
 0x13e   :  { %v11266_v38 = vpop.f32.mrb[36].mxu0 }
 0x13f   :  { %v11378_v16 = vpop.f32.mrb[36].mxu1  ;;  %v11267_v13 = vpop.f32.mrb[37].mxu0 }
 0x140   :  { %v11268_v25 = vadd.f32 %v11267_v13, %v11266_v38  ;;  %v11379_v10 = vpop.f32.mrb[37].mxu1  ;;  %v11269_v15 = vpop.f32.mrb[38].mxu0 }
 0x141   :  { %v11380_v19 = vadd.f32 %v11379_v10, %v11378_v16  ;;  %v11381_v53 = vpop.f32.mrb[38].mxu1  ;;  %v11270_v34 = vpop.f32.mrb[39].mxu0 }
 0x142   :  { %v11271_v40 = vadd.f32 %v11270_v34, %v11269_v15  ;;  %v11382_v43 = vpop.f32.mrb[39].mxu1  ;;  %v14566_v15 = vcombine.low %v104_v32, %v108_v57  ;;  %v14568_v34 = vcombine.high %v112_v39, %v116_v31  ;;  %v120_v32 = vld [vmem:[%s17772_s2 + $0x258] sm:$0xff] }
 0x143   :  { %v14553_v55 = vadd.f32 %v11380_v19, %v11268_v25  ;;  %v11383_v58 = vadd.f32 %v11382_v43, %v11381_v53  ;;  %v124_v57 = vld [vmem:[%s17772_s2 + $0x278] sm:$0xff] }
 0x144   :  { %1918 = vmatmul.mubr.bf16.gmra.mrb[144].mxu1 %v14549_v48  ;;  %17996 = vst [vmem:[#allocation97_spill] sm:$0xff] %v14566_v15  ;;  %17997 = vst [vmem:[#allocation98_spill] sm:$0xff] %v14568_v34 }
 0x145   :  { %v14556_v30 = vadd.f32 %v11383_v58, %v11271_v40  ;;  %9923 = vmatprep.mubr.msk.bf16.mxu1 %vm1301_vm1, %v14551_v22 }
 0x146   :  { %v11272_v38 = vpop.f32.mrb[40].mxu0 }
 0x147   :  { %v11384_v16 = vpop.f32.mrb[40].mxu1  ;;  %v11273_v13 = vpop.f32.mrb[41].mxu0 }
 0x148   :  { %v11274_v25 = vadd.f32 %v11273_v13, %v11272_v38  ;;  %v11385_v43 = vpop.f32.mrb[41].mxu1  ;;  %v11275_v10 = vpop.f32.mrb[42].mxu0 }
 0x149   :  { %v11386_v58 = vadd.f32 %v11385_v43, %v11384_v16  ;;  %v11387_v19 = vpop.f32.mrb[42].mxu1  ;;  %v11276_v53 = vpop.f32.mrb[43].mxu0 }
 0x14a   :  { %v11277_v40 = vadd.f32 %v11276_v53, %v11275_v10  ;;  %v11388_v22 = vpop.f32.mrb[43].mxu1 }
 0x14b   :  { %v14570_v48 = vadd.f32 %v11386_v58, %v11274_v25  ;;  %v11389_v20 = vadd.f32 %v11388_v22, %v11387_v19  ;;  %v13029_v22 = vld [vmem:[%s17771_s0 + $0x234] sm:$0xff]   ;;  %v14589_v58 = vcombine.low %v112_v39, %v116_v31  ;;  %v13032_v39 = vld [vmem:[%s17771_s0 + $0x1fc] sm:$0xff]  }
 0x14c   :  { %1926 = vmatmul.mubr.bf16.gmra.mrb[148].mxu1 %v14566_v15  ;;  %11550 = vmatprep.subr.bf16.mxu1 %v13029_v22 }
 0x14d   :  { %v14573_v6 = vadd.f32 %v11389_v20, %v11277_v40  ;;  %9924 = vmatprep.mubr.msk.bf16.mxu1 %vm1301_vm1, %v14568_v34  ;;  %v13030_v20 = vld [vmem:[%s17771_s0 + $0x1f4] sm:$0xff]   ;;  %17998 = vst [vmem:[#allocation99_spill] sm:$0xff] %v14589_v58  ;;  %v14591_v34 = vcombine.high %v120_v32, %v124_v57 }
 0x14e   :  { %v11278_v38 = vpop.f32.mrb[44].mxu0  ;;  %11551 = vmatpush3.bf16.msra.mxu1 %v13030_v20  ;;  %v13034_v20 = vld [vmem:[%s17771_s0 + $0x204] sm:$0xff]  }
 0x14f   :  { %v11390_v16 = vpop.f32.mrb[44].mxu1  ;;  %v11279_v13 = vpop.f32.mrb[45].mxu0  ;;  %17999 = vst [vmem:[#allocation100_spill] sm:$0xff] %v14591_v34  ;;  %11552 = vmatprep.subr.bf16.mxu1 %v13031_v45 }
 0x150   :  { %v11280_v25 = vadd.f32 %v11279_v13, %v11278_v38  ;;  %v11391_v43 = vpop.f32.mrb[45].mxu1  ;;  %v11281_v10 = vpop.f32.mrb[46].mxu0  ;;  %v13033_v13 = vld [vmem:[%s17771_s0 + $0x244] sm:$0xff]  }
 0x151   :  { %v11392_v19 = vadd.f32 %v11391_v43, %v11390_v16  ;;  %v11393_v53 = vpop.f32.mrb[46].mxu1  ;;  %v11282_v40 = vpop.f32.mrb[47].mxu0  ;;  %v128_v16 = vld [vmem:[%s17772_s2 + $0x298] sm:$0xff] }
 0x152   :  { %v11283_v15 = vadd.f32 %v11282_v40, %v11281_v10  ;;  %v11394_v60 = vpop.f32.mrb[47].mxu1  ;;  %11553 = vmatpush3.bf16.msra.mxu1 %v13032_v39 }
 0x153   :  { %v14596_v33 = vadd.f32 %v11392_v19, %v11280_v25  ;;  %v11395_v38 = vadd.f32 %v11394_v60, %v11393_v53  ;;  %v132_v60 = vld [vmem:[%s17772_s2 + $0x2b8] sm:$0xff]  ;;  %v14618_v19 = vcombine.low %v120_v32, %v124_v57  ;;  %11554 = vmatprep.subr.bf16.mxu1 %v13033_v13  ;;  %v13036_v32 = vld [vmem:[%s17771_s0 + $0x20c] sm:$0xff]  }
 0x154   :  { %1934 = vmatmul.mubr.bf16.gmra.mrb[152].mxu1 %v14589_v58  ;;  %v14620_v39 = vcombine.high %v128_v16, %v132_v60 }
 0x155   :  { %v14602_v31 = vadd.f32 %v11395_v38, %v11283_v15  ;;  %9925 = vmatprep.mubr.msk.bf16.mxu1 %vm1301_vm1, %v14591_v34  ;;  %18000 = vst [vmem:[#allocation101_spill] sm:$0xff] %v14618_v19 }
 0x156   :  { %v11284_v22 = vpop.f32.mrb[48].mxu0  ;;  %18001 = vst [vmem:[#allocation102_spill] sm:$0xff] %v14620_v39  ;;  %11555 = vmatpush3.bf16.msra.mxu1 %v13034_v20  ;;  %v13038_v20 = vld [vmem:[%s17771_s0 + $0x214] sm:$0xff]  }
 0x157   :  { %v11396_v45 = vpop.f32.mrb[48].mxu1  ;;  %v11285_v15 = vpop.f32.mrb[49].mxu0  ;;  %11556 = vmatprep.subr.bf16.mxu1 %v13035_v23 }
 0x158   :  { %v11286_v25 = vadd.f32 %v11285_v15, %v11284_v22  ;;  %v11397_v43 = vpop.f32.mrb[49].mxu1  ;;  %v11287_v10 = vpop.f32.mrb[50].mxu0  ;;  %v13037_v15 = vld [vmem:[%s17771_s0 + $0x254] sm:$0xff]  }
 0x159   :  { %v11398_v53 = vadd.f32 %v11397_v43, %v11396_v45  ;;  %v11399_v40 = vpop.f32.mrb[50].mxu1  ;;  %v11288_v38 = vpop.f32.mrb[51].mxu0  ;;  %v136_v45 = vld [vmem:[%s17772_s2 + $0x2d8] sm:$0xff] }
 0x15a   :  { %v11289_v34 = vadd.f32 %v11288_v38, %v11287_v10  ;;  %v11400_v58 = vpop.f32.mrb[51].mxu1  ;;  %11557 = vmatpush3.bf16.msra.mxu1 %v13036_v32 }
 0x15b   :  { %v14625_v21 = vadd.f32 %v11398_v53, %v11286_v25  ;;  %v11401_v22 = vadd.f32 %v11400_v58, %v11399_v40  ;;  %v140_v58 = vld [vmem:[%s17772_s2 + $0x2f8] sm:$0xff]  ;;  %v14647_v53 = vcombine.low %v128_v16, %v132_v60  ;;  %11558 = vmatprep.subr.bf16.mxu1 %v13037_v15 }
 0x15c   :  { %1942 = vmatmul.mubr.bf16.gmra.mrb[156].mxu1 %v14618_v19  ;;  %v14649_v32 = vcombine.high %v136_v45, %v140_v58 }
 0x15d   :  { %v14631_v57 = vadd.f32 %v11401_v22, %v11289_v34  ;;  %9926 = vmatprep.mubr.msk.bf16.mxu1 %vm1301_vm1, %v14620_v39  ;;  %18002 = vst [vmem:[#allocation103_spill] sm:$0xff] %v14647_v53 }
 0x15e   :  { %v11290_v13 = vpop.f32.mrb[52].mxu0  ;;  %18003 = vst [vmem:[#allocation104_spill] sm:$0xff] %v14649_v32  ;;  %11559 = vmatpush3.bf16.msra.mxu1 %v13038_v20 }
 0x15f   :  { %v11402_v23 = vpop.f32.mrb[52].mxu1  ;;  %v11291_v34 = vpop.f32.mrb[53].mxu0  ;;  %11560 = vmatprep.subr.bf16.mxu1 %v13039_v11 }
 0x160   :  { %v11292_v25 = vadd.f32 %v11291_v34, %v11290_v13  ;;  %v11403_v43 = vpop.f32.mrb[53].mxu1  ;;  %v11293_v10 = vpop.f32.mrb[54].mxu0  ;;  %v13040_v13 = vld [vmem:[%s17771_s0 + $0x21c] sm:$0xff]   ;;  %v13041_v34 = vld [vmem:[%s17771_s0 + $0x264] sm:$0xff]  }
 0x161   :  { %v11404_v40 = vadd.f32 %v11403_v43, %v11402_v23  ;;  %v11405_v38 = vpop.f32.mrb[54].mxu1  ;;  %v11294_v22 = vpop.f32.mrb[55].mxu0  ;;  %v148_v23 = vld [vmem:[%s17772_s2 + $0x338] sm:$0xff]  ;;  %v14676_v43 = vcombine.low %v136_v45, %v140_v58  ;;  %v13044_v45 = vld [vmem:[%s17771_s0 + $0x22c] sm:$0xff]  }
 0x162   :  { %v11295_v39 = vadd.f32 %v11294_v22, %v11293_v10  ;;  %v11406_v19 = vpop.f32.mrb[55].mxu1  ;;  %11561 = vmatpush3.bf16.msra.mxu1 %v13040_v13 }
 0x163   :  { %v11407_v9 = vadd.f32 %v11406_v19, %v11405_v38  ;;  %v14657_v16 = vadd.f32 %v11404_v40, %v11292_v25  ;;  %v144_v19 = vld [vmem:[%s17772_s2 + $0x318] sm:$0xff]  ;;  %18006 = vst [vmem:[#allocation107_spill] sm:$0xff] %v14676_v43  ;;  %11562 = vmatprep.subr.bf16.mxu1 %v13041_v34 }
 0x164   :  { %1950 = vmatmul.mubr.bf16.gmra.mrb[160].mxu1 %v14647_v53  ;;  %v14678_v13 = vcombine.high %v144_v19, %v148_v23  ;;  %v13043_v53 = vld [vmem:[%s17771_s0 + $0x26c] sm:$0xff]  }
 0x165   :  { %18004 = vst [vmem:[#allocation105_spill] sm:$0xff] %v14657_v16  ;;  %9927 = vmatprep.mubr.msk.bf16.mxu1 %vm1301_vm1, %v14649_v32  ;;  %v14662_v60 = vadd.f32 %v11407_v9, %v11295_v39  ;;  %v13042_v9 = vld [vmem:[%s17771_s0 + $0x224] sm:$0xff]  }
 0x166   :  { %v11296_v15 = vpop.f32.mrb[56].mxu0  ;;  %18007 = vst [vmem:[#allocation108_spill] sm:$0xff] %v14678_v13  ;;  %11563 = vmatpush3.bf16.msra.mxu1 %v13042_v9 }
 0x167   :  { %18005 = vst [vmem:[#allocation106_spill] sm:$0xff] %v14662_v60  ;;  %v11408_v11 = vpop.f32.mrb[56].mxu1  ;;  %v11297_v20 = vpop.f32.mrb[57].mxu0  ;;  %11564 = vmatprep.subr.bf16.mxu1 %v13043_v53  ;;  %v156_v53 = vld [vmem:[%s17772_s2 + $0x378] sm:$0xff] }
 0x168   :  { %v11409_v39 = vpop.f32.mrb[57].mxu1  ;;  %v11299_v25 = vpop.f32.mrb[58].mxu0  ;;  %v11298_v10 = vadd.f32 %v11297_v20, %v11296_v15  ;;  %v14692_v15 = vld [vmem:[%s17773_s3] sm:$0xff]  }
 0x169   :  { %v11410_v40 = vadd.f32 %v11409_v39, %v11408_v11  ;;  %v11411_v38 = vpop.f32.mrb[58].mxu1  ;;  %v11300_v22 = vpop.f32.mrb[59].mxu0  ;;  %18008 = vst [vmem:[#allocation109_spill] sm:$0xff] %v14692_v15  ;;  %v152_v11 = vld [vmem:[%s17772_s2 + $0x358] sm:$0xff]  ;;  %12214 = vmatprep.subr.bf16.mxu0 %v14692_v15 }
 0x16a   :  { %v11412_v32 = vpop.f32.mrb[59].mxu1  ;;  %v11301_v60 = vadd.f32 %v11300_v22, %v11299_v25  ;;  %11565 = vmatpush3.bf16.msra.mxu1 %v13044_v45  ;;  %12215 = vmatpush3.bf16.msra.mxu0 %v14692_v15  ;;  %v14713_v45 = vcombine.high %v152_v11, %v156_v53 }
 0x16b   :  { %v11413_v16 = vadd.f32 %v11412_v32, %v11411_v38  ;;  %v14686_v58 = vadd.f32 %v11410_v40, %v11298_v10 }
 0x16c   :  { %1958 = vmatmul.mubr.bf16.gmra.mrb[164].mxu1 %v14676_v43  ;;  %18012 = vst [vmem:[#allocation113_spill] sm:$0xff] %v14713_v45 }
 0x16d   :  { %9928 = vmatprep.mubr.msk.bf16.mxu1 %vm1301_vm1, %v14678_v13  ;;  %v14696_v34 = vadd.f32 %v11413_v16, %v11301_v60  ;;  %v14706_v16 = vcombine.low %v144_v19, %v148_v23  ;;  %v14711_v60 = vld [vmem:[%s17773_s3 + $0x8] sm:$0xff]  }
 0x16e   :  { %v11302_v32 = vpop.f32.mrb[60].mxu0  ;;  %18011 = vst [vmem:[#allocation112_spill] sm:$0xff] %v14711_v60  ;;  %12216 = vmatprep.subr.bf16.mxu0 %v14711_v60 }
 0x16f   :  { %18009 = vst [vmem:[#allocation110_spill] sm:$0xff] %v14696_v34  ;;  %v11414_v20 = vpop.f32.mrb[60].mxu1  ;;  %v11303_v9 = vpop.f32.mrb[61].mxu0  ;;  %18010 = vst [vmem:[#allocation111_spill] sm:$0xff] %v14706_v16  ;;  %12217 = vmatpush3.bf16.msra.mxu0 %v14711_v60 }
 0x170   :  { %v11304_v39 = vadd.f32 %v11303_v9, %v11302_v32  ;;  %v11415_v25 = vpop.f32.mrb[61].mxu1  ;;  %v11305_v10 = vpop.f32.mrb[62].mxu0 }
 0x171   :  { %v11416_v40 = vadd.f32 %v11415_v25, %v11414_v20  ;;  %v11417_v38 = vpop.f32.mrb[62].mxu1  ;;  %v11306_v22 = vpop.f32.mrb[63].mxu0  ;;  %v160_v20 = vld [vmem:[%s17772_s2 + $0x398] sm:$0xff] }
 0x172   :  { %v11307_v13 = vadd.f32 %v11306_v22, %v11305_v10  ;;  %v11418_v43 = vpop.f32.mrb[63].mxu1 }
 0x173   :  { %v11419_v15 = vadd.f32 %v11418_v43, %v11417_v38  ;;  %v14717_v32 = vadd.f32 %v11416_v40, %v11304_v39  ;;  %v164_v43 = vld [vmem:[%s17772_s2 + $0x3b8] sm:$0xff]  ;;  %v14730_v38 = vcombine.low %v152_v11, %v156_v53 }
 0x174   :  { %1966 = vmatmul.mubr.bf16.gmra.mrb[168].mxu1 %v14706_v16 }
 0x175   :  { %18013 = vst [vmem:[#allocation114_spill] sm:$0xff] %v14717_v32  ;;  %9929 = vmatprep.mubr.msk.bf16.mxu1 %vm1301_vm1, %v14713_v45  ;;  %v14722_v19 = vadd.f32 %v11419_v15, %v11307_v13  ;;  %18015 = vst [vmem:[#allocation116_spill] sm:$0xff] %v14730_v38  ;;  %v14732_v15 = vcombine.high %v160_v20, %v164_v43 }
 0x176   :  { %v11436_v23 = vpop.f32.mrb[64].mxu0 }
 0x177   :  { %18014 = vst [vmem:[#allocation115_spill] sm:$0xff] %v14722_v19  ;;  %v11448_v9 = vpop.f32.mrb[64].mxu1  ;;  %v11437_v25 = vpop.f32.mrb[65].mxu0  ;;  %18016 = vst [vmem:[#allocation117_spill] sm:$0xff] %v14732_v15 }
 0x178   :  { %v11438_v39 = vadd.f32 %v11437_v25, %v11436_v23  ;;  %v11449_v10 = vpop.f32.mrb[65].mxu1  ;;  %v11439_v40 = vpop.f32.mrb[66].mxu0  ;;  %v14755_v25 = vcombine.low %v160_v20, %v164_v43 }
 0x179   :  { %v11450_v22 = vadd.f32 %v11449_v10, %v11448_v9  ;;  %v11451_v45 = vpop.f32.mrb[66].mxu1  ;;  %v11440_v13 = vpop.f32.mrb[67].mxu0 }
 0x17a   :  { %v14735_v16 = vadd.f32 %v11438_v39, %v14402_v42  ;;  %v11441_v60 = vadd.f32 %v11440_v13, %v11439_v40  ;;  %v11452_v19 = vpop.f32.mrb[67].mxu1  ;;  %v168_v42 = vld [vmem:[%s17772_s2 + $0x3d8] sm:$0xff] }
 0x17b   :  { %v11453_v32 = vadd.f32 %v11452_v19, %v11451_v45  ;;  %v14738_v34 = vadd.f32 %v11450_v22, %v14434_v2  ;;  %v172_v2 = vld [vmem:[%s17772_s2 + $0x3f8] sm:$0xff]  ;;  %s13561_s2 = smov 125  }
 0x17c   :  { %v14741_v23 = vadd.f32 %v11441_v60, %v14406_v28  ;;  %1974 = vmatmul.mubr.bf16.gmra.mrb[172].mxu1 %v14730_v38 }
 0x17d   :  { %9930 = vmatprep.mubr.msk.bf16.mxu1 %vm1301_vm1, %v14732_v15  ;;  %v14747_v11 = vadd.f32 %v11453_v32, %v14437_v62  ;;  %v14757_v32 = vcombine.high %v168_v42, %v172_v2 }
 0x17e   :  { %v11442_v53 = vpop.f32.mrb[68].mxu0 }
 0x17f   :  { %v11454_v45 = vpop.f32.mrb[68].mxu1  ;;  %v11443_v28 = vpop.f32.mrb[69].mxu0 }
 0x180   :  { %v11444_v60 = vadd.f32 %v11443_v28, %v11442_v53  ;;  %v11455_v19 = vpop.f32.mrb[69].mxu1  ;;  %v11445_v9 = vpop.f32.mrb[70].mxu0 }
 0x181   :  { %v11456_v39 = vadd.f32 %v11455_v19, %v11454_v45  ;;  %v11457_v10 = vpop.f32.mrb[70].mxu1  ;;  %v11446_v62 = vpop.f32.mrb[71].mxu0  ;;  %v14774_v45 = vcombine.low %v168_v42, %v172_v2 }
 0x182   :  { %v14760_v40 = vadd.f32 %v11444_v60, %v14418_v46  ;;  %v11447_v22 = vadd.f32 %v11446_v62, %v11445_v9  ;;  %v11458_v13 = vpop.f32.mrb[71].mxu1 }
 0x183   :  { %v11459_v15 = vadd.f32 %v11458_v13, %v11457_v10  ;;  %v14763_v38 = vadd.f32 %v11456_v39, %v14451_v52 }
 0x184   :  { %v14766_v53 = vadd.f32 %v11447_v22, %v14422_v17  ;;  %1982 = vmatmul.mubr.bf16.gmra.mrb[176].mxu1 %v14755_v25 }
 0x185   :  { %9931 = vmatprep.mubr.msk.bf16.mxu1 %vm1301_vm1, %v14757_v32  ;;  %v14772_v20 = vadd.f32 %v11459_v15, %v14454_v59 }
 0x187   :  { %v11460_v43 = vpop.f32.mrb[72].mxu1 }
 0x188   :  { %v11461_v46 = vpop.f32.mrb[73].mxu1 }
 0x189   :  { %v11462_v28 = vadd.f32 %v11461_v46, %v11460_v43  ;;  %v11463_v60 = vpop.f32.mrb[74].mxu1 }
 0x18a   :  { %v11464_v19 = vpop.f32.mrb[75].mxu1 }
 0x18b   :  { %v11465_v52 = vadd.f32 %v11464_v19, %v11463_v60  ;;  %v14777_v9 = vadd.f32 %v11462_v28, %v14468_v50 }
 0x18c   :  { %1990 = vmatmul.mubr.bf16.gmra.mrb[180].mxu1 %v14774_v45 }
 0x18d   :  { %2860 = vmatprep.mubr.bf16.mxu1 %v13745_v36  ;;  %v14782_v17 = vadd.f32 %v11465_v52, %v14471_v1 }
 0x18f   :  { %v11466_v59 = vpop.f32.mrb[76].mxu1 }
 0x190   :  { %v11467_v15 = vpop.f32.mrb[77].mxu1 }
 0x191   :  { %v11468_v39 = vadd.f32 %v11467_v15, %v11466_v59  ;;  %v11469_v10 = vpop.f32.mrb[78].mxu1 }
 0x192   :  { %v11470_v42 = vpop.f32.mrb[79].mxu1 }
 0x193   :  { %v11471_v2 = vadd.f32 %v11470_v42, %v11469_v10  ;;  %v14785_v62 = vadd.f32 %v11468_v39, %v14485_v27 }
 0x194   :  { %2861 = vmatmul.mubr.bf16.vlgmr.msra.gmra.mrb[184].mxu1 %v13743_v35 }
 0x195   :  { %2868 = vmatprep.mubr.bf16.mxu1 %v13769_v44  ;;  %v14790_v50 = vadd.f32 %v11471_v2, %v14488_v18 }
 0x197   :  { %v11472_v36 = vpop.f32.mrb[80].mxu1 }
 0x198   :  { %v11473_v22 = vpop.f32.mrb[81].mxu1 }
 0x199   :  { %v11474_v1 = vadd.f32 %v11473_v22, %v11472_v36  ;;  %v11475_v13 = vpop.f32.mrb[82].mxu1 }
 0x19a   :  { %v11476_v43 = vpop.f32.mrb[83].mxu1 }
 0x19b   :  { %v11477_v46 = vadd.f32 %v11476_v43, %v11475_v13  ;;  %v14793_v28 = vadd.f32 %v11474_v1, %v14502_v47 }
 0x19c   :  { %2869 = vmatmul.mubr.bf16.gmra.mrb[188].mxu1 %v13800_v54 }
 0x19d   :  { %2876 = vmatprep.mubr.bf16.mxu1 %v13804_v56  ;;  %v14798_v35 = vadd.f32 %v11477_v46, %v14505_v29 }
 0x19f   :  { %v11478_v44 = vpop.f32.mrb[84].mxu1 }
 0x1a0   :  { %v11479_v27 = vpop.f32.mrb[85].mxu1 }
 0x1a1   :  { %v11480_v18 = vadd.f32 %v11479_v27, %v11478_v44  ;;  %v11481_v60 = vpop.f32.mrb[86].mxu1 }
 0x1a2   :  { %v11482_v19 = vpop.f32.mrb[87].mxu1 }
 0x1a3   :  { %v11483_v52 = vadd.f32 %v11482_v19, %v11481_v60  ;;  %v14801_v59 = vadd.f32 %v11480_v18, %v14519_v8 }
 0x1a4   :  { %2877 = vmatmul.mubr.bf16.gmra.mrb[192].mxu1 %v13830_v0 }
 0x1a5   :  { %2884 = vmatprep.mubr.bf16.mxu1 %v13837_v3  ;;  %v14806_v54 = vadd.f32 %v11483_v52, %v14522_v4  ;;  %v13047_v3 = vld [vmem:[%s17771_s0 + $0x2b4] sm:$0xff]  }
 0x1a6   :  { %11662 = vmatprep.subr.bf16.mxu0 %v13047_v3  ;;  %v18017_v3 = vld [vmem:[#allocation105_spill] sm:$0xff] }
 0x1a7   :  { %v11484_v56 = vpop.f32.mrb[88].mxu1 }
 0x1a8   :  { %v11485_v47 = vpop.f32.mrb[89].mxu1 }
 0x1a9   :  { %v11486_v29 = vadd.f32 %v11485_v47, %v11484_v56  ;;  %v11487_v15 = vpop.f32.mrb[90].mxu1 }
 0x1aa   :  { %v11488_v39 = vpop.f32.mrb[91].mxu1 }
 0x1ab   :  { %v11489_v10 = vadd.f32 %v11488_v39, %v11487_v15  ;;  %v14809_v42 = vadd.f32 %v11486_v29, %v14536_v5 }
 0x1ac   :  { %2885 = vmatmul.mubr.bf16.gmra.mrb[196].mxu1 %v13866_v12 }
 0x1ad   :  { %2892 = vmatprep.mubr.bf16.mxu1 %v13870_v14  ;;  %v14814_v0 = vadd.f32 %v11489_v10, %v14539_v7 }
 0x1af   :  { %v11490_v4 = vpop.f32.mrb[92].mxu1 }
 0x1b0   :  { %v11491_v8 = vpop.f32.mrb[93].mxu1 }
 0x1b1   :  { %v11492_v2 = vadd.f32 %v11491_v8, %v11490_v4  ;;  %v11493_v36 = vpop.f32.mrb[94].mxu1  ;;  %v13060_v8 = vld [vmem:[%s17771_s0 + $0x2fc] sm:$0xff]  }
 0x1b2   :  { %v11494_v22 = vpop.f32.mrb[95].mxu1 }
 0x1b3   :  { %v11495_v1 = vadd.f32 %v11494_v22, %v11493_v36  ;;  %v14820_v5 = vadd.f32 %v11492_v2, %v14553_v55  ;;  %v18018_v2 = vld [vmem:[#allocation20_spill] sm:$0xff]  ;;  %v18019_v36 = vld [vmem:[#allocation22_spill] sm:$0xff] }
 0x1b4   :  { %2893 = vmatmul.mubr.bf16.gmra.mrb[200].mxu1 %v13902_v24  ;;  %v18020_v22 = vld [vmem:[#allocation106_spill] sm:$0xff] }
 0x1b5   :  { %2900 = vmatprep.mubr.bf16.mxu1 %v13906_v26  ;;  %v14825_v12 = vadd.f32 %v11495_v1, %v14556_v30 }
 0x1b7   :  { %v11496_v14 = vpop.f32.mrb[96].mxu1 }
 0x1b8   :  { %v11497_v7 = vpop.f32.mrb[97].mxu1 }
 0x1b9   :  { %v11498_v13 = vadd.f32 %v11497_v7, %v11496_v14  ;;  %v11499_v43 = vpop.f32.mrb[98].mxu1  ;;  %v13063_v14 = vld [vmem:[%s17771_s0 + $0x344] sm:$0xff]  }
 0x1ba   :  { %v11500_v46 = vpop.f32.mrb[99].mxu1 }
 0x1bb   :  { %v11501_v44 = vadd.f32 %v11500_v46, %v11499_v43  ;;  %v14828_v27 = vadd.f32 %v11498_v13, %v14570_v48  ;;  %v13064_v13 = vld [vmem:[%s17771_s0 + $0x304] sm:$0xff]  }
 0x1bc   :  { %2901 = vmatmul.mubr.bf16.gmra.mrb[204].mxu1 %v13933_v37 }
 0x1bd   :  { %2908 = vmatprep.mubr.bf16.mxu1 %v13937_v41  ;;  %v14833_v24 = vadd.f32 %v11501_v44, %v14573_v6 }
 0x1bf   :  { %v11502_v26 = vpop.f32.mrb[100].mxu1 }
 0x1c0   :  { %v11503_v55 = vpop.f32.mrb[101].mxu1 }
 0x1c1   :  { %v11504_v30 = vadd.f32 %v11503_v55, %v11502_v26  ;;  %v11505_v18 = vpop.f32.mrb[102].mxu1  ;;  %v13065_v55 = vld [vmem:[%s17771_s0 + $0x34c] sm:$0xff]  }
 0x1c2   :  { %v11506_v60 = vpop.f32.mrb[103].mxu1 }
 0x1c3   :  { %v11507_v19 = vadd.f32 %v11506_v60, %v11505_v18  ;;  %v14836_v52 = vadd.f32 %v11504_v30, %v14596_v33  ;;  %v13066_v60 = vld [vmem:[%s17771_s0 + $0x30c] sm:$0xff]  }
 0x1c4   :  { %2909 = vmatmul.mubr.bf16.gmra.mrb[208].mxu1 %v13957_v49 }
 0x1c5   :  { %2916 = vmatprep.mubr.bf16.mxu1 %v13961_v51  ;;  %v14841_v37 = vadd.f32 %v11507_v19, %v14602_v31  ;;  %v13057_v51 = vld [vmem:[%s17771_s0 + $0x334] sm:$0xff]   ;;  %v18021_v19 = vld [vmem:[#allocation24_spill] sm:$0xff] }
 0x1c6   :  { %v13058_v31 = vld [vmem:[%s17771_s0 + $0x2f4] sm:$0xff]   ;;  %11774 = vmatprep.subr.bf16.mxu1 %v13057_v51 }
 0x1c7   :  { %v11508_v41 = vpop.f32.mrb[104].mxu1  ;;  %11775 = vmatpush3.bf16.msra.mxu1 %v13058_v31 }
 0x1c8   :  { %v11509_v48 = vpop.f32.mrb[105].mxu1 }
 0x1c9   :  { %v11510_v6 = vadd.f32 %v11509_v48, %v11508_v41  ;;  %v11511_v56 = vpop.f32.mrb[106].mxu1  ;;  %v18022_v41 = vld [vmem:[#allocation26_spill] sm:$0xff] }
 0x1ca   :  { %v11512_v47 = vpop.f32.mrb[107].mxu1  ;;  %v18023_v48 = vld [vmem:[#allocation110_spill] sm:$0xff] }
 0x1cb   :  { %v11513_v29 = vadd.f32 %v11512_v47, %v11511_v56  ;;  %v14844_v15 = vadd.f32 %v11510_v6, %v14625_v21  ;;  %v13069_v56 = vld [vmem:[%s17771_s0 + $0x354] sm:$0xff]  }
 0x1cc   :  { %2917 = vmatmul.mubr.bf16.gmra.mrb[212].mxu1 %v13981_v61 }
 0x1cd   :  { %2924 = vmatprep.mubr.bf16.mxu1 %v13985_v63  ;;  %v14849_v49 = vadd.f32 %v11513_v29, %v14631_v57  ;;  %v13059_v63 = vld [vmem:[%s17771_s0 + $0x33c] sm:$0xff]  }
 0x1ce   :  { %11776 = vmatprep.subr.bf16.mxu1 %v13059_v63  ;;  %v13072_v63 = vld [vmem:[%s17771_s0 + $0x31c] sm:$0xff]  }
 0x1cf   :  { %v11514_v33 = vpop.f32.mrb[108].mxu1  ;;  %11777 = vmatpush3.bf16.msra.mxu1 %v13060_v8  ;;  %v18027_v8 = vld [vmem:[#allocation115_spill] sm:$0xff] }
 0x1d0   :  { %v11515_v39 = vpop.f32.mrb[109].mxu1  ;;  %11778 = vmatprep.subr.bf16.mxu1 %v13063_v14  ;;  %v13076_v14 = vld [vmem:[%s17771_s0 + $0x324] sm:$0xff]  }
 0x1d1   :  { %v11516_v21 = vadd.f32 %v11515_v39, %v11514_v33  ;;  %v11517_v10 = vpop.f32.mrb[110].mxu1  ;;  %v13071_v39 = vld [vmem:[%s17771_s0 + $0x35c] sm:$0xff]  }
 0x1d2   :  { %v11518_v61 = vpop.f32.mrb[111].mxu1 }
 0x1d3   :  { %v11519_v57 = vadd.f32 %v11518_v61, %v11517_v10  ;;  %v14861_v4 = vadd.f32 %v11516_v21, %v18017_v3  ;;  %11779 = vmatpush3.bf16.msra.mxu1 %v13064_v13  ;;  %v18024_v10 = vld [vmem:[#allocation114_spill] sm:$0xff] }
 0x1d4   :  { %2925 = vmatmul.mubr.bf16.gmra.mrb[216].mxu1 %v18018_v2  ;;  %11780 = vmatprep.subr.bf16.mxu1 %v13065_v55  ;;  %v18026_v3 = vld [vmem:[#allocation30_spill] sm:$0xff] }
 0x1d5   :  { %2932 = vmatprep.mubr.bf16.mxu1 %v18019_v36  ;;  %v14869_v1 = vadd.f32 %v11519_v57, %v18020_v22  ;;  %v18025_v57 = vld [vmem:[#allocation28_spill] sm:$0xff] }
 0x1d6   :  { %v13075_v36 = vld [vmem:[%s17771_s0 + $0x364] sm:$0xff]  }
 0x1d7   :  { %v11520_v7 = vpop.f32.mrb[112].mxu1  ;;  %11781 = vmatpush3.bf16.msra.mxu1 %v13066_v60  ;;  %v18028_v60 = vld [vmem:[#allocation32_spill] sm:$0xff] }
 0x1d8   :  { %v11521_v43 = vpop.f32.mrb[113].mxu1  ;;  %11782 = vmatprep.subr.bf16.mxu1 %v13069_v56 }
 0x1d9   :  { %v11522_v46 = vadd.f32 %v11521_v43, %v11520_v7  ;;  %v11523_v44 = vpop.f32.mrb[114].mxu1  ;;  %v13077_v7 = vld [vmem:[%s17771_s0 + $0x36c] sm:$0xff]  }
 0x1da   :  { %v11524_v26 = vpop.f32.mrb[115].mxu1 }
 0x1db   :  { %v11525_v30 = vadd.f32 %v11524_v26, %v11523_v44  ;;  %v14881_v18 = vadd.f32 %v11522_v46, %v14686_v58  ;;  %v13070_v58 = vld [vmem:[%s17771_s0 + $0x314] sm:$0xff]   ;;  %v13078_v44 = vld [vmem:[%s17771_s0 + $0x32c] sm:$0xff]  }
 0x1dc   :  { %2933 = vmatmul.mubr.bf16.gmra.mrb[220].mxu1 %v18021_v19  ;;  %v18029_v19 = vld [vmem:[#allocation34_spill] sm:$0xff] }
 0x1dd   :  { %2940 = vmatprep.mubr.bf16.mxu1 %v18022_v41  ;;  %v14889_v6 = vadd.f32 %v11525_v30, %v18023_v48  ;;  %11783 = vmatpush3.bf16.msra.mxu1 %v13070_v58 }
 0x1de   :  { %11784 = vmatprep.subr.bf16.mxu1 %v13071_v39  ;;  %v18032_v39 = vld [vmem:[#allocation38_spill] sm:$0xff] }
 0x1df   :  { %v11526_v47 = vpop.f32.mrb[116].mxu1 }
 0x1e0   :  { %v11527_v29 = vpop.f32.mrb[117].mxu1 }
 0x1e1   :  { %v11528_v51 = vadd.f32 %v11527_v29, %v11526_v47  ;;  %v11529_v33 = vpop.f32.mrb[118].mxu1  ;;  %11785 = vmatpush3.bf16.msra.mxu1 %v13072_v63  ;;  %v13048_v29 = vld [vmem:[%s17771_s0 + $0x274] sm:$0xff]   ;;  %v13051_v63 = vld [vmem:[%s17771_s0 + $0x2c4] sm:$0xff]  }
 0x1e2   :  { %v11530_v31 = vpop.f32.mrb[119].mxu1  ;;  %11786 = vmatprep.subr.bf16.mxu1 %v13075_v36  ;;  %v13052_v36 = vld [vmem:[%s17771_s0 + $0x284] sm:$0xff]  }
 0x1e3   :  { %v11531_v21 = vadd.f32 %v11530_v31, %v11529_v33  ;;  %v14901_v61 = vadd.f32 %v11528_v51, %v18024_v10  ;;  %v13049_v33 = vld [vmem:[%s17771_s0 + $0x2bc] sm:$0xff]   ;;  %v18031_v31 = vld [vmem:[#allocation36_spill] sm:$0xff] }
 0x1e4   :  { %2941 = vmatmul.mubr.bf16.gmra.mrb[224].mxu1 %v18025_v57 }
 0x1e5   :  { %2948 = vmatprep.mubr.bf16.mxu1 %v18026_v3  ;;  %v14909_v2 = vadd.f32 %v11531_v21, %v18027_v8  ;;  %11787 = vmatpush3.bf16.msra.mxu1 %v13076_v14  ;;  %v18033_v14 = vld [vmem:[#allocation40_spill] sm:$0xff] }
 0x1e6   :  { %11788 = vmatprep.subr.bf16.mxu1 %v13077_v7  ;;  %v18034_v7 = vld [vmem:[#allocation42_spill] sm:$0xff] }
 0x1e7   :  { %v1871_v22 = vpop.f32.mrb[120].mxu1 }
 0x1e8   :  { %v1872_v13 = vadd.f32 %v1871_v22, %v14735_v16  ;;  %v1873_v43 = vpop.f32.mrb[121].mxu1  ;;  %v18030_v16 = vld [vmem:[#allocation109_spill] sm:$0xff] }
 0x1e9   :  { %v1874_v46 = vpop.f32.mrb[122].mxu1  ;;  %11789 = vmatpush3.bf16.msra.mxu1 %v13078_v44  ;;  %v13055_v44 = vld [vmem:[%s17771_s0 + $0x2d4] sm:$0xff]  }
 0x1ea   :  { %v1875_v26 = vadd.f32 %v1874_v46, %v14741_v23  ;;  %v1876_v55 = vpop.f32.mrb[123].mxu1  ;;  %12250 = vmatprep.subr.bf16.mxu1 %v18030_v16 }
 0x1ec   :  { %v1998_v30 = vpack.c.bf16 %v1875_v26, %v1872_v13  ;;  %2949 = vmatmul.mubr.bf16.gmra.mrb[228].mxu1 %v18028_v60  ;;  %v13056_v60 = vld [vmem:[%s17771_s0 + $0x294] sm:$0xff]  }
 0x1ed   :  { %2956 = vmatprep.mubr.bf16.mxu1 %v18029_v19 }
 0x1ee   :  { %12218 = vmatprep.mubr.msk.bf16.mxu0 %vm2026_vm2, %v1998_v30 }
 0x1ef   :  { %v1879_v41 = vpop.f32.mrb[124].mxu1 }
 0x1f0   :  { %v1880_v48 = vadd.f32 %v1879_v41, %v14760_v40  ;;  %v1881_v56 = vpop.f32.mrb[125].mxu1  ;;  %v18035_v41 = vld [vmem:[#allocation44_spill] sm:$0xff] }
 0x1f1   :  { %v1882_v47 = vpop.f32.mrb[126].mxu1 }
 0x1f2   :  { %v1883_v23 = vadd.f32 %v1882_v47, %v14766_v53  ;;  %v1884_v58 = vpop.f32.mrb[127].mxu1  ;;  %v13050_v53 = vld [vmem:[%s17771_s0 + $0x27c] sm:$0xff]  }
 0x1f3   :  { %v13067_v58 = vld [vmem:[%s17771_s0 + $0x2e4] sm:$0xff]  }
 0x1f4   :  { %v1999_v51 = vpack.c.bf16 %v1883_v23, %v1880_v48  ;;  %2957 = vmatmul.mubr.bf16.gmra.mrb[232].mxu1 %v18031_v31  ;;  %v18036_v48 = vld [vmem:[#allocation46_spill] sm:$0xff]  ;;  %v13068_v31 = vld [vmem:[%s17771_s0 + $0x2a4] sm:$0xff]  }
 0x1f5   :  { %2964 = vmatprep.mubr.bf16.mxu1 %v18032_v39 }
 0x1f6   :  { %12219 = vmatmul.mubr.msk.bf16.vlgmr.msra.gmra.mrb[72].mxu0 %vm2026_vm2, %v1999_v51 }
 0x1f7   :  { %v1887_v40 = vpop.f32.mrb[128].mxu1  ;;  %11663 = vmatpush3.bf16.msra.mxu0 %v13048_v29 }
 0x1f8   :  { %v1888_v21 = vadd.f32 %v1887_v40, %v14738_v34  ;;  %v1889_v10 = vpop.f32.mrb[129].mxu1  ;;  %11664 = vmatprep.subr.bf16.mxu0 %v13049_v33  ;;  %v13053_v34 = vld [vmem:[%s17771_s0 + $0x2cc] sm:$0xff]  }
 0x1f9   :  { %v1890_v57 = vpop.f32.mrb[130].mxu1  ;;  %v18037_v40 = vld [vmem:[#allocation48_spill] sm:$0xff] }
 0x1fa   :  { %v1891_v3 = vadd.f32 %v1890_v57, %v14747_v11  ;;  %v1892_v8 = vpop.f32.mrb[131].mxu1  ;;  %v13054_v11 = vld [vmem:[%s17771_s0 + $0x28c] sm:$0xff]  }
 0x1fb   :  { %11665 = vmatpush3.bf16.msra.mxu0 %v13050_v53  ;;  %v18038_v53 = vld [vmem:[#allocation50_spill] sm:$0xff] }
 0x1fc   :  { %v2000_v22 = vpack.c.bf16 %v1891_v3, %v1888_v21  ;;  %11666 = vmatprep.subr.bf16.mxu0 %v13051_v63  ;;  %2965 = vmatmul.mubr.bf16.gmra.mrb[236].mxu1 %v18033_v14  ;;  %v18041_v14 = vld [vmem:[#allocation54_spill] sm:$0xff] }
 0x1fd   :  { %2972 = vmatprep.mubr.bf16.mxu1 %v18034_v7  ;;  %v18042_v7 = vld [vmem:[#allocation112_spill] sm:$0xff] }
 0x1fe   :  { %12222 = vmatprep.mubr.msk.bf16.mxu0 %vm2026_vm2, %v2000_v22  ;;  %v18039_v22 = vmov 0  }
 0x1ff   :  { %v1895_v13 = vpop.f32.mrb[132].mxu1  ;;  %11667 = vmatpush3.bf16.msra.mxu0 %v13052_v36 }
 0x200   :  { %v1896_v43 = vadd.f32 %v1895_v13, %v14763_v38  ;;  %v1897_v46 = vpop.f32.mrb[133].mxu1  ;;  %11668 = vmatprep.subr.bf16.mxu0 %v13053_v34  ;;  %v13061_v38 = vld [vmem:[%s17771_s0 + $0x2dc] sm:$0xff]   ;;  %v18040_v34 = vld [vmem:[#allocation52_spill] sm:$0xff] }
 0x201   :  { %v1898_v26 = vpop.f32.mrb[134].mxu1 }
 0x202   :  { %v1899_v55 = vadd.f32 %v1898_v26, %v14772_v20  ;;  %v1900_v30 = vpop.f32.mrb[135].mxu1  ;;  %v13062_v20 = vld [vmem:[%s17771_s0 + $0x29c] sm:$0xff]   ;;  %v18043_v26 = vld [vmem:[#allocation56_spill] sm:$0xff] }
 0x203   :  { %11669 = vmatpush3.bf16.msra.mxu0 %v13054_v11 }
 0x204   :  { %v2001_v19 = vpack.c.bf16 %v1899_v55, %v1896_v43  ;;  %11670 = vmatprep.subr.bf16.mxu0 %v13055_v44  ;;  %2973 = vmatmul.mubr.bf16.gmra.mrb[240].mxu1 %v18035_v41  ;;  %v18044_v55 = vld [vmem:[#allocation51_spill] sm:$0xff] }
 0x205   :  { %2980 = vmatprep.mubr.bf16.mxu1 %v18036_v48  ;;  %v18045_v48 = vld [vmem:[#allocation53_spill] sm:$0xff] }
 0x206   :  { %12223 = vmatmul.mubr.msk.bf16.gmra.mrb[76].mxu0 %vm2026_vm2, %v2001_v19 }
 0x207   :  { %v1903_v56 = vpop.f32.mrb[136].mxu1  ;;  %11671 = vmatpush3.bf16.msra.mxu0 %v13056_v60 }
 0x208   :  { %v1904_v47 = vadd.f32 %v1903_v56, %v14777_v9  ;;  %v1905_v23 = vpop.f32.mrb[137].mxu1  ;;  %11672 = vmatprep.subr.bf16.mxu0 %v13061_v38  ;;  %v13073_v9 = vld [vmem:[%s17771_s0 + $0x2ec] sm:$0xff]  }
 0x209   :  { %v1906_v29 = vpop.f32.mrb[138].mxu1 }
 0x20a   :  { %v1907_v51 = vadd.f32 %v1906_v29, %v14782_v17  ;;  %v1908_v33 = vpop.f32.mrb[139].mxu1  ;;  %v13074_v17 = vld [vmem:[%s17771_s0 + $0x2ac] sm:$0xff]  }
 0x20b   :  { %11673 = vmatpush3.bf16.msra.mxu0 %v13062_v20 }
 0x20c   :  { %v2002_v39 = vpack.c.bf16 %v1907_v51, %v1904_v47  ;;  %11674 = vmatprep.subr.bf16.mxu0 %v13067_v58  ;;  %2981 = vmatmul.mubr.bf16.gmra.mrb[244].mxu1 %v18037_v40  ;;  %v18047_v51 = vld [vmem:[#allocation57_spill] sm:$0xff] }
 0x20d   :  { %3182 = vmatprep.mubr.bf16.mxu1 %v18038_v53 }
 0x20e   :  { %12226 = vmatprep.mubr.msk.bf16.mxu0 %vm2026_vm2, %v2002_v39 }
 0x20f   :  { %v1911_v21 = vpop.f32.mrb[140].mxu1  ;;  %11675 = vmatpush3.bf16.msra.mxu0 %v13068_v31 }
 0x210   :  { %v1912_v10 = vadd.f32 %v1911_v21, %v14785_v62  ;;  %v1913_v63 = vpop.f32.mrb[141].mxu1  ;;  %11676 = vmatprep.subr.bf16.mxu0 %v13073_v9  ;;  %v18049_v21 = vld [vmem:[#allocation59_spill] sm:$0xff] }
 0x211   :  { %v1914_v57 = vpop.f32.mrb[142].mxu1 }
 0x212   :  { %v1915_v3 = vadd.f32 %v1914_v57, %v14790_v50  ;;  %v1916_v8 = vpop.f32.mrb[143].mxu1 }
 0x213   :  { %11677 = vmatpush3.bf16.msra.mxu0 %v13074_v17 }
 0x214   :  { %v2003_v36 = vpack.c.bf16 %v1915_v3, %v1912_v10  ;;  %3311 = vmatprep.subr.bf16.mxu0 %v18039_v22  ;;  %3183 = vmatmul.mubr.bf16.vlgmr.msra.gmra.mrb[248].mxu1 %v18040_v34 }
 0x215   :  { %3190 = vmatprep.mubr.bf16.mxu1 %v18041_v14  ;;  %12251 = vmatpush3.bf16.msra.mxu1 %v18030_v16 }
 0x216   :  { %12227 = vmatmul.mubr.msk.bf16.gmra.mrb[80].mxu0 %vm2026_vm2, %v2003_v36  ;;  %12252 = vmatprep.subr.bf16.mxu1 %v18042_v7  ;;  %v18051_v36 = vld [vmem:[#allocation61_spill] sm:$0xff] }
 0x217   :  { %v1919_v62 = vpop.f32.mrb[144].mxu1 }
 0x218   :  { %v1920_v13 = vadd.f32 %v1919_v62, %v14793_v28  ;;  %v1921_v11 = vpop.f32.mrb[145].mxu1 }
 0x219   :  { %v1922_v50 = vpop.f32.mrb[146].mxu1  ;;  %12253 = vmatpush3.bf16.msra.mxu1 %v18042_v7 }
 0x21a   :  { %v1923_v43 = vadd.f32 %v1922_v50, %v14798_v35  ;;  %v1924_v46 = vpop.f32.mrb[147].mxu1  ;;  %v18046_v35 = vld [vmem:[#allocation55_spill] sm:$0xff] }
 0x21b   :  { %v18053_v50 = vld [vmem:[#allocation63_spill] sm:$0xff] }
 0x21c   :  { %v2004_v44 = vpack.c.bf16 %v1923_v43, %v1920_v13  ;;  %3191 = vmatmul.mubr.bf16.gmra.mrb[252].mxu1 %v18043_v26 }
 0x21d   :  { %3198 = vmatprep.mubr.bf16.mxu1 %v18044_v55 }
 0x21e   :  { %12230 = vmatprep.mubr.msk.bf16.mxu0 %vm2026_vm2, %v2004_v44 }
 0x21f   :  { %v1927_v16 = vpop.f32.mrb[148].mxu1 }
 0x220   :  { %v1928_v30 = vadd.f32 %v1927_v16, %v14801_v59  ;;  %v1929_v60 = vpop.f32.mrb[149].mxu1 }
 0x221   :  { %v1930_v19 = vpop.f32.mrb[150].mxu1 }
 0x222   :  { %v1931_v28 = vadd.f32 %v1930_v19, %v14806_v54  ;;  %v1932_v38 = vpop.f32.mrb[151].mxu1  ;;  %v18048_v54 = vld [vmem:[#allocation58_spill] sm:$0xff] }
 0x224   :  { %v2005_v41 = vpack.c.bf16 %v1931_v28, %v1928_v30  ;;  %3199 = vmatmul.mubr.bf16.gmra.mrb[0].mxu1 %v18045_v48  ;;  %v18055_v30 = vld [vmem:[#allocation65_spill] sm:$0xff] }
 0x225   :  { %3206 = vmatprep.mubr.bf16.mxu1 %v18046_v35  ;;  %v18057_v35 = vld [vmem:[#allocation67_spill] sm:$0xff] }
 0x226   :  { %12231 = vmatmul.mubr.msk.bf16.gmra.mrb[84].mxu0 %vm2026_vm2, %v2005_v41 }
 0x227   :  { %v1935_v56 = vpop.f32.mrb[152].mxu1 }
 0x228   :  { %v1936_v20 = vadd.f32 %v1935_v56, %v14809_v42  ;;  %v1937_v47 = vpop.f32.mrb[153].mxu1 }
 0x229   :  { %v1938_v23 = vpop.f32.mrb[154].mxu1 }
 0x22a   :  { %v1939_v58 = vadd.f32 %v1938_v23, %v14814_v0  ;;  %v1940_v59 = vpop.f32.mrb[155].mxu1  ;;  %v18050_v0 = vld [vmem:[#allocation60_spill] sm:$0xff] }
 0x22c   :  { %v2006_v29 = vpack.c.bf16 %v1939_v58, %v1936_v20  ;;  %3207 = vmatmul.mubr.bf16.gmra.mrb[4].mxu1 %v18047_v51 }
 0x22d   :  { %3214 = vmatprep.mubr.bf16.mxu1 %v18048_v54 }
 0x22e   :  { %12234 = vmatprep.mubr.msk.bf16.mxu0 %vm2026_vm2, %v2006_v29  ;;  %v18059_v29 = vld [vmem:[#allocation69_spill] sm:$0xff] }
 0x22f   :  { %v1943_v33 = vpop.f32.mrb[156].mxu1 }
 0x230   :  { %v1944_v31 = vadd.f32 %v1943_v33, %v14820_v5  ;;  %v1945_v39 = vpop.f32.mrb[157].mxu1 }
 0x231   :  { %v1946_v9 = vpop.f32.mrb[158].mxu1 }
 0x232   :  { %v1947_v40 = vadd.f32 %v1946_v9, %v14825_v12  ;;  %v1948_v42 = vpop.f32.mrb[159].mxu1  ;;  %v18052_v12 = vld [vmem:[#allocation62_spill] sm:$0xff] }
 0x233   :  { %v18063_v42 = vld [vmem:[#allocation4_spill] sm:$0xff] }
 0x234   :  { %v2007_v53 = vpack.c.bf16 %v1947_v40, %v1944_v31  ;;  %3215 = vmatmul.mubr.bf16.gmra.mrb[8].mxu1 %v18049_v21  ;;  %v18061_v40 = vld [vmem:[#allocation71_spill] sm:$0xff]  ;;  %v18064_v21 = vld [vmem:[#allocation73_spill] sm:$0xff] }
 0x235   :  { %3222 = vmatprep.mubr.bf16.mxu1 %v18050_v0  ;;  %v18066_v0 = vld [vmem:[#allocation3_spill] sm:$0xff] }
 0x236   :  { %12235 = vmatmul.mubr.msk.bf16.gmra.mrb[88].mxu0 %vm2026_vm2, %v2007_v53  ;;  %v13079_v53 = vld [vmem:[%s17771_s0 + $0x374] sm:$0xff]  }
 0x237   :  { %v1951_v17 = vpop.f32.mrb[160].mxu1 }
 0x238   :  { %v1952_v10 = vadd.f32 %v1951_v17, %v14828_v27  ;;  %v1953_v63 = vpop.f32.mrb[161].mxu1  ;;  %v13080_v17 = vld [vmem:[%s17771_s0 + $0x37c] sm:$0xff]  }
 0x239   :  { %v1954_v57 = vpop.f32.mrb[162].mxu1  ;;  %v18068_v63 = vld [vmem:[#allocation75_spill] sm:$0xff] }
 0x23a   :  { %v1955_v3 = vadd.f32 %v1954_v57, %v14833_v24  ;;  %v1956_v5 = vpop.f32.mrb[163].mxu1  ;;  %v18054_v24 = vld [vmem:[#allocation64_spill] sm:$0xff] }
 0x23b   :  { %v18069_v57 = vld [vmem:[#allocation76_spill] sm:$0xff]  ;;  %v18071_v5 = vld [vmem:[#allocation7_spill] sm:$0xff] }
 0x23c   :  { %v2008_v8 = vpack.c.bf16 %v1955_v3, %v1952_v10  ;;  %3223 = vmatmul.mubr.bf16.gmra.mrb[12].mxu1 %v18051_v36  ;;  %v13081_v10 = vld [vmem:[%s17771_s0 + $0x384] sm:$0xff]   ;;  %v18070_v3 = vld [vmem:[#allocation6_spill] sm:$0xff] }
 0x23d   :  { %3230 = vmatprep.mubr.bf16.mxu1 %v18052_v12  ;;  %v13083_v36 = vld [vmem:[%s17771_s0 + $0x394] sm:$0xff]  }
 0x23e   :  { %12238 = vmatprep.mubr.msk.bf16.mxu0 %vm2026_vm2, %v2008_v8  ;;  %v13082_v8 = vld [vmem:[%s17771_s0 + $0x38c] sm:$0xff]  }
 0x23f   :  { %v1959_v34 = vpop.f32.mrb[164].mxu1  ;;  %v18072_v12 = vld [vmem:[#allocation77_spill] sm:$0xff] }
 0x240   :  { %v1960_v14 = vadd.f32 %v1959_v34, %v14836_v52  ;;  %v1961_v7 = vpop.f32.mrb[165].mxu1  ;;  %v18073_v34 = vld [vmem:[#allocation78_spill] sm:$0xff] }
 0x241   :  { %v1962_v62 = vpop.f32.mrb[166].mxu1 }
 0x242   :  { %v1963_v13 = vadd.f32 %v1962_v62, %v14841_v37  ;;  %v1964_v27 = vpop.f32.mrb[167].mxu1  ;;  %v18056_v37 = vld [vmem:[#allocation66_spill] sm:$0xff]  ;;  %v18075_v62 = vld [vmem:[#allocation9_spill] sm:$0xff] }
 0x244   :  { %v2009_v11 = vpack.c.bf16 %v1963_v13, %v1960_v14  ;;  %3231 = vmatmul.mubr.bf16.gmra.mrb[16].mxu1 %v18053_v50  ;;  %v18074_v14 = vld [vmem:[#allocation8_spill] sm:$0xff]  ;;  %v13084_v13 = vld [vmem:[%s17771_s0 + $0x39c] sm:$0xff]  }
 0x245   :  { %3238 = vmatprep.mubr.bf16.mxu1 %v18054_v24 }
 0x246   :  { %12239 = vmatmul.mubr.msk.bf16.gmra.mrb[92].mxu0 %vm2026_vm2, %v2009_v11 }
 0x247   :  { %v1967_v43 = vpop.f32.mrb[168].mxu1 }
 0x248   :  { %v1968_v46 = vadd.f32 %v1967_v43, %v14844_v15  ;;  %v1969_v44 = vpop.f32.mrb[169].mxu1 }
 0x249   :  { %v1970_v26 = vpop.f32.mrb[170].mxu1  ;;  %v18076_v44 = vld [vmem:[#allocation79_spill] sm:$0xff] }
 0x24a   :  { %v1971_v55 = vadd.f32 %v1970_v26, %v14849_v49  ;;  %v1972_v52 = vpop.f32.mrb[171].mxu1  ;;  %v18058_v49 = vld [vmem:[#allocation68_spill] sm:$0xff] }
 0x24b   :  { %v18077_v26 = vld [vmem:[#allocation80_spill] sm:$0xff] }
 0x24c   :  { %v2010_v16 = vpack.c.bf16 %v1971_v55, %v1968_v46  ;;  %3239 = vmatmul.mubr.bf16.gmra.mrb[20].mxu1 %v18055_v30  ;;  %v13085_v46 = vld [vmem:[%s17771_s0 + $0x3a4] sm:$0xff]   ;;  %v18078_v55 = vld [vmem:[#allocation10_spill] sm:$0xff]  ;;  %v13086_v30 = vld [vmem:[%s17771_s0 + $0x3ac] sm:$0xff]  }
 0x24d   :  { %3246 = vmatprep.mubr.bf16.mxu1 %v18056_v37 }
 0x24e   :  { %12242 = vmatprep.mubr.msk.bf16.mxu0 %vm2026_vm2, %v2010_v16  ;;  %v18079_v16 = vld [vmem:[#allocation11_spill] sm:$0xff] }
 0x24f   :  { %v1975_v60 = vpop.f32.mrb[172].mxu1 }
 0x250   :  { %v1976_v19 = vadd.f32 %v1975_v60, %v14861_v4  ;;  %v1977_v28 = vpop.f32.mrb[173].mxu1 }
 0x251   :  { %v1978_v38 = vpop.f32.mrb[174].mxu1 }
 0x252   :  { %v1979_v41 = vadd.f32 %v1978_v38, %v14869_v1  ;;  %v1980_v15 = vpop.f32.mrb[175].mxu1  ;;  %v18060_v1 = vld [vmem:[#allocation70_spill] sm:$0xff] }
 0x253   :  { %v13087_v38 = vld [vmem:[%s17771_s0 + $0x3b4] sm:$0xff]  }
 0x254   :  { %v2011_v48 = vpack.c.bf16 %v1979_v41, %v1976_v19  ;;  %3247 = vmatmul.mubr.bf16.gmra.mrb[24].mxu1 %v18057_v35 }
 0x255   :  { %3254 = vmatprep.mubr.bf16.mxu1 %v18058_v49 }
 0x256   :  { %12243 = vmatmul.mubr.msk.bf16.gmra.mrb[96].mxu0 %vm2026_vm2, %v2011_v48  ;;  %v18080_v48 = vld [vmem:[#allocation81_spill] sm:$0xff] }
 0x257   :  { %v1983_v56 = vpop.f32.mrb[176].mxu1 }
 0x258   :  { %v1984_v20 = vadd.f32 %v1983_v56, %v14881_v18  ;;  %v1985_v47 = vpop.f32.mrb[177].mxu1 }
 0x259   :  { %v1986_v23 = vpop.f32.mrb[178].mxu1 }
 0x25a   :  { %v1987_v58 = vadd.f32 %v1986_v23, %v14889_v6  ;;  %v1988_v4 = vpop.f32.mrb[179].mxu1  ;;  %v18062_v6 = vld [vmem:[#allocation72_spill] sm:$0xff]  ;;  %v18082_v23 = vld [vmem:[#allocation13_spill] sm:$0xff] }
 0x25c   :  { %v2012_v59 = vpack.c.bf16 %v1987_v58, %v1984_v20  ;;  %3255 = vmatmul.mubr.bf16.gmra.mrb[28].mxu1 %v18059_v29  ;;  %v18081_v20 = vld [vmem:[#allocation12_spill] sm:$0xff]  ;;  %v13088_v58 = vld [vmem:[%s17771_s0 + $0x3bc] sm:$0xff]  }
 0x25d   :  { %3262 = vmatprep.mubr.bf16.mxu1 %v18060_v1 }
 0x25e   :  { %12246 = vmatprep.mubr.msk.bf16.mxu0 %vm2026_vm2, %v2012_v59 }
 0x25f   :  { %v1991_v51 = vpop.f32.mrb[180].mxu1 }
 0x260   :  { %v1992_v54 = vadd.f32 %v1991_v51, %v14901_v61  ;;  %v1993_v33 = vpop.f32.mrb[181].mxu1  ;;  %v18065_v61 = vld [vmem:[#allocation74_spill] sm:$0xff] }
 0x261   :  { %v1994_v31 = vpop.f32.mrb[182].mxu1  ;;  %v13089_v33 = vld [vmem:[%s17771_s0 + $0x3c4] sm:$0xff]  }
 0x262   :  { %v1995_v39 = vadd.f32 %v1994_v31, %v14909_v2  ;;  %v1996_v18 = vpop.f32.mrb[183].mxu1  ;;  %v18067_v2 = vld [vmem:[#allocation5_spill] sm:$0xff] }
 0x264   :  { %v2013_v9 = vpack.c.bf16 %v1995_v39, %v1992_v54  ;;  %3263 = vmatmul.mubr.bf16.gmra.mrb[32].mxu1 %v18061_v40 }
 0x265   :  { %3270 = vmatprep.mubr.bf16.mxu1 %v18062_v6  ;;  %v18083_v6 = vld [vmem:[#allocation14_spill] sm:$0xff] }
 0x266   :  { %12247 = vmatmul.mubr.msk.bf16.gmra.mrb[100].mxu0 %vm2026_vm2, %v2013_v9 }
 0x267   :  { %3021 = vmatprep.mubr.bf16.mxu0 %v18063_v42  ;;  %v11566_v7 = vpop.f32.mrb[184].mxu1 }
 0x268   :  { %v11567_v27 = vpop.f32.mrb[185].mxu1 }
 0x269   :  { %v15089_v11 = vadd.f32 %v11567_v27, %v11566_v7  ;;  %v11569_v50 = vpop.f32.mrb[186].mxu1  ;;  %v18086_v7 = vld [vmem:[#allocation17_spill] sm:$0xff] }
 0x26a   :  { %v11570_v24 = vpop.f32.mrb[187].mxu1 }
 0x26b   :  { %v15091_v43 = vadd.f32 %v11570_v24, %v11569_v50  ;;  %v13093_v50 = vld [vmem:[%s17771_s0 + $0x3e4] ss:$0 sps:$4 sm:$0xff]  }
 0x26c   :  { %3271 = vmatmul.mubr.bf16.gmra.mrb[36].mxu1 %v18064_v21  ;;  %v13090_v21 = vld [vmem:[%s17771_s0 + $0x3cc] sm:$0xff]  }
 0x26d   :  { %3278 = vmatprep.mubr.bf16.mxu1 %v18065_v61 }
 0x26e   :  { %3022 = vmatmul.mubr.bf16.vlgmr.msra.gmra.mrb[104].mxu0 %v18066_v0 }
 0x26f   :  { %3312 = vmatpush1.bf16.msra.mxu0 %v13079_v53  ;;  %3029 = vmatprep.mubr.bf16.mxu0 %v18067_v2  ;;  %v11572_v52 = vpop.f32.mrb[188].mxu1  ;;  %v18084_v53 = vld [vmem:[#allocation15_spill] sm:$0xff] }
 0x270   :  { %3313 = vmatprep.subr.bf16.mxu0 %v18039_v22  ;;  %v11573_v37 = vpop.f32.mrb[189].mxu1 }
 0x271   :  { %v15105_v60 = vadd.f32 %v11573_v37, %v11572_v52  ;;  %v11575_v19 = vpop.f32.mrb[190].mxu1  ;;  %v2826_v52 = vsel %vm1350_vm0, %v13093_v50, 0 }
 0x272   :  { %v11576_v28 = vpop.f32.mrb[191].mxu1 }
 0x273   :  { %3314 = vmatpush1.bf16.msra.mxu0 %v13080_v17  ;;  %v15110_v41 = vadd.f32 %v11576_v28, %v11575_v19 }
 0x274   :  { %3315 = vmatprep.subr.bf16.mxu0 %v18039_v22  ;;  %3279 = vmatmul.mubr.bf16.gmra.mrb[40].mxu1 %v18068_v63 }
 0x275   :  { %3286 = vmatprep.mubr.bf16.mxu1 %v18069_v57  ;;  %v13091_v57 = vld [vmem:[%s17771_s0 + $0x3d4] sm:$0xff]  }
 0x276   :  { %3030 = vmatmul.mubr.bf16.gmra.mrb[108].mxu0 %v18070_v3 }
 0x277   :  { %3037 = vmatprep.mubr.bf16.mxu0 %v18071_v5  ;;  %3316 = vmatpush1.bf16.msra.mxu0 %v13081_v10  ;;  %v11578_v15 = vpop.f32.mrb[192].mxu1 }
 0x278   :  { %3317 = vmatprep.subr.bf16.mxu0 %v18039_v22  ;;  %v11579_v35 = vpop.f32.mrb[193].mxu1 }
 0x279   :  { %v15114_v49 = vadd.f32 %v11579_v35, %v11578_v15  ;;  %v11581_v56 = vpop.f32.mrb[194].mxu1  ;;  %v18089_v35 = vld [vmem:[#allocation21_spill] sm:$0xff] }
 0x27a   :  { %v11582_v47 = vpop.f32.mrb[195].mxu1 }
 0x27b   :  { %3318 = vmatpush1.bf16.msra.mxu0 %v13082_v8  ;;  %v15121_v4 = vadd.f32 %v11582_v47, %v11581_v56  ;;  %v18090_v56 = vld [vmem:[#allocation23_spill] sm:$0xff] }
 0x27c   :  { %3319 = vmatprep.subr.bf16.mxu0 %v18039_v22  ;;  %3287 = vmatmul.mubr.bf16.gmra.mrb[44].mxu1 %v18072_v12 }
 0x27d   :  { %3294 = vmatprep.mubr.bf16.mxu1 %v18073_v34  ;;  %v18085_v34 = vld [vmem:[#allocation16_spill] sm:$0xff] }
 0x27e   :  { %3038 = vmatmul.mubr.bf16.gmra.mrb[112].mxu0 %v18074_v14 }
 0x27f   :  { %3045 = vmatprep.mubr.bf16.mxu0 %v18075_v62  ;;  %3320 = vmatpush1.bf16.msra.mxu0 %v13083_v36  ;;  %v11584_v59 = vpop.f32.mrb[196].mxu1  ;;  %v13092_v62 = vld [vmem:[%s17771_s0 + $0x3dc] sm:$0xff]   ;;  %s13559_s0 = smov 127  }
 0x280   :  { %3321 = vmatprep.subr.bf16.mxu0 %v18039_v22  ;;  %v11585_v29 = vpop.f32.mrb[197].mxu1 }
 0x281   :  { %v15124_v1 = vadd.f32 %v11585_v29, %v11584_v59  ;;  %v11587_v51 = vpop.f32.mrb[198].mxu1 }
 0x282   :  { %v11588_v54 = vpop.f32.mrb[199].mxu1 }
 0x283   :  { %3322 = vmatpush1.bf16.msra.mxu0 %v13084_v13  ;;  %v15129_v31 = vadd.f32 %v11588_v54, %v11587_v51  ;;  %v18091_v51 = vld [vmem:[#allocation25_spill] sm:$0xff]  ;;  %v18092_v54 = vld [vmem:[#allocation27_spill] sm:$0xff] }
 0x284   :  { %3323 = vmatprep.subr.bf16.mxu0 %v18039_v22  ;;  %3295 = vmatmul.mubr.bf16.gmra.mrb[48].mxu1 %v18076_v44 }
 0x285   :  { %3302 = vmatprep.mubr.bf16.mxu1 %v18077_v26 }
 0x286   :  { %3046 = vmatmul.mubr.bf16.gmra.mrb[116].mxu0 %v18078_v55 }
 0x287   :  { %3053 = vmatprep.mubr.bf16.mxu0 %v18079_v16  ;;  %3324 = vmatpush1.bf16.msra.mxu0 %v13085_v46  ;;  %v11590_v39 = vpop.f32.mrb[200].mxu1  ;;  %v18087_v16 = vld [vmem:[#allocation18_spill] sm:$0xff] }
 0x288   :  { %3325 = vmatprep.subr.bf16.mxu0 %v18039_v22  ;;  %v11591_v18 = vpop.f32.mrb[201].mxu1 }
 0x289   :  { %v15132_v9 = vadd.f32 %v11591_v18, %v11590_v39  ;;  %v11593_v40 = vpop.f32.mrb[202].mxu1 }
 0x28a   :  { %v11594_v42 = vpop.f32.mrb[203].mxu1 }
 0x28b   :  { %3326 = vmatpush1.bf16.msra.mxu0 %v13086_v30  ;;  %v15139_v61 = vadd.f32 %v11594_v42, %v11593_v40  ;;  %v18088_v30 = vld [vmem:[#allocation19_spill] sm:$0xff] }
 0x28c   :  { %3327 = vmatprep.subr.bf16.mxu0 %v18039_v22  ;;  %3303 = vmatmul.mubr.bf16.gmra.mrb[52].mxu1 %v18080_v48 }
 0x28e   :  { %3054 = vmatmul.mubr.bf16.gmra.mrb[120].mxu0 %v18081_v20 }
 0x28f   :  { %3061 = vmatprep.mubr.bf16.mxu0 %v18082_v23  ;;  %3328 = vmatpush1.bf16.msra.mxu0 %v13087_v38  ;;  %v11596_v0 = vpop.f32.mrb[204].mxu1 }
 0x290   :  { %3329 = vmatprep.subr.bf16.mxu0 %v18039_v22  ;;  %v11597_v2 = vpop.f32.mrb[205].mxu1 }
 0x291   :  { %v15142_v17 = vadd.f32 %v11597_v2, %v11596_v0  ;;  %v11599_v10 = vpop.f32.mrb[206].mxu1 }
 0x292   :  { %v11600_v63 = vpop.f32.mrb[207].mxu1 }
 0x293   :  { %3330 = vmatpush1.bf16.msra.mxu0 %v13088_v58  ;;  %v15147_v3 = vadd.f32 %v11600_v63, %v11599_v10 }
 0x294   :  { %3331 = vmatprep.subr.bf16.mxu0 %v18039_v22 }
 0x296   :  { %3062 = vmatmul.mubr.bf16.gmra.mrb[124].mxu0 %v18083_v6 }
 0x297   :  { %3069 = vmatprep.mubr.bf16.mxu0 %v18084_v53  ;;  %3332 = vmatpush1.bf16.msra.mxu0 %v13089_v33  ;;  %v11602_v5 = vpop.f32.mrb[208].mxu1  ;;  %v18093_v53 = vld [vmem:[#allocation29_spill] sm:$0xff] }
 0x298   :  { %3333 = vmatprep.subr.bf16.mxu0 %v18039_v22  ;;  %v11603_v8 = vpop.f32.mrb[209].mxu1 }
 0x299   :  { %v15150_v36 = vadd.f32 %v11603_v8, %v11602_v5  ;;  %v11605_v12 = vpop.f32.mrb[210].mxu1  ;;  %v18096_v8 = vld [vmem:[#allocation33_spill] sm:$0xff] }
 0x29a   :  { %v11606_v14 = vpop.f32.mrb[211].mxu1 }
 0x29b   :  { %3334 = vmatpush1.bf16.msra.mxu0 %v13090_v21  ;;  %v15157_v13 = vadd.f32 %v11606_v14, %v11605_v12  ;;  %v18094_v21 = vld [vmem:[#allocation31_spill] sm:$0xff] }
 0x29c   :  { %3335 = vmatprep.subr.bf16.mxu0 %v18039_v22  ;;  %v18097_v12 = vld [vmem:[#allocation35_spill] sm:$0xff] }
 0x29e   :  { %3070 = vmatmul.mubr.bf16.gmra.mrb[128].mxu0 %v18085_v34 }
 0x29f   :  { %3077 = vmatprep.mubr.bf16.mxu0 %v18086_v7  ;;  %3336 = vmatpush1.bf16.msra.mxu0 %v13091_v57  ;;  %v11608_v27 = vpop.f32.mrb[212].mxu1 }
 0x2a0   :  { %3337 = vmatprep.subr.bf16.mxu0 %v18039_v22  ;;  %v11609_v24 = vpop.f32.mrb[213].mxu1 }
 0x2a1   :  { %v15163_v46 = vadd.f32 %v11609_v24, %v11608_v27  ;;  %v11611_v44 = vpop.f32.mrb[214].mxu1 }
 0x2a2   :  { %v11612_v26 = vpop.f32.mrb[215].mxu1 }
 0x2a3   :  { %3338 = vmatpush1.bf16.msra.mxu0 %v13092_v62  ;;  %v15165_v55 = vadd.f32 %v11612_v26, %v11611_v44 }
 0x2a4   :  { %3339 = vmatprep.subr.bf16.mxu0 %v18039_v22 }
 0x2a6   :  { %3078 = vmatmul.mubr.bf16.gmra.mrb[132].mxu0 %v18087_v16  ;;  %v18104_v16 = vld [vmem:[#allocation37_spill] sm:$0xff] }
 0x2a7   :  { %3085 = vmatprep.mubr.bf16.mxu0 %v18088_v30  ;;  %3340 = vmatpush1.bf16.msra.mxu0 %v2826_v52  ;;  %v11614_v37 = vpop.f32.mrb[216].mxu1  ;;  %v18105_v30 = vld [vmem:[#allocation39_spill] sm:$0xff] }
 0x2a8   :  { %v11615_v19 = vpop.f32.mrb[217].mxu1 }
 0x2a9   :  { %v15171_v28 = vadd.f32 %v11615_v19, %v11614_v37  ;;  %v11617_v38 = vpop.f32.mrb[218].mxu1 }
 0x2aa   :  { %v11618_v15 = vpop.f32.mrb[219].mxu1 }
 0x2ab   :  { %v15173_v48 = vadd.f32 %v11618_v15, %v11617_v38 }
 0x2ae   :  { %3086 = vmatmul.mubr.bf16.gmra.mrb[136].mxu0 %v18089_v35 }
 0x2af   :  { %3093 = vmatprep.mubr.bf16.mxu0 %v18090_v56  ;;  %v11620_v20 = vpop.f32.mrb[220].mxu1 }
 0x2b0   :  { %v11621_v47 = vpop.f32.mrb[221].mxu1 }
 0x2b1   :  { %v15177_v23 = vadd.f32 %v11621_v47, %v11620_v20  ;;  %v11623_v58 = vpop.f32.mrb[222].mxu1  ;;  %v18108_v20 = vld [vmem:[#allocation41_spill] sm:$0xff]  ;;  %v18109_v47 = vld [vmem:[#allocation43_spill] sm:$0xff] }
 0x2b2   :  { %v11624_v59 = vpop.f32.mrb[223].mxu1 }
 0x2b3   :  { %v15179_v29 = vadd.f32 %v11624_v59, %v11623_v58 }
 0x2b6   :  { %3094 = vmatmul.mubr.bf16.gmra.mrb[140].mxu0 %v18091_v51 }
 0x2b7   :  { %3101 = vmatprep.mubr.bf16.mxu0 %v18092_v54  ;;  %v11626_v33 = vpop.f32.mrb[224].mxu1 }
 0x2b8   :  { %v11627_v39 = vpop.f32.mrb[225].mxu1 }
 0x2b9   :  { %v15183_v18 = vadd.f32 %v11627_v39, %v11626_v33  ;;  %v11629_v40 = vpop.f32.mrb[226].mxu1 }
 0x2ba   :  { %v11630_v6 = vpop.f32.mrb[227].mxu1 }
 0x2bb   :  { %v15185_v42 = vadd.f32 %v11630_v6, %v11629_v40 }
 0x2be   :  { %3102 = vmatmul.mubr.bf16.gmra.mrb[144].mxu0 %v18093_v53 }
 0x2bf   :  { %3109 = vmatprep.mubr.bf16.mxu0 %v18094_v21  ;;  %v11632_v0 = vpop.f32.mrb[228].mxu1 }
 0x2c0   :  { %v11633_v2 = vpop.f32.mrb[229].mxu1 }
 0x2c1   :  { %v15189_v10 = vadd.f32 %v11633_v2, %v11632_v0  ;;  %v11635_v63 = vpop.f32.mrb[230].mxu1  ;;  %v18114_v0 = vld [vmem:[#allocation45_spill] sm:$0xff]  ;;  %v18115_v2 = vld [vmem:[#allocation47_spill] sm:$0xff] }
 0x2c2   :  { %v11636_v57 = vpop.f32.mrb[231].mxu1 }
 0x2c3   :  { %v15191_v5 = vadd.f32 %v11636_v57, %v11635_v63 }
 0x2c5   :  { %18095 = vst [vmem:[#allocation105_spill] sm:$0xff] %v15191_v5  ;;  %v18156_v5 = vld [vmem:[#allocation108_spill] sm:$0xff] }
 0x2c6   :  { %3110 = vmatmul.mubr.bf16.gmra.mrb[148].mxu0 %v18096_v8 }
 0x2c7   :  { %3117 = vmatprep.mubr.bf16.mxu0 %v18097_v12  ;;  %v11638_v34 = vpop.f32.mrb[232].mxu1 }
 0x2c8   :  { %v11639_v14 = vpop.f32.mrb[233].mxu1 }
 0x2c9   :  { %v15195_v7 = vpop.f32.mrb[72].mxu0  ;;  %v15197_v62 = vadd.f32 %v11639_v14, %v11638_v34  ;;  %v11641_v27 = vpop.f32.mrb[234].mxu1 }
 0x2ca   :  { %18098 = vst [vmem:[#allocation20_spill] sm:$0xff] %v15195_v7  ;;  %v15199_v50 = vpop.f32.mrb[73].mxu0  ;;  %v11642_v24 = vpop.f32.mrb[235].mxu1 }
 0x2cb   :  { %18099 = vst [vmem:[#allocation22_spill] sm:$0xff] %v15197_v62  ;;  %18100 = vst [vmem:[#allocation106_spill] sm:$0xff] %v15199_v50  ;;  %v15201_v44 = vpop.f32.mrb[74].mxu0  ;;  %v15203_v26 = vadd.f32 %v11642_v24, %v11641_v27  ;;  %v18118_v27 = vld [vmem:[#allocation49_spill] sm:$0xff]  ;;  %v18119_v24 = vld [vmem:[#allocation82_spill] sm:$0xff] }
 0x2cc   :  { %18101 = vst [vmem:[#allocation24_spill] sm:$0xff] %v15201_v44  ;;  %v15205_v52 = vpop.f32.mrb[75].mxu0 }
 0x2cd   :  { %18102 = vst [vmem:[#allocation26_spill] sm:$0xff] %v15203_v26  ;;  %18103 = vst [vmem:[#allocation110_spill] sm:$0xff] %v15205_v52 }
 0x2ce   :  { %3118 = vmatmul.mubr.bf16.gmra.mrb[152].mxu0 %v18104_v16 }
 0x2cf   :  { %3125 = vmatprep.mubr.bf16.mxu0 %v18105_v30  ;;  %v11644_v37 = vpop.f32.mrb[236].mxu1 }
 0x2d0   :  { %v11645_v19 = vpop.f32.mrb[237].mxu1 }
 0x2d1   :  { %v15209_v38 = vadd.f32 %v11645_v19, %v11644_v37  ;;  %v11647_v15 = vpop.f32.mrb[238].mxu1 }
 0x2d2   :  { %v11648_v35 = vpop.f32.mrb[239].mxu1 }
 0x2d3   :  { %18106 = vst [vmem:[#allocation114_spill] sm:$0xff] %v15209_v38  ;;  %v15211_v56 = vadd.f32 %v11648_v35, %v11647_v15 }
 0x2d5   :  { %18107 = vst [vmem:[#allocation28_spill] sm:$0xff] %v15211_v56 }
 0x2d6   :  { %3126 = vmatmul.mubr.bf16.gmra.mrb[156].mxu0 %v18108_v20 }
 0x2d7   :  { %3133 = vmatprep.mubr.bf16.mxu0 %v18109_v47  ;;  %v11650_v58 = vpop.f32.mrb[240].mxu1 }
 0x2d8   :  { %v11651_v59 = vpop.f32.mrb[241].mxu1 }
 0x2d9   :  { %v15215_v51 = vpop.f32.mrb[76].mxu0  ;;  %v15217_v54 = vadd.f32 %v11651_v59, %v11650_v58  ;;  %v11653_v33 = vpop.f32.mrb[242].mxu1 }
 0x2da   :  { %18110 = vst [vmem:[#allocation30_spill] sm:$0xff] %v15215_v51  ;;  %v2125_v39 = vpop.f32.mrb[77].mxu0  ;;  %v11654_v40 = vpop.f32.mrb[243].mxu1 }
 0x2db   :  { %18111 = vst [vmem:[#allocation115_spill] sm:$0xff] %v15217_v54  ;;  %2236 = vrot.lane.b32.xlu0 %v2125_v39, %s13559_s0  ;;  %v15220_v6 = vpop.f32.mrb[78].mxu0  ;;  %v15222_v53 = vadd.f32 %v11654_v40, %v11653_v33  ;;  %v18122_v33 = vld [vmem:[#allocation83_spill] sm:$0xff]  ;;  %v18123_v39 = vld [vmem:[#allocation84_spill] sm:$0xff] }
 0x2dc   :  { %18112 = vst [vmem:[#allocation32_spill] sm:$0xff] %v15220_v6  ;;  %v2128_v21 = vpop.f32.mrb[79].mxu0 }
 0x2dd   :  { %18113 = vst [vmem:[#allocation34_spill] sm:$0xff] %v15222_v53 }
 0x2de   :  { %3134 = vmatmul.mubr.bf16.gmra.mrb[160].mxu0 %v18114_v0 }
 0x2df   :  { %2238 = vrot.lane.b32.xlu0 %v2128_v21, %s13559_s0  ;;  %3141 = vmatprep.mubr.bf16.mxu0 %v18115_v2  ;;  %v11656_v63 = vpop.f32.mrb[244].mxu1 }
 0x2e0   :  { %v11657_v57 = vpop.f32.mrb[245].mxu1 }
 0x2e1   :  { %v15227_v8 = vadd.f32 %v11657_v57, %v11656_v63  ;;  %v11659_v12 = vpop.f32.mrb[246].mxu1 }
 0x2e2   :  { %v11660_v34 = vpop.f32.mrb[247].mxu1 }
 0x2e3   :  { %18116 = vst [vmem:[#allocation109_spill] sm:$0xff] %v15227_v8  ;;  %v15229_v14 = vadd.f32 %v11660_v34, %v11659_v12  ;;  %v18124_v12 = vld [vmem:[#allocation85_spill] sm:$0xff]  ;;  %v18125_v34 = vld [vmem:[#allocation86_spill] sm:$0xff] }
 0x2e5   :  { %18117 = vst [vmem:[#allocation36_spill] sm:$0xff] %v15229_v14 }
 0x2e6   :  { %3142 = vmatmul.mubr.bf16.gmra.mrb[164].mxu0 %v18118_v27 }
 0x2e7   :  { %10138 = vmatprep.mubr.msk.bf16.mxu0 %vm1301_vm1, %v18119_v24  ;;  %v11790_v16 = vpop.f32.mrb[248].mxu1 }
 0x2e8   :  { %v11791_v30 = vpop.f32.mrb[249].mxu1 }
 0x2e9   :  { %v15234_v37 = vpop.f32.mrb[80].mxu0  ;;  %v15236_v19 = vadd.f32 %v11791_v30, %v11790_v16  ;;  %v11793_v15 = vpop.f32.mrb[250].mxu1 }
 0x2ea   :  { %18120 = vst [vmem:[#allocation38_spill] sm:$0xff] %v15234_v37  ;;  %v2141_v35 = vpop.f32.mrb[81].mxu0  ;;  %v11794_v20 = vpop.f32.mrb[251].mxu1 }
 0x2eb   :  { %2248 = vrot.lane.b32.xlu1 %v2141_v35, %s13560_s16  ;;  %v15239_v47 = vpop.f32.mrb[82].mxu0  ;;  %v15241_v58 = vadd.f32 %v11794_v20, %v11793_v15 }
 0x2ec   :  { %18121 = vst [vmem:[#allocation40_spill] sm:$0xff] %v15239_v47  ;;  %v2144_v59 = vpop.f32.mrb[83].mxu0 }
 0x2ee   :  { %3344 = vmatmul.mubr.bf16.vlgmr.msra.gmra.mrb[168].mxu0 %v18122_v33 }
 0x2ef   :  { %2250 = vrot.lane.b32.xlu1 %v2144_v59, %s13560_s16  ;;  %10139 = vmatprep.mubr.msk.bf16.mxu0 %vm1301_vm1, %v18123_v39  ;;  %v11796_v40 = vpop.f32.mrb[252].mxu1 }
 0x2f0   :  { %v11797_v21 = vpop.f32.mrb[253].mxu1 }
 0x2f1   :  { %v15247_v0 = vadd.f32 %v11797_v21, %v11796_v40  ;;  %v11799_v2 = vpop.f32.mrb[254].mxu1  ;;  %v18128_v40 = vld [vmem:[#allocation87_spill] sm:$0xff]  ;;  %v18129_v21 = vld [vmem:[#allocation88_spill] sm:$0xff] }
 0x2f2   :  { %v11800_v63 = vpop.f32.mrb[255].mxu1 }
 0x2f3   :  { %v15249_v57 = vadd.f32 %v11800_v63, %v11799_v2 }
 0x2f6   :  { %3352 = vmatmul.mubr.bf16.gmra.mrb[172].mxu0 %v18124_v12 }
 0x2f7   :  { %10140 = vmatprep.mubr.msk.bf16.mxu0 %vm1301_vm1, %v18125_v34  ;;  %v11802_v27 = vpop.f32.mrb[0].mxu1 }
 0x2f8   :  { %v11803_v24 = vpop.f32.mrb[1].mxu1 }
 0x2f9   :  { %v15254_v16 = vpop.f32.mrb[84].mxu0  ;;  %v15256_v30 = vadd.f32 %v11803_v24, %v11802_v27  ;;  %v11805_v15 = vpop.f32.mrb[2].mxu1 }
 0x2fa   :  { %18126 = vst [vmem:[#allocation42_spill] sm:$0xff] %v15254_v16  ;;  %v2157_v35 = vpop.f32.mrb[85].mxu0  ;;  %v11806_v20 = vpop.f32.mrb[3].mxu1 }
 0x2fb   :  { %2260 = vrot.lane.b32.xlu0 %v2157_v35, %s13561_s2  ;;  %v15259_v59 = vpop.f32.mrb[86].mxu0  ;;  %v15261_v33 = vadd.f32 %v11806_v20, %v11805_v15  ;;  %v18130_v35 = vld [vmem:[#allocation89_spill] sm:$0xff]  ;;  %v18131_v15 = vld [vmem:[#allocation90_spill] sm:$0xff] }
 0x2fc   :  { %18127 = vst [vmem:[#allocation44_spill] sm:$0xff] %v15259_v59  ;;  %v2160_v39 = vpop.f32.mrb[87].mxu0 }
 0x2fd   :  { %2262 = vrot.lane.b32.xlu1 %v2160_v39, %s13561_s2 }
 0x2fe   :  { %3360 = vmatmul.mubr.bf16.gmra.mrb[176].mxu0 %v18128_v40 }
 0x2ff   :  { %10141 = vmatprep.mubr.msk.bf16.mxu0 %vm1301_vm1, %v18129_v21  ;;  %v11808_v2 = vpop.f32.mrb[4].mxu1 }
 0x300   :  { %v11809_v63 = vpop.f32.mrb[5].mxu1 }
 0x301   :  { %v15267_v12 = vadd.f32 %v11809_v63, %v11808_v2  ;;  %v11811_v34 = vpop.f32.mrb[6].mxu1 }
 0x302   :  { %v11812_v27 = vpop.f32.mrb[7].mxu1 }
 0x303   :  { %v15269_v24 = vadd.f32 %v11812_v27, %v11811_v34  ;;  %v18134_v27 = vld [vmem:[#allocation91_spill] sm:$0xff] }
 0x306   :  { %3368 = vmatmul.mubr.bf16.gmra.mrb[180].mxu0 %v18130_v35  ;;  %v18135_v35 = vld [vmem:[#allocation92_spill] sm:$0xff] }
 0x307   :  { %10142 = vmatprep.mubr.msk.bf16.mxu0 %vm1301_vm1, %v18131_v15  ;;  %v11814_v20 = vpop.f32.mrb[8].mxu1 }
 0x308   :  { %v11815_v39 = vpop.f32.mrb[9].mxu1 }
 0x309   :  { %v15274_v22 = vpop.f32.mrb[88].mxu0  ;;  %v15276_v40 = vadd.f32 %v11815_v39, %v11814_v20  ;;  %v11817_v21 = vpop.f32.mrb[10].mxu1 }
 0x30a   :  { %18132 = vst [vmem:[#allocation46_spill] sm:$0xff] %v15274_v22  ;;  %v2173_v44 = vpop.f32.mrb[89].mxu0  ;;  %v11818_v7 = vpop.f32.mrb[11].mxu1 }
 0x30b   :  { %2272 = vrot.lane.b32.xlu0 %v2173_v44, %s13562_s17  ;;  %v15279_v2 = vpop.f32.mrb[90].mxu0  ;;  %v15281_v63 = vadd.f32 %v11818_v7, %v11817_v21  ;;  %v18136_v44 = vld [vmem:[#allocation93_spill] sm:$0xff]  ;;  %v18137_v7 = vld [vmem:[#allocation94_spill] sm:$0xff] }
 0x30c   :  { %18133 = vst [vmem:[#allocation48_spill] sm:$0xff] %v15279_v2  ;;  %v2176_v34 = vpop.f32.mrb[91].mxu0 }
 0x30d   :  { %2274 = vrot.lane.b32.xlu1 %v2176_v34, %s13562_s17 }
 0x30e   :  { %3376 = vmatmul.mubr.bf16.gmra.mrb[184].mxu0 %v18134_v27 }
 0x30f   :  { %10143 = vmatprep.mubr.msk.bf16.mxu0 %vm1301_vm1, %v18135_v35  ;;  %v11820_v15 = vpop.f32.mrb[12].mxu1 }
 0x310   :  { %v11821_v20 = vpop.f32.mrb[13].mxu1 }
 0x311   :  { %v15287_v39 = vadd.f32 %v11821_v20, %v11820_v15  ;;  %v11823_v22 = vpop.f32.mrb[14].mxu1  ;;  %v18140_v20 = vld [vmem:[#allocation95_spill] sm:$0xff] }
 0x312   :  { %v11824_v59 = vpop.f32.mrb[15].mxu1 }
 0x313   :  { %v15289_v16 = vadd.f32 %v11824_v59, %v11823_v22 }
 0x316   :  { %3384 = vmatmul.mubr.bf16.gmra.mrb[188].mxu0 %v18136_v44  ;;  %v18141_v44 = vld [vmem:[#allocation96_spill] sm:$0xff] }
 0x317   :  { %10144 = vmatprep.mubr.msk.bf16.mxu0 %vm1301_vm1, %v18137_v7  ;;  %v11826_v21 = vpop.f32.mrb[16].mxu1 }
 0x318   :  { %v11827_v34 = vpop.f32.mrb[17].mxu1 }
 0x319   :  { %v15294_v2 = vpop.f32.mrb[92].mxu0  ;;  %v15296_v27 = vadd.f32 %v11827_v34, %v11826_v21  ;;  %v11829_v35 = vpop.f32.mrb[18].mxu1 }
 0x31a   :  { %18138 = vst [vmem:[#allocation50_spill] sm:$0xff] %v15294_v2  ;;  %v2189_v47 = vpop.f32.mrb[93].mxu0  ;;  %v11830_v37 = vpop.f32.mrb[19].mxu1 }
 0x31b   :  { %2284 = vrot.lane.b32.xlu0 %v2189_v47, %s13563_s18  ;;  %v15299_v15 = vpop.f32.mrb[94].mxu0  ;;  %v15301_v22 = vadd.f32 %v11830_v37, %v11829_v35  ;;  %v18142_v47 = vld [vmem:[#allocation97_spill] sm:$0xff]  ;;  %v18143_v37 = vld [vmem:[#allocation98_spill] sm:$0xff] }
 0x31c   :  { %18139 = vst [vmem:[#allocation52_spill] sm:$0xff] %v15299_v15  ;;  %v2192_v59 = vpop.f32.mrb[95].mxu0 }
 0x31d   :  { %2286 = vrot.lane.b32.xlu1 %v2192_v59, %s13563_s18 }
 0x31e   :  { %3392 = vmatmul.mubr.bf16.gmra.mrb[192].mxu0 %v18140_v20 }
 0x31f   :  { %10145 = vmatprep.mubr.msk.bf16.mxu0 %vm1301_vm1, %v18141_v44  ;;  %v11832_v7 = vpop.f32.mrb[20].mxu1 }
 0x320   :  { %v11833_v21 = vpop.f32.mrb[21].mxu1 }
 0x321   :  { %v15307_v34 = vadd.f32 %v11833_v21, %v11832_v7  ;;  %v11835_v2 = vpop.f32.mrb[22].mxu1  ;;  %v18146_v21 = vld [vmem:[#allocation99_spill] sm:$0xff] }
 0x322   :  { %v11836_v6 = vpop.f32.mrb[23].mxu1 }
 0x323   :  { %v15309_v51 = vadd.f32 %v11836_v6, %v11835_v2 }
 0x326   :  { %3400 = vmatmul.mubr.bf16.gmra.mrb[196].mxu0 %v18142_v47  ;;  %v18147_v47 = vld [vmem:[#allocation100_spill] sm:$0xff] }
 0x327   :  { %10146 = vmatprep.mubr.msk.bf16.mxu0 %vm1301_vm1, %v18143_v37  ;;  %v11838_v35 = vpop.f32.mrb[24].mxu1 }
 0x328   :  { %v11839_v59 = vpop.f32.mrb[25].mxu1 }
 0x329   :  { %v15314_v15 = vpop.f32.mrb[96].mxu0  ;;  %v15316_v20 = vadd.f32 %v11839_v59, %v11838_v35  ;;  %v11841_v44 = vpop.f32.mrb[26].mxu1 }
 0x32a   :  { %18144 = vst [vmem:[#allocation54_spill] sm:$0xff] %v15314_v15  ;;  %v2205_v14 = vpop.f32.mrb[97].mxu0  ;;  %v11842_v8 = vpop.f32.mrb[27].mxu1 }
 0x32b   :  { %2296 = vrot.lane.b32.xlu0 %v2205_v14, %s13564_s19  ;;  %v15319_v7 = vpop.f32.mrb[98].mxu0  ;;  %v15321_v6 = vadd.f32 %v11842_v8, %v11841_v44  ;;  %v18148_v14 = vld [vmem:[#allocation101_spill] sm:$0xff]  ;;  %v18149_v8 = vld [vmem:[#allocation102_spill] sm:$0xff] }
 0x32c   :  { %18145 = vst [vmem:[#allocation112_spill] sm:$0xff] %v15319_v7  ;;  %v2208_v2 = vpop.f32.mrb[99].mxu0 }
 0x32d   :  { %2298 = vrot.lane.b32.xlu1 %v2208_v2, %s13564_s19 }
 0x32e   :  { %3408 = vmatmul.mubr.bf16.gmra.mrb[200].mxu0 %v18146_v21 }
 0x32f   :  { %10147 = vmatprep.mubr.msk.bf16.mxu0 %vm1301_vm1, %v18147_v47  ;;  %v11844_v37 = vpop.f32.mrb[28].mxu1 }
 0x330   :  { %v11845_v35 = vpop.f32.mrb[29].mxu1 }
 0x331   :  { %v15327_v59 = vadd.f32 %v11845_v35, %v11844_v37  ;;  %v11847_v15 = vpop.f32.mrb[30].mxu1  ;;  %v18152_v35 = vld [vmem:[#allocation103_spill] sm:$0xff] }
 0x332   :  { %v11848_v53 = vpop.f32.mrb[31].mxu1 }
 0x333   :  { %v15329_v54 = vadd.f32 %v11848_v53, %v11847_v15 }
 0x336   :  { %3416 = vmatmul.mubr.bf16.gmra.mrb[204].mxu0 %v18148_v14  ;;  %v18153_v14 = vld [vmem:[#allocation104_spill] sm:$0xff] }
 0x337   :  { %10148 = vmatprep.mubr.msk.bf16.mxu0 %vm1301_vm1, %v18149_v8  ;;  %v11850_v44 = vpop.f32.mrb[32].mxu1 }
 0x338   :  { %v11851_v2 = vpop.f32.mrb[33].mxu1 }
 0x339   :  { %v15334_v7 = vpop.f32.mrb[100].mxu0  ;;  %v15336_v21 = vadd.f32 %v11851_v2, %v11850_v44  ;;  %v11853_v47 = vpop.f32.mrb[34].mxu1 }
 0x33a   :  { %18150 = vst [vmem:[#allocation56_spill] sm:$0xff] %v15334_v7  ;;  %v2221_v56 = vpop.f32.mrb[101].mxu0  ;;  %v11854_v38 = vpop.f32.mrb[35].mxu1 }
 0x33b   :  { %2308 = vrot.lane.b32.xlu0 %v2221_v56, %s13565_s20  ;;  %v15339_v37 = vpop.f32.mrb[102].mxu0  ;;  %v15341_v53 = vadd.f32 %v11854_v38, %v11853_v47 }
 0x33c   :  { %18151 = vst [vmem:[#allocation51_spill] sm:$0xff] %v15339_v37  ;;  %v2224_v15 = vpop.f32.mrb[103].mxu0 }
 0x33d   :  { %2310 = vrot.lane.b32.xlu1 %v2224_v15, %s13565_s20 }
 0x33e   :  { %3424 = vmatmul.mubr.bf16.gmra.mrb[208].mxu0 %v18152_v35  ;;  %v18155_v35 = vld [vmem:[#allocation107_spill] sm:$0xff] }
 0x33f   :  { %10149 = vmatprep.mubr.msk.bf16.mxu0 %vm1301_vm1, %v18153_v14  ;;  %v11856_v8 = vpop.f32.mrb[36].mxu1 }
 0x340   :  { %v11857_v44 = vpop.f32.mrb[37].mxu1 }
 0x341   :  { %v11678_v2 = vpop.f32.mrb[104].mxu0  ;;  %v15347_v7 = vadd.f32 %v11857_v44, %v11856_v8  ;;  %v11859_v26 = vpop.f32.mrb[38].mxu1 }
 0x342   :  { %v11679_v62 = vpop.f32.mrb[105].mxu0  ;;  %v11860_v56 = vpop.f32.mrb[39].mxu1 }
 0x343   :  { %18154 = vst [vmem:[#allocation53_spill] sm:$0xff] %v15347_v7  ;;  %v11680_v52 = vadd.f32 %v11679_v62, %v11678_v2  ;;  %v11681_v37 = vpop.f32.mrb[106].mxu0  ;;  %v15349_v38 = vadd.f32 %v11860_v56, %v11859_v26 }
 0x344   :  { %v11682_v47 = vpop.f32.mrb[107].mxu0 }
 0x345   :  { %v3024_v15 = vadd.f32 %v11680_v52, %v15089_v11  ;;  %v11683_v50 = vadd.f32 %v11682_v47, %v11681_v37 }
 0x346   :  { %3432 = vmatmul.mubr.bf16.gmra.mrb[212].mxu0 %v18155_v35 }
 0x347   :  { %v3027_v14 = vadd.f32 %v11683_v50, %v15091_v43  ;;  %10150 = vmatprep.mubr.msk.bf16.mxu0 %vm1301_vm1, %v18156_v5  ;;  %v11862_v8 = vpop.f32.mrb[40].mxu1  ;;  %v15357_v44 = vadd.f32 %v15236_v19, %v3024_v15  ;;  %v18157_v19 = vld [vmem:[#allocation111_spill] sm:$0xff] }
 0x348   :  { %v11863_v7 = vpop.f32.mrb[41].mxu1 }
 0x349   :  { %v11684_v62 = vpop.f32.mrb[108].mxu0  ;;  %v15359_v2 = vadd.f32 %v11863_v7, %v11862_v8  ;;  %v11865_v26 = vpop.f32.mrb[42].mxu1  ;;  %v15362_v56 = vadd.f32 %v15241_v58, %v3027_v14  ;;  %v18158_v7 = vld [vmem:[#allocation113_spill] sm:$0xff] }
 0x34a   :  { %v11685_v11 = vpop.f32.mrb[109].mxu0  ;;  %v11866_v52 = vpop.f32.mrb[43].mxu1 }
 0x34b   :  { %v11686_v37 = vadd.f32 %v11685_v11, %v11684_v62  ;;  %v11687_v47 = vpop.f32.mrb[110].mxu0  ;;  %v15364_v43 = vadd.f32 %v11866_v52, %v11865_v26 }
 0x34c   :  { %v11688_v50 = vpop.f32.mrb[111].mxu0 }
 0x34d   :  { %v3032_v5 = vadd.f32 %v11686_v37, %v15105_v60  ;;  %v11689_v35 = vadd.f32 %v11688_v50, %v11687_v47 }
 0x34e   :  { %3440 = vmatmul.mubr.bf16.gmra.mrb[216].mxu0 %v18157_v19 }
 0x34f   :  { %v3035_v15 = vadd.f32 %v11689_v35, %v15110_v41  ;;  %10151 = vmatprep.mubr.msk.bf16.mxu0 %vm1301_vm1, %v18158_v7  ;;  %v11868_v8 = vpop.f32.mrb[44].mxu1  ;;  %v15372_v58 = vadd.f32 %v15247_v0, %v3032_v5  ;;  %v18159_v0 = vld [vmem:[#allocation116_spill] sm:$0xff] }
 0x350   :  { %v11869_v14 = vpop.f32.mrb[45].mxu1 }
 0x351   :  { %v11690_v62 = vpop.f32.mrb[112].mxu0  ;;  %v15374_v11 = vadd.f32 %v11869_v14, %v11868_v8  ;;  %v15377_v26 = vadd.f32 %v15249_v57, %v3035_v15  ;;  %v11871_v52 = vpop.f32.mrb[46].mxu1  ;;  %v18160_v8 = vld [vmem:[#allocation117_spill] sm:$0xff] }
 0x352   :  { %v11691_v60 = vpop.f32.mrb[113].mxu0  ;;  %v11872_v50 = vpop.f32.mrb[47].mxu1 }
 0x353   :  { %v11692_v37 = vadd.f32 %v11691_v60, %v11690_v62  ;;  %v11693_v47 = vpop.f32.mrb[114].mxu0  ;;  %v15379_v35 = vadd.f32 %v11872_v50, %v11871_v52 }
 0x354   :  { %v11694_v41 = vpop.f32.mrb[115].mxu0 }
 0x355   :  { %v3040_v19 = vadd.f32 %v11692_v37, %v15114_v49  ;;  %v11695_v7 = vadd.f32 %v11694_v41, %v11693_v47 }
 0x356   :  { %3448 = vmatmul.mubr.bf16.gmra.mrb[220].mxu0 %v18159_v0 }
 0x357   :  { %v3043_v5 = vadd.f32 %v11695_v7, %v15121_v4  ;;  %10152 = vmatprep.mubr.msk.bf16.mxu0 %vm1301_vm1, %v18160_v8  ;;  %v11874_v57 = vpop.f32.mrb[48].mxu1  ;;  %v15387_v15 = vadd.f32 %v15256_v30, %v3040_v19 }
 0x358   :  { %v11875_v14 = vpop.f32.mrb[49].mxu1 }
 0x359   :  { %v11696_v62 = vpop.f32.mrb[116].mxu0  ;;  %v15389_v60 = vadd.f32 %v11875_v14, %v11874_v57  ;;  %v11877_v52 = vpop.f32.mrb[50].mxu1  ;;  %v15392_v50 = vadd.f32 %v15261_v33, %v3043_v5 }
 0x35a   :  { %v11697_v49 = vpop.f32.mrb[117].mxu0  ;;  %v11878_v37 = vpop.f32.mrb[51].mxu1 }
 0x35b   :  { %v11698_v47 = vadd.f32 %v11697_v49, %v11696_v62  ;;  %v11699_v41 = vpop.f32.mrb[118].mxu0  ;;  %v15394_v4 = vadd.f32 %v11878_v37, %v11877_v52 }
 0x35c   :  { %v11700_v7 = vpop.f32.mrb[119].mxu0 }
 0x35d   :  { %v3048_v0 = vadd.f32 %v11698_v47, %v15124_v1  ;;  %v11701_v8 = vadd.f32 %v11700_v7, %v11699_v41 }
 0x35e   :  { %3456 = vmatmul.mubr.bf16.gmra.mrb[224].mxu0 %v14755_v25 }
 0x35f   :  { %v3051_v30 = vadd.f32 %v11701_v8, %v15129_v31  ;;  %10153 = vmatprep.mubr.msk.bf16.mxu0 %vm1301_vm1, %v14757_v32  ;;  %v11880_v19 = vpop.f32.mrb[52].mxu1  ;;  %v15402_v33 = vadd.f32 %v15267_v12, %v3048_v0 }
 0x360   :  { %v11881_v5 = vpop.f32.mrb[53].mxu1 }
 0x361   :  { %v11702_v57 = vpop.f32.mrb[120].mxu0  ;;  %v15404_v14 = vadd.f32 %v11881_v5, %v11880_v19  ;;  %v15407_v62 = vadd.f32 %v15269_v24, %v3051_v30  ;;  %v11883_v52 = vpop.f32.mrb[54].mxu1 }
 0x362   :  { %v11703_v1 = vpop.f32.mrb[121].mxu0  ;;  %v11884_v37 = vpop.f32.mrb[55].mxu1 }
 0x363   :  { %v11704_v49 = vadd.f32 %v11703_v1, %v11702_v57  ;;  %v11705_v25 = vpop.f32.mrb[122].mxu0  ;;  %v15409_v47 = vadd.f32 %v11884_v37, %v11883_v52 }
 0x364   :  { %v11706_v31 = vpop.f32.mrb[123].mxu0 }
 0x365   :  { %v3056_v32 = vadd.f32 %v11704_v49, %v15132_v9  ;;  %v11707_v41 = vadd.f32 %v11706_v31, %v11705_v25 }
 0x366   :  { %3464 = vmatmul.mubr.bf16.gmra.mrb[228].mxu0 %v14774_v45 }
 0x367   :  { %v3059_v12 = vadd.f32 %v11707_v41, %v15139_v61  ;;  %v15415_v7 = vadd.f32 %v15276_v40, %v3056_v32 }
 0x369   :  { %v11708_v24 = vpop.f32.mrb[124].mxu0  ;;  %v15418_v0 = vadd.f32 %v15281_v63, %v3059_v12 }
 0x36a   :  { %v11709_v8 = vpop.f32.mrb[125].mxu0 }
 0x36b   :  { %v11710_v30 = vadd.f32 %v11709_v8, %v11708_v24  ;;  %v11711_v19 = vpop.f32.mrb[126].mxu0 }
 0x36c   :  { %v11712_v5 = vpop.f32.mrb[127].mxu0 }
 0x36d   :  { %v3064_v57 = vadd.f32 %v11710_v30, %v15142_v17  ;;  %v11713_v1 = vadd.f32 %v11712_v5, %v11711_v19 }
 0x36f   :  { %v3067_v9 = vadd.f32 %v11713_v1, %v15147_v3  ;;  %v15423_v45 = vadd.f32 %v15287_v39, %v3064_v57 }
 0x371   :  { %v11714_v61 = vpop.f32.mrb[128].mxu0  ;;  %v15426_v40 = vadd.f32 %v15289_v16, %v3067_v9 }
 0x372   :  { %v11715_v52 = vpop.f32.mrb[129].mxu0 }
 0x373   :  { %v11716_v49 = vadd.f32 %v11715_v52, %v11714_v61  ;;  %v11717_v63 = vpop.f32.mrb[130].mxu0 }
 0x374   :  { %v11718_v25 = vpop.f32.mrb[131].mxu0 }
 0x375   :  { %v3072_v37 = vadd.f32 %v11716_v49, %v15150_v36  ;;  %v11719_v31 = vadd.f32 %v11718_v25, %v11717_v63 }
 0x377   :  { %v3075_v32 = vadd.f32 %v11719_v31, %v15157_v13  ;;  %v15431_v17 = vadd.f32 %v15296_v27, %v3072_v37 }
 0x379   :  { %v11720_v3 = vpop.f32.mrb[132].mxu0  ;;  %v15434_v39 = vadd.f32 %v15301_v22, %v3075_v32 }
 0x37a   :  { %v11721_v41 = vpop.f32.mrb[133].mxu0 }
 0x37b   :  { %v11722_v12 = vadd.f32 %v11721_v41, %v11720_v3  ;;  %v11723_v16 = vpop.f32.mrb[134].mxu0  ;;  %v2237_v41 = vpop.permute.xlu0 %2236 }
 0x37c   :  { %v11724_v24 = vpop.f32.mrb[135].mxu0 }
 0x37d   :  { %v3080_v8 = vadd.f32 %v11722_v12, %v15163_v46  ;;  %v11725_v30 = vadd.f32 %v11724_v24, %v11723_v16  ;;  %v2249_v24 = vpop.permute.xlu1 %2248 }
 0x37f   :  { %v3083_v19 = vadd.f32 %v11725_v30, %v15165_v55  ;;  %v15439_v36 = vadd.f32 %v15307_v34, %v3080_v8 }
 0x381   :  { %v11726_v13 = vpop.f32.mrb[136].mxu0  ;;  %v15442_v27 = vadd.f32 %v15309_v51, %v3083_v19 }
 0x382   :  { %v11727_v5 = vpop.f32.mrb[137].mxu0 }
 0x383   :  { %v11728_v57 = vadd.f32 %v11727_v5, %v11726_v13  ;;  %v11729_v22 = vpop.f32.mrb[138].mxu0  ;;  %v2251_v5 = vpop.permute.xlu1 %2250 }
 0x384   :  { %v11730_v1 = vpop.f32.mrb[139].mxu0 }
 0x385   :  { %v3088_v9 = vadd.f32 %v11728_v57, %v15171_v28  ;;  %v11731_v61 = vadd.f32 %v11730_v1, %v11729_v22 }
 0x387   :  { %v3091_v52 = vadd.f32 %v11731_v61, %v15173_v48  ;;  %v15447_v46 = vadd.f32 %v15316_v20, %v3088_v9 }
 0x389   :  { %v11732_v55 = vpop.f32.mrb[140].mxu0  ;;  %v15450_v34 = vadd.f32 %v15321_v6, %v3091_v52  ;;  %v2263_v52 = vpop.permute.xlu1 %2262 }
 0x38a   :  { %v11733_v49 = vpop.f32.mrb[141].mxu0 }
 0x38b   :  { %v11734_v63 = vadd.f32 %v11733_v49, %v11732_v55  ;;  %v11735_v51 = vpop.f32.mrb[142].mxu0  ;;  %v18161_v55 = vld [vmem:[#allocation105_spill] sm:$0xff] }
 0x38c   :  { %v11736_v25 = vpop.f32.mrb[143].mxu0  ;;  %v18162_v49 = vld [vmem:[#allocation53_spill] sm:$0xff] }
 0x38d   :  { %v3096_v37 = vadd.f32 %v11734_v63, %v15177_v23  ;;  %v11737_v31 = vadd.f32 %v11736_v25, %v11735_v51 }
 0x38f   :  { %v3099_v32 = vadd.f32 %v11737_v31, %v15179_v29  ;;  %v15455_v28 = vadd.f32 %v15327_v59, %v3096_v37  ;;  %v2239_v59 = vpop.permute.xlu0 %2238  ;;  %v2275_v37 = vpop.permute.xlu1 %2274 }
 0x391   :  { %v11738_v48 = vpop.f32.mrb[144].mxu0  ;;  %v15458_v20 = vadd.f32 %v15329_v54, %v3099_v32 }
 0x392   :  { %v11739_v3 = vpop.f32.mrb[145].mxu0 }
 0x393   :  { %v11740_v6 = vadd.f32 %v11739_v3, %v11738_v48  ;;  %v11741_v12 = vpop.f32.mrb[146].mxu0  ;;  %v2261_v9 = vpop.permute.xlu0 %2260  ;;  %v18163_v48 = vld [vmem:[#allocation106_spill] sm:$0xff] }
 0x394   :  { %v11742_v16 = vpop.f32.mrb[147].mxu0  ;;  %v2244_v3 = vadd.f32 %v2237_v41, %v18163_v48 }
 0x395   :  { %v3104_v8 = vadd.f32 %v11740_v6, %v15183_v18  ;;  %v11743_v30 = vadd.f32 %v11742_v16, %v11741_v12  ;;  %v18164_v6 = vld [vmem:[#allocation110_spill] sm:$0xff] }
 0x397   :  { %v3107_v23 = vadd.f32 %v11743_v30, %v15185_v42  ;;  %v15463_v29 = vadd.f32 %v15336_v21, %v3104_v8  ;;  %v2273_v63 = vpop.permute.xlu0 %2272  ;;  %v18165_v8 = vld [vmem:[#allocation22_spill] sm:$0xff] }
 0x399   :  { %v11744_v19 = vpop.f32.mrb[148].mxu0  ;;  %v15466_v13 = vadd.f32 %v15341_v53, %v3107_v23 }
 0x39a   :  { %v11745_v54 = vpop.f32.mrb[149].mxu0 }
 0x39b   :  { %v11746_v57 = vadd.f32 %v11745_v54, %v11744_v19  ;;  %v11747_v22 = vpop.f32.mrb[150].mxu0  ;;  %v2285_v16 = vpop.permute.xlu0 %2284  ;;  %v2256_v19 = vadd.f32 %v2249_v24, %v2244_v3  ;;  %v18167_v3 = vld [vmem:[#allocation114_spill] sm:$0xff] }
 0x39c   :  { %v11748_v1 = vpop.f32.mrb[151].mxu0 }
 0x39d   :  { %v3112_v61 = vadd.f32 %v11746_v57, %v15189_v10  ;;  %v11749_v18 = vadd.f32 %v11748_v1, %v11747_v22  ;;  %v2245_v10 = vadd.f32 %v2239_v59, %v18164_v6  ;;  %v2287_v57 = vpop.permute.xlu1 %2286  ;;  %v18166_v22 = vld [vmem:[#allocation26_spill] sm:$0xff] }
 0x39f   :  { %v3115_v42 = vadd.f32 %v11749_v18, %v18161_v55  ;;  %v15471_v21 = vadd.f32 %v18162_v49, %v3112_v61  ;;  %v2257_v54 = vadd.f32 %v2251_v5, %v2245_v10  ;;  %v2268_v61 = vadd.f32 %v2261_v9, %v2256_v19  ;;  %v2297_v55 = vpop.permute.xlu0 %2296 }
 0x3a1   :  { %v11750_v51 = vpop.f32.mrb[152].mxu0  ;;  %v15474_v53 = vadd.f32 %v15349_v38, %v3115_v42  ;;  %v2269_v18 = vadd.f32 %v2263_v52, %v2257_v54  ;;  %v2280_v59 = vadd.f32 %v2273_v63, %v2268_v61  ;;  %v18169_v61 = vld [vmem:[#allocation115_spill] sm:$0xff] }
 0x3a2   :  { %v11751_v25 = vpop.f32.mrb[153].mxu0 }
 0x3a3   :  { %v11752_v31 = vadd.f32 %v11751_v25, %v11750_v51  ;;  %v11753_v32 = vpop.f32.mrb[154].mxu0  ;;  %v2281_v49 = vadd.f32 %v2275_v37, %v2269_v18  ;;  %v2299_v25 = vpop.permute.xlu1 %2298  ;;  %v2292_v5 = vadd.f32 %v2285_v16, %v2280_v59 }
 0x3a4   :  { %v11754_v12 = vpop.f32.mrb[155].mxu0 }
 0x3a5   :  { %v3120_v30 = vadd.f32 %v11752_v31, %v18165_v8  ;;  %v11755_v23 = vadd.f32 %v11754_v12, %v11753_v32  ;;  %v2293_v32 = vadd.f32 %v2287_v57, %v2281_v49  ;;  %v2304_v9 = vadd.f32 %v2297_v55, %v2292_v5  ;;  %v18168_v12 = vld [vmem:[#allocation28_spill] sm:$0xff]  ;;  %v18171_v5 = vld [vmem:[#allocation109_spill] sm:$0xff] }
 0x3a7   :  { %v3123_v1 = vadd.f32 %v11755_v23, %v18166_v22  ;;  %v15481_v38 = vadd.f32 %v15359_v2, %v3120_v30  ;;  %v2305_v52 = vadd.f32 %v2299_v25, %v2293_v32 }
 0x3a9   :  { %v11756_v42 = vpop.f32.mrb[156].mxu0  ;;  %v15484_v41 = vadd.f32 %v15364_v43, %v3123_v1 }
 0x3aa   :  { %v11757_v51 = vpop.f32.mrb[157].mxu0 }
 0x3ab   :  { %v11758_v31 = vadd.f32 %v11757_v51, %v11756_v42  ;;  %v11759_v24 = vpop.f32.mrb[158].mxu0  ;;  %v18170_v42 = vld [vmem:[#allocation34_spill] sm:$0xff] }
 0x3ac   :  { %v11760_v48 = vpop.f32.mrb[159].mxu0 }
 0x3ad   :  { %v3128_v6 = vadd.f32 %v11758_v31, %v18167_v3  ;;  %v11761_v2 = vadd.f32 %v11760_v48, %v11759_v24  ;;  %v2309_v10 = vpop.permute.xlu0 %2308  ;;  %v18172_v3 = vld [vmem:[#allocation36_spill] sm:$0xff] }
 0x3ae   :  { %v2316_v63 = vadd.f32 %v2309_v10, %v2304_v9 }
 0x3af   :  { %v3131_v8 = vadd.f32 %v11761_v2, %v18168_v12  ;;  %v2311_v30 = vpop.permute.xlu1 %2310  ;;  %v15489_v43 = vadd.f32 %v15374_v11, %v3128_v6 }
 0x3b0   :  { %v2317_v37 = vadd.f32 %v2311_v30, %v2305_v52 }
 0x3b1   :  { %v11762_v23 = vpop.f32.mrb[160].mxu0  ;;  %v15492_v19 = vadd.f32 %v15379_v35, %v3131_v8 }
 0x3b2   :  { %v2320_v16 = vpack.c.bf16 %v2317_v37, %v2316_v63  ;;  %v11763_v54 = vpop.f32.mrb[161].mxu0 }
 0x3b3   :  { %v11764_v57 = vadd.f32 %v11763_v54, %v11762_v23  ;;  %v11765_v22 = vpop.f32.mrb[162].mxu0 }
 0x3b4   :  { %2322 = vst [vmem:[#allocation2] sm:$0xff] %v2320_v16  ;;  %v11766_v1 = vpop.f32.mrb[163].mxu0 }
 0x3b5   :  { %v3136_v18 = vadd.f32 %v11764_v57, %v18169_v61  ;;  %v11767_v55 = vadd.f32 %v11766_v1, %v11765_v22 }
 0x3b7   :  { %v3139_v59 = vadd.f32 %v11767_v55, %v18170_v42  ;;  %v15497_v11 = vadd.f32 %v15389_v60, %v3136_v18 }
 0x3b9   :  { %v11768_v49 = vpop.f32.mrb[164].mxu0  ;;  %v15500_v51 = vadd.f32 %v15394_v4, %v3139_v59 }
 0x3ba   :  { %v11769_v35 = vpop.f32.mrb[165].mxu0 }
 0x3bb   :  { %v11770_v25 = vadd.f32 %v11769_v35, %v11768_v49  ;;  %v11771_v31 = vpop.f32.mrb[166].mxu0 }
 0x3bc   :  { %v11772_v24 = vpop.f32.mrb[167].mxu0 }
 0x3bd   :  { %v3144_v32 = vadd.f32 %v11770_v25, %v18171_v5  ;;  %v11773_v48 = vadd.f32 %v11772_v24, %v11771_v31 }
 0x3bf   :  { %v3147_v6 = vadd.f32 %v11773_v48, %v18172_v3  ;;  %v15505_v2 = vadd.f32 %v15404_v14, %v3144_v32 }
 0x3c1   :  { %v3345_v10 = vpop.f32.mrb[168].mxu0  ;;  %v15508_v60 = vadd.f32 %v15409_v47, %v3147_v6 }
 0x3c2   :  { %v3346_v9 = vadd.f32 %v3345_v10, %v15357_v44  ;;  %v3347_v4 = vpop.f32.mrb[169].mxu0 }
 0x3c3   :  { %v3348_v52 = vpop.f32.mrb[170].mxu0 }
 0x3c4   :  { %v3349_v12 = vadd.f32 %v3348_v52, %v15362_v56  ;;  %v3350_v8 = vpop.f32.mrb[171].mxu0 }
 0x3c6   :  { %v3472_v30 = vpack.c.bf16 %v3349_v12, %v3346_v9 }
 0x3c8   :  { %12254 = vmatprep.mubr.msk.bf16.mxu1 %vm2026_vm2, %v3472_v30 }
 0x3c9   :  { %v3353_v63 = vpop.f32.mrb[172].mxu0 }
 0x3ca   :  { %v3354_v37 = vadd.f32 %v3353_v63, %v15372_v58  ;;  %v3355_v23 = vpop.f32.mrb[173].mxu0 }
 0x3cb   :  { %v3356_v14 = vpop.f32.mrb[174].mxu0 }
 0x3cc   :  { %v3357_v16 = vadd.f32 %v3356_v14, %v15377_v26  ;;  %v3358_v54 = vpop.f32.mrb[175].mxu0 }
 0x3ce   :  { %v3473_v47 = vpack.c.bf16 %v3357_v16, %v3354_v37 }
 0x3d0   :  { %12255 = vmatmul.mubr.msk.bf16.vlgmr.msra.gmra.mrb[56].mxu1 %vm2026_vm2, %v3473_v47 }
 0x3d1   :  { %v3361_v44 = vpop.f32.mrb[176].mxu0 }
 0x3d2   :  { %v3362_v57 = vadd.f32 %v3361_v44, %v15387_v15  ;;  %v3363_v22 = vpop.f32.mrb[177].mxu0 }
 0x3d3   :  { %v3364_v56 = vpop.f32.mrb[178].mxu0 }
 0x3d4   :  { %v3365_v1 = vadd.f32 %v3364_v56, %v15392_v50  ;;  %v3366_v61 = vpop.f32.mrb[179].mxu0 }
 0x3d6   :  { %v3474_v18 = vpack.c.bf16 %v3365_v1, %v3362_v57 }
 0x3d8   :  { %12258 = vmatprep.mubr.msk.bf16.mxu1 %vm2026_vm2, %v3474_v18 }
 0x3d9   :  { %v3369_v58 = vpop.f32.mrb[180].mxu0 }
 0x3da   :  { %v3370_v55 = vadd.f32 %v3369_v58, %v15402_v33  ;;  %v3371_v42 = vpop.f32.mrb[181].mxu0 }
 0x3db   :  { %v3372_v26 = vpop.f32.mrb[182].mxu0 }
 0x3dc   :  { %v3373_v59 = vadd.f32 %v3372_v26, %v15407_v62  ;;  %v3374_v49 = vpop.f32.mrb[183].mxu0 }
 0x3de   :  { %v3475_v35 = vpack.c.bf16 %v3373_v59, %v3370_v55 }
 0x3e0   :  { %12259 = vmatmul.mubr.msk.bf16.gmra.mrb[60].mxu1 %vm2026_vm2, %v3475_v35 }
 0x3e1   :  { %v3377_v15 = vpop.f32.mrb[184].mxu0 }
 0x3e2   :  { %v3378_v25 = vadd.f32 %v3377_v15, %v15415_v7  ;;  %v3379_v31 = vpop.f32.mrb[185].mxu0 }
 0x3e3   :  { %v3380_v50 = vpop.f32.mrb[186].mxu0 }
 0x3e4   :  { %v3381_v24 = vadd.f32 %v3380_v50, %v15418_v0  ;;  %v3382_v5 = vpop.f32.mrb[187].mxu0 }
 0x3e6   :  { %v3476_v32 = vpack.c.bf16 %v3381_v24, %v3378_v25 }
 0x3e8   :  { %12262 = vmatprep.mubr.msk.bf16.mxu1 %vm2026_vm2, %v3476_v32 }
 0x3e9   :  { %v3385_v33 = vpop.f32.mrb[188].mxu0 }
 0x3ea   :  { %v3386_v48 = vadd.f32 %v3385_v33, %v15423_v45  ;;  %v3387_v3 = vpop.f32.mrb[189].mxu0 }
 0x3eb   :  { %v3388_v62 = vpop.f32.mrb[190].mxu0 }
 0x3ec   :  { %v3389_v6 = vadd.f32 %v3388_v62, %v15426_v40  ;;  %v3390_v10 = vpop.f32.mrb[191].mxu0 }
 0x3ee   :  { %v3477_v9 = vpack.c.bf16 %v3389_v6, %v3386_v48 }
 0x3f0   :  { %12263 = vmatmul.mubr.msk.bf16.gmra.mrb[64].mxu1 %vm2026_vm2, %v3477_v9 }
 0x3f1   :  { %v3393_v7 = vpop.f32.mrb[192].mxu0 }
 0x3f2   :  { %v3394_v4 = vadd.f32 %v3393_v7, %v15431_v17  ;;  %v3395_v52 = vpop.f32.mrb[193].mxu0 }
 0x3f3   :  { %v3396_v0 = vpop.f32.mrb[194].mxu0 }
 0x3f4   :  { %v3397_v12 = vadd.f32 %v3396_v0, %v15434_v39  ;;  %v3398_v8 = vpop.f32.mrb[195].mxu0 }
 0x3f6   :  { %v3478_v30 = vpack.c.bf16 %v3397_v12, %v3394_v4 }
 0x3f8   :  { %12266 = vmatprep.mubr.msk.bf16.mxu1 %vm2026_vm2, %v3478_v30 }
 0x3f9   :  { %v3401_v45 = vpop.f32.mrb[196].mxu0 }
 0x3fa   :  { %v3402_v63 = vadd.f32 %v3401_v45, %v15439_v36  ;;  %v3403_v37 = vpop.f32.mrb[197].mxu0 }
 0x3fb   :  { %v3404_v40 = vpop.f32.mrb[198].mxu0 }
 0x3fc   :  { %v3405_v23 = vadd.f32 %v3404_v40, %v15442_v27  ;;  %v3406_v14 = vpop.f32.mrb[199].mxu0 }
 0x3fd   :  { %v13095_v14 = vld [vmem:[%s17774_s4 + $0x48] sm:$0xff]  }
 0x3fe   :  { %v3479_v16 = vpack.c.bf16 %v3405_v23, %v3402_v63 }
 0x400   :  { %12267 = vmatmul.mubr.msk.bf16.gmra.mrb[68].mxu1 %vm2026_vm2, %v3479_v16 }
 0x401   :  { %v3409_v17 = vpop.f32.mrb[200].mxu0 }
 0x402   :  { %v3410_v54 = vadd.f32 %v3409_v17, %v15447_v46  ;;  %v3411_v47 = vpop.f32.mrb[201].mxu0 }
 0x403   :  { %v3412_v39 = vpop.f32.mrb[202].mxu0 }
 0x404   :  { %v3413_v44 = vadd.f32 %v3412_v39, %v15450_v34  ;;  %v3414_v57 = vpop.f32.mrb[203].mxu0  ;;  %v13096_v39 = vld [vmem:[%s17774_s4 + $0x50] sm:$0xff]  }
 0x406   :  { %v3480_v22 = vpack.c.bf16 %v3413_v44, %v3410_v54 }
 0x408   :  { %12270 = vmatprep.mubr.msk.bf16.mxu1 %vm2026_vm2, %v3480_v22 }
 0x409   :  { %v3417_v36 = vpop.f32.mrb[204].mxu0 }
 0x40a   :  { %v3418_v56 = vadd.f32 %v3417_v36, %v15455_v28  ;;  %v3419_v1 = vpop.f32.mrb[205].mxu0 }
 0x40b   :  { %v3420_v27 = vpop.f32.mrb[206].mxu0 }
 0x40c   :  { %v3421_v61 = vadd.f32 %v3420_v27, %v15458_v20  ;;  %v3422_v18 = vpop.f32.mrb[207].mxu0 }
 0x40e   :  { %v3481_v58 = vpack.c.bf16 %v3421_v61, %v3418_v56  ;;  %v13097_v56 = vld [vmem:[%s17774_s4 + $0x58] sm:$0xff]  }
 0x410   :  { %12271 = vmatmul.mubr.msk.bf16.gmra.mrb[72].mxu1 %vm2026_vm2, %v3481_v58  ;;  %v13098_v58 = vld [vmem:[%s17774_s4 + $0x60] sm:$0xff]  }
 0x411   :  { %v3425_v46 = vpop.f32.mrb[208].mxu0 }
 0x412   :  { %v3426_v55 = vadd.f32 %v3425_v46, %v15463_v29  ;;  %v3427_v42 = vpop.f32.mrb[209].mxu0  ;;  %v13099_v46 = vld [vmem:[%s17774_s4] sm:$0xff]  }
 0x413   :  { %v3428_v34 = vpop.f32.mrb[210].mxu0 }
 0x414   :  { %v3429_v26 = vadd.f32 %v3428_v34, %v15466_v13  ;;  %v3430_v59 = vpop.f32.mrb[211].mxu0 }
 0x416   :  { %v3482_v49 = vpack.c.bf16 %v3429_v26, %v3426_v55  ;;  %v13100_v55 = vld [vmem:[%s17774_s4 + $0x8] sm:$0xff]  }
 0x418   :  { %12274 = vmatprep.mubr.msk.bf16.mxu1 %vm2026_vm2, %v3482_v49  ;;  %v13101_v49 = vld [vmem:[%s17774_s4 + $0x68] sm:$0xff]  }
 0x419   :  { %v3433_v28 = vpop.f32.mrb[212].mxu0 }
 0x41a   :  { %v3434_v35 = vadd.f32 %v3433_v28, %v15471_v21  ;;  %v3435_v15 = vpop.f32.mrb[213].mxu0  ;;  %v13102_v28 = vld [vmem:[%s17774_s4 + $0x10] sm:$0xff]  }
 0x41b   :  { %v3436_v20 = vpop.f32.mrb[214].mxu0 }
 0x41c   :  { %v3437_v25 = vadd.f32 %v3436_v20, %v15474_v53  ;;  %v3438_v31 = vpop.f32.mrb[215].mxu0 }
 0x41e   :  { %v3483_v50 = vpack.c.bf16 %v3437_v25, %v3434_v35  ;;  %v13103_v35 = vld [vmem:[%s17774_s4 + $0x18] sm:$0xff]  }
 0x420   :  { %12275 = vmatmul.mubr.msk.bf16.gmra.mrb[76].mxu1 %vm2026_vm2, %v3483_v50  ;;  %v13104_v50 = vld [vmem:[%s17774_s4 + $0x70] sm:$0xff]  }
 0x421   :  { %v3441_v29 = vpop.f32.mrb[216].mxu0 }
 0x422   :  { %v3442_v24 = vadd.f32 %v3441_v29, %v15481_v38  ;;  %v3443_v5 = vpop.f32.mrb[217].mxu0  ;;  %v13105_v29 = vld [vmem:[%s17774_s4 + $0x20] sm:$0xff]  }
 0x423   :  { %v3444_v13 = vpop.f32.mrb[218].mxu0 }
 0x424   :  { %v3445_v32 = vadd.f32 %v3444_v13, %v15484_v41  ;;  %v3446_v33 = vpop.f32.mrb[219].mxu0 }
 0x426   :  { %v3484_v48 = vpack.c.bf16 %v3445_v32, %v3442_v24  ;;  %v13106_v24 = vld [vmem:[%s17774_s4 + $0x28] sm:$0xff]  }
 0x428   :  { %12278 = vmatprep.mubr.msk.bf16.mxu1 %vm2026_vm2, %v3484_v48 }
 0x429   :  { %v3449_v21 = vpop.f32.mrb[220].mxu0 }
 0x42a   :  { %v3450_v3 = vadd.f32 %v3449_v21, %v15489_v43  ;;  %v3451_v62 = vpop.f32.mrb[221].mxu0  ;;  %v13108_v21 = vld [vmem:[%s17774_s4 + $0x30] sm:$0xff]  }
 0x42b   :  { %v3452_v53 = vpop.f32.mrb[222].mxu0 }
 0x42c   :  { %v3453_v6 = vadd.f32 %v3452_v53, %v15492_v19  ;;  %v3454_v10 = vpop.f32.mrb[223].mxu0  ;;  %v13107_v53 = vld [vmem:[%s17774_s4 + $0x78] sm:$0xff]  }
 0x42d   :  { %v13109_v10 = vld [vmem:[%s17774_s4 + $0x38] sm:$0xff]  }
 0x42e   :  { %v3485_v9 = vpack.c.bf16 %v3453_v6, %v3450_v3 }
 0x430   :  { %12279 = vmatmul.mubr.msk.bf16.gmra.mrb[80].mxu1 %vm2026_vm2, %v3485_v9  ;;  %v18173_v9 = vld [vmem:[#allocation30_spill] sm:$0xff] }
 0x431   :  { %v3457_v38 = vpop.f32.mrb[224].mxu0 }
 0x432   :  { %v3458_v7 = vadd.f32 %v3457_v38, %v15497_v11  ;;  %v3459_v4 = vpop.f32.mrb[225].mxu0  ;;  %v13566_v11 = vmov 0.0   ;;  %v18174_v38 = vld [vmem:[#allocation32_spill] sm:$0xff] }
 0x433   :  { %v3460_v41 = vpop.f32.mrb[226].mxu0  ;;  %12286 = vmatprep.subr.bf16.mxu0 %v13566_v11  ;;  %12306 = vmatprep.subr.bf16.mxu1 %v13566_v11  ;;  %v18176_v4 = vld [vmem:[#allocation40_spill] sm:$0xff] }
 0x434   :  { %v3461_v52 = vadd.f32 %v3460_v41, %v15500_v51  ;;  %v3462_v0 = vpop.f32.mrb[227].mxu0  ;;  %v13094_v51 = vld [vmem:[%s17774_s4 + $0x40] sm:$0xff]   ;;  %12307 = vmatpush3.bf16.msra.mxu1 %v13099_v46  ;;  %12302 = vmatprep.mubr.msk.bf16.mxu0 %vm13567_vm3, %v13566_v11  ;;  %v18177_v41 = vld [vmem:[#allocation42_spill] sm:$0xff] }
 0x435   :  { %12287 = vmatpush3.bf16.msra.mxu0 %v13094_v51  ;;  %12308 = vmatprep.subr.bf16.mxu1 %v13566_v11  ;;  %v18179_v0 = vld [vmem:[#allocation46_spill] sm:$0xff] }
 0x436   :  { %v3486_v12 = vpack.c.bf16 %v3461_v52, %v3458_v7  ;;  %12288 = vmatprep.subr.bf16.mxu0 %v13566_v11  ;;  %v18175_v7 = vld [vmem:[#allocation38_spill] sm:$0xff]  ;;  %v18178_v52 = vld [vmem:[#allocation44_spill] sm:$0xff] }
 0x438   :  { %12282 = vmatprep.mubr.msk.bf16.mxu1 %vm2026_vm2, %v3486_v12  ;;  %12309 = vmatpush3.bf16.msra.mxu1 %v13100_v55  ;;  %v18180_v12 = vld [vmem:[#allocation48_spill] sm:$0xff] }
 0x439   :  { %v3465_v43 = vpop.f32.mrb[228].mxu0  ;;  %12289 = vmatpush3.bf16.msra.mxu0 %v13095_v14  ;;  %12310 = vmatprep.subr.bf16.mxu1 %v13566_v11 }
 0x43a   :  { %v3466_v8 = vadd.f32 %v3465_v43, %v15505_v2  ;;  %v3467_v30 = vpop.f32.mrb[229].mxu0  ;;  %12290 = vmatprep.subr.bf16.mxu0 %v13566_v11  ;;  %v18181_v43 = vld [vmem:[#allocation50_spill] sm:$0xff] }
 0x43b   :  { %v3468_v19 = vpop.f32.mrb[230].mxu0  ;;  %v18183_v30 = vld [vmem:[#allocation54_spill] sm:$0xff] }
 0x43c   :  { %v3469_v45 = vadd.f32 %v3468_v19, %v15508_v60  ;;  %v3470_v63 = vpop.f32.mrb[231].mxu0  ;;  %12311 = vmatpush3.bf16.msra.mxu1 %v13102_v28  ;;  %v18184_v19 = vld [vmem:[#allocation112_spill] sm:$0xff] }
 0x43d   :  { %12291 = vmatpush3.bf16.msra.mxu0 %v13096_v39  ;;  %12312 = vmatprep.subr.bf16.mxu1 %v13566_v11  ;;  %v18186_v63 = vld [vmem:[#allocation51_spill] sm:$0xff] }
 0x43e   :  { %v3487_v37 = vpack.c.bf16 %v3469_v45, %v3466_v8  ;;  %12292 = vmatprep.subr.bf16.mxu0 %v13566_v11  ;;  %v18182_v8 = vld [vmem:[#allocation52_spill] sm:$0xff] }
 0x43f   :  { %v18185_v45 = vld [vmem:[#allocation56_spill] sm:$0xff] }
 0x440   :  { %12283 = vmatmul.mubr.msk.bf16.gmra.mrb[84].mxu1 %vm2026_vm2, %v3487_v37 }
 0x441   :  { %12293 = vmatpush3.bf16.msra.mxu0 %v13097_v56  ;;  %12313 = vmatpush3.bf16.msra.mxu1 %v13103_v35 }
 0x442   :  { %12294 = vmatprep.subr.bf16.mxu0 %v13566_v11  ;;  %12314 = vmatprep.subr.bf16.mxu1 %v13566_v11 }
 0x443   :  { %12322 = vmatprep.mubr.msk.bf16.mxu1 %vm13567_vm3, %v13566_v11 }
 0x445   :  { %12295 = vmatpush3.bf16.msra.mxu0 %v13098_v58  ;;  %12315 = vmatpush3.bf16.msra.mxu1 %v13105_v29 }
 0x446   :  { %12296 = vmatprep.subr.bf16.mxu0 %v13566_v11  ;;  %12316 = vmatprep.subr.bf16.mxu1 %v13566_v11 }
 0x449   :  { %12297 = vmatpush3.bf16.msra.mxu0 %v13101_v49  ;;  %12317 = vmatpush3.bf16.msra.mxu1 %v13106_v24 }
 0x44a   :  { %12298 = vmatprep.subr.bf16.mxu0 %v13566_v11  ;;  %12318 = vmatprep.subr.bf16.mxu1 %v13566_v11 }
 0x44d   :  { %12299 = vmatpush3.bf16.msra.mxu0 %v13104_v50  ;;  %12319 = vmatpush3.bf16.msra.mxu1 %v13108_v21 }
 0x44e   :  { %12300 = vmatprep.subr.bf16.mxu0 %v13566_v11  ;;  %12320 = vmatprep.subr.bf16.mxu1 %v13566_v11 }
 0x451   :  { %12301 = vmatpush3.bf16.msra.mxu0 %v13107_v53  ;;  %12321 = vmatpush3.bf16.msra.mxu1 %v13109_v10 }
 0x452   :  { %12326 = vmatprep.subr.bf16.mxu0 %v13566_v11  ;;  %12346 = vmatprep.subr.bf16.mxu1 %v13566_v11 }
 0x4a3   :  { %v15564_v2 = vpop.f32.mrb[56].mxu1 }
 0x4a4   :  { %v15566_v40 = vpop.f32.mrb[57].mxu1 }
 0x4a5   :  { %v15568_v60 = vpop.f32.mrb[58].mxu1 }
 0x4a6   :  { %v15570_v23 = vpop.f32.mrb[59].mxu1 }
 0x4b3   :  { %v15576_v16 = vpop.f32.mrb[60].mxu1 }
 0x4b4   :  { %v3586_v17 = vpop.f32.mrb[61].mxu1 }
 0x4b5   :  { %3697 = vrot.lane.b32.xlu0 %v3586_v17, %s13559_s0  ;;  %v15579_v54 = vpop.f32.mrb[62].mxu1 }
 0x4b6   :  { %v3589_v47 = vpop.f32.mrb[63].mxu1 }
 0x4b7   :  { %3699 = vrot.lane.b32.xlu1 %v3589_v47, %s13559_s0 }
 0x4c3   :  { %v15586_v44 = vpop.f32.mrb[64].mxu1 }
 0x4c4   :  { %v3602_v57 = vpop.f32.mrb[65].mxu1 }
 0x4c5   :  { %3709 = vrot.lane.b32.xlu0 %v3602_v57, %s13560_s16  ;;  %v15589_v22 = vpop.f32.mrb[66].mxu1 }
 0x4c6   :  { %v3605_v36 = vpop.f32.mrb[67].mxu1 }
 0x4c7   :  { %3711 = vrot.lane.b32.xlu1 %v3605_v36, %s13560_s16 }
 0x4d3   :  { %v15596_v1 = vpop.f32.mrb[68].mxu1 }
 0x4d4   :  { %v3618_v27 = vpop.f32.mrb[69].mxu1 }
 0x4d5   :  { %3721 = vrot.lane.b32.xlu0 %v3618_v27, %s13561_s2  ;;  %v15599_v61 = vpop.f32.mrb[70].mxu1 }
 0x4d6   :  { %v3621_v18 = vpop.f32.mrb[71].mxu1 }
 0x4d7   :  { %3723 = vrot.lane.b32.xlu1 %v3621_v18, %s13561_s2 }
 0x4e3   :  { %v15614_v42 = vpop.f32.mrb[72].mxu1 }
 0x4e4   :  { %v3634_v34 = vpop.f32.mrb[73].mxu1 }
 0x4e5   :  { %3733 = vrot.lane.b32.xlu0 %v3634_v34, %s13562_s17  ;;  %v15617_v26 = vpop.f32.mrb[74].mxu1 }
 0x4e6   :  { %v3637_v59 = vpop.f32.mrb[75].mxu1 }
 0x4e7   :  { %3735 = vrot.lane.b32.xlu1 %v3637_v59, %s13562_s17 }
 0x4f3   :  { %v12276_v15 = vpop.f32.mrb[76].mxu1 }
 0x4f4   :  { %v3650_v20 = vpop.f32.mrb[77].mxu1 }
 0x4f5   :  { %3745 = vrot.lane.b32.xlu0 %v3650_v20, %s13563_s18  ;;  %v12277_v25 = vpop.f32.mrb[78].mxu1 }
 0x4f6   :  { %v3653_v31 = vpop.f32.mrb[79].mxu1 }
 0x4f7   :  { %3747 = vrot.lane.b32.xlu1 %v3653_v31, %s13563_s18  ;;  %v3786_v31 = vld [vmem:[#allocation2] sm:$0x1] }
 0x4f8   :  { %v3823_v29 = vunpack.c.l.b16 %v3786_v31  ;;  %v13125_v31 = vld [vmem:[%s17774_s4 + $0xf8] sm:$0xff]  }
 0x503   :  { %v12280_v5 = vpop.f32.mrb[80].mxu1 }
 0x504   :  { %v3666_v13 = vpop.f32.mrb[81].mxu1 }
 0x505   :  { %3757 = vrot.lane.b32.xlu0 %v3666_v13, %s13564_s19  ;;  %v12281_v32 = vpop.f32.mrb[82].mxu1 }
 0x506   :  { %v3669_v33 = vpop.f32.mrb[83].mxu1 }
 0x507   :  { %3759 = vrot.lane.b32.xlu1 %v3669_v33, %s13564_s19  ;;  %v3825_v33 = vrot.slane %v3823_v29, 1 }
 0x513   :  { %v12284_v48 = vpop.f32.mrb[84].mxu1 }
 0x514   :  { %v3682_v3 = vpop.f32.mrb[85].mxu1 }
 0x515   :  { %3769 = vrot.lane.b32.xlu0 %v3682_v3, %s13565_s20  ;;  %v12285_v62 = vpop.f32.mrb[86].mxu1 }
 0x516   :  { %v3685_v6 = vpop.f32.mrb[87].mxu1 }
 0x517   :  { %3771 = vrot.lane.b32.xlu1 %v3685_v6, %s13565_s20 }
 0x519   :  { %3701 = vrot.lane.b32.xlu0 %v15576_v16, %s13559_s0 }
 0x51b   :  { %3703 = vrot.lane.b32.xlu1 %v15579_v54, %s13559_s0 }
 0x51d   :  { %2240 = vrot.lane.b32.xlu0 %v18173_v9, %s13559_s0  ;;  %v13111_v9 = vld [vmem:[%s17774_s4 + $0xc0] sm:$0xff]  }
 0x51f   :  { %2242 = vrot.lane.b32.xlu1 %v18174_v38, %s13559_s0 }
 0x521   :  { %3713 = vrot.lane.b32.xlu0 %v15586_v44, %s13560_s16 }
 0x523   :  { %3715 = vrot.lane.b32.xlu1 %v15589_v22, %s13560_s16 }
 0x525   :  { %2252 = vrot.lane.b32.xlu0 %v18175_v7, %s13560_s16 }
 0x527   :  { %2254 = vrot.lane.b32.xlu1 %v18176_v4, %s13560_s16  ;;  %v3698_v37 = vpop.permute.xlu0 %3697  ;;  %v13112_v4 = vld [vmem:[%s17774_s4 + $0x88] sm:$0xff]  }
 0x528   :  { %v3705_v44 = vadd.f32 %v3698_v37, %v15566_v40 }
 0x529   :  { %3725 = vrot.lane.b32.xlu0 %v15596_v1, %s13561_s2  ;;  %v3700_v51 = vpop.permute.xlu1 %3699 }
 0x52a   :  { %v3706_v57 = vadd.f32 %v3700_v51, %v15570_v23  ;;  %v13118_v51 = vld [vmem:[%s17774_s4 + $0xa0] sm:$0xff]  }
 0x52b   :  { %3727 = vrot.lane.b32.xlu1 %v15599_v61, %s13561_s2 }
 0x52d   :  { %2264 = vrot.lane.b32.xlu0 %v18177_v41, %s13561_s2 }
 0x52f   :  { %2266 = vrot.lane.b32.xlu1 %v18178_v52, %s13561_s2  ;;  %v13113_v52 = vld [vmem:[%s17774_s4 + $0xc8] sm:$0xff]  }
 0x531   :  { %3737 = vrot.lane.b32.xlu0 %v15614_v42, %s13562_s17 }
 0x533   :  { %3739 = vrot.lane.b32.xlu1 %v15617_v26, %s13562_s17 }
 0x535   :  { %2276 = vrot.lane.b32.xlu0 %v18179_v0, %s13562_s17 }
 0x537   :  { %2278 = vrot.lane.b32.xlu1 %v18180_v12, %s13562_s17  ;;  %v3710_v14 = vpop.permute.xlu0 %3709  ;;  %v13114_v12 = vld [vmem:[%s17774_s4 + $0x90] sm:$0xff]  }
 0x538   :  { %v3717_v36 = vadd.f32 %v3710_v14, %v3705_v44  ;;  %v4010_v44 = vld [vmem:[#allocation2] sm:$0x2] }
 0x539   :  { %3749 = vrot.lane.b32.xlu0 %v12276_v15, %s13563_s18  ;;  %v3712_v16 = vpop.permute.xlu1 %3711 }
 0x53a   :  { %v3718_v56 = vadd.f32 %v3712_v16, %v3706_v57  ;;  %v13119_v16 = vld [vmem:[%s17774_s4 + $0xe0] sm:$0xff]   ;;  %v13121_v57 = vld [vmem:[%s17774_s4 + $0xe8] sm:$0xff]  }
 0x53b   :  { %3751 = vrot.lane.b32.xlu1 %v12277_v25, %s13563_s18 }
 0x53d   :  { %2288 = vrot.lane.b32.xlu0 %v18181_v43, %s13563_s18 }
 0x53f   :  { %2290 = vrot.lane.b32.xlu1 %v18182_v8, %s13563_s18  ;;  %v13115_v8 = vld [vmem:[%s17774_s4 + $0xd0] sm:$0xff]  }
 0x541   :  { %3761 = vrot.lane.b32.xlu0 %v12280_v5, %s13564_s19 }
 0x543   :  { %3763 = vrot.lane.b32.xlu1 %v12281_v32, %s13564_s19 }
 0x545   :  { %2300 = vrot.lane.b32.xlu0 %v18183_v30, %s13564_s19 }
 0x547   :  { %2302 = vrot.lane.b32.xlu1 %v18184_v19, %s13564_s19  ;;  %v3722_v17 = vpop.permute.xlu0 %3721  ;;  %v13116_v19 = vld [vmem:[%s17774_s4 + $0x98] sm:$0xff]  }
 0x548   :  { %v3729_v27 = vadd.f32 %v3722_v17, %v3717_v36 }
 0x549   :  { %3773 = vrot.lane.b32.xlu0 %v12284_v48, %s13565_s20  ;;  %v3724_v54 = vpop.permute.xlu1 %3723 }
 0x54a   :  { %v3730_v61 = vadd.f32 %v3724_v54, %v3718_v56  ;;  %v13122_v56 = vld [vmem:[%s17774_s4 + $0xb0] sm:$0xff]  }
 0x54b   :  { %3775 = vrot.lane.b32.xlu1 %v12285_v62, %s13565_s20  ;;  %v13110_v62 = vld [vmem:[%s17774_s4 + $0x80] sm:$0xff]  }
 0x54d   :  { %2312 = vrot.lane.b32.xlu0 %v18185_v45, %s13565_s20 }
 0x54f   :  { %2314 = vrot.lane.b32.xlu1 %v18186_v63, %s13565_s20  ;;  %v13117_v63 = vld [vmem:[%s17774_s4 + $0xd8] sm:$0xff]  }
 0x557   :  { %v3734_v47 = vpop.permute.xlu0 %3733 }
 0x558   :  { %v3741_v58 = vadd.f32 %v3734_v47, %v3729_v27  ;;  %v13120_v47 = vld [vmem:[%s17774_s4 + $0xa8] sm:$0xff]  }
 0x559   :  { %v3736_v39 = vpop.permute.xlu1 %3735 }
 0x55a   :  { %v3742_v46 = vadd.f32 %v3736_v39, %v3730_v61 }
 0x567   :  { %v3746_v22 = vpop.permute.xlu0 %3745 }
 0x568   :  { %v3753_v42 = vadd.f32 %v3746_v22, %v3741_v58  ;;  %v13123_v58 = vld [vmem:[%s17774_s4 + $0xf0] sm:$0xff]  }
 0x569   :  { %v3748_v1 = vpop.permute.xlu1 %3747 }
 0x56a   :  { %v3754_v34 = vadd.f32 %v3748_v1, %v3742_v46  ;;  %v4031_v1 = vunpack.c.l.b16 %v4010_v44 }
 0x577   :  { %v3758_v18 = vpop.permute.xlu0 %3757 }
 0x578   :  { %v3765_v59 = vadd.f32 %v3758_v18, %v3753_v42 }
 0x579   :  { %v3760_v55 = vpop.permute.xlu1 %3759 }
 0x57a   :  { %v3766_v49 = vadd.f32 %v3760_v55, %v3754_v34 }
 0x587   :  { %v3770_v26 = vpop.permute.xlu0 %3769 }
 0x588   :  { %v3777_v35 = vadd.f32 %v3770_v26, %v3765_v59  ;;  %v4033_v26 = vrot.slane %v4031_v1, 2  ;;  %v18187_v59 = vld [vmem:[#allocation20_spill] sm:$0xff] }
 0x589   :  { %v3772_v28 = vpop.permute.xlu1 %3771 }
 0x58a   :  { %v3778_v40 = vadd.f32 %v3772_v28, %v3766_v49 }
 0x58b   :  { %v15718_v15 = vpop.permute.xlu0 %3701 }
 0x58c   :  { %v3781_v23 = vpack.c.bf16 %v3778_v40, %v3777_v35  ;;  %v3707_v61 = vadd.f32 %v15564_v2, %v15718_v15  ;;  %v13124_v2 = vld [vmem:[%s17774_s4 + $0xb8] sm:$0xff]   ;;  %v4144_v35 = vrot.slane %v4031_v1, 3  ;;  %v18188_v40 = vld [vmem:[#allocation24_spill] sm:$0xff] }
 0x58d   :  { %v15720_v20 = vpop.permute.xlu1 %3703 }
 0x58e   :  { %3784 = vst [vmem:[#allocation2 + $0x10] sm:$0xff] %v3781_v23  ;;  %v3708_v18 = vadd.f32 %v15568_v60, %v15720_v20 }
 0x58f   :  { %v15722_v25 = vpop.permute.xlu0 %2240 }
 0x590   :  { %v2246_v49 = vadd.f32 %v18187_v59, %v15722_v25  ;;  %v13141_v59 = vld [vmem:[%s17774_s4 + $0x178] sm:$0xff]  }
 0x591   :  { %v15724_v50 = vpop.permute.xlu1 %2242 }
 0x592   :  { %v2247_v15 = vadd.f32 %v18188_v40, %v15724_v50  ;;  %v13142_v40 = vld [vmem:[%s17774_s4 + $0x180] sm:$0xff]  }
 0x593   :  { %v15726_v24 = vpop.permute.xlu0 %3713 }
 0x594   :  { %v3719_v42 = vadd.f32 %v15726_v24, %v3707_v61  ;;  %v4238_v61 = vld [vmem:[#allocation2] sm:$0x4] }
 0x595   :  { %v15728_v5 = vpop.permute.xlu1 %3715  ;;  %v3787_v13 = vld [vmem:[#allocation2 + $0x10] sm:$0x1]  ;;  %v4011_v54 = vld [vmem:[#allocation2 + $0x10] sm:$0x2]  ;;  %v4239_v1 = vld [vmem:[#allocation2 + $0x10] sm:$0x4] }
 0x596   :  { %v3824_v32 = vunpack.c.l.b16 %v3787_v13  ;;  %v4032_v22 = vunpack.c.l.b16 %v4011_v54  ;;  %v3720_v34 = vadd.f32 %v15728_v5, %v3708_v18  ;;  %v13137_v18 = vld [vmem:[%s17774_s4 + $0x168] sm:$0xff]  }
 0x597   :  { %v15730_v48 = vpop.permute.xlu0 %2252 }
 0x598   :  { %v3827_v21 = vsel %vm3826_vm4, %v3824_v32, %v3825_v33  ;;  %v3918_v3 = vrot.slane %v3824_v32, 7  ;;  %v4034_v46 = vrot.slane %v4032_v22, 1  ;;  %v4145_v60 = vrot.slane %v4032_v22, 2  ;;  %v13126_v33 = vld [vmem:[%s17774_s4 + $0x100] sm:$0xff]   ;;  %v13133_v22 = vld [vmem:[%s17774_s4 + $0x158] sm:$0xff]  }
 0x599   :  { %v15736_v53 = vpop.permute.xlu1 %2254  ;;  %v3828_v6 = vpack.c.b16 %v3827_v21, %v3827_v21  ;;  %v2258_v25 = vadd.f32 %v15730_v48, %v2246_v49 }
 0x59a   :  { %v3919_v10 = vsel %vm3826_vm4, %v3918_v3, %v3823_v29  ;;  %v4035_v29 = vsel %vm3826_vm4, %v4034_v46, %v4033_v26  ;;  %v2259_v5 = vadd.f32 %v15736_v53, %v2247_v15  ;;  %v4146_v32 = vsel %vm3826_vm4, %v4145_v60, %v4144_v35  ;;  %v13127_v53 = vld [vmem:[%s17774_s4 + $0x140] sm:$0xff]   ;;  %v13138_v46 = vld [vmem:[%s17774_s4 + $0x130] sm:$0xff]  }
 0x59b   :  { %v15742_v38 = vpop.permute.xlu0 %3725  ;;  %12303 = vmatmul.mubr.bf16.vlgmr.msra.gmra.mrb[232].mxu0 %v3828_v6  ;;  %v3920_v7 = vpack.c.b16 %v3919_v10, %v3919_v10 }
 0x59c   :  { %12327 = vmatpush3.bf16.msra.mxu0 %v13110_v62  ;;  %12342 = vmatprep.mubr.msk.bf16.mxu0 %vm13567_vm3, %v13566_v11  ;;  %v3731_v23 = vadd.f32 %v15742_v38, %v3719_v42  ;;  %v4036_v62 = vpack.c.b16 %v4035_v29, %v4035_v29  ;;  %v4147_v38 = vpack.c.b16 %v4146_v32, %v4146_v32  ;;  %v13139_v42 = vld [vmem:[%s17774_s4 + $0x170] sm:$0xff]   ;;  %v13145_v29 = vld [vmem:[%s17774_s4 + $0x1c8] sm:$0xff]   ;;  %v13151_v32 = vld [vmem:[%s17774_s4 + $0x1e0] sm:$0xff]  }
 0x59d   :  { %12323 = vmatmul.mubr.bf16.vlgmr.msra.gmra.mrb[88].mxu1 %v3920_v7  ;;  %v15749_v41 = vpop.permute.xlu1 %3727  ;;  %12328 = vmatprep.subr.bf16.mxu0 %v13566_v11 }
 0x59e   :  { %12347 = vmatpush3.bf16.msra.mxu1 %v13111_v9  ;;  %12362 = vmatprep.mubr.msk.bf16.mxu1 %vm13567_vm3, %v13566_v11  ;;  %v3732_v20 = vadd.f32 %v15749_v41, %v3720_v34 }
 0x59f   :  { %v15757_v0 = vpop.permute.xlu0 %2264  ;;  %12348 = vmatprep.subr.bf16.mxu1 %v13566_v11 }
 0x5a0   :  { %12329 = vmatpush3.bf16.msra.mxu0 %v13112_v4  ;;  %v2270_v21 = vadd.f32 %v15757_v0, %v2258_v25  ;;  %v13128_v0 = vld [vmem:[%s17774_s4 + $0x108] sm:$0xff]   ;;  %v13146_v25 = vld [vmem:[%s17774_s4 + $0x190] sm:$0xff]  }
 0x5a1   :  { %v15763_v43 = vpop.permute.xlu1 %2266  ;;  %12330 = vmatprep.subr.bf16.mxu0 %v13566_v11 }
 0x5a2   :  { %12349 = vmatpush3.bf16.msra.mxu1 %v13113_v52  ;;  %v2271_v48 = vadd.f32 %v15763_v43, %v2259_v5  ;;  %v13148_v5 = vld [vmem:[%s17774_s4 + $0x198] sm:$0xff]  }
 0x5a3   :  { %v3738_v30 = vpop.permute.xlu0 %3737  ;;  %12350 = vmatprep.subr.bf16.mxu1 %v13566_v11 }
 0x5a4   :  { %12331 = vmatpush3.bf16.msra.mxu0 %v13114_v12  ;;  %v3743_v13 = vadd.f32 %v3738_v30, %v3731_v23  ;;  %v13143_v23 = vld [vmem:[%s17774_s4 + $0x1c0] sm:$0xff]  }
 0x5a5   :  { %v3740_v45 = vpop.permute.xlu1 %3739  ;;  %12332 = vmatprep.subr.bf16.mxu0 %v13566_v11 }
 0x5a6   :  { %12351 = vmatpush3.bf16.msra.mxu1 %v13115_v8  ;;  %v3744_v50 = vadd.f32 %v3740_v45, %v3732_v20  ;;  %v13129_v45 = vld [vmem:[%s17774_s4 + $0x148] sm:$0xff]  }
 0x5a7   :  { %v15777_v37 = vpop.permute.xlu0 %2276  ;;  %12352 = vmatprep.subr.bf16.mxu1 %v13566_v11 }
 0x5a8   :  { %12333 = vmatpush3.bf16.msra.mxu0 %v13116_v19  ;;  %v2282_v9 = vadd.f32 %v15777_v37, %v2270_v21  ;;  %v13152_v21 = vld [vmem:[%s17774_s4 + $0x1a8] sm:$0xff]  }
 0x5a9   :  { %v15783_v14 = vpop.permute.xlu1 %2278  ;;  %12334 = vmatprep.subr.bf16.mxu0 %v13566_v11 }
 0x5aa   :  { %12353 = vmatpush3.bf16.msra.mxu1 %v13117_v63  ;;  %v2283_v4 = vadd.f32 %v15783_v14, %v2271_v48 }
 0x5ab   :  { %v3750_v17 = vpop.permute.xlu0 %3749  ;;  %12354 = vmatprep.subr.bf16.mxu1 %v13566_v11 }
 0x5ac   :  { %12335 = vmatpush3.bf16.msra.mxu0 %v13118_v51  ;;  %v3755_v6 = vadd.f32 %v3750_v17, %v3743_v13  ;;  %v13149_v13 = vld [vmem:[%s17774_s4 + $0x1d8] sm:$0xff]  }
 0x5ad   :  { %v3752_v39 = vpop.permute.xlu1 %3751  ;;  %12336 = vmatprep.subr.bf16.mxu0 %v13566_v11 }
 0x5ae   :  { %12355 = vmatpush3.bf16.msra.mxu1 %v13119_v16  ;;  %v3756_v10 = vadd.f32 %v3752_v39, %v3744_v50  ;;  %v13130_v16 = vld [vmem:[%s17774_s4 + $0x110] sm:$0xff]   ;;  %v13150_v50 = vld [vmem:[%s17774_s4 + $0x1a0] sm:$0xff]  }
 0x5af   :  { %v2289_v36 = vpop.permute.xlu0 %2288  ;;  %12356 = vmatprep.subr.bf16.mxu1 %v13566_v11  ;;  %v13131_v39 = vld [vmem:[%s17774_s4 + $0x150] sm:$0xff]  }
 0x5b0   :  { %12337 = vmatpush3.bf16.msra.mxu0 %v13120_v47  ;;  %v2294_v12 = vadd.f32 %v2289_v36, %v2282_v9  ;;  %v13134_v36 = vld [vmem:[%s17774_s4 + $0x120] sm:$0xff]  }
 0x5b1   :  { %v2291_v27 = vpop.permute.xlu1 %2290  ;;  %12338 = vmatprep.subr.bf16.mxu0 %v13566_v11 }
 0x5b2   :  { %12357 = vmatpush3.bf16.msra.mxu1 %v13121_v57  ;;  %v2295_v8 = vadd.f32 %v2291_v27, %v2283_v4  ;;  %v13132_v57 = vld [vmem:[%s17774_s4 + $0x118] sm:$0xff]   ;;  %v13136_v27 = vld [vmem:[%s17774_s4 + $0x128] sm:$0xff]  }
 0x5b3   :  { %v3762_v55 = vpop.permute.xlu0 %3761  ;;  %12358 = vmatprep.subr.bf16.mxu1 %v13566_v11 }
 0x5b4   :  { %12339 = vmatpush3.bf16.msra.mxu0 %v13122_v56  ;;  %v3767_v41 = vadd.f32 %v3762_v55, %v3755_v6  ;;  %v13135_v56 = vld [vmem:[%s17774_s4 + $0x160] sm:$0xff]   ;;  %v4259_v55 = vunpack.c.l.b16 %v4238_v61  ;;  %v13154_v6 = vld [vmem:[%s17774_s4 + $0x1b0] sm:$0xff]   ;;  %v13172_v61 = vld [vmem:[%s17774_s4 + $0x238] sm:$0xff]  }
 0x5b5   :  { %v3764_v28 = vpop.permute.xlu1 %3763  ;;  %12340 = vmatprep.subr.bf16.mxu0 %v13566_v11 }
 0x5b6   :  { %12359 = vmatpush3.bf16.msra.mxu1 %v13123_v58  ;;  %v3768_v52 = vadd.f32 %v3764_v28, %v3756_v10  ;;  %v4260_v58 = vunpack.c.l.b16 %v4239_v1  ;;  %v4261_v26 = vrot.slane %v4259_v55, 4  ;;  %v4372_v28 = vrot.slane %v4259_v55, 5 }
 0x5b7   :  { %v2301_v24 = vpop.permute.xlu0 %2300  ;;  %12360 = vmatprep.subr.bf16.mxu1 %v13566_v11 }
 0x5b8   :  { %12341 = vmatpush3.bf16.msra.mxu0 %v13124_v2  ;;  %v2306_v37 = vadd.f32 %v2301_v24, %v2294_v12  ;;  %v4262_v34 = vrot.slane %v4260_v58, 3  ;;  %v13140_v2 = vld [vmem:[%s17774_s4 + $0x138] sm:$0xff]   ;;  %v4373_v60 = vrot.slane %v4260_v58, 4  ;;  %v13147_v24 = vld [vmem:[%s17774_s4 + $0x1d0] sm:$0xff]  }
 0x5b9   :  { %v2303_v3 = vpop.permute.xlu1 %2302  ;;  %12366 = vmatprep.subr.bf16.mxu0 %v13566_v11 }
 0x5ba   :  { %12361 = vmatpush3.bf16.msra.mxu1 %v13125_v31  ;;  %v2307_v51 = vadd.f32 %v2303_v3, %v2295_v8  ;;  %v4263_v49 = vsel %vm3826_vm4, %v4262_v34, %v4261_v26  ;;  %v4374_v35 = vsel %vm3826_vm4, %v4373_v60, %v4372_v28  ;;  %v13144_v31 = vld [vmem:[%s17774_s4 + $0x188] sm:$0xff]   ;;  %v4466_v3 = vld [vmem:[#allocation2] sm:$0x8]  ;;  %v13179_v28 = vld [vmem:[%s17774_s4 + $0x2d0] sm:$0xff]  }
 0x5bb   :  { %12343 = vmatmul.mubr.bf16.vlgmr.msra.gmra.mrb[236].mxu0 %v4036_v62  ;;  %v3774_v7 = vpop.permute.xlu0 %3773  ;;  %12386 = vmatprep.subr.bf16.mxu1 %v13566_v11  ;;  %v4264_v15 = vpack.c.b16 %v4263_v49, %v4263_v49  ;;  %v4375_v20 = vpack.c.b16 %v4374_v35, %v4374_v35  ;;  %v13153_v62 = vld [vmem:[%s17774_s4 + $0x1e8] sm:$0xff]   ;;  %v4487_v10 = vunpack.c.l.b16 %v4466_v3  ;;  %v13178_v49 = vld [vmem:[%s17774_s4 + $0x290] sm:$0xff]   ;;  %v13180_v35 = vld [vmem:[%s17774_s4 + $0x298] sm:$0xff]  }
 0x5bc   :  { %12367 = vmatpush3.bf16.msra.mxu0 %v13126_v33  ;;  %12382 = vmatprep.mubr.msk.bf16.mxu0 %vm13567_vm3, %v13566_v11  ;;  %v3779_v30 = vadd.f32 %v3774_v7, %v3767_v41  ;;  %v4467_v33 = vld [vmem:[#allocation2 + $0x10] sm:$0x8]  ;;  %v13157_v41 = vld [vmem:[%s17774_s4 + $0x1f8] sm:$0xff]   ;;  %v13176_v60 = vld [vmem:[%s17774_s4 + $0x288] sm:$0xff]  }
 0x5bd   :  { %12363 = vmatmul.mubr.bf16.vlgmr.msra.gmra.mrb[92].mxu1 %v4147_v38  ;;  %v3776_v43 = vpop.permute.xlu1 %3775  ;;  %12368 = vmatprep.subr.bf16.mxu0 %v13566_v11  ;;  %v4488_v48 = vunpack.c.l.b16 %v4467_v33  ;;  %v13156_v38 = vld [vmem:[%s17774_s4 + $0x1b8] sm:$0xff]   ;;  %v4489_v7 = vrot.slane %v4487_v10, 6 }
 0x5be   :  { %12387 = vmatpush3.bf16.msra.mxu1 %v13127_v53  ;;  %v3780_v19 = vadd.f32 %v3776_v43, %v3768_v52  ;;  %12402 = vmatprep.mubr.msk.bf16.mxu1 %vm13567_vm3, %v13566_v11  ;;  %v13155_v53 = vld [vmem:[%s17774_s4 + $0x1f0] sm:$0xff]   ;;  %v13158_v43 = vld [vmem:[%s17774_s4 + $0x200] sm:$0xff]   ;;  %v13188_v33 = vld [vmem:[%s17774_s4 + $0x2b8] sm:$0xff]  }
 0x5bf   :  { %v2313_v63 = vpop.permute.xlu0 %2312  ;;  %12388 = vmatprep.subr.bf16.mxu1 %v13566_v11  ;;  %v4490_v9 = vrot.slane %v4488_v48, 5  ;;  %v4601_v4 = vrot.slane %v4488_v48, 6 }
 0x5c0   :  { %v3782_v14 = vpack.c.bf16 %v3780_v19, %v3779_v30  ;;  %12369 = vmatpush3.bf16.msra.mxu0 %v13128_v0  ;;  %v2318_v54 = vadd.f32 %v2313_v63, %v2306_v37  ;;  %v4600_v0 = vrot.slane %v4487_v10, 7  ;;  %v13159_v30 = vld [vmem:[%s17774_s4 + $0x240] sm:$0xff]   ;;  %v13161_v63 = vld [vmem:[%s17774_s4 + $0x248] sm:$0xff]   ;;  %v13162_v37 = vld [vmem:[%s17774_s4 + $0x210] sm:$0xff]  }
 0x5c1   :  { %v2315_v17 = vpop.permute.xlu1 %2314  ;;  %12370 = vmatprep.subr.bf16.mxu0 %v13566_v11  ;;  %v4491_v52 = vsel %vm3826_vm4, %v4490_v9, %v4489_v7 }
 0x5c2   :  { %3785 = vst [vmem:[#allocation2 + $0x18] sm:$0xff] %v3782_v14  ;;  %12389 = vmatpush3.bf16.msra.mxu1 %v13129_v45  ;;  %v2319_v47 = vadd.f32 %v2315_v17, %v2307_v51  ;;  %v4602_v12 = vsel %vm3826_vm4, %v4601_v4, %v4600_v0  ;;  %v4492_v8 = vpack.c.b16 %v4491_v52, %v4491_v52  ;;  %v13160_v45 = vld [vmem:[%s17774_s4 + $0x208] sm:$0xff]   ;;  %v13163_v51 = vld [vmem:[%s17774_s4 + $0x250] sm:$0xff]   ;;  %v13164_v14 = vld [vmem:[%s17774_s4 + $0x218] sm:$0xff]  }
 0x5c3   :  { %12390 = vmatprep.subr.bf16.mxu1 %v13566_v11  ;;  %v4603_v19 = vpack.c.b16 %v4602_v12, %v4602_v12  ;;  %v13166_v17 = vld [vmem:[%s17774_s4 + $0x220] sm:$0xff]   ;;  %v13192_v4 = vld [vmem:[%s17774_s4 + $0x308] sm:$0xff]   ;;  %v13194_v52 = vld [vmem:[%s17774_s4 + $0x310] sm:$0xff]  }
 0x5c4   :  { %v2321_v44 = vpack.c.bf16 %v2319_v47, %v2318_v54  ;;  %12371 = vmatpush3.bf16.msra.mxu0 %v13130_v16  ;;  %v13165_v16 = vld [vmem:[%s17774_s4 + $0x258] sm:$0xff]   ;;  %v13167_v54 = vld [vmem:[%s17774_s4 + $0x260] sm:$0xff]   ;;  %v4695_v47 = vld [vmem:[#allocation2 + $0x10] sm:$0x10] }
 0x5c5   :  { %12372 = vmatprep.subr.bf16.mxu0 %v13566_v11  ;;  %v13195_v0 = vld [vmem:[%s17774_s4 + $0x350] sm:$0xff]   ;;  %v13196_v12 = vld [vmem:[%s17774_s4 + $0x318] sm:$0xff]  }
 0x5c6   :  { %2323 = vst [vmem:[#allocation2 + $0x8] sm:$0xff] %v2321_v44  ;;  %12391 = vmatpush3.bf16.msra.mxu1 %v13131_v39  ;;  %v13168_v39 = vld [vmem:[%s17774_s4 + $0x228] sm:$0xff]  }
 0x5c7   :  { %12392 = vmatprep.subr.bf16.mxu1 %v13566_v11  ;;  %v13169_v44 = vld [vmem:[%s17774_s4 + $0x268] sm:$0xff]  }
 0x5c8   :  { %12373 = vmatpush3.bf16.msra.mxu0 %v13132_v57  ;;  %v4716_v57 = vunpack.c.h.b16 %v4695_v47  ;;  %v13204_v47 = vld [vmem:[%s17774_s4 + $0x338] sm:$0xff]  }
 0x5c9   :  { %12374 = vmatprep.subr.bf16.mxu0 %v13566_v11 }
 0x5ca   :  { %12393 = vmatpush3.bf16.msra.mxu1 %v13133_v22  ;;  %v4694_v22 = vld [vmem:[#allocation2] sm:$0x10] }
 0x5cb   :  { %12394 = vmatprep.subr.bf16.mxu1 %v13566_v11  ;;  %v4715_v1 = vunpack.c.h.b16 %v4694_v22 }
 0x5cc   :  { %12375 = vmatpush3.bf16.msra.mxu0 %v13134_v36  ;;  %v13170_v36 = vld [vmem:[%s17774_s4 + $0x230] sm:$0xff]  }
 0x5cd   :  { %12376 = vmatprep.subr.bf16.mxu0 %v13566_v11 }
 0x5ce   :  { %12395 = vmatpush3.bf16.msra.mxu1 %v13135_v56  ;;  %v13171_v56 = vld [vmem:[%s17774_s4 + $0x270] sm:$0xff]  }
 0x5cf   :  { %12396 = vmatprep.subr.bf16.mxu1 %v13566_v11 }
 0x5d0   :  { %12377 = vmatpush3.bf16.msra.mxu0 %v13136_v27  ;;  %v4717_v27 = vrot.slane %v4716_v57, 7 }
 0x5d1   :  { %12378 = vmatprep.subr.bf16.mxu0 %v13566_v11 }
 0x5d2   :  { %12397 = vmatpush3.bf16.msra.mxu1 %v13137_v18  ;;  %v13173_v18 = vld [vmem:[%s17774_s4 + $0x278] sm:$0xff]   ;;  %v4718_v58 = vsel %vm3826_vm4, %v4717_v27, %v4715_v1 }
 0x5d3   :  { %12398 = vmatprep.subr.bf16.mxu1 %v13566_v11  ;;  %v4719_v34 = vpack.c.b16 %v4718_v58, %v4718_v58  ;;  %v13208_v58 = vld [vmem:[%s17774_s4 + $0x388] sm:$0xff]  }
 0x5d4   :  { %12379 = vmatpush3.bf16.msra.mxu0 %v13138_v46  ;;  %v4827_v46 = vrot.slane %v4715_v1, 1 }
 0x5d5   :  { %12380 = vmatprep.subr.bf16.mxu0 %v13566_v11 }
 0x5d6   :  { %12399 = vmatpush3.bf16.msra.mxu1 %v13139_v42  ;;  %v4828_v55 = vsel %vm3826_vm4, %v4716_v57, %v4827_v46  ;;  %v13174_v42 = vld [vmem:[%s17774_s4 + $0x280] sm:$0xff]   ;;  %v13205_v57 = vld [vmem:[%s17774_s4 + $0x378] sm:$0xff]   ;;  %v13209_v46 = vld [vmem:[%s17774_s4 + $0x3c8] sm:$0xff]  }
 0x5d7   :  { %12400 = vmatprep.subr.bf16.mxu1 %v13566_v11  ;;  %v4829_v26 = vpack.c.b16 %v4828_v55, %v4828_v55  ;;  %v13210_v55 = vld [vmem:[%s17774_s4 + $0x390] sm:$0xff]  }
 0x5d8   :  { %12381 = vmatpush3.bf16.msra.mxu0 %v13140_v2  ;;  %v13175_v2 = vld [vmem:[%s17774_s4 + $0x2c0] sm:$0xff]  }
 0x5d9   :  { %12406 = vmatprep.subr.bf16.mxu0 %v13566_v11 }
 0x5da   :  { %12401 = vmatpush3.bf16.msra.mxu1 %v13141_v59  ;;  %v13177_v59 = vld [vmem:[%s17774_s4 + $0x2c8] sm:$0xff]  }
 0x5db   :  { %12383 = vmatmul.mubr.bf16.vlgmr.msra.gmra.mrb[240].mxu0 %v4264_v15  ;;  %12426 = vmatprep.subr.bf16.mxu1 %v13566_v11  ;;  %v13182_v15 = vld [vmem:[%s17774_s4 + $0x2a0] sm:$0xff]  }
 0x5dc   :  { %12407 = vmatpush3.bf16.msra.mxu0 %v13142_v40  ;;  %12422 = vmatprep.mubr.msk.bf16.mxu0 %vm13567_vm3, %v13566_v11  ;;  %v13181_v40 = vld [vmem:[%s17774_s4 + $0x2d8] sm:$0xff]  }
 0x5dd   :  { %12403 = vmatmul.mubr.bf16.vlgmr.msra.gmra.mrb[96].mxu1 %v4375_v20  ;;  %12408 = vmatprep.subr.bf16.mxu0 %v13566_v11  ;;  %v4921_v20 = vld [vmem:[#allocation2 + $0x10] sm:$0x20] }
 0x5de   :  { %12427 = vmatpush3.bf16.msra.mxu1 %v13143_v23  ;;  %12442 = vmatprep.mubr.msk.bf16.mxu1 %vm13567_vm3, %v13566_v11  ;;  %v13183_v23 = vld [vmem:[%s17774_s4 + $0x2e0] sm:$0xff]  }
 0x5df   :  { %12428 = vmatprep.subr.bf16.mxu1 %v13566_v11 }
 0x5e0   :  { %12409 = vmatpush3.bf16.msra.mxu0 %v13144_v31  ;;  %v13184_v31 = vld [vmem:[%s17774_s4 + $0x2a8] sm:$0xff]  }
 0x5e1   :  { %12410 = vmatprep.subr.bf16.mxu0 %v13566_v11 }
 0x5e2   :  { %12429 = vmatpush3.bf16.msra.mxu1 %v13145_v29  ;;  %v4920_v29 = vld [vmem:[#allocation2] sm:$0x20] }
 0x5e3   :  { %12430 = vmatprep.subr.bf16.mxu1 %v13566_v11 }
 0x5e4   :  { %12411 = vmatpush3.bf16.msra.mxu0 %v13146_v25  ;;  %v13185_v25 = vld [vmem:[%s17774_s4 + $0x2e8] sm:$0xff]  }
 0x5e5   :  { %12412 = vmatprep.subr.bf16.mxu0 %v13566_v11 }
 0x5e6   :  { %12431 = vmatpush3.bf16.msra.mxu1 %v13147_v24  ;;  %v4942_v24 = vunpack.c.h.b16 %v4921_v20 }
 0x5e7   :  { %12432 = vmatprep.subr.bf16.mxu1 %v13566_v11 }
 0x5e8   :  { %12413 = vmatpush3.bf16.msra.mxu0 %v13148_v5  ;;  %v13186_v5 = vld [vmem:[%s17774_s4 + $0x2b0] sm:$0xff]   ;;  %v5055_v3 = vrot.slane %v4942_v24, 2 }
 0x5e9   :  { %12414 = vmatprep.subr.bf16.mxu0 %v13566_v11 }
 0x5ea   :  { %12433 = vmatpush3.bf16.msra.mxu1 %v13149_v13  ;;  %v4941_v13 = vunpack.c.h.b16 %v4920_v29 }
 0x5eb   :  { %12434 = vmatprep.subr.bf16.mxu1 %v13566_v11 }
 0x5ec   :  { %12415 = vmatpush3.bf16.msra.mxu0 %v13150_v50  ;;  %v13187_v50 = vld [vmem:[%s17774_s4 + $0x2f0] sm:$0xff]  }
 0x5ed   :  { %12416 = vmatprep.subr.bf16.mxu0 %v13566_v11 }
 0x5ee   :  { %12435 = vmatpush3.bf16.msra.mxu1 %v13151_v32  ;;  %v4944_v32 = vrot.slane %v4942_v24, 1 }
 0x5ef   :  { %12436 = vmatprep.subr.bf16.mxu1 %v13566_v11 }
 0x5f0   :  { %12417 = vmatpush3.bf16.msra.mxu0 %v13152_v21  ;;  %v4943_v21 = vrot.slane %v4941_v13, 2 }
 0x5f1   :  { %12418 = vmatprep.subr.bf16.mxu0 %v13566_v11 }
 0x5f2   :  { %12437 = vmatpush3.bf16.msra.mxu1 %v13153_v62  ;;  %v13189_v62 = vld [vmem:[%s17774_s4 + $0x2f8] sm:$0xff]   ;;  %v4945_v48 = vsel %vm3826_vm4, %v4944_v32, %v4943_v21  ;;  %v13219_v32 = vld [vmem:[%s17774_s4 + $0x3f0] sm:$0xff]  }
 0x5f3   :  { %12438 = vmatprep.subr.bf16.mxu1 %v13566_v11  ;;  %v4946_v9 = vpack.c.b16 %v4945_v48, %v4945_v48 }
 0x5f4   :  { %12419 = vmatpush3.bf16.msra.mxu0 %v13154_v6  ;;  %v5054_v6 = vrot.slane %v4941_v13, 3 }
 0x5f5   :  { %12420 = vmatprep.subr.bf16.mxu0 %v13566_v11 }
 0x5f6   :  { %12439 = vmatpush3.bf16.msra.mxu1 %v13155_v53  ;;  %v5056_v10 = vsel %vm3826_vm4, %v5055_v3, %v5054_v6  ;;  %v13190_v53 = vld [vmem:[%s17774_s4 + $0x300] sm:$0xff]   ;;  %v13220_v3 = vld [vmem:[%s17774_s4 + $0x3b8] sm:$0xff]  }
 0x5f7   :  { %12440 = vmatprep.subr.bf16.mxu1 %v13566_v11  ;;  %v5057_v7 = vpack.c.b16 %v5056_v10, %v5056_v10  ;;  %v13221_v6 = vld [vmem:[%s17774_s4 + $0x3f8] sm:$0xff]  }
 0x5f8   :  { %12421 = vmatpush3.bf16.msra.mxu0 %v13156_v38  ;;  %v13191_v38 = vld [vmem:[%s17774_s4 + $0x340] sm:$0xff]  }
 0x5f9   :  { %12446 = vmatprep.subr.bf16.mxu0 %v13566_v11 }
 0x5fa   :  { %12441 = vmatpush3.bf16.msra.mxu1 %v13157_v41  ;;  %v13193_v41 = vld [vmem:[%s17774_s4 + $0x348] sm:$0xff]  }
 0x5fb   :  { %12423 = vmatmul.mubr.bf16.vlgmr.msra.gmra.mrb[244].mxu0 %v4492_v8  ;;  %12466 = vmatprep.subr.bf16.mxu1 %v13566_v11  ;;  %v13198_v8 = vld [vmem:[%s17774_s4 + $0x320] sm:$0xff]  }
 0x5fc   :  { %12447 = vmatpush3.bf16.msra.mxu0 %v13158_v43  ;;  %12462 = vmatprep.mubr.msk.bf16.mxu0 %vm13567_vm3, %v13566_v11  ;;  %v13197_v43 = vld [vmem:[%s17774_s4 + $0x358] sm:$0xff]  }
 0x5fd   :  { %12443 = vmatmul.mubr.bf16.vlgmr.msra.gmra.mrb[100].mxu1 %v4603_v19  ;;  %12448 = vmatprep.subr.bf16.mxu0 %v13566_v11  ;;  %v5149_v19 = vld [vmem:[#allocation2 + $0x10] sm:$0x40] }
 0x5fe   :  { %12467 = vmatpush3.bf16.msra.mxu1 %v13159_v30  ;;  %12482 = vmatprep.mubr.msk.bf16.mxu1 %vm13567_vm3, %v13566_v11  ;;  %v13199_v30 = vld [vmem:[%s17774_s4 + $0x360] sm:$0xff]  }
 0x5ff   :  { %12468 = vmatprep.subr.bf16.mxu1 %v13566_v11 }
 0x600   :  { %12449 = vmatpush3.bf16.msra.mxu0 %v13160_v45  ;;  %v13200_v45 = vld [vmem:[%s17774_s4 + $0x328] sm:$0xff]  }
 0x601   :  { %12450 = vmatprep.subr.bf16.mxu0 %v13566_v11 }
 0x602   :  { %12469 = vmatpush3.bf16.msra.mxu1 %v13161_v63  ;;  %v5148_v63 = vld [vmem:[#allocation2] sm:$0x40] }
 0x603   :  { %12470 = vmatprep.subr.bf16.mxu1 %v13566_v11 }
 0x604   :  { %12451 = vmatpush3.bf16.msra.mxu0 %v13162_v37  ;;  %v5170_v37 = vunpack.c.h.b16 %v5149_v19  ;;  %v13230_v19 = vld [vmem:[%s17774_s4 + $0x420] sm:$0xff]  }
 0x605   :  { %12452 = vmatprep.subr.bf16.mxu0 %v13566_v11 }
 0x606   :  { %12471 = vmatpush3.bf16.msra.mxu1 %v13163_v51  ;;  %v13201_v51 = vld [vmem:[%s17774_s4 + $0x368] sm:$0xff]  }
 0x607   :  { %12472 = vmatprep.subr.bf16.mxu1 %v13566_v11 }
 0x608   :  { %12453 = vmatpush3.bf16.msra.mxu0 %v13164_v14  ;;  %v5169_v14 = vunpack.c.h.b16 %v5148_v63  ;;  %v13232_v63 = vld [vmem:[%s17774_s4 + $0x428] sm:$0xff]  }
 0x609   :  { %12454 = vmatprep.subr.bf16.mxu0 %v13566_v11 }
 0x60a   :  { %12473 = vmatpush3.bf16.msra.mxu1 %v13165_v16  ;;  %v13202_v16 = vld [vmem:[%s17774_s4 + $0x330] sm:$0xff]  }
 0x60b   :  { %12474 = vmatprep.subr.bf16.mxu1 %v13566_v11 }
 0x60c   :  { %12455 = vmatpush3.bf16.msra.mxu0 %v13166_v17  ;;  %v13203_v17 = vld [vmem:[%s17774_s4 + $0x370] sm:$0xff]  }
 0x60d   :  { %12456 = vmatprep.subr.bf16.mxu0 %v13566_v11 }
 0x60e   :  { %12475 = vmatpush3.bf16.msra.mxu1 %v13167_v54  ;;  %v5172_v54 = vrot.slane %v5170_v37, 3 }
 0x60f   :  { %12476 = vmatprep.subr.bf16.mxu1 %v13566_v11 }
 0x610   :  { %12457 = vmatpush3.bf16.msra.mxu0 %v13168_v39  ;;  %v5171_v39 = vrot.slane %v5169_v14, 4 }
 0x611   :  { %12458 = vmatprep.subr.bf16.mxu0 %v13566_v11 }
 0x612   :  { %12477 = vmatpush3.bf16.msra.mxu1 %v13169_v44  ;;  %v5283_v44 = vrot.slane %v5170_v37, 4  ;;  %v5173_v22 = vsel %vm3826_vm4, %v5172_v54, %v5171_v39  ;;  %v5605_v37 = vld [vmem:[#allocation2 + $0x18] sm:$0x1] }
 0x613   :  { %12478 = vmatprep.subr.bf16.mxu1 %v13566_v11  ;;  %v5174_v27 = vpack.c.b16 %v5173_v22, %v5173_v22  ;;  %v13234_v22 = vld [vmem:[%s17774_s4 + $0x430] sm:$0xff]  }
 0x614   :  { %12459 = vmatpush3.bf16.msra.mxu0 %v13170_v36  ;;  %v5282_v36 = vrot.slane %v5169_v14, 5 }
 0x615   :  { %12460 = vmatprep.subr.bf16.mxu0 %v13566_v11 }
 0x616   :  { %12479 = vmatpush3.bf16.msra.mxu1 %v13171_v56  ;;  %v13206_v56 = vld [vmem:[%s17774_s4 + $0x380] sm:$0xff]   ;;  %v5284_v1 = vsel %vm3826_vm4, %v5283_v44, %v5282_v36 }
 0x617   :  { %12480 = vmatprep.subr.bf16.mxu1 %v13566_v11 }
 0x618   :  { %12461 = vmatpush3.bf16.msra.mxu0 %v13172_v61  ;;  %v13207_v61 = vld [vmem:[%s17774_s4 + $0x3c0] sm:$0xff]  }
 0x619   :  { %12486 = vmatprep.subr.bf16.mxu0 %v13566_v11 }
 0x61a   :  { %12481 = vmatpush3.bf16.msra.mxu1 %v13173_v18  ;;  %v5285_v18 = vpack.c.b16 %v5284_v1, %v5284_v1 }
 0x61b   :  { %12463 = vmatmul.mubr.bf16.vlgmr.msra.gmra.mrb[248].mxu0 %v4719_v34  ;;  %12506 = vmatprep.subr.bf16.mxu1 %v13566_v11  ;;  %v13212_v34 = vld [vmem:[%s17774_s4 + $0x398] sm:$0xff]  }
 0x61c   :  { %12487 = vmatpush3.bf16.msra.mxu0 %v13174_v42  ;;  %12502 = vmatprep.mubr.msk.bf16.mxu0 %vm13567_vm3, %v13566_v11  ;;  %v13211_v42 = vld [vmem:[%s17774_s4 + $0x3d0] sm:$0xff]  }
 0x61d   :  { %12483 = vmatmul.mubr.bf16.vlgmr.msra.gmra.mrb[104].mxu1 %v4829_v26  ;;  %12488 = vmatprep.subr.bf16.mxu0 %v13566_v11  ;;  %v13214_v26 = vld [vmem:[%s17774_s4 + $0x3a0] sm:$0xff]  }
 0x61e   :  { %12507 = vmatpush3.bf16.msra.mxu1 %v13175_v2  ;;  %12522 = vmatprep.mubr.msk.bf16.mxu1 %vm13567_vm3, %v13566_v11  ;;  %v13213_v2 = vld [vmem:[%s17774_s4 + $0x3d8] sm:$0xff]  }
 0x61f   :  { %12508 = vmatprep.subr.bf16.mxu1 %v13566_v11 }
 0x620   :  { %12489 = vmatpush3.bf16.msra.mxu0 %v13176_v60  ;;  %v13215_v60 = vld [vmem:[%s17774_s4 + $0x3e0] sm:$0xff]  }
 0x621   :  { %12490 = vmatprep.subr.bf16.mxu0 %v13566_v11 }
 0x622   :  { %12509 = vmatpush3.bf16.msra.mxu1 %v13177_v59  ;;  %v5377_v59 = vld [vmem:[#allocation2 + $0x10] sm:$0x80] }
 0x623   :  { %12510 = vmatprep.subr.bf16.mxu1 %v13566_v11 }
 0x624   :  { %12491 = vmatpush3.bf16.msra.mxu0 %v13178_v49  ;;  %v13216_v49 = vld [vmem:[%s17774_s4 + $0x3a8] sm:$0xff]  }
 0x625   :  { %12492 = vmatprep.subr.bf16.mxu0 %v13566_v11 }
 0x626   :  { %12511 = vmatpush3.bf16.msra.mxu1 %v13179_v28  ;;  %v5376_v28 = vld [vmem:[#allocation2] sm:$0x80] }
 0x627   :  { %12512 = vmatprep.subr.bf16.mxu1 %v13566_v11  ;;  %v5397_v20 = vunpack.c.h.b16 %v5376_v28  ;;  %v13240_v28 = vld [vmem:[%s17774_s4 + $0x488] sm:$0xff]  }
 0x628   :  { %12493 = vmatpush3.bf16.msra.mxu0 %v13180_v35  ;;  %v5398_v35 = vunpack.c.h.b16 %v5377_v59  ;;  %v13239_v59 = vld [vmem:[%s17774_s4 + $0x4c0] sm:$0xff]  }
 0x629   :  { %12494 = vmatprep.subr.bf16.mxu0 %v13566_v11 }
 0x62a   :  { %12513 = vmatpush3.bf16.msra.mxu1 %v13181_v40  ;;  %v5511_v48 = vrot.slane %v5398_v35, 6 }
 0x62b   :  { %12514 = vmatprep.subr.bf16.mxu1 %v13566_v11 }
 0x62c   :  { %12495 = vmatpush3.bf16.msra.mxu0 %v13182_v15  ;;  %v13217_v15 = vld [vmem:[%s17774_s4 + $0x3e8] sm:$0xff]  }
 0x62d   :  { %12496 = vmatprep.subr.bf16.mxu0 %v13566_v11 }
 0x62e   :  { %12515 = vmatpush3.bf16.msra.mxu1 %v13183_v23 }
 0x62f   :  { %12516 = vmatprep.subr.bf16.mxu1 %v13566_v11 }
 0x630   :  { %12497 = vmatpush3.bf16.msra.mxu0 %v13184_v31 }
 0x631   :  { %12498 = vmatprep.subr.bf16.mxu0 %v13566_v11 }
 0x632   :  { %12517 = vmatpush3.bf16.msra.mxu1 %v13185_v25  ;;  %v13218_v25 = vld [vmem:[%s17774_s4 + $0x3b0] sm:$0xff]  }
 0x633   :  { %12518 = vmatprep.subr.bf16.mxu1 %v13566_v11 }
 0x634   :  { %12499 = vmatpush3.bf16.msra.mxu0 %v13186_v5 }
 0x635   :  { %12500 = vmatprep.subr.bf16.mxu0 %v13566_v11 }
 0x636   :  { %12519 = vmatpush3.bf16.msra.mxu1 %v13187_v50 }
 0x637   :  { %12520 = vmatprep.subr.bf16.mxu1 %v13566_v11 }
 0x638   :  { %12501 = vmatpush3.bf16.msra.mxu0 %v13188_v33  ;;  %v5400_v33 = vrot.slane %v5398_v35, 5  ;;  %v13241_v35 = vld [vmem:[%s17774_s4 + $0x4c8] sm:$0xff]  }
 0x639   :  { %12526 = vmatprep.subr.bf16.mxu0 %v13566_v11 }
 0x63a   :  { %12521 = vmatpush3.bf16.msra.mxu1 %v13189_v62  ;;  %v5399_v62 = vrot.slane %v5397_v20, 6 }
 0x63b   :  { %12503 = vmatmul.mubr.bf16.vlgmr.msra.gmra.mrb[252].mxu0 %v4946_v9  ;;  %12546 = vmatprep.subr.bf16.mxu1 %v13566_v11  ;;  %v13222_v9 = vld [vmem:[%s17774_s4 + $0x400] sm:$0xff]  }
 0x63c   :  { %12527 = vmatpush3.bf16.msra.mxu0 %v13190_v53  ;;  %12542 = vmatprep.mubr.msk.bf16.mxu0 %vm13567_vm3, %v13566_v11  ;;  %v5401_v10 = vsel %vm3826_vm4, %v5400_v33, %v5399_v62  ;;  %v5510_v53 = vrot.slane %v5397_v20, 7  ;;  %v13245_v20 = vld [vmem:[%s17774_s4 + $0x4d8] sm:$0xff]  }
 0x63d   :  { %12523 = vmatmul.mubr.bf16.vlgmr.msra.gmra.mrb[108].mxu1 %v5057_v7  ;;  %12528 = vmatprep.subr.bf16.mxu0 %v13566_v11  ;;  %v5402_v7 = vpack.c.b16 %v5401_v10, %v5401_v10 }
 0x63e   :  { %12547 = vmatpush3.bf16.msra.mxu1 %v13191_v38  ;;  %12562 = vmatprep.mubr.msk.bf16.mxu1 %vm13567_vm3, %v13566_v11  ;;  %v5512_v38 = vsel %vm3826_vm4, %v5511_v48, %v5510_v53 }
 0x63f   :  { %12548 = vmatprep.subr.bf16.mxu1 %v13566_v11 }
 0x640   :  { %12529 = vmatpush3.bf16.msra.mxu0 %v13192_v4  ;;  %v13223_v4 = vld [vmem:[%s17774_s4 + $0x440] sm:$0xff]  }
 0x641   :  { %12530 = vmatprep.subr.bf16.mxu0 %v13566_v11 }
 0x642   :  { %12549 = vmatpush3.bf16.msra.mxu1 %v13193_v41  ;;  %v5513_v41 = vpack.c.b16 %v5512_v38, %v5512_v38 }
 0x643   :  { %12550 = vmatprep.subr.bf16.mxu1 %v13566_v11 }
 0x644   :  { %12531 = vmatpush3.bf16.msra.mxu0 %v13194_v52  ;;  %v13224_v52 = vld [vmem:[%s17774_s4 + $0x408] sm:$0xff]  }
 0x645   :  { %12532 = vmatprep.subr.bf16.mxu0 %v13566_v11 }
 0x646   :  { %12551 = vmatpush3.bf16.msra.mxu1 %v13195_v0  ;;  %v13225_v0 = vld [vmem:[%s17774_s4 + $0x448] sm:$0xff]  }
 0x647   :  { %12552 = vmatprep.subr.bf16.mxu1 %v13566_v11 }
 0x648   :  { %12533 = vmatpush3.bf16.msra.mxu0 %v13196_v12  ;;  %v13226_v12 = vld [vmem:[%s17774_s4 + $0x410] sm:$0xff]  }
 0x649   :  { %12534 = vmatprep.subr.bf16.mxu0 %v13566_v11 }
 0x64a   :  { %12553 = vmatpush3.bf16.msra.mxu1 %v13197_v43  ;;  %v13227_v43 = vld [vmem:[%s17774_s4 + $0x450] sm:$0xff]  }
 0x64b   :  { %12554 = vmatprep.subr.bf16.mxu1 %v13566_v11 }
 0x64c   :  { %12535 = vmatpush3.bf16.msra.mxu0 %v13198_v8  ;;  %v13228_v8 = vld [vmem:[%s17774_s4 + $0x418] sm:$0xff]  }
 0x64d   :  { %12536 = vmatprep.subr.bf16.mxu0 %v13566_v11 }
 0x64e   :  { %12555 = vmatpush3.bf16.msra.mxu1 %v13199_v30  ;;  %v13229_v30 = vld [vmem:[%s17774_s4 + $0x458] sm:$0xff]  }
 0x64f   :  { %12556 = vmatprep.subr.bf16.mxu1 %v13566_v11 }
 0x650   :  { %12537 = vmatpush3.bf16.msra.mxu0 %v13200_v45  ;;  %v13231_v45 = vld [vmem:[%s17774_s4 + $0x460] sm:$0xff]  }
 0x651   :  { %12538 = vmatprep.subr.bf16.mxu0 %v13566_v11 }
 0x652   :  { %12557 = vmatpush3.bf16.msra.mxu1 %v13201_v51  ;;  %v5604_v51 = vld [vmem:[#allocation2 + $0x8] sm:$0x1] }
 0x653   :  { %12558 = vmatprep.subr.bf16.mxu1 %v13566_v11  ;;  %v5625_v39 = vunpack.c.l.b16 %v5604_v51 }
 0x654   :  { %12539 = vmatpush3.bf16.msra.mxu0 %v13202_v16  ;;  %v13233_v16 = vld [vmem:[%s17774_s4 + $0x468] sm:$0xff]  }
 0x655   :  { %12540 = vmatprep.subr.bf16.mxu0 %v13566_v11 }
 0x656   :  { %12559 = vmatpush3.bf16.msra.mxu1 %v13203_v17 }
 0x657   :  { %12560 = vmatprep.subr.bf16.mxu1 %v13566_v11 }
 0x658   :  { %12541 = vmatpush3.bf16.msra.mxu0 %v13204_v47  ;;  %v5626_v47 = vunpack.c.l.b16 %v5605_v37  ;;  %v13255_v37 = vld [vmem:[%s17774_s4 + $0x540] sm:$0xff]  }
 0x659   :  { %12566 = vmatprep.subr.bf16.mxu0 %v13566_v11 }
 0x65a   :  { %12561 = vmatpush3.bf16.msra.mxu1 %v13205_v57 }
 0x65b   :  { %12543 = vmatmul.mubr.bf16.vlgmr.msra.gmra.mrb[0].mxu0 %v5174_v27  ;;  %12586 = vmatprep.subr.bf16.mxu1 %v13566_v11 }
 0x65c   :  { %12567 = vmatpush3.bf16.msra.mxu0 %v13206_v56  ;;  %12582 = vmatprep.mubr.msk.bf16.mxu0 %vm13567_vm3, %v13566_v11 }
 0x65d   :  { %12563 = vmatmul.mubr.bf16.vlgmr.msra.gmra.mrb[112].mxu1 %v5285_v18  ;;  %12568 = vmatprep.subr.bf16.mxu0 %v13566_v11 }
 0x65e   :  { %12587 = vmatpush3.bf16.msra.mxu1 %v13207_v61  ;;  %12602 = vmatprep.mubr.msk.bf16.mxu1 %vm13567_vm3, %v13566_v11  ;;  %v13235_v61 = vld [vmem:[%s17774_s4 + $0x470] sm:$0xff]  }
 0x65f   :  { %12588 = vmatprep.subr.bf16.mxu1 %v13566_v11 }
 0x660   :  { %12569 = vmatpush3.bf16.msra.mxu0 %v13208_v58  ;;  %v13236_v58 = vld [vmem:[%s17774_s4 + $0x438] sm:$0xff]  }
 0x661   :  { %12570 = vmatprep.subr.bf16.mxu0 %v13566_v11 }
 0x662   :  { %12589 = vmatpush3.bf16.msra.mxu1 %v13209_v46  ;;  %v5627_v46 = vrot.slane %v5626_v47, 7 }
 0x663   :  { %12590 = vmatprep.subr.bf16.mxu1 %v13566_v11 }
 0x664   :  { %12571 = vmatpush3.bf16.msra.mxu0 %v13210_v55  ;;  %v5737_v55 = vrot.slane %v5625_v39, 1 }
 0x665   :  { %12572 = vmatprep.subr.bf16.mxu0 %v13566_v11 }
 0x666   :  { %12591 = vmatpush3.bf16.msra.mxu1 %v13211_v42  ;;  %v13237_v42 = vld [vmem:[%s17774_s4 + $0x478] sm:$0xff]  }
 0x667   :  { %12592 = vmatprep.subr.bf16.mxu1 %v13566_v11 }
 0x668   :  { %12573 = vmatpush3.bf16.msra.mxu0 %v13212_v34  ;;  %v5628_v34 = vsel %vm3826_vm4, %v5627_v46, %v5625_v39  ;;  %v13261_v39 = vld [vmem:[%s17774_s4 + $0x558] sm:$0xff]  }
 0x669   :  { %12574 = vmatprep.subr.bf16.mxu0 %v13566_v11 }
 0x66a   :  { %12593 = vmatpush3.bf16.msra.mxu1 %v13213_v2  ;;  %v13238_v2 = vld [vmem:[%s17774_s4 + $0x480] sm:$0xff]  }
 0x66b   :  { %12594 = vmatprep.subr.bf16.mxu1 %v13566_v11 }
 0x66c   :  { %12575 = vmatpush3.bf16.msra.mxu0 %v13214_v26  ;;  %v5738_v26 = vsel %vm3826_vm4, %v5626_v47, %v5737_v55  ;;  %v13260_v47 = vld [vmem:[%s17774_s4 + $0x518] sm:$0xff]  }
 0x66d   :  { %12576 = vmatprep.subr.bf16.mxu0 %v13566_v11 }
 0x66e   :  { %12595 = vmatpush3.bf16.msra.mxu1 %v13215_v60  ;;  %v3912_v40 = vpop.f32.mrb[232].mxu0  ;;  %v5629_v60 = vpack.c.b16 %v5628_v34, %v5628_v34  ;;  %v13266_v34 = vld [vmem:[%s17774_s4 + $0x530] sm:$0xff]  }
 0x66f   :  { %v12304_v23 = vpop.f32.mrb[233].mxu0  ;;  %12596 = vmatprep.subr.bf16.mxu1 %v13566_v11 }
 0x670   :  { %12577 = vmatpush3.bf16.msra.mxu0 %v13216_v49  ;;  %v3915_v31 = vpop.f32.mrb[234].mxu0  ;;  %v4004_v29 = vpop.f32.mrb[88].mxu1  ;;  %v5739_v49 = vpack.c.b16 %v5738_v26, %v5738_v26  ;;  %v13244_v23 = vld [vmem:[%s17774_s4 + $0x498] sm:$0xff]  }
 0x671   :  { %v16239_v24 = vadd.f32 %v4004_v29, %v3912_v40  ;;  %v12305_v5 = vpop.f32.mrb[235].mxu0  ;;  %v12324_v13 = vpop.f32.mrb[89].mxu1  ;;  %12578 = vmatprep.subr.bf16.mxu0 %v13566_v11  ;;  %v13242_v40 = vld [vmem:[%s17774_s4 + $0x490] sm:$0xff]   ;;  %v13246_v31 = vld [vmem:[%s17774_s4 + $0x4a0] sm:$0xff]  }
 0x672   :  { %12597 = vmatpush3.bf16.msra.mxu1 %v13217_v15  ;;  %v4007_v50 = vpop.f32.mrb[90].mxu1  ;;  %v13243_v15 = vld [vmem:[%s17774_s4 + $0x4d0] sm:$0xff]   ;;  %v13247_v29 = vld [vmem:[%s17774_s4 + $0x4e0] sm:$0xff]   ;;  %v5831_v5 = vld [vmem:[#allocation2 + $0x18] sm:$0x2] }
 0x673   :  { %v12325_v21 = vpop.f32.mrb[91].mxu1  ;;  %12598 = vmatprep.subr.bf16.mxu1 %v13566_v11 }
 0x674   :  { %12579 = vmatpush3.bf16.msra.mxu0 %v13218_v25  ;;  %v5830_v25 = vld [vmem:[#allocation2 + $0x8] sm:$0x2] }
 0x675   :  { %12580 = vmatprep.subr.bf16.mxu0 %v13566_v11  ;;  %v5851_v13 = vunpack.c.l.b16 %v5830_v25  ;;  %v13270_v25 = vld [vmem:[%s17774_s4 + $0x580] sm:$0xff]  }
 0x676   :  { %12599 = vmatpush3.bf16.msra.mxu1 %v13219_v32  ;;  %v13249_v32 = vld [vmem:[%s17774_s4 + $0x4e8] sm:$0xff]  }
 0x677   :  { %12600 = vmatprep.subr.bf16.mxu1 %v13566_v11 }
 0x678   :  { %12581 = vmatpush3.bf16.msra.mxu0 %v13220_v3  ;;  %v5852_v3 = vunpack.c.l.b16 %v5831_v5 }
 0x679   :  { %12606 = vmatprep.subr.bf16.mxu0 %v13566_v11 }
 0x67a   :  { %12601 = vmatpush3.bf16.msra.mxu1 %v13221_v6  ;;  %v13250_v6 = vld [vmem:[%s17774_s4 + $0x4b0] sm:$0xff]  }
 0x67b   :  { %12583 = vmatmul.mubr.bf16.vlgmr.msra.gmra.mrb[4].mxu0 %v5402_v7  ;;  %12626 = vmatprep.subr.bf16.mxu1 %v13566_v11  ;;  %v13251_v7 = vld [vmem:[%s17774_s4 + $0x4f0] sm:$0xff]  }
 0x67c   :  { %12607 = vmatpush3.bf16.msra.mxu0 %v13222_v9  ;;  %12622 = vmatprep.mubr.msk.bf16.mxu0 %vm13567_vm3, %v13566_v11 }
 0x67d   :  { %12603 = vmatmul.mubr.bf16.vlgmr.msra.gmra.mrb[116].mxu1 %v5513_v41  ;;  %12608 = vmatprep.subr.bf16.mxu0 %v13566_v11 }
 0x67e   :  { %12627 = vmatpush3.bf16.msra.mxu1 %v13223_v4  ;;  %12642 = vmatprep.mubr.msk.bf16.mxu1 %vm13567_vm3, %v13566_v11  ;;  %v5853_v4 = vrot.slane %v5851_v13, 2 }
 0x67f   :  { %12628 = vmatprep.subr.bf16.mxu1 %v13566_v11 }
 0x680   :  { %12609 = vmatpush3.bf16.msra.mxu0 %v13224_v52  ;;  %v13252_v52 = vld [vmem:[%s17774_s4 + $0x4b8] sm:$0xff]  }
 0x681   :  { %12610 = vmatprep.subr.bf16.mxu0 %v13566_v11 }
 0x682   :  { %12629 = vmatpush3.bf16.msra.mxu1 %v13225_v0  ;;  %v5854_v0 = vrot.slane %v5852_v3, 1 }
 0x683   :  { %12630 = vmatprep.subr.bf16.mxu1 %v13566_v11 }
 0x684   :  { %12611 = vmatpush3.bf16.msra.mxu0 %v13226_v12  ;;  %v5964_v12 = vrot.slane %v5851_v13, 3  ;;  %v13271_v13 = vld [vmem:[%s17774_s4 + $0x5c0] sm:$0xff]  }
 0x685   :  { %12612 = vmatprep.subr.bf16.mxu0 %v13566_v11 }
 0x686   :  { %12631 = vmatpush3.bf16.msra.mxu1 %v13227_v43  ;;  %v13253_v43 = vld [vmem:[%s17774_s4 + $0x4f8] sm:$0xff]  }
 0x687   :  { %12632 = vmatprep.subr.bf16.mxu1 %v13566_v11 }
 0x688   :  { %12613 = vmatpush3.bf16.msra.mxu0 %v13228_v8  ;;  %v5855_v8 = vsel %vm3826_vm4, %v5854_v0, %v5853_v4 }
 0x689   :  { %12614 = vmatprep.subr.bf16.mxu0 %v13566_v11 }
 0x68a   :  { %12633 = vmatpush3.bf16.msra.mxu1 %v13229_v30  ;;  %v5965_v30 = vrot.slane %v5852_v3, 2  ;;  %v13275_v3 = vld [vmem:[%s17774_s4 + $0x5d0] sm:$0xff]  }
 0x68b   :  { %12634 = vmatprep.subr.bf16.mxu1 %v13566_v11 }
 0x68c   :  { %12615 = vmatpush3.bf16.msra.mxu0 %v13230_v19  ;;  %v13254_v19 = vld [vmem:[%s17774_s4 + $0x500] sm:$0xff]  }
 0x68d   :  { %12616 = vmatprep.subr.bf16.mxu0 %v13566_v11 }
 0x68e   :  { %v4120_v14 = vpop.f32.mrb[236].mxu0  ;;  %12635 = vmatpush3.bf16.msra.mxu1 %v13231_v45  ;;  %v5966_v45 = vsel %vm3826_vm4, %v5965_v30, %v5964_v12  ;;  %v13282_v30 = vld [vmem:[%s17774_s4 + $0x5b0] sm:$0xff]  }
 0x68f   :  { %v4126_v17 = vadd.f32 %v4120_v14, %v16239_v24  ;;  %v12344_v54 = vpop.f32.mrb[237].mxu0  ;;  %12636 = vmatprep.subr.bf16.mxu1 %v13566_v11  ;;  %v13248_v24 = vld [vmem:[%s17774_s4 + $0x4a8] sm:$0xff]   ;;  %v5967_v51 = vpack.c.b16 %v5966_v45, %v5966_v45 }
 0x690   :  { %v4123_v44 = vpop.f32.mrb[238].mxu0  ;;  %v4231_v57 = vpop.f32.mrb[92].mxu1  ;;  %12617 = vmatpush3.bf16.msra.mxu0 %v13232_v63  ;;  %v5856_v63 = vpack.c.b16 %v5855_v8, %v5855_v8  ;;  %v13256_v14 = vld [vmem:[%s17774_s4 + $0x508] sm:$0xff]   ;;  %v13259_v54 = vld [vmem:[%s17774_s4 + $0x550] sm:$0xff]  }
 0x691   :  { %v16312_v36 = vadd.f32 %v4231_v57, %v4126_v17  ;;  %v12345_v56 = vpop.f32.mrb[239].mxu0  ;;  %v12364_v1 = vpop.f32.mrb[93].mxu1  ;;  %12618 = vmatprep.subr.bf16.mxu0 %v13566_v11  ;;  %v13258_v17 = vld [vmem:[%s17774_s4 + $0x510] sm:$0xff]   ;;  %v13262_v44 = vld [vmem:[%s17774_s4 + $0x520] sm:$0xff]  }
 0x692   :  { %v4234_v27 = vpop.f32.mrb[94].mxu1  ;;  %12637 = vmatpush3.bf16.msra.mxu1 %v13233_v16  ;;  %v13257_v16 = vld [vmem:[%s17774_s4 + $0x548] sm:$0xff]   ;;  %v13263_v57 = vld [vmem:[%s17774_s4 + $0x560] sm:$0xff]   ;;  %v6059_v56 = vld [vmem:[#allocation2 + $0x18] sm:$0x4] }
 0x693   :  { %v12365_v18 = vpop.f32.mrb[95].mxu1  ;;  %12638 = vmatprep.subr.bf16.mxu1 %v13566_v11  ;;  %v6080_v46 = vunpack.c.l.b16 %v6059_v56 }
 0x694   :  { %12619 = vmatpush3.bf16.msra.mxu0 %v13234_v22  ;;  %v6058_v22 = vld [vmem:[#allocation2 + $0x8] sm:$0x4] }
 0x695   :  { %12620 = vmatprep.subr.bf16.mxu0 %v13566_v11  ;;  %v6079_v1 = vunpack.c.l.b16 %v6058_v22  ;;  %v13286_v22 = vld [vmem:[%s17774_s4 + $0x600] sm:$0xff]  }
 0x696   :  { %12639 = vmatpush3.bf16.msra.mxu1 %v13235_v61  ;;  %v13265_v61 = vld [vmem:[%s17774_s4 + $0x568] sm:$0xff]  }
 0x697   :  { %12640 = vmatprep.subr.bf16.mxu1 %v13566_v11 }
 0x698   :  { %12621 = vmatpush3.bf16.msra.mxu0 %v13236_v58 }
 0x699   :  { %12646 = vmatprep.subr.bf16.mxu0 %v13566_v11 }
 0x69a   :  { %12641 = vmatpush3.bf16.msra.mxu1 %v13237_v42 }
 0x69b   :  { %12623 = vmatmul.mubr.bf16.vlgmr.msra.gmra.mrb[8].mxu0 %v5629_v60  ;;  %12666 = vmatprep.subr.bf16.mxu1 %v13566_v11 }
 0x69c   :  { %12647 = vmatpush3.bf16.msra.mxu0 %v13238_v2  ;;  %12662 = vmatprep.mubr.msk.bf16.mxu0 %vm13567_vm3, %v13566_v11 }
 0x69d   :  { %12643 = vmatmul.mubr.bf16.vlgmr.msra.gmra.mrb[120].mxu1 %v5739_v49  ;;  %12648 = vmatprep.subr.bf16.mxu0 %v13566_v11  ;;  %v13267_v49 = vld [vmem:[%s17774_s4 + $0x570] sm:$0xff]  }
 0x69e   :  { %12667 = vmatpush3.bf16.msra.mxu1 %v13239_v59  ;;  %12682 = vmatprep.mubr.msk.bf16.mxu1 %vm13567_vm3, %v13566_v11 }
 0x69f   :  { %12668 = vmatprep.subr.bf16.mxu1 %v13566_v11 }
 0x6a0   :  { %12649 = vmatpush3.bf16.msra.mxu0 %v13240_v28  ;;  %v6081_v28 = vrot.slane %v6079_v1, 4 }
 0x6a1   :  { %12650 = vmatprep.subr.bf16.mxu0 %v13566_v11 }
 0x6a2   :  { %12669 = vmatpush3.bf16.msra.mxu1 %v13241_v35 }
 0x6a3   :  { %12670 = vmatprep.subr.bf16.mxu1 %v13566_v11 }
 0x6a4   :  { %12651 = vmatpush3.bf16.msra.mxu0 %v13242_v40  ;;  %v13268_v40 = vld [vmem:[%s17774_s4 + $0x538] sm:$0xff]  }
 0x6a5   :  { %12652 = vmatprep.subr.bf16.mxu0 %v13566_v11 }
 0x6a6   :  { %12671 = vmatpush3.bf16.msra.mxu1 %v13243_v15  ;;  %v6082_v15 = vrot.slane %v6080_v46, 3 }
 0x6a7   :  { %12672 = vmatprep.subr.bf16.mxu1 %v13566_v11 }
 0x6a8   :  { %12653 = vmatpush3.bf16.msra.mxu0 %v13244_v23  ;;  %v6192_v23 = vrot.slane %v6079_v1, 5  ;;  %v13287_v1 = vld [vmem:[%s17774_s4 + $0x640] sm:$0xff]  }
 0x6a9   :  { %12654 = vmatprep.subr.bf16.mxu0 %v13566_v11 }
 0x6aa   :  { %12673 = vmatpush3.bf16.msra.mxu1 %v13245_v20  ;;  %v13269_v20 = vld [vmem:[%s17774_s4 + $0x578] sm:$0xff]  }
 0x6ab   :  { %12674 = vmatprep.subr.bf16.mxu1 %v13566_v11 }
 0x6ac   :  { %12655 = vmatpush3.bf16.msra.mxu0 %v13246_v31  ;;  %v6083_v31 = vsel %vm3826_vm4, %v6082_v15, %v6081_v28  ;;  %v13297_v28 = vld [vmem:[%s17774_s4 + $0x668] sm:$0xff]  }
 0x6ad   :  { %12656 = vmatprep.subr.bf16.mxu0 %v13566_v11  ;;  %v6084_v5 = vpack.c.b16 %v6083_v31, %v6083_v31 }
 0x6ae   :  { %v4348_v50 = vpop.f32.mrb[240].mxu0  ;;  %12675 = vmatpush3.bf16.msra.mxu1 %v13247_v29  ;;  %v6193_v29 = vrot.slane %v6080_v46, 4  ;;  %v13291_v46 = vld [vmem:[%s17774_s4 + $0x650] sm:$0xff]  }
 0x6af   :  { %v4354_v33 = vadd.f32 %v4348_v50, %v16312_v36  ;;  %v12384_v21 = vpop.f32.mrb[241].mxu0  ;;  %12676 = vmatprep.subr.bf16.mxu1 %v13566_v11  ;;  %v13264_v36 = vld [vmem:[%s17774_s4 + $0x528] sm:$0xff]  }
 0x6b0   :  { %v4351_v62 = vpop.f32.mrb[242].mxu0  ;;  %v4459_v48 = vpop.f32.mrb[96].mxu1  ;;  %12657 = vmatpush3.bf16.msra.mxu0 %v13248_v24  ;;  %v6194_v24 = vsel %vm3826_vm4, %v6193_v29, %v6192_v23  ;;  %v13274_v21 = vld [vmem:[%s17774_s4 + $0x590] sm:$0xff]  }
 0x6b1   :  { %v16385_v10 = vadd.f32 %v4459_v48, %v4354_v33  ;;  %v12385_v53 = vpop.f32.mrb[243].mxu0  ;;  %v12404_v9 = vpop.f32.mrb[97].mxu1  ;;  %12658 = vmatprep.subr.bf16.mxu0 %v13566_v11  ;;  %v6195_v50 = vpack.c.b16 %v6194_v24, %v6194_v24  ;;  %v13273_v33 = vld [vmem:[%s17774_s4 + $0x5c8] sm:$0xff]   ;;  %v13276_v62 = vld [vmem:[%s17774_s4 + $0x598] sm:$0xff]   ;;  %v13298_v29 = vld [vmem:[%s17774_s4 + $0x630] sm:$0xff]  }
 0x6b2   :  { %v4462_v38 = vpop.f32.mrb[98].mxu1  ;;  %12677 = vmatpush3.bf16.msra.mxu1 %v13249_v32  ;;  %v13272_v32 = vld [vmem:[%s17774_s4 + $0x588] sm:$0xff]   ;;  %v13277_v48 = vld [vmem:[%s17774_s4 + $0x5d8] sm:$0xff]  }
 0x6b3   :  { %v12405_v41 = vpop.f32.mrb[99].mxu1  ;;  %12678 = vmatprep.subr.bf16.mxu1 %v13566_v11  ;;  %v6286_v53 = vld [vmem:[#allocation2 + $0x8] sm:$0x8]  ;;  %v6287_v38 = vld [vmem:[#allocation2 + $0x18] sm:$0x8] }
 0x6b4   :  { %12659 = vmatpush3.bf16.msra.mxu0 %v13250_v6  ;;  %v13278_v6 = vld [vmem:[%s17774_s4 + $0x5a0] sm:$0xff]   ;;  %v13280_v9 = vld [vmem:[%s17774_s4 + $0x5a8] sm:$0xff]   ;;  %v6308_v12 = vunpack.c.l.b16 %v6287_v38 }
 0x6b5   :  { %12660 = vmatprep.subr.bf16.mxu0 %v13566_v11  ;;  %v13281_v41 = vld [vmem:[%s17774_s4 + $0x5e8] sm:$0xff]  }
 0x6b6   :  { %12679 = vmatpush3.bf16.msra.mxu1 %v13251_v7  ;;  %v6307_v7 = vunpack.c.l.b16 %v6286_v53 }
 0x6b7   :  { %12680 = vmatprep.subr.bf16.mxu1 %v13566_v11 }
 0x6b8   :  { %12661 = vmatpush3.bf16.msra.mxu0 %v13252_v52 }
 0x6b9   :  { %12686 = vmatprep.subr.bf16.mxu0 %v13566_v11 }
 0x6ba   :  { %12681 = vmatpush3.bf16.msra.mxu1 %v13253_v43 }
 0x6bb   :  { %12663 = vmatmul.mubr.bf16.vlgmr.msra.gmra.mrb[12].mxu0 %v5856_v63  ;;  %12706 = vmatprep.subr.bf16.mxu1 %v13566_v11 }
 0x6bc   :  { %12687 = vmatpush3.bf16.msra.mxu0 %v13254_v19  ;;  %12702 = vmatprep.mubr.msk.bf16.mxu0 %vm13567_vm3, %v13566_v11 }
 0x6bd   :  { %12683 = vmatmul.mubr.bf16.vlgmr.msra.gmra.mrb[124].mxu1 %v5967_v51  ;;  %12688 = vmatprep.subr.bf16.mxu0 %v13566_v11  ;;  %v13283_v51 = vld [vmem:[%s17774_s4 + $0x5f0] sm:$0xff]  }
 0x6be   :  { %12707 = vmatpush3.bf16.msra.mxu1 %v13255_v37  ;;  %12722 = vmatprep.mubr.msk.bf16.mxu1 %vm13567_vm3, %v13566_v11 }
 0x6bf   :  { %12708 = vmatprep.subr.bf16.mxu1 %v13566_v11 }
 0x6c0   :  { %12689 = vmatpush3.bf16.msra.mxu0 %v13256_v14  ;;  %v6309_v14 = vrot.slane %v6307_v7, 6 }
 0x6c1   :  { %12690 = vmatprep.subr.bf16.mxu0 %v13566_v11 }
 0x6c2   :  { %12709 = vmatpush3.bf16.msra.mxu1 %v13257_v16 }
 0x6c3   :  { %12710 = vmatprep.subr.bf16.mxu1 %v13566_v11 }
 0x6c4   :  { %12691 = vmatpush3.bf16.msra.mxu0 %v13258_v17  ;;  %v13284_v17 = vld [vmem:[%s17774_s4 + $0x5b8] sm:$0xff]  }
 0x6c5   :  { %12692 = vmatprep.subr.bf16.mxu0 %v13566_v11 }
 0x6c6   :  { %12711 = vmatpush3.bf16.msra.mxu1 %v13259_v54  ;;  %v6310_v54 = vrot.slane %v6308_v12, 5 }
 0x6c7   :  { %12712 = vmatprep.subr.bf16.mxu1 %v13566_v11 }
 0x6c8   :  { %12693 = vmatpush3.bf16.msra.mxu0 %v13260_v47  ;;  %v6420_v47 = vrot.slane %v6307_v7, 7  ;;  %v13304_v7 = vld [vmem:[%s17774_s4 + $0x688] sm:$0xff]  }
 0x6c9   :  { %12694 = vmatprep.subr.bf16.mxu0 %v13566_v11 }
 0x6ca   :  { %12713 = vmatpush3.bf16.msra.mxu1 %v13261_v39  ;;  %v13285_v39 = vld [vmem:[%s17774_s4 + $0x5f8] sm:$0xff]  }
 0x6cb   :  { %12714 = vmatprep.subr.bf16.mxu1 %v13566_v11 }
 0x6cc   :  { %12695 = vmatpush3.bf16.msra.mxu0 %v13262_v44  ;;  %v6311_v44 = vsel %vm3826_vm4, %v6310_v54, %v6309_v14 }
 0x6cd   :  { %12696 = vmatprep.subr.bf16.mxu0 %v13566_v11  ;;  %v6312_v56 = vpack.c.b16 %v6311_v44, %v6311_v44 }
 0x6ce   :  { %v4576_v27 = vpop.f32.mrb[244].mxu0  ;;  %12715 = vmatpush3.bf16.msra.mxu1 %v13263_v57  ;;  %v6421_v57 = vrot.slane %v6308_v12, 6  ;;  %v13309_v12 = vld [vmem:[%s17774_s4 + $0x6d8] sm:$0xff]  }
 0x6cf   :  { %v4582_v18 = vadd.f32 %v4576_v27, %v16385_v10  ;;  %v12424_v58 = vpop.f32.mrb[245].mxu0  ;;  %12716 = vmatprep.subr.bf16.mxu1 %v13566_v11  ;;  %v13279_v10 = vld [vmem:[%s17774_s4 + $0x5e0] sm:$0xff]  }
 0x6d0   :  { %v4579_v55 = vpop.f32.mrb[246].mxu0  ;;  %v4687_v42 = vpop.f32.mrb[100].mxu1  ;;  %12697 = vmatpush3.bf16.msra.mxu0 %v13264_v36  ;;  %v6422_v36 = vsel %vm3826_vm4, %v6421_v57, %v6420_v47  ;;  %v13290_v58 = vld [vmem:[%s17774_s4 + $0x610] sm:$0xff]  }
 0x6d1   :  { %v16458_v2 = vadd.f32 %v4687_v42, %v4582_v18  ;;  %v12425_v26 = vpop.f32.mrb[247].mxu0  ;;  %v12444_v60 = vpop.f32.mrb[101].mxu1  ;;  %12698 = vmatprep.subr.bf16.mxu0 %v13566_v11  ;;  %v6423_v27 = vpack.c.b16 %v6422_v36, %v6422_v36  ;;  %v13289_v18 = vld [vmem:[%s17774_s4 + $0x648] sm:$0xff]   ;;  %v13292_v55 = vld [vmem:[%s17774_s4 + $0x618] sm:$0xff]  }
 0x6d2   :  { %v4690_v59 = vpop.f32.mrb[102].mxu1  ;;  %12717 = vmatpush3.bf16.msra.mxu1 %v13265_v61  ;;  %v13288_v61 = vld [vmem:[%s17774_s4 + $0x608] sm:$0xff]   ;;  %v13293_v42 = vld [vmem:[%s17774_s4 + $0x658] sm:$0xff]  }
 0x6d3   :  { %v12445_v35 = vpop.f32.mrb[103].mxu1  ;;  %12718 = vmatprep.subr.bf16.mxu1 %v13566_v11  ;;  %v13296_v26 = vld [vmem:[%s17774_s4 + $0x628] sm:$0xff]   ;;  %v6515_v60 = vld [vmem:[#allocation2 + $0x18] sm:$0x10] }
 0x6d4   :  { %12699 = vmatpush3.bf16.msra.mxu0 %v13266_v34  ;;  %v13294_v34 = vld [vmem:[%s17774_s4 + $0x620] sm:$0xff]   ;;  %v6514_v59 = vld [vmem:[#allocation2 + $0x8] sm:$0x10]  ;;  %v6536_v15 = vunpack.c.h.b16 %v6515_v60 }
 0x6d5   :  { %12700 = vmatprep.subr.bf16.mxu0 %v13566_v11  ;;  %v6535_v23 = vunpack.c.h.b16 %v6514_v59  ;;  %v13319_v60 = vld [vmem:[%s17774_s4 + $0x740] sm:$0xff]  }
 0x6d6   :  { %12719 = vmatpush3.bf16.msra.mxu1 %v13267_v49 }
 0x6d7   :  { %12720 = vmatprep.subr.bf16.mxu1 %v13566_v11 }
 0x6d8   :  { %12701 = vmatpush3.bf16.msra.mxu0 %v13268_v40 }
 0x6d9   :  { %12726 = vmatprep.subr.bf16.mxu0 %v13566_v11 }
 0x6da   :  { %12721 = vmatpush3.bf16.msra.mxu1 %v13269_v20 }
 0x6db   :  { %12703 = vmatmul.mubr.bf16.vlgmr.msra.gmra.mrb[16].mxu0 %v6084_v5  ;;  %12746 = vmatprep.subr.bf16.mxu1 %v13566_v11 }
 0x6dc   :  { %12727 = vmatpush3.bf16.msra.mxu0 %v13270_v25  ;;  %12742 = vmatprep.mubr.msk.bf16.mxu0 %vm13567_vm3, %v13566_v11 }
 0x6dd   :  { %12723 = vmatmul.mubr.bf16.vlgmr.msra.gmra.mrb[128].mxu1 %v6195_v50  ;;  %12728 = vmatprep.subr.bf16.mxu0 %v13566_v11  ;;  %v13299_v50 = vld [vmem:[%s17774_s4 + $0x670] sm:$0xff]  }
 0x6de   :  { %12747 = vmatpush3.bf16.msra.mxu1 %v13271_v13  ;;  %12762 = vmatprep.mubr.msk.bf16.mxu1 %vm13567_vm3, %v13566_v11 }
 0x6df   :  { %12748 = vmatprep.subr.bf16.mxu1 %v13566_v11 }
 0x6e0   :  { %12729 = vmatpush3.bf16.msra.mxu0 %v13272_v32 }
 0x6e1   :  { %12730 = vmatprep.subr.bf16.mxu0 %v13566_v11 }
 0x6e2   :  { %12749 = vmatpush3.bf16.msra.mxu1 %v13273_v33  ;;  %v13300_v33 = vld [vmem:[%s17774_s4 + $0x638] sm:$0xff]  }
 0x6e3   :  { %12750 = vmatprep.subr.bf16.mxu1 %v13566_v11 }
 0x6e4   :  { %12731 = vmatpush3.bf16.msra.mxu0 %v13274_v21  ;;  %v6537_v21 = vrot.slane %v6536_v15, 7 }
 0x6e5   :  { %12732 = vmatprep.subr.bf16.mxu0 %v13566_v11 }
 0x6e6   :  { %12751 = vmatpush3.bf16.msra.mxu1 %v13275_v3  ;;  %v6647_v3 = vrot.slane %v6535_v23, 1 }
 0x6e7   :  { %12752 = vmatprep.subr.bf16.mxu1 %v13566_v11 }
 0x6e8   :  { %12733 = vmatpush3.bf16.msra.mxu0 %v13276_v62  ;;  %v13301_v62 = vld [vmem:[%s17774_s4 + $0x678] sm:$0xff]  }
 0x6e9   :  { %12734 = vmatprep.subr.bf16.mxu0 %v13566_v11 }
 0x6ea   :  { %12753 = vmatpush3.bf16.msra.mxu1 %v13277_v48  ;;  %v6538_v48 = vsel %vm3826_vm4, %v6537_v21, %v6535_v23  ;;  %v13325_v23 = vld [vmem:[%s17774_s4 + $0x758] sm:$0xff]  }
 0x6eb   :  { %12754 = vmatprep.subr.bf16.mxu1 %v13566_v11  ;;  %v6539_v53 = vpack.c.b16 %v6538_v48, %v6538_v48  ;;  %v13330_v48 = vld [vmem:[%s17774_s4 + $0x730] sm:$0xff]  }
 0x6ec   :  { %12735 = vmatpush3.bf16.msra.mxu0 %v13278_v6  ;;  %v13302_v6 = vld [vmem:[%s17774_s4 + $0x680] sm:$0xff]  }
 0x6ed   :  { %12736 = vmatprep.subr.bf16.mxu0 %v13566_v11 }
 0x6ee   :  { %v4803_v4 = vpop.f32.mrb[248].mxu0  ;;  %12755 = vmatpush3.bf16.msra.mxu1 %v13279_v10  ;;  %v6648_v10 = vsel %vm3826_vm4, %v6536_v15, %v6647_v3  ;;  %v13324_v15 = vld [vmem:[%s17774_s4 + $0x718] sm:$0xff]  }
 0x6ef   :  { %v4809_v52 = vadd.f32 %v4803_v4, %v16458_v2  ;;  %v12464_v0 = vpop.f32.mrb[249].mxu0  ;;  %12756 = vmatprep.subr.bf16.mxu1 %v13566_v11  ;;  %v13295_v2 = vld [vmem:[%s17774_s4 + $0x660] sm:$0xff]   ;;  %v6649_v38 = vpack.c.b16 %v6648_v10, %v6648_v10  ;;  %v13305_v4 = vld [vmem:[%s17774_s4 + $0x6c8] sm:$0xff]  }
 0x6f0   :  { %v4806_v43 = vpop.f32.mrb[250].mxu0  ;;  %v4913_v8 = vpop.f32.mrb[104].mxu1  ;;  %12737 = vmatpush3.bf16.msra.mxu0 %v13280_v9  ;;  %v13303_v9 = vld [vmem:[%s17774_s4 + $0x6c0] sm:$0xff]   ;;  %v13308_v0 = vld [vmem:[%s17774_s4 + $0x698] sm:$0xff]  }
 0x6f1   :  { %v16531_v19 = vadd.f32 %v4913_v8, %v4809_v52  ;;  %v12465_v45 = vpop.f32.mrb[251].mxu0  ;;  %v12484_v63 = vpop.f32.mrb[105].mxu1  ;;  %12738 = vmatprep.subr.bf16.mxu0 %v13566_v11  ;;  %v13307_v52 = vld [vmem:[%s17774_s4 + $0x6d0] sm:$0xff]   ;;  %v13310_v43 = vld [vmem:[%s17774_s4 + $0x6a0] sm:$0xff]  }
 0x6f2   :  { %v4916_v37 = vpop.f32.mrb[106].mxu1  ;;  %12757 = vmatpush3.bf16.msra.mxu1 %v13281_v41  ;;  %v13306_v41 = vld [vmem:[%s17774_s4 + $0x690] sm:$0xff]   ;;  %v13311_v8 = vld [vmem:[%s17774_s4 + $0x6e0] sm:$0xff]   ;;  %v6741_v45 = vld [vmem:[#allocation2 + $0x18] sm:$0x20] }
 0x6f3   :  { %v12485_v16 = vpop.f32.mrb[107].mxu1  ;;  %12758 = vmatprep.subr.bf16.mxu1 %v13566_v11 }
 0x6f4   :  { %12739 = vmatpush3.bf16.msra.mxu0 %v13282_v30  ;;  %v6740_v30 = vld [vmem:[#allocation2 + $0x8] sm:$0x20] }
 0x6f5   :  { %12740 = vmatprep.subr.bf16.mxu0 %v13566_v11  ;;  %v6761_v63 = vunpack.c.h.b16 %v6740_v30  ;;  %v13334_v30 = vld [vmem:[%s17774_s4 + $0x780] sm:$0xff]  }
 0x6f6   :  { %12759 = vmatpush3.bf16.msra.mxu1 %v13283_v51  ;;  %v13313_v51 = vld [vmem:[%s17774_s4 + $0x6e8] sm:$0xff]  }
 0x6f7   :  { %12760 = vmatprep.subr.bf16.mxu1 %v13566_v11 }
 0x6f8   :  { %12741 = vmatpush3.bf16.msra.mxu0 %v13284_v17  ;;  %v6762_v17 = vunpack.c.h.b16 %v6741_v45 }
 0x6f9   :  { %12766 = vmatprep.subr.bf16.mxu0 %v13566_v11 }
 0x6fa   :  { %12761 = vmatpush3.bf16.msra.mxu1 %v13285_v39  ;;  %v13314_v39 = vld [vmem:[%s17774_s4 + $0x6b0] sm:$0xff]  }
 0x6fb   :  { %12743 = vmatmul.mubr.bf16.vlgmr.msra.gmra.mrb[20].mxu0 %v6312_v56  ;;  %12786 = vmatprep.subr.bf16.mxu1 %v13566_v11  ;;  %v13315_v56 = vld [vmem:[%s17774_s4 + $0x6f0] sm:$0xff]  }
 0x6fc   :  { %12767 = vmatpush3.bf16.msra.mxu0 %v13286_v22  ;;  %12782 = vmatprep.mubr.msk.bf16.mxu0 %vm13567_vm3, %v13566_v11 }
 0x6fd   :  { %12763 = vmatmul.mubr.bf16.vlgmr.msra.gmra.mrb[132].mxu1 %v6423_v27  ;;  %12768 = vmatprep.subr.bf16.mxu0 %v13566_v11 }
 0x6fe   :  { %12787 = vmatpush3.bf16.msra.mxu1 %v13287_v1  ;;  %12802 = vmatprep.mubr.msk.bf16.mxu1 %vm13567_vm3, %v13566_v11  ;;  %v6763_v1 = vrot.slane %v6761_v63, 2 }
 0x6ff   :  { %12788 = vmatprep.subr.bf16.mxu1 %v13566_v11 }
 0x700   :  { %12769 = vmatpush3.bf16.msra.mxu0 %v13288_v61  ;;  %v13316_v61 = vld [vmem:[%s17774_s4 + $0x6b8] sm:$0xff]  }
 0x701   :  { %12770 = vmatprep.subr.bf16.mxu0 %v13566_v11 }
 0x702   :  { %12789 = vmatpush3.bf16.msra.mxu1 %v13289_v18  ;;  %v6764_v18 = vrot.slane %v6762_v17, 1 }
 0x703   :  { %12790 = vmatprep.subr.bf16.mxu1 %v13566_v11 }
 0x704   :  { %12771 = vmatpush3.bf16.msra.mxu0 %v13290_v58  ;;  %v6874_v58 = vrot.slane %v6761_v63, 3  ;;  %v13335_v63 = vld [vmem:[%s17774_s4 + $0x7c0] sm:$0xff]  }
 0x705   :  { %12772 = vmatprep.subr.bf16.mxu0 %v13566_v11 }
 0x706   :  { %12791 = vmatpush3.bf16.msra.mxu1 %v13291_v46  ;;  %v13317_v46 = vld [vmem:[%s17774_s4 + $0x6f8] sm:$0xff]  }
 0x707   :  { %12792 = vmatprep.subr.bf16.mxu1 %v13566_v11 }
 0x708   :  { %12773 = vmatpush3.bf16.msra.mxu0 %v13292_v55  ;;  %v6765_v55 = vsel %vm3826_vm4, %v6764_v18, %v6763_v1 }
 0x709   :  { %12774 = vmatprep.subr.bf16.mxu0 %v13566_v11 }
 0x70a   :  { %12793 = vmatpush3.bf16.msra.mxu1 %v13293_v42  ;;  %v6875_v42 = vrot.slane %v6762_v17, 2  ;;  %v13339_v17 = vld [vmem:[%s17774_s4 + $0x7d0] sm:$0xff]  }
 0x70b   :  { %12794 = vmatprep.subr.bf16.mxu1 %v13566_v11 }
 0x70c   :  { %12775 = vmatpush3.bf16.msra.mxu0 %v13294_v34  ;;  %v13318_v34 = vld [vmem:[%s17774_s4 + $0x700] sm:$0xff]  }
 0x70d   :  { %12776 = vmatprep.subr.bf16.mxu0 %v13566_v11 }
 0x70e   :  { %v5030_v49 = vpop.f32.mrb[252].mxu0  ;;  %12795 = vmatpush3.bf16.msra.mxu1 %v13295_v2  ;;  %v6876_v2 = vsel %vm3826_vm4, %v6875_v42, %v6874_v58  ;;  %v13346_v42 = vld [vmem:[%s17774_s4 + $0x7b0] sm:$0xff]  }
 0x70f   :  { %v5036_v35 = vadd.f32 %v5030_v49, %v16531_v19  ;;  %v12504_v40 = vpop.f32.mrb[253].mxu0  ;;  %12796 = vmatprep.subr.bf16.mxu1 %v13566_v11  ;;  %v13312_v19 = vld [vmem:[%s17774_s4 + $0x6a8] sm:$0xff]   ;;  %v6877_v59 = vpack.c.b16 %v6876_v2, %v6876_v2 }
 0x710   :  { %v5033_v20 = vpop.f32.mrb[254].mxu0  ;;  %v5141_v31 = vpop.f32.mrb[108].mxu1  ;;  %12777 = vmatpush3.bf16.msra.mxu0 %v13296_v26  ;;  %v6766_v26 = vpack.c.b16 %v6765_v55, %v6765_v55  ;;  %v13320_v49 = vld [vmem:[%s17774_s4 + $0x708] sm:$0xff]   ;;  %v13323_v40 = vld [vmem:[%s17774_s4 + $0x750] sm:$0xff]  }
 0x711   :  { %v16604_v25 = vadd.f32 %v5141_v31, %v5036_v35  ;;  %v12505_v24 = vpop.f32.mrb[255].mxu0  ;;  %v12524_v5 = vpop.f32.mrb[109].mxu1  ;;  %12778 = vmatprep.subr.bf16.mxu0 %v13566_v11  ;;  %v13322_v35 = vld [vmem:[%s17774_s4 + $0x710] sm:$0xff]   ;;  %v13326_v20 = vld [vmem:[%s17774_s4 + $0x720] sm:$0xff]  }
 0x712   :  { %v5144_v13 = vpop.f32.mrb[110].mxu1  ;;  %12797 = vmatpush3.bf16.msra.mxu1 %v13297_v28  ;;  %v13321_v28 = vld [vmem:[%s17774_s4 + $0x748] sm:$0xff]   ;;  %v13327_v31 = vld [vmem:[%s17774_s4 + $0x760] sm:$0xff]   ;;  %v6969_v24 = vld [vmem:[#allocation2 + $0x18] sm:$0x40] }
 0x713   :  { %v12525_v32 = vpop.f32.mrb[111].mxu1  ;;  %12798 = vmatprep.subr.bf16.mxu1 %v13566_v11  ;;  %v6990_v21 = vunpack.c.h.b16 %v6969_v24 }
 0x714   :  { %12779 = vmatpush3.bf16.msra.mxu0 %v13298_v29  ;;  %v6968_v29 = vld [vmem:[#allocation2 + $0x8] sm:$0x40] }
 0x715   :  { %12780 = vmatprep.subr.bf16.mxu0 %v13566_v11  ;;  %v6989_v5 = vunpack.c.h.b16 %v6968_v29 }
 0x716   :  { %12799 = vmatpush3.bf16.msra.mxu1 %v13299_v50  ;;  %v13329_v50 = vld [vmem:[%s17774_s4 + $0x768] sm:$0xff]  }
 0x717   :  { %12800 = vmatprep.subr.bf16.mxu1 %v13566_v11 }
 0x718   :  { %12781 = vmatpush3.bf16.msra.mxu0 %v13300_v33 }
 0x719   :  { %12806 = vmatprep.subr.bf16.mxu0 %v13566_v11 }
 0x71a   :  { %12801 = vmatpush3.bf16.msra.mxu1 %v13301_v62 }
 0x71b   :  { %12783 = vmatmul.mubr.bf16.vlgmr.msra.gmra.mrb[24].mxu0 %v6539_v53  ;;  %12826 = vmatprep.subr.bf16.mxu1 %v13566_v11 }
 0x71c   :  { %12807 = vmatpush3.bf16.msra.mxu0 %v13302_v6  ;;  %12822 = vmatprep.mubr.msk.bf16.mxu0 %vm13567_vm3, %v13566_v11 }
 0x71d   :  { %12803 = vmatmul.mubr.bf16.vlgmr.msra.gmra.mrb[136].mxu1 %v6649_v38  ;;  %12808 = vmatprep.subr.bf16.mxu0 %v13566_v11  ;;  %v13331_v38 = vld [vmem:[%s17774_s4 + $0x770] sm:$0xff]  }
 0x71e   :  { %12827 = vmatpush3.bf16.msra.mxu1 %v13303_v9  ;;  %12842 = vmatprep.mubr.msk.bf16.mxu1 %vm13567_vm3, %v13566_v11 }
 0x71f   :  { %12828 = vmatprep.subr.bf16.mxu1 %v13566_v11 }
 0x720   :  { %12809 = vmatpush3.bf16.msra.mxu0 %v13304_v7  ;;  %v6991_v7 = vrot.slane %v6989_v5, 4 }
 0x721   :  { %12810 = vmatprep.subr.bf16.mxu0 %v13566_v11 }
 0x722   :  { %12829 = vmatpush3.bf16.msra.mxu1 %v13305_v4 }
 0x723   :  { %12830 = vmatprep.subr.bf16.mxu1 %v13566_v11 }
 0x724   :  { %12811 = vmatpush3.bf16.msra.mxu0 %v13306_v41  ;;  %v13332_v41 = vld [vmem:[%s17774_s4 + $0x738] sm:$0xff]  }
 0x725   :  { %12812 = vmatprep.subr.bf16.mxu0 %v13566_v11 }
 0x726   :  { %12831 = vmatpush3.bf16.msra.mxu1 %v13307_v52  ;;  %v6992_v52 = vrot.slane %v6990_v21, 3 }
 0x727   :  { %12832 = vmatprep.subr.bf16.mxu1 %v13566_v11 }
 0x728   :  { %12813 = vmatpush3.bf16.msra.mxu0 %v13308_v0  ;;  %v7102_v0 = vrot.slane %v6989_v5, 5  ;;  %v18189_v5 = vmov 0  }
 0x729   :  { %12814 = vmatprep.subr.bf16.mxu0 %v13566_v11 }
 0x72a   :  { %12833 = vmatpush3.bf16.msra.mxu1 %v13309_v12  ;;  %v13333_v12 = vld [vmem:[%s17774_s4 + $0x778] sm:$0xff]  }
 0x72b   :  { %12834 = vmatprep.subr.bf16.mxu1 %v13566_v11 }
 0x72c   :  { %12815 = vmatpush3.bf16.msra.mxu0 %v13310_v43  ;;  %v6993_v43 = vsel %vm3826_vm4, %v6992_v52, %v6991_v7 }
 0x72d   :  { %12816 = vmatprep.subr.bf16.mxu0 %v13566_v11  ;;  %v6994_v45 = vpack.c.b16 %v6993_v43, %v6993_v43  ;;  %v7499_v43 = vld [vmem:[%s17775_s7] sm:$0xff] }
 0x72e   :  { %v5258_v37 = vpop.f32.mrb[0].mxu0  ;;  %12835 = vmatpush3.bf16.msra.mxu1 %v13311_v8  ;;  %v7103_v8 = vrot.slane %v6990_v21, 4 }
 0x72f   :  { %v5264_v14 = vadd.f32 %v5258_v37, %v16604_v25  ;;  %v12544_v16 = vpop.f32.mrb[1].mxu0  ;;  %12836 = vmatprep.subr.bf16.mxu1 %v13566_v11  ;;  %v13328_v25 = vld [vmem:[%s17774_s4 + $0x728] sm:$0xff]  }
 0x730   :  { %v5261_v54 = vpop.f32.mrb[2].mxu0  ;;  %v5369_v47 = vpop.f32.mrb[112].mxu1  ;;  %12817 = vmatpush3.bf16.msra.mxu0 %v13312_v19  ;;  %v7104_v19 = vsel %vm3826_vm4, %v7103_v8, %v7102_v0  ;;  %v13338_v16 = vld [vmem:[%s17774_s4 + $0x790] sm:$0xff]   ;;  %v7503_v8 = vld [vmem:[%s17775_s7 + $0x20] sm:$0xff] }
 0x731   :  { %v16677_v44 = vadd.f32 %v5369_v47, %v5264_v14  ;;  %v12545_v57 = vpop.f32.mrb[3].mxu0  ;;  %v12564_v22 = vpop.f32.mrb[113].mxu1  ;;  %12818 = vmatprep.subr.bf16.mxu0 %v13566_v11  ;;  %v7105_v37 = vpack.c.b16 %v7104_v19, %v7104_v19  ;;  %v13337_v14 = vld [vmem:[%s17774_s4 + $0x7c8] sm:$0xff]   ;;  %v13340_v54 = vld [vmem:[%s17774_s4 + $0x798] sm:$0xff]   ;;  %v10923_v19 = vcombine.low %v7499_v43, %v7503_v8 }
 0x732   :  { %v5372_v36 = vpop.f32.mrb[114].mxu1  ;;  %12837 = vmatpush3.bf16.msra.mxu1 %v13313_v51  ;;  %v13336_v51 = vld [vmem:[%s17774_s4 + $0x788] sm:$0xff]   ;;  %v13341_v47 = vld [vmem:[%s17774_s4 + $0x7d8] sm:$0xff]  }
 0x733   :  { %v12565_v27 = vpop.f32.mrb[115].mxu1  ;;  %12838 = vmatprep.subr.bf16.mxu1 %v13566_v11  ;;  %v7196_v57 = vld [vmem:[#allocation2 + $0x8] sm:$0x80]  ;;  %v7197_v36 = vld [vmem:[#allocation2 + $0x18] sm:$0x80] }
 0x734   :  { %12819 = vmatpush3.bf16.msra.mxu0 %v13314_v39  ;;  %v13342_v39 = vld [vmem:[%s17774_s4 + $0x7a0] sm:$0xff]   ;;  %v13344_v22 = vld [vmem:[%s17774_s4 + $0x7a8] sm:$0xff]   ;;  %v7218_v58 = vunpack.c.h.b16 %v7197_v36 }
 0x735   :  { %12820 = vmatprep.subr.bf16.mxu0 %v13566_v11  ;;  %v13345_v27 = vld [vmem:[%s17774_s4 + $0x7e8] sm:$0xff]  }
 0x736   :  { %12839 = vmatpush3.bf16.msra.mxu1 %v13315_v56  ;;  %v7217_v56 = vunpack.c.h.b16 %v7196_v57  ;;  %v7519_v57 = vld [vmem:[%s17775_s7 + $0xa0] sm:$0xff]  ;;  %v7520_v36 = vld [vmem:[%s17775_s7 + $0xa8] sm:$0xff] }
 0x737   :  { %12840 = vmatprep.subr.bf16.mxu1 %v13566_v11 }
 0x738   :  { %12821 = vmatpush3.bf16.msra.mxu0 %v13316_v61 }
 0x739   :  { %12846 = vmatprep.subr.bf16.mxu0 %v13566_v11 }
 0x73a   :  { %12841 = vmatpush3.bf16.msra.mxu1 %v13317_v46 }
 0x73b   :  { %12823 = vmatmul.mubr.bf16.vlgmr.msra.gmra.mrb[28].mxu0 %v6766_v26  ;;  %12866 = vmatprep.subr.bf16.mxu1 %v13566_v11 }
 0x73c   :  { %12847 = vmatpush3.bf16.msra.mxu0 %v13318_v34  ;;  %12862 = vmatprep.mubr.msk.bf16.mxu0 %vm13567_vm3, %v13566_v11 }
 0x73d   :  { %12843 = vmatmul.mubr.bf16.vlgmr.msra.gmra.mrb[140].mxu1 %v6877_v59  ;;  %12848 = vmatprep.subr.bf16.mxu0 %v13566_v11  ;;  %v13347_v59 = vld [vmem:[%s17774_s4 + $0x7f0] sm:$0xff]  }
 0x73e   :  { %12867 = vmatpush3.bf16.msra.mxu1 %v13319_v60  ;;  %12882 = vmatprep.mubr.msk.bf16.mxu1 %vm13567_vm3, %v13566_v11 }
 0x73f   :  { %12868 = vmatprep.subr.bf16.mxu1 %v13566_v11 }
 0x740   :  { %12849 = vmatpush3.bf16.msra.mxu0 %v13320_v49  ;;  %v7219_v49 = vrot.slane %v7217_v56, 6 }
 0x741   :  { %12850 = vmatprep.subr.bf16.mxu0 %v13566_v11 }
 0x742   :  { %12869 = vmatpush3.bf16.msra.mxu1 %v13321_v28 }
 0x743   :  { %12870 = vmatprep.subr.bf16.mxu1 %v13566_v11 }
 0x744   :  { %12851 = vmatpush3.bf16.msra.mxu0 %v13322_v35  ;;  %v13348_v35 = vld [vmem:[%s17774_s4 + $0x7b8] sm:$0xff]  }
 0x745   :  { %12852 = vmatprep.subr.bf16.mxu0 %v13566_v11 }
 0x746   :  { %12871 = vmatpush3.bf16.msra.mxu1 %v13323_v40  ;;  %v7220_v40 = vrot.slane %v7218_v58, 5 }
 0x747   :  { %12872 = vmatprep.subr.bf16.mxu1 %v13566_v11 }
 0x748   :  { %12853 = vmatpush3.bf16.msra.mxu0 %v13324_v15  ;;  %v7330_v15 = vrot.slane %v7217_v56, 7 }
 0x749   :  { %12854 = vmatprep.subr.bf16.mxu0 %v13566_v11 }
 0x74a   :  { %12873 = vmatpush3.bf16.msra.mxu1 %v13325_v23  ;;  %v13349_v23 = vld [vmem:[%s17774_s4 + $0x7f8] sm:$0xff]  }
 0x74b   :  { %12874 = vmatprep.subr.bf16.mxu1 %v13566_v11 }
 0x74c   :  { %12855 = vmatpush3.bf16.msra.mxu0 %v13326_v20  ;;  %v7221_v20 = vsel %vm3826_vm4, %v7220_v40, %v7219_v49  ;;  %v7532_v49 = vld [vmem:[%s17775_s7 + $0x108] sm:$0xff] }
 0x74d   :  { %12856 = vmatprep.subr.bf16.mxu0 %v13566_v11 }
 0x74e   :  { %v5486_v13 = vpop.f32.mrb[4].mxu0  ;;  %12875 = vmatpush3.bf16.msra.mxu1 %v13327_v31  ;;  %v7331_v31 = vrot.slane %v7218_v58, 6  ;;  %v7527_v58 = vld [vmem:[%s17775_s7 + $0xe0] sm:$0xff] }
 0x74f   :  { %v5492_v32 = vadd.f32 %v5486_v13, %v16677_v44  ;;  %v12584_v33 = vpop.f32.mrb[5].mxu0  ;;  %12876 = vmatprep.subr.bf16.mxu1 %v13566_v11  ;;  %v13343_v44 = vld [vmem:[%s17774_s4 + $0x7e0] sm:$0xff]  }
 0x750   :  { %v5489_v3 = vpop.f32.mrb[6].mxu0  ;;  %v5597_v62 = vpop.f32.mrb[116].mxu1  ;;  %12857 = vmatpush3.bf16.msra.mxu0 %v13328_v25  ;;  %v7332_v29 = vsel %vm3826_vm4, %v7331_v31, %v7330_v15  ;;  %v7222_v25 = vpack.c.b16 %v7221_v20, %v7221_v20  ;;  %v7539_v20 = vld [vmem:[%s17775_s7 + $0x140] sm:$0xff] }
 0x751   :  { %v16750_v6 = vadd.f32 %v5597_v62, %v5492_v32  ;;  %v12585_v10 = vpop.f32.mrb[7].mxu0  ;;  %v12604_v53 = vpop.f32.mrb[117].mxu1  ;;  %12858 = vmatprep.subr.bf16.mxu0 %v13566_v11  ;;  %v7333_v24 = vpack.c.b16 %v7332_v29, %v7332_v29  ;;  %v7543_v31 = vld [vmem:[%s17775_s7 + $0x160] sm:$0xff]  ;;  %v7540_v29 = vld [vmem:[%s17775_s7 + $0x148] sm:$0xff] }
 0x752   :  { %v5600_v9 = vpop.f32.mrb[118].mxu1  ;;  %12877 = vmatpush3.bf16.msra.mxu1 %v13329_v50 }
 0x753   :  { %v12605_v4 = vpop.f32.mrb[119].mxu1  ;;  %12878 = vmatprep.subr.bf16.mxu1 %v13566_v11 }
 0x754   :  { %12859 = vmatpush3.bf16.msra.mxu0 %v13330_v48 }
 0x755   :  { %12860 = vmatprep.subr.bf16.mxu0 %v13566_v11 }
 0x756   :  { %12879 = vmatpush3.bf16.msra.mxu1 %v13331_v38 }
 0x757   :  { %12880 = vmatprep.subr.bf16.mxu1 %v13566_v11 }
 0x758   :  { %12861 = vmatpush3.bf16.msra.mxu0 %v13332_v41 }
 0x759   :  { %12886 = vmatprep.subr.bf16.mxu0 %v13566_v11 }
 0x75a   :  { %12881 = vmatpush3.bf16.msra.mxu1 %v13333_v12 }
 0x75b   :  { %12863 = vmatmul.mubr.bf16.vlgmr.msra.gmra.mrb[32].mxu0 %v6994_v45  ;;  %12906 = vmatprep.subr.bf16.mxu1 %v13566_v11  ;;  %v10924_v45 = vcombine.high %v7499_v43, %v7503_v8 }
 0x75c   :  { %12887 = vmatpush3.bf16.msra.mxu0 %v13334_v30  ;;  %12902 = vmatprep.mubr.msk.bf16.mxu0 %vm13567_vm3, %v13566_v11  ;;  %v7500_v30 = vld [vmem:[%s17775_s7 + $0x8] sm:$0xff] }
 0x75d   :  { %12883 = vmatmul.mubr.bf16.vlgmr.msra.gmra.mrb[144].mxu1 %v7105_v37  ;;  %12888 = vmatprep.subr.bf16.mxu0 %v13566_v11  ;;  %v7507_v37 = vld [vmem:[%s17775_s7 + $0x40] sm:$0xff] }
 0x75e   :  { %12907 = vmatpush3.bf16.msra.mxu1 %v13335_v63  ;;  %12922 = vmatprep.mubr.msk.bf16.mxu1 %vm13567_vm3, %v13566_v11  ;;  %v7504_v63 = vld [vmem:[%s17775_s7 + $0x28] sm:$0xff] }
 0x75f   :  { %12908 = vmatprep.subr.bf16.mxu1 %v13566_v11 }
 0x760   :  { %12889 = vmatpush3.bf16.msra.mxu0 %v13336_v51  ;;  %v7511_v51 = vld [vmem:[%s17775_s7 + $0x60] sm:$0xff] }
 0x761   :  { %12890 = vmatprep.subr.bf16.mxu0 %v13566_v11  ;;  %v10931_v56 = vcombine.low %v7507_v37, %v7511_v51 }
 0x762   :  { %12909 = vmatpush3.bf16.msra.mxu1 %v13337_v14  ;;  %v10925_v14 = vcombine.low %v7500_v30, %v7504_v63 }
 0x763   :  { %12910 = vmatprep.subr.bf16.mxu1 %v13566_v11 }
 0x764   :  { %12891 = vmatpush3.bf16.msra.mxu0 %v13338_v16  ;;  %v10926_v16 = vcombine.high %v7500_v30, %v7504_v63  ;;  %v7556_v63 = vld [vmem:[%s17775_s7 + $0x1c8] sm:$0xff] }
 0x765   :  { %12892 = vmatprep.subr.bf16.mxu0 %v13566_v11 }
 0x766   :  { %12911 = vmatpush3.bf16.msra.mxu1 %v13339_v17  ;;  %v10932_v17 = vcombine.high %v7507_v37, %v7511_v51 }
 0x767   :  { %12912 = vmatprep.subr.bf16.mxu1 %v13566_v11 }
 0x768   :  { %12893 = vmatpush3.bf16.msra.mxu0 %v13340_v54  ;;  %v7508_v54 = vld [vmem:[%s17775_s7 + $0x48] sm:$0xff] }
 0x769   :  { %12894 = vmatprep.subr.bf16.mxu0 %v13566_v11 }
 0x76a   :  { %12913 = vmatpush3.bf16.msra.mxu1 %v13341_v47  ;;  %v7512_v47 = vld [vmem:[%s17775_s7 + $0x68] sm:$0xff] }
 0x76b   :  { %12914 = vmatprep.subr.bf16.mxu1 %v13566_v11 }
 0x76c   :  { %12895 = vmatpush3.bf16.msra.mxu0 %v13342_v39  ;;  %v7515_v39 = vld [vmem:[%s17775_s7 + $0x80] sm:$0xff] }
 0x76d   :  { %12896 = vmatprep.subr.bf16.mxu0 %v13566_v11 }
 0x76e   :  { %v5713_v1 = vpop.f32.mrb[8].mxu0  ;;  %12915 = vmatpush3.bf16.msra.mxu1 %v13343_v44  ;;  %v10934_v44 = vcombine.high %v7508_v54, %v7512_v47 }
 0x76f   :  { %v5719_v61 = vadd.f32 %v5713_v1, %v16750_v6  ;;  %v12624_v18 = vpop.f32.mrb[9].mxu0  ;;  %12916 = vmatprep.subr.bf16.mxu1 %v13566_v11  ;;  %v10933_v1 = vcombine.low %v7508_v54, %v7512_v47 }
 0x770   :  { %v5716_v46 = vpop.f32.mrb[10].mxu0  ;;  %v5823_v55 = vpop.f32.mrb[120].mxu1  ;;  %12897 = vmatpush3.bf16.msra.mxu0 %v13344_v22  ;;  %v7516_v22 = vld [vmem:[%s17775_s7 + $0x88] sm:$0xff]  ;;  %v7523_v18 = vld [vmem:[%s17775_s7 + $0xc0] sm:$0xff] }
 0x771   :  { %v5829_v34 = vadd.f32 %v5823_v55, %v5719_v61  ;;  %v12625_v2 = vpop.f32.mrb[11].mxu0  ;;  %v12644_v26 = vpop.f32.mrb[121].mxu1  ;;  %12898 = vmatprep.subr.bf16.mxu0 %v13566_v11  ;;  %v10942_v61 = vcombine.high %v7516_v22, %v7520_v36  ;;  %v7524_v46 = vld [vmem:[%s17775_s7 + $0xc8] sm:$0xff] }
 0x772   :  { %v5826_v60 = vpop.f32.mrb[122].mxu1  ;;  %12917 = vmatpush3.bf16.msra.mxu1 %v13345_v27  ;;  %v10940_v27 = vcombine.high %v7515_v39, %v7519_v57  ;;  %v7528_v55 = vld [vmem:[%s17775_s7 + $0xe8] sm:$0xff]  ;;  %v10948_v2 = vcombine.high %v7523_v18, %v7527_v58 }
 0x773   :  { %v12645_v28 = vpop.f32.mrb[123].mxu1  ;;  %12918 = vmatprep.subr.bf16.mxu1 %v13566_v11  ;;  %v10950_v26 = vcombine.high %v7524_v46, %v7528_v55  ;;  %v7531_v60 = vld [vmem:[%s17775_s7 + $0x100] sm:$0xff]  ;;  %v10949_v40 = vcombine.low %v7524_v46, %v7528_v55 }
 0x774   :  { %12899 = vmatpush3.bf16.msra.mxu0 %v13346_v42  ;;  %v10939_v42 = vcombine.low %v7515_v39, %v7519_v57  ;;  %v7536_v28 = vld [vmem:[%s17775_s7 + $0x128] sm:$0xff]  ;;  %v16956_v57 = vld [vmem:[%s17775_s7 + $0x18] sm:$0xff] }
 0x775   :  { %12900 = vmatprep.subr.bf16.mxu0 %v13566_v11 }
 0x776   :  { %12919 = vmatpush3.bf16.msra.mxu1 %v13347_v59  ;;  %v7535_v59 = vld [vmem:[%s17775_s7 + $0x120] sm:$0xff] }
 0x777   :  { %12920 = vmatprep.subr.bf16.mxu1 %v13566_v11  ;;  %v10956_v15 = vcombine.high %v7531_v60, %v7535_v59 }
 0x778   :  { %12901 = vmatpush3.bf16.msra.mxu0 %v13348_v35  ;;  %v10947_v35 = vcombine.low %v7523_v18, %v7527_v58 }
 0x779   :  { %7883 = vmatprep.subr.bf16.mxu0 %v10924_v45  ;;  %v7559_v45 = vld [vmem:[%s17775_s7 + $0x1e0] sm:$0xff] }
 0x77a   :  { %12921 = vmatpush3.bf16.msra.mxu1 %v13349_v23  ;;  %v10958_v23 = vcombine.high %v7532_v49, %v7536_v28 }
 0x77b   :  { %12903 = vmatmul.mubr.bf16.vlgmr.msra.gmra.mrb[36].mxu0 %v7222_v25  ;;  %7924 = vmatprep.subr.bf16.mxu1 %v10926_v16  ;;  %v7544_v25 = vld [vmem:[%s17775_s7 + $0x168] sm:$0xff]  ;;  %v16942_v16 = vld [vmem:[%s17775_s7 + $0x10] sm:$0xff] }
 0x77c   :  { %7915 = vmatprep.mubr.bf16.mxu0 %v18189_v5  ;;  %7884 = vmatpush1.bf16.msra.mxu0 %v10923_v19  ;;  %v7555_v19 = vld [vmem:[%s17775_s7 + $0x1c0] sm:$0xff] }
 0x77d   :  { %12923 = vmatmul.mubr.bf16.vlgmr.msra.gmra.mrb[148].mxu1 %v7333_v24  ;;  %7885 = vmatprep.subr.bf16.mxu0 %v10932_v17  ;;  %v10955_v24 = vcombine.low %v7531_v60, %v7535_v59  ;;  %v10979_v37 = vcombine.low %v7555_v19, %v7559_v45  ;;  %v10980_v51 = vcombine.high %v7555_v19, %v7559_v45  ;;  %v16947_v17 = vld [vmem:[%s17775_s7 + $0x30] sm:$0xff] }
 0x77e   :  { %7956 = vmatprep.mubr.bf16.mxu1 %v18189_v5  ;;  %7925 = vmatpush1.bf16.msra.mxu1 %v10925_v14  ;;  %v7560_v14 = vld [vmem:[%s17775_s7 + $0x1e8] sm:$0xff]  ;;  %v10927_v39 = vcombine.low %v16942_v16, %v16947_v17 }
 0x77f   :  { %7926 = vmatprep.subr.bf16.mxu1 %v10934_v44  ;;  %v10981_v54 = vcombine.low %v7556_v63, %v7560_v14  ;;  %v10982_v47 = vcombine.high %v7556_v63, %v7560_v14  ;;  %v10928_v44 = vcombine.high %v16942_v16, %v16947_v17  ;;  %v7517_v63 = vld [vmem:[%s17775_s7 + $0x90] sm:$0xff]  ;;  %v7522_v14 = vld [vmem:[%s17775_s7 + $0xb8] sm:$0xff] }
 0x780   :  { %7886 = vmatpush1.bf16.msra.mxu0 %v10931_v56  ;;  %v7526_v16 = vld [vmem:[%s17775_s7 + $0xd8] sm:$0xff] }
 0x781   :  { %7887 = vmatprep.subr.bf16.mxu0 %v10940_v27  ;;  %v7530_v17 = vld [vmem:[%s17775_s7 + $0xf8] sm:$0xff] }
 0x782   :  { %7927 = vmatpush1.bf16.msra.mxu1 %v10933_v1 }
 0x783   :  { %7928 = vmatprep.subr.bf16.mxu1 %v10942_v61 }
 0x784   :  { %7888 = vmatpush1.bf16.msra.mxu0 %v10939_v42 }
 0x785   :  { %7889 = vmatprep.subr.bf16.mxu0 %v10948_v2 }
 0x788   :  { %7890 = vmatpush1.bf16.msra.mxu0 %v10947_v35 }
 0x789   :  { %7891 = vmatprep.subr.bf16.mxu0 %v10956_v15 }
 0x78c   :  { %7892 = vmatpush1.bf16.msra.mxu0 %v10955_v24 }
 0x78e   :  { %v5940_v13 = vpop.f32.mrb[12].mxu0 }
 0x78f   :  { %v5946_v50 = vadd.f32 %v5940_v13, %v5829_v34  ;;  %v12664_v32 = vpop.f32.mrb[13].mxu0  ;;  %v10941_v34 = vcombine.low %v7516_v22, %v7520_v36  ;;  %v10957_v13 = vcombine.low %v7532_v49, %v7536_v28  ;;  %v16961_v22 = vld [vmem:[%s17775_s7 + $0x38] sm:$0xff] }
 0x790   :  { %v5943_v33 = vpop.f32.mrb[14].mxu0  ;;  %v6051_v21 = vpop.f32.mrb[124].mxu1  ;;  %v10966_v32 = vcombine.high %v7540_v29, %v7544_v25  ;;  %v10929_v36 = vcombine.low %v16956_v57, %v16961_v22  ;;  %v10930_v56 = vcombine.high %v16956_v57, %v16961_v22 }
 0x791   :  { %v6057_v3 = vadd.f32 %v6051_v21, %v5946_v50  ;;  %v12665_v62 = vpop.f32.mrb[15].mxu0  ;;  %v12684_v11 = vpop.f32.mrb[125].mxu1  ;;  %7929 = vmatpush1.bf16.msra.mxu1 %v10941_v34  ;;  %v10964_v50 = vcombine.high %v7539_v20, %v7543_v31  ;;  %v10963_v33 = vcombine.low %v7539_v20, %v7543_v31  ;;  %v10965_v21 = vcombine.low %v7540_v29, %v7544_v25 }
 0x792   :  { %v6054_v48 = vpop.f32.mrb[126].mxu1  ;;  %7930 = vmatprep.subr.bf16.mxu1 %v10950_v26 }
 0x793   :  { %v12685_v6 = vpop.f32.mrb[127].mxu1  ;;  %7893 = vmatprep.subr.bf16.mxu0 %v10964_v50  ;;  %v7547_v48 = vld [vmem:[%s17775_s7 + $0x180] sm:$0xff] }
 0x794   :  { %7894 = vmatpush1.bf16.msra.mxu0 %v10963_v33  ;;  %v7551_v6 = vld [vmem:[%s17775_s7 + $0x1a0] sm:$0xff] }
 0x795   :  { %7931 = vmatpush1.bf16.msra.mxu1 %v10949_v40 }
 0x796   :  { %7932 = vmatprep.subr.bf16.mxu1 %v10958_v23 }
 0x799   :  { %7933 = vmatpush1.bf16.msra.mxu1 %v10957_v13 }
 0x79a   :  { %7934 = vmatprep.subr.bf16.mxu1 %v10966_v32 }
 0x79d   :  { %7935 = vmatpush1.bf16.msra.mxu1 %v10965_v21 }
 0x7ae   :  { %v6168_v10 = vpop.f32.mrb[16].mxu0 }
 0x7af   :  { %v6174_v53 = vadd.f32 %v6168_v10, %v6057_v3  ;;  %v12704_v9 = vpop.f32.mrb[17].mxu0  ;;  %v7548_v10 = vld [vmem:[%s17775_s7 + $0x188] sm:$0xff] }
 0x7b0   :  { %v6171_v38 = vpop.f32.mrb[18].mxu0  ;;  %v6279_v7 = vpop.f32.mrb[128].mxu1 }
 0x7b1   :  { %v16840_v4 = vadd.f32 %v6279_v7, %v6174_v53  ;;  %v12705_v41 = vpop.f32.mrb[19].mxu0  ;;  %v12724_v52 = vpop.f32.mrb[129].mxu1  ;;  %v10971_v38 = vcombine.low %v7547_v48, %v7551_v6  ;;  %v10972_v7 = vcombine.high %v7547_v48, %v7551_v6 }
 0x7b2   :  { %v6282_v0 = vpop.f32.mrb[130].mxu1 }
 0x7b3   :  { %v12725_v12 = vpop.f32.mrb[131].mxu1  ;;  %7895 = vmatprep.subr.bf16.mxu0 %v10972_v7 }
 0x7b4   :  { %7896 = vmatpush1.bf16.msra.mxu0 %v10971_v38 }
 0x7b5   :  { %7897 = vmatprep.subr.bf16.mxu0 %v10980_v51  ;;  %v7518_v51 = vld [vmem:[%s17775_s7 + $0x98] sm:$0xff] }
 0x7b6   :  { %v10945_v57 = vcombine.low %v7518_v51, %v7522_v14 }
 0x7b8   :  { %7898 = vmatpush1.bf16.msra.mxu0 %v10979_v37  ;;  %v7521_v37 = vld [vmem:[%s17775_s7 + $0xb0] sm:$0xff] }
 0x7b9   :  { %7965 = vmatprep.subr.bf16.mxu0 %v10928_v44  ;;  %v10944_v44 = vcombine.high %v7517_v63, %v7521_v37 }
 0x7ce   :  { %v6396_v3 = vpop.f32.mrb[20].mxu0 }
 0x7cf   :  { %v6402_v62 = vadd.f32 %v6396_v3, %v16840_v4  ;;  %v12744_v11 = vpop.f32.mrb[21].mxu0  ;;  %v7552_v4 = vld [vmem:[%s17775_s7 + $0x1a8] sm:$0xff] }
 0x7d0   :  { %v6399_v53 = vpop.f32.mrb[22].mxu0  ;;  %v6507_v9 = vpop.f32.mrb[132].mxu1  ;;  %v10973_v12 = vcombine.low %v7548_v10, %v7552_v4  ;;  %v10974_v43 = vcombine.high %v7548_v10, %v7552_v4  ;;  %v7509_v4 = vld [vmem:[%s17775_s7 + $0x50] sm:$0xff] }
 0x7d1   :  { %v6513_v41 = vadd.f32 %v6507_v9, %v6402_v62  ;;  %v12745_v52 = vpop.f32.mrb[23].mxu0  ;;  %v12764_v0 = vpop.f32.mrb[133].mxu1  ;;  %v10922_v53 = vld [vmem:[%s17776_s5] ss:$0 sm:$0xff] }
 0x7d2   :  { %v6510_v8 = vpop.f32.mrb[134].mxu1  ;;  %7936 = vmatprep.subr.bf16.mxu1 %v10974_v43  ;;  %v7513_v52 = vld [vmem:[%s17775_s7 + $0x70] sm:$0xff]  ;;  %v7510_v0 = vld [vmem:[%s17775_s7 + $0x58] sm:$0xff] }
 0x7d3   :  { %v12765_v30 = vpop.f32.mrb[135].mxu1  ;;  %7937 = vmatpush1.bf16.msra.mxu1 %v10973_v12  ;;  %v7514_v12 = vld [vmem:[%s17775_s7 + $0x78] sm:$0xff]  ;;  %v10936_v19 = vcombine.high %v7509_v4, %v7513_v52 }
 0x7d4   :  { %7938 = vmatprep.subr.bf16.mxu1 %v10982_v47  ;;  %v10938_v45 = vcombine.high %v7510_v0, %v7514_v12  ;;  %v10937_v47 = vcombine.low %v7510_v0, %v7514_v12  ;;  %v7442_v0 = vld [vmem:[%s17777_s6 + $0x40] sm:$0xff] }
 0x7d5   :  { %v7446_v12 = vld [vmem:[%s17777_s6 + $0x60] sm:$0xff] }
 0x7d7   :  { %7939 = vmatpush1.bf16.msra.mxu1 %v10981_v54  ;;  %v10935_v54 = vcombine.low %v7509_v4, %v7513_v52 }
 0x7d8   :  { %8006 = vmatprep.subr.bf16.mxu1 %v10930_v56  ;;  %v10946_v56 = vcombine.high %v7518_v51, %v7522_v14  ;;  %v7450_v51 = vld [vmem:[%s17777_s6 + $0x80] sm:$0xff] }
 0x7d9   :  { %v7454_v14 = vld [vmem:[%s17777_s6 + $0xa0] sm:$0xff] }
 0x7ee   :  { %v6623_v1 = vpop.f32.mrb[24].mxu0 }
 0x7ef   :  { %v6629_v27 = vadd.f32 %v6623_v1, %v6513_v41  ;;  %v12784_v61 = vpop.f32.mrb[25].mxu0  ;;  %v7525_v1 = vld [vmem:[%s17775_s7 + $0xd0] sm:$0xff] }
 0x7f0   :  { %v6626_v18 = vpop.f32.mrb[26].mxu0  ;;  %v6733_v58 = vpop.f32.mrb[136].mxu1  ;;  %v7533_v61 = vld [vmem:[%s17775_s7 + $0x110] sm:$0xff] }
 0x7f1   :  { %v6739_v46 = vadd.f32 %v6733_v58, %v6629_v27  ;;  %v12785_v55 = vpop.f32.mrb[27].mxu0  ;;  %v12804_v42 = vpop.f32.mrb[137].mxu1  ;;  %v7529_v27 = vld [vmem:[%s17775_s7 + $0xf0] sm:$0xff]  ;;  %v7534_v58 = vld [vmem:[%s17775_s7 + $0x118] sm:$0xff] }
 0x7f2   :  { %v6736_v34 = vpop.f32.mrb[138].mxu1  ;;  %v10952_v22 = vcombine.high %v7525_v1, %v7529_v27  ;;  %v7537_v18 = vld [vmem:[%s17775_s7 + $0x130] sm:$0xff]  ;;  %v10951_v55 = vcombine.low %v7525_v1, %v7529_v27  ;;  %v10953_v42 = vcombine.low %v7526_v16, %v7530_v17  ;;  %v11004_v1 = vcombine.high %v7450_v51, %v7454_v14 }
 0x7f3   :  { %v12805_v2 = vpop.f32.mrb[139].mxu1  ;;  %v10960_v34 = vcombine.high %v7533_v61, %v7537_v18 }
 0x80e   :  { %v6850_v26 = vpop.f32.mrb[28].mxu0 }
 0x80f   :  { %v6856_v60 = vadd.f32 %v6850_v26, %v6739_v46  ;;  %v12824_v59 = vpop.f32.mrb[29].mxu0  ;;  %v7538_v46 = vld [vmem:[%s17775_s7 + $0x138] sm:$0xff]  ;;  %v7541_v26 = vld [vmem:[%s17775_s7 + $0x150] sm:$0xff] }
 0x810   :  { %v6853_v49 = vpop.f32.mrb[30].mxu0  ;;  %v6961_v28 = vpop.f32.mrb[140].mxu1  ;;  %v10962_v2 = vcombine.high %v7534_v58, %v7538_v46  ;;  %v7542_v59 = vld [vmem:[%s17775_s7 + $0x158] sm:$0xff] }
 0x811   :  { %v6967_v35 = vadd.f32 %v6961_v28, %v6856_v60  ;;  %v12825_v40 = vpop.f32.mrb[31].mxu0  ;;  %v12844_v15 = vpop.f32.mrb[141].mxu1  ;;  %v7545_v60 = vld [vmem:[%s17775_s7 + $0x170] sm:$0xff]  ;;  %v7546_v49 = vld [vmem:[%s17775_s7 + $0x178] sm:$0xff]  ;;  %v10959_v28 = vcombine.low %v7533_v61, %v7537_v18  ;;  %v7466_v18 = vld [vmem:[%s17777_s6 + $0x100] sm:$0xff] }
 0x812   :  { %v6964_v23 = vpop.f32.mrb[142].mxu1  ;;  %v10968_v40 = vcombine.high %v7541_v26, %v7545_v60  ;;  %v10970_v15 = vcombine.high %v7542_v59, %v7546_v49 }
 0x813   :  { %v12845_v20 = vpop.f32.mrb[143].mxu1  ;;  %v7549_v23 = vld [vmem:[%s17775_s7 + $0x190] sm:$0xff] }
 0x814   :  { %v7553_v20 = vld [vmem:[%s17775_s7 + $0x1b0] sm:$0xff] }
 0x82e   :  { %v7078_v31 = vpop.f32.mrb[32].mxu0 }
 0x82f   :  { %v7084_v29 = vadd.f32 %v7078_v31, %v6967_v35  ;;  %v12864_v25 = vpop.f32.mrb[33].mxu0  ;;  %v10961_v35 = vcombine.low %v7534_v58, %v7538_v46  ;;  %v7550_v31 = vld [vmem:[%s17775_s7 + $0x198] sm:$0xff]  ;;  %v7470_v58 = vld [vmem:[%s17777_s6 + $0x120] sm:$0xff]  ;;  %v7467_v46 = vld [vmem:[%s17777_s6 + $0x108] sm:$0xff] }
 0x830   :  { %v7081_v24 = vpop.f32.mrb[34].mxu0  ;;  %v7189_v13 = vpop.f32.mrb[144].mxu1  ;;  %v10967_v25 = vcombine.low %v7541_v26, %v7545_v60  ;;  %v7474_v60 = vld [vmem:[%s17777_s6 + $0x140] sm:$0xff] }
 0x831   :  { %v7195_v50 = vadd.f32 %v7189_v13, %v7084_v29  ;;  %v12865_v32 = vpop.f32.mrb[35].mxu0  ;;  %v12884_v33 = vpop.f32.mrb[145].mxu1  ;;  %v7554_v29 = vld [vmem:[%s17775_s7 + $0x1b8] sm:$0xff]  ;;  %v10969_v24 = vcombine.low %v7542_v59, %v7546_v49  ;;  %v10976_v13 = vcombine.high %v7549_v23, %v7553_v20  ;;  %v7478_v59 = vld [vmem:[%s17777_s6 + $0x160] sm:$0xff]  ;;  %v7475_v49 = vld [vmem:[%s17777_s6 + $0x148] sm:$0xff] }
 0x832   :  { %v7192_v21 = vpop.f32.mrb[146].mxu1  ;;  %v7557_v32 = vld [vmem:[%s17775_s7 + $0x1d0] sm:$0xff] }
 0x833   :  { %v12885_v3 = vpop.f32.mrb[147].mxu1  ;;  %v7561_v33 = vld [vmem:[%s17775_s7 + $0x1f0] sm:$0xff]  ;;  %v7558_v21 = vld [vmem:[%s17775_s7 + $0x1d8] sm:$0xff] }
 0x834   :  { %v7562_v3 = vld [vmem:[%s17775_s7 + $0x1f8] sm:$0xff] }
 0x835   :  { %v10985_v4 = vcombine.low %v7558_v21, %v7562_v3 }
 0x84e   :  { %v7306_v62 = vpop.f32.mrb[36].mxu0 }
 0x84f   :  { %v7312_v11 = vadd.f32 %v7306_v62, %v7195_v50  ;;  %v12904_v48 = vpop.f32.mrb[37].mxu0  ;;  %v10978_v50 = vcombine.high %v7550_v31, %v7554_v29  ;;  %v10975_v62 = vcombine.low %v7549_v23, %v7553_v20  ;;  %v7482_v20 = vld [vmem:[%s17777_s6 + $0x180] sm:$0xff] }
 0x850   :  { %v7309_v6 = vpop.f32.mrb[38].mxu0  ;;  %v7417_v10 = vpop.f32.mrb[148].mxu1  ;;  %v10984_v48 = vcombine.high %v7557_v32, %v7561_v33 }
 0x851   :  { %v7423_v9 = vadd.f32 %v7417_v10, %v7312_v11  ;;  %v12905_v38 = vpop.f32.mrb[39].mxu0  ;;  %v12924_v7 = vpop.f32.mrb[149].mxu1  ;;  %v10977_v11 = vcombine.low %v7550_v31, %v7554_v29  ;;  %v10986_v6 = vcombine.high %v7558_v21, %v7562_v3  ;;  %v7434_v10 = vld [vmem:[%s17777_s6] sm:$0xff]  ;;  %v7483_v29 = vld [vmem:[%s17777_s6 + $0x188] sm:$0xff] }
 0x852   :  { %v7420_v41 = vpop.f32.mrb[150].mxu1  ;;  %v7439_v38 = vld [vmem:[%s17777_s6 + $0x28] sm:$0xff]  ;;  %v10983_v7 = vcombine.low %v7557_v32, %v7561_v33  ;;  %v7486_v31 = vld [vmem:[%s17777_s6 + $0x1a0] sm:$0xff] }
 0x853   :  { %v7431_v43 = vadd.f32 %v10922_v53, %v7423_v9  ;;  %v12925_v8 = vpop.f32.mrb[151].mxu1  ;;  %v7438_v53 = vld [vmem:[%s17777_s6 + $0x20] sm:$0xff]  ;;  %v7435_v9 = vld [vmem:[%s17777_s6 + $0x8] sm:$0xff] }
 0x854   :  { %v10988_v41 = vcombine.high %v7434_v10, %v7438_v53  ;;  %v10990_v52 = vcombine.high %v7435_v9, %v7439_v38  ;;  %v7447_v8 = vld [vmem:[%s17777_s6 + $0x68] sm:$0xff]  ;;  %v7490_v33 = vld [vmem:[%s17777_s6 + $0x1c0] sm:$0xff] }
 0x855   :  { %v16982_v30 = vpack.c.bf16 %v7431_v43, %v7431_v43  ;;  %v7443_v43 = vld [vmem:[%s17777_s6 + $0x48] sm:$0xff]  ;;  %v7494_v21 = vld [vmem:[%s17777_s6 + $0x1e0] sm:$0xff] }
 0x856   :  { %v7491_v3 = vld [vmem:[%s17777_s6 + $0x1c8] sm:$0xff] }
 0x857   :  { %7916 = vmatmul.mubr.bf16.vlgmr.msra.gmra.mrb[40].mxu0 %v16982_v30  ;;  %7957 = vmatmul.mubr.bf16.vlgmr.msra.gmra.mrb[152].mxu1 %v16982_v30 }
 0x858   :  { %7966 = vmatpush1.bf16.msra.mxu0 %v10927_v39  ;;  %8007 = vmatpush1.bf16.msra.mxu1 %v10929_v36  ;;  %v10943_v39 = vcombine.low %v7517_v63, %v7521_v37  ;;  %v10954_v36 = vcombine.high %v7526_v16, %v7530_v17  ;;  %v10996_v63 = vcombine.high %v7442_v0, %v7446_v12  ;;  %v7458_v16 = vld [vmem:[%s17777_s6 + $0xc0] sm:$0xff] }
 0x859   :  { %7967 = vmatprep.subr.bf16.mxu0 %v10936_v19  ;;  %8008 = vmatprep.subr.bf16.mxu1 %v10938_v45  ;;  %v10987_v19 = vcombine.low %v7434_v10, %v7438_v53  ;;  %v10989_v45 = vcombine.low %v7435_v9, %v7439_v38  ;;  %v10998_v37 = vcombine.high %v7443_v43, %v7447_v8  ;;  %v7462_v17 = vld [vmem:[%s17777_s6 + $0xe0] sm:$0xff]  ;;  %v7436_v53 = vld [vmem:[%s17777_s6 + $0x10] sm:$0xff]  ;;  %v7437_v38 = vld [vmem:[%s17777_s6 + $0x18] sm:$0xff] }
 0x85a   :  { %7997 = vmatprep.mubr.bf16.mxu0 %v18189_v5  ;;  %8038 = vmatprep.mubr.bf16.mxu1 %v18189_v5  ;;  %v7440_v9 = vld [vmem:[%s17777_s6 + $0x30] sm:$0xff] }
 0x85c   :  { %7968 = vmatpush1.bf16.msra.mxu0 %v10935_v54  ;;  %8009 = vmatpush1.bf16.msra.mxu1 %v10937_v47  ;;  %v7451_v54 = vld [vmem:[%s17777_s6 + $0x88] sm:$0xff] }
 0x85d   :  { %7969 = vmatprep.subr.bf16.mxu0 %v10944_v44  ;;  %8010 = vmatprep.subr.bf16.mxu1 %v10946_v56  ;;  %v7455_v47 = vld [vmem:[%s17777_s6 + $0xa8] sm:$0xff]  ;;  %v10995_v44 = vcombine.low %v7442_v0, %v7446_v12  ;;  %v10997_v56 = vcombine.low %v7443_v43, %v7447_v8  ;;  %v10992_v0 = vcombine.high %v7436_v53, %v7440_v9  ;;  %v7444_v43 = vld [vmem:[%s17777_s6 + $0x50] sm:$0xff] }
 0x85e   :  { %v11006_v27 = vcombine.high %v7451_v54, %v7455_v47  ;;  %v7448_v8 = vld [vmem:[%s17777_s6 + $0x70] sm:$0xff] }
 0x860   :  { %7970 = vmatpush1.bf16.msra.mxu0 %v10943_v39  ;;  %8011 = vmatpush1.bf16.msra.mxu1 %v10945_v57  ;;  %v7463_v39 = vld [vmem:[%s17777_s6 + $0xe8] sm:$0xff]  ;;  %v11003_v57 = vcombine.low %v7450_v51, %v7454_v14  ;;  %v11000_v14 = vcombine.high %v7444_v43, %v7448_v8 }
 0x861   :  { %7971 = vmatprep.subr.bf16.mxu0 %v10952_v22  ;;  %8012 = vmatprep.subr.bf16.mxu1 %v10954_v36  ;;  %v11005_v22 = vcombine.low %v7451_v54, %v7455_v47  ;;  %v11012_v36 = vcombine.high %v7458_v16, %v7462_v17  ;;  %v7452_v47 = vld [vmem:[%s17777_s6 + $0x90] sm:$0xff] }
 0x864   :  { %7972 = vmatpush1.bf16.msra.mxu0 %v10951_v55  ;;  %8013 = vmatpush1.bf16.msra.mxu1 %v10953_v42  ;;  %v7471_v55 = vld [vmem:[%s17777_s6 + $0x128] sm:$0xff]  ;;  %v11011_v42 = vcombine.low %v7458_v16, %v7462_v17 }
 0x865   :  { %7973 = vmatprep.subr.bf16.mxu0 %v10960_v34  ;;  %8014 = vmatprep.subr.bf16.mxu1 %v10962_v2  ;;  %v11020_v2 = vcombine.high %v7466_v18, %v7470_v58  ;;  %v11022_v26 = vcombine.high %v7467_v46, %v7471_v55 }
 0x868   :  { %7974 = vmatpush1.bf16.msra.mxu0 %v10959_v28  ;;  %8015 = vmatpush1.bf16.msra.mxu1 %v10961_v35  ;;  %v7479_v28 = vld [vmem:[%s17777_s6 + $0x168] sm:$0xff]  ;;  %v11019_v35 = vcombine.low %v7466_v18, %v7470_v58 }
 0x869   :  { %7975 = vmatprep.subr.bf16.mxu0 %v10968_v40  ;;  %8016 = vmatprep.subr.bf16.mxu1 %v10970_v15  ;;  %v11021_v40 = vcombine.low %v7467_v46, %v7471_v55  ;;  %v11028_v15 = vcombine.high %v7474_v60, %v7478_v59  ;;  %v11030_v23 = vcombine.high %v7475_v49, %v7479_v28  ;;  %v7468_v55 = vld [vmem:[%s17777_s6 + $0x110] sm:$0xff] }
 0x86c   :  { %7976 = vmatpush1.bf16.msra.mxu0 %v10967_v25  ;;  %8017 = vmatpush1.bf16.msra.mxu1 %v10969_v24  ;;  %v7487_v25 = vld [vmem:[%s17777_s6 + $0x1a8] sm:$0xff]  ;;  %v11027_v24 = vcombine.low %v7474_v60, %v7478_v59 }
 0x86d   :  { %7977 = vmatprep.subr.bf16.mxu0 %v10976_v13  ;;  %8018 = vmatprep.subr.bf16.mxu1 %v10978_v50  ;;  %v11029_v13 = vcombine.low %v7475_v49, %v7479_v28  ;;  %v11036_v50 = vcombine.high %v7482_v20, %v7486_v31  ;;  %v11038_v32 = vcombine.high %v7483_v29, %v7487_v25  ;;  %v7476_v49 = vld [vmem:[%s17777_s6 + $0x150] sm:$0xff] }
 0x86e   :  { %v7480_v28 = vld [vmem:[%s17777_s6 + $0x170] sm:$0xff] }
 0x870   :  { %7978 = vmatpush1.bf16.msra.mxu0 %v10975_v62  ;;  %8019 = vmatpush1.bf16.msra.mxu1 %v10977_v11  ;;  %v7495_v62 = vld [vmem:[%s17777_s6 + $0x1e8] sm:$0xff]  ;;  %v11035_v11 = vcombine.low %v7482_v20, %v7486_v31  ;;  %v11032_v20 = vcombine.high %v7476_v49, %v7480_v28 }
 0x871   :  { %7979 = vmatprep.subr.bf16.mxu0 %v10984_v48  ;;  %8020 = vmatprep.subr.bf16.mxu1 %v10986_v6  ;;  %v11037_v48 = vcombine.low %v7483_v29, %v7487_v25  ;;  %v11044_v6 = vcombine.high %v7490_v33, %v7494_v21  ;;  %v11046_v10 = vcombine.high %v7491_v3, %v7495_v62  ;;  %v7484_v29 = vld [vmem:[%s17777_s6 + $0x190] sm:$0xff] }
 0x872   :  { %v7488_v25 = vld [vmem:[%s17777_s6 + $0x1b0] sm:$0xff] }
 0x874   :  { %7980 = vmatpush1.bf16.msra.mxu0 %v10983_v7  ;;  %8021 = vmatpush1.bf16.msra.mxu1 %v10985_v4  ;;  %v7441_v7 = vld [vmem:[%s17777_s6 + $0x38] sm:$0xff]  ;;  %v11043_v4 = vcombine.low %v7490_v33, %v7494_v21  ;;  %v11040_v33 = vcombine.high %v7484_v29, %v7488_v25 }
 0x875   :  { %8367 = vmatprep.subr.bf16.mxu0 %v10988_v41  ;;  %8408 = vmatprep.subr.bf16.mxu1 %v10990_v52  ;;  %v11045_v41 = vcombine.low %v7491_v3, %v7495_v62  ;;  %v7432_v52 = vld [vmem:[%s17778_s1] sm:$0x3]  ;;  %v10994_v12 = vcombine.high %v7437_v38, %v7441_v7  ;;  %v10993_v51 = vcombine.low %v7437_v38, %v7441_v7  ;;  %v7492_v3 = vld [vmem:[%s17777_s6 + $0x1d0] sm:$0xff] }
 0x876   :  { %v7496_v62 = vld [vmem:[%s17777_s6 + $0x1f0] sm:$0xff] }
 0x877   :  { %7998 = vmatmul.mubr.bf16.vlgmr.msra.gmra.mrb[44].mxu0 %v16982_v30  ;;  %8039 = vmatmul.mubr.bf16.vlgmr.msra.gmra.mrb[156].mxu1 %v16982_v30  ;;  %v7459_v30 = vld [vmem:[%s17777_s6 + $0xc8] sm:$0xff]  ;;  %v11047_v38 = vcombine.low %v7492_v3, %v7496_v62 }
 0x878   :  { %8368 = vmatpush1.bf16.msra.mxu0 %v10987_v19  ;;  %8409 = vmatpush1.bf16.msra.mxu1 %v10989_v45  ;;  %v11014_v61 = vcombine.high %v7459_v30, %v7463_v39  ;;  %v11013_v34 = vcombine.low %v7459_v30, %v7463_v39  ;;  %v7445_v19 = vld [vmem:[%s17777_s6 + $0x58] sm:$0xff]  ;;  %v7460_v39 = vld [vmem:[%s17777_s6 + $0xd0] sm:$0xff] }
 0x879   :  { %8369 = vmatprep.subr.bf16.mxu0 %v10996_v63  ;;  %8410 = vmatprep.subr.bf16.mxu1 %v10998_v37  ;;  %v7449_v45 = vld [vmem:[%s17777_s6 + $0x78] sm:$0xff]  ;;  %v17193_v63 = vpack.c.bf16 %v7432_v52, %v7432_v52  ;;  %v10991_v37 = vcombine.low %v7436_v53, %v7440_v9  ;;  %v11048_v53 = vcombine.high %v7492_v3, %v7496_v62 }
 0x87a   :  { %8399 = vmatprep.mubr.bf16.mxu0 %v18189_v5  ;;  %8440 = vmatprep.mubr.bf16.mxu1 %v18189_v5  ;;  %v11002_v54 = vcombine.high %v7445_v19, %v7449_v45  ;;  %v11001_v16 = vcombine.low %v7445_v19, %v7449_v45  ;;  %v13355_v52 = vld [vmem:[%s17779_s9 + $0x14] ss:$8 sps:$4 sm:$0xff]   ;;  %v13359_v19 = vld [vmem:[%s17779_s9 + $0x30] ss:$8 sps:$4 sm:$0xff]   ;;  %v13364_v45 = vld [vmem:[%s17779_s9 + $0x44] ss:$8 sps:$4 sm:$0xff]  }
 0x87c   :  { %8370 = vmatpush1.bf16.msra.mxu0 %v10995_v44  ;;  %8411 = vmatpush1.bf16.msra.mxu1 %v10997_v56  ;;  %v7456_v44 = vld [vmem:[%s17777_s6 + $0xb0] sm:$0xff]  ;;  %v7453_v56 = vld [vmem:[%s17777_s6 + $0x98] sm:$0xff] }
 0x87d   :  { %8371 = vmatprep.subr.bf16.mxu0 %v11004_v1  ;;  %8412 = vmatprep.subr.bf16.mxu1 %v11006_v27  ;;  %v7457_v1 = vld [vmem:[%s17777_s6 + $0xb8] sm:$0xff]  ;;  %v10999_v27 = vcombine.low %v7444_v43, %v7448_v8  ;;  %v11008_v17 = vcombine.high %v7452_v47, %v7456_v44  ;;  %v13356_v43 = vld [vmem:[%s17779_s9 + $0x20] ss:$8 sps:$4 sm:$0xff]  }
 0x87e   :  { %v11010_v30 = vcombine.high %v7453_v56, %v7457_v1  ;;  %v11009_v18 = vcombine.low %v7453_v56, %v7457_v1  ;;  %v13361_v8 = vld [vmem:[%s17779_s9 + $0x34] ss:$8 sps:$4 sm:$0xff]   ;;  %v13376_v56 = vld [vmem:[%s17779_s9 + $0x84] ss:$8 sps:$4 sm:$0xff]   ;;  %v13374_v1 = vld [vmem:[%s17779_s9 + $0x80] ss:$8 sps:$4 sm:$0xff]  }
 0x880   :  { %8372 = vmatpush1.bf16.msra.mxu0 %v11003_v57  ;;  %8413 = vmatpush1.bf16.msra.mxu1 %v11005_v22  ;;  %v7464_v57 = vld [vmem:[%s17777_s6 + $0xf0] sm:$0xff]  ;;  %v7461_v22 = vld [vmem:[%s17777_s6 + $0xd8] sm:$0xff] }
 0x881   :  { %8373 = vmatprep.subr.bf16.mxu0 %v11012_v36  ;;  %8414 = vmatprep.subr.bf16.mxu1 %v11014_v61  ;;  %v7465_v36 = vld [vmem:[%s17777_s6 + $0xf8] sm:$0xff]  ;;  %v11007_v61 = vcombine.low %v7452_v47, %v7456_v44  ;;  %v11016_v58 = vcombine.high %v7460_v39, %v7464_v57 }
 0x882   :  { %v11018_v46 = vcombine.high %v7461_v22, %v7465_v36  ;;  %v13373_v47 = vld [vmem:[%s17779_s9 + $0x74] ss:$8 sps:$4 sm:$0xff]   ;;  %v13371_v44 = vld [vmem:[%s17779_s9 + $0x70] ss:$8 sps:$4 sm:$0xff]  }
 0x884   :  { %8374 = vmatpush1.bf16.msra.mxu0 %v11011_v42  ;;  %8415 = vmatpush1.bf16.msra.mxu1 %v11013_v34  ;;  %v7472_v42 = vld [vmem:[%s17777_s6 + $0x130] sm:$0xff]  ;;  %v7473_v34 = vld [vmem:[%s17777_s6 + $0x138] sm:$0xff] }
 0x885   :  { %8375 = vmatprep.subr.bf16.mxu0 %v11020_v2  ;;  %8416 = vmatprep.subr.bf16.mxu1 %v11022_v26  ;;  %v11015_v2 = vcombine.low %v7460_v39, %v7464_v57  ;;  %v11017_v26 = vcombine.low %v7461_v22, %v7465_v36  ;;  %v11024_v60 = vcombine.high %v7468_v55, %v7472_v42  ;;  %v13385_v39 = vld [vmem:[%s17779_s9 + $0xb4] ss:$8 sps:$4 sm:$0xff]   ;;  %v13383_v57 = vld [vmem:[%s17779_s9 + $0xb0] ss:$8 sps:$4 sm:$0xff]   ;;  %v13388_v22 = vld [vmem:[%s17779_s9 + $0xc4] ss:$8 sps:$4 sm:$0xff]  }
 0x886   :  { %v13386_v36 = vld [vmem:[%s17779_s9 + $0xc0] ss:$8 sps:$4 sm:$0xff]  }
 0x888   :  { %8376 = vmatpush1.bf16.msra.mxu0 %v11019_v35  ;;  %8417 = vmatpush1.bf16.msra.mxu1 %v11021_v40  ;;  %v7477_v35 = vld [vmem:[%s17777_s6 + $0x158] sm:$0xff] }
 0x889   :  { %8377 = vmatprep.subr.bf16.mxu0 %v11028_v15  ;;  %8418 = vmatprep.subr.bf16.mxu1 %v11030_v23  ;;  %v7481_v40 = vld [vmem:[%s17777_s6 + $0x178] sm:$0xff]  ;;  %v11023_v15 = vcombine.low %v7468_v55, %v7472_v42  ;;  %v8531_v55 = vld [vmem:[%s17780_s8] sm:$0xff] }
 0x88a   :  { %v11034_v31 = vcombine.high %v7477_v35, %v7481_v40 }
 0x88c   :  { %8378 = vmatpush1.bf16.msra.mxu0 %v11027_v24  ;;  %8419 = vmatpush1.bf16.msra.mxu1 %v11029_v13  ;;  %v7485_v24 = vld [vmem:[%s17777_s6 + $0x198] sm:$0xff] }
 0x88d   :  { %8379 = vmatprep.subr.bf16.mxu0 %v11036_v50  ;;  %8420 = vmatprep.subr.bf16.mxu1 %v11038_v32  ;;  %v7489_v13 = vld [vmem:[%s17777_s6 + $0x1b8] sm:$0xff]  ;;  %v11031_v50 = vcombine.low %v7476_v49, %v7480_v28  ;;  %v11033_v32 = vcombine.low %v7477_v35, %v7481_v40 }
 0x88e   :  { %v11042_v21 = vcombine.high %v7485_v24, %v7489_v13 }
 0x890   :  { %8380 = vmatpush1.bf16.msra.mxu0 %v11035_v11  ;;  %8421 = vmatpush1.bf16.msra.mxu1 %v11037_v48  ;;  %v7493_v11 = vld [vmem:[%s17777_s6 + $0x1d8] sm:$0xff] }
 0x891   :  { %8381 = vmatprep.subr.bf16.mxu0 %v11044_v6  ;;  %8422 = vmatprep.subr.bf16.mxu1 %v11046_v10  ;;  %v7497_v48 = vld [vmem:[%s17777_s6 + $0x1f8] sm:$0xff]  ;;  %v11039_v6 = vcombine.low %v7484_v29, %v7488_v25  ;;  %v11041_v10 = vcombine.low %v7485_v24, %v7489_v13 }
 0x892   :  { %v11050_v9 = vcombine.high %v7493_v11, %v7497_v48  ;;  %v11049_v7 = vcombine.low %v7493_v11, %v7497_v48 }
 0x894   :  { %8382 = vmatpush1.bf16.msra.mxu0 %v11043_v4  ;;  %8423 = vmatpush1.bf16.msra.mxu1 %v11045_v41  ;;  %v13352_v4 = vld [vmem:[%s17779_s9 + $0x4] ss:$8 sps:$4 sm:$0xff]   ;;  %v13350_v41 = vld [vmem:[%s17779_s9] ss:$8 sps:$4 sm:$0xff]  }
 0x895   :  { %8449 = vmatprep.subr.bf16.mxu0 %v10992_v0  ;;  %8490 = vmatprep.subr.bf16.mxu1 %v10994_v12  ;;  %v13353_v0 = vld [vmem:[%s17779_s9 + $0x10] ss:$8 sps:$4 sm:$0xff]   ;;  %v13358_v12 = vld [vmem:[%s17779_s9 + $0x24] ss:$8 sps:$4 sm:$0xff]  }
 0x897   :  { %8400 = vmatmul.mubr.bf16.vlgmr.msra.gmra.mrb[48].mxu0 %v17193_v63  ;;  %8441 = vmatmul.mubr.bf16.vlgmr.msra.gmra.mrb[160].mxu1 %v17193_v63 }
 0x898   :  { %8450 = vmatpush1.bf16.msra.mxu0 %v10991_v37  ;;  %8491 = vmatpush1.bf16.msra.mxu1 %v10993_v51  ;;  %v13367_v37 = vld [vmem:[%s17779_s9 + $0x54] ss:$8 sps:$4 sm:$0xff]   ;;  %v13365_v51 = vld [vmem:[%s17779_s9 + $0x50] ss:$8 sps:$4 sm:$0xff]  }
 0x899   :  { %8451 = vmatprep.subr.bf16.mxu0 %v11000_v14  ;;  %8492 = vmatprep.subr.bf16.mxu1 %v11002_v54  ;;  %v13368_v14 = vld [vmem:[%s17779_s9 + $0x60] ss:$8 sps:$4 sm:$0xff]   ;;  %v13370_v54 = vld [vmem:[%s17779_s9 + $0x64] ss:$8 sps:$4 sm:$0xff]  }
 0x89a   :  { %8481 = vmatprep.mubr.bf16.mxu0 %v18189_v5  ;;  %8522 = vmatprep.mubr.bf16.mxu1 %v18189_v5  ;;  %v7469_v5 = vld [vmem:[%s17777_s6 + $0x118] sm:$0xff] }
 0x89b   :  { %v11026_v59 = vcombine.high %v7469_v5, %v7473_v34  ;;  %v11025_v23 = vcombine.low %v7469_v5, %v7473_v34  ;;  %v13392_v5 = vld [vmem:[%s17779_s9 + $0xe0] ss:$8 sps:$4 sm:$0xff]   ;;  %v13394_v34 = vld [vmem:[%s17779_s9 + $0xe4] ss:$8 sps:$4 sm:$0xff]  }
 0x89c   :  { %8452 = vmatpush1.bf16.msra.mxu0 %v10999_v27  ;;  %8493 = vmatpush1.bf16.msra.mxu1 %v11001_v16  ;;  %v13379_v27 = vld [vmem:[%s17779_s9 + $0x94] ss:$8 sps:$4 sm:$0xff]   ;;  %v13377_v16 = vld [vmem:[%s17779_s9 + $0x90] ss:$8 sps:$4 sm:$0xff]  }
 0x89d   :  { %8453 = vmatprep.subr.bf16.mxu0 %v11008_v17  ;;  %8494 = vmatprep.subr.bf16.mxu1 %v11010_v30  ;;  %v13382_v17 = vld [vmem:[%s17779_s9 + $0xa4] ss:$8 sps:$4 sm:$0xff]   ;;  %v13380_v30 = vld [vmem:[%s17779_s9 + $0xa0] ss:$8 sps:$4 sm:$0xff]  }
 0x8a0   :  { %8454 = vmatpush1.bf16.msra.mxu0 %v11007_v61  ;;  %8495 = vmatpush1.bf16.msra.mxu1 %v11009_v18  ;;  %v13391_v61 = vld [vmem:[%s17779_s9 + $0xd4] ss:$8 sps:$4 sm:$0xff]   ;;  %v13389_v18 = vld [vmem:[%s17779_s9 + $0xd0] ss:$8 sps:$4 sm:$0xff]  }
 0x8a1   :  { %8455 = vmatprep.subr.bf16.mxu0 %v11016_v58  ;;  %8496 = vmatprep.subr.bf16.mxu1 %v11018_v46  ;;  %v8533_v58 = vlaneseq }
 0x8a3   :  { %v17357_v46 = vshrl.u32 %v8533_v58, 7  ;;  %v13401_v58 = vld [vmem:[%s17779_s9 + $0x110] ss:$8 sps:$4 sm:$0xff]  }
 0x8a4   :  { %8456 = vmatpush1.bf16.msra.mxu0 %v11015_v2  ;;  %8497 = vmatpush1.bf16.msra.mxu1 %v11017_v26  ;;  %v13397_v26 = vld [vmem:[%s17779_s9 + $0xf4] ss:$8 sps:$4 sm:$0xff]  }
 0x8a5   :  { %8457 = vmatprep.subr.bf16.mxu0 %v11024_v60  ;;  %8498 = vmatprep.subr.bf16.mxu1 %v11026_v59  ;;  %v8543_v42 = vsub.s32 2, %v17357_v46  ;;  %v13395_v60 = vld [vmem:[%s17779_s9 + $0xf0] ss:$8 sps:$4 sm:$0xff]   ;;  %v13400_v59 = vld [vmem:[%s17779_s9 + $0x104] ss:$8 sps:$4 sm:$0xff]   ;;  %v8551_v49 = vsub.s32 4, %v17357_v46 }
 0x8a6   :  { %v8559_v35 = vsub.s32 6, %v17357_v46  ;;  %v8555_v40 = vsub.s32 5, %v17357_v46 }
 0x8a7   :  { %v8544_v2 = vrot.slane %v8531_v55, %v8543_v42  ;;  %v17379_v28 = vrot.slane %v8531_v55, %v8551_v49  ;;  %v13404_v42 = vld [vmem:[%s17779_s9 + $0x120] ss:$8 sps:$4 sm:$0xff]   ;;  %v13418_v49 = vld [vmem:[%s17779_s9 + $0x164] ss:$8 sps:$4 sm:$0xff]  }
 0x8a8   :  { %8458 = vmatpush1.bf16.msra.mxu0 %v11023_v15  ;;  %8499 = vmatpush1.bf16.msra.mxu1 %v11025_v23  ;;  %v8563_v15 = vsub.s32 7, %v17357_v46  ;;  %v17384_v23 = vrot.slane %v8531_v55, %v8559_v35 }
 0x8a9   :  { %8459 = vmatprep.subr.bf16.mxu0 %v11032_v20  ;;  %8500 = vmatprep.subr.bf16.mxu1 %v11034_v31  ;;  %v17386_v20 = vrot.slane %v8531_v55, %v8555_v40 }
 0x8aa   :  { %v17388_v31 = vrot.slane %v8531_v55, %v8563_v15  ;;  %v13416_v15 = vld [vmem:[%s17779_s9 + $0x160] ss:$8 sps:$4 sm:$0xff]  }
 0x8ac   :  { %8460 = vmatpush1.bf16.msra.mxu0 %v11031_v50  ;;  %8501 = vmatpush1.bf16.msra.mxu1 %v11033_v32 }
 0x8ad   :  { %8461 = vmatprep.subr.bf16.mxu0 %v11040_v33  ;;  %8502 = vmatprep.subr.bf16.mxu1 %v11042_v21 }
 0x8b0   :  { %8462 = vmatpush1.bf16.msra.mxu0 %v11039_v6  ;;  %8503 = vmatpush1.bf16.msra.mxu1 %v11041_v10 }
 0x8b1   :  { %8463 = vmatprep.subr.bf16.mxu0 %v11048_v53  ;;  %8504 = vmatprep.subr.bf16.mxu1 %v11050_v9 }
 0x8b4   :  { %8464 = vmatpush1.bf16.msra.mxu0 %v11047_v38  ;;  %8505 = vmatpush1.bf16.msra.mxu1 %v11049_v7  ;;  %v8535_v38 = vsub.s32 0, %v17357_v46  ;;  %v8539_v7 = vsub.s32 1, %v17357_v46 }
 0x8b5   :  { %9377 = vmatprep.subr.bf16.mxu0 %v13352_v4  ;;  %v8547_v4 = vsub.s32 3, %v17357_v46 }
 0x8b7   :  { %8482 = vmatmul.mubr.bf16.vlgmr.msra.gmra.mrb[52].mxu0 %v17193_v63  ;;  %8523 = vmatmul.mubr.bf16.vlgmr.msra.gmra.mrb[164].mxu1 %v17193_v63  ;;  %v13362_v63 = vld [vmem:[%s17779_s9 + $0x40] ss:$8 sps:$4 sm:$0xff]  }
 0x8b8   :  { %9378 = vmatpush1.bf16.msra.mxu0 %v13350_v41  ;;  %v8536_v41 = vrot.slane %v8531_v55, %v8535_v38 }
 0x8b9   :  { %9379 = vmatprep.subr.bf16.mxu0 %v13355_v52 }
 0x8bc   :  { %9380 = vmatpush1.bf16.msra.mxu0 %v13353_v0 }
 0x8bd   :  { %9381 = vmatprep.subr.bf16.mxu0 %v13358_v12  ;;  %v8540_v12 = vrot.slane %v8531_v55, %v8539_v7 }
 0x8c0   :  { %9382 = vmatpush1.bf16.msra.mxu0 %v13356_v43  ;;  %v8548_v43 = vrot.slane %v8531_v55, %v8547_v4  ;;  %v13406_v55 = vld [vmem:[%s17779_s9 + $0x124] ss:$8 sps:$4 sm:$0xff]  }
 0x8c1   :  { %9383 = vmatprep.subr.bf16.mxu0 %v13361_v8 }
 0x8c4   :  { %9384 = vmatpush1.bf16.msra.mxu0 %v13359_v19 }
 0x8c5   :  { %9385 = vmatprep.subr.bf16.mxu0 %v13364_v45 }
 0x8c8   :  { %9386 = vmatpush1.bf16.msra.mxu0 %v13362_v63 }
 0x8c9   :  { %9387 = vmatprep.subr.bf16.mxu0 %v13367_v37 }
 0x8cc   :  { %9388 = vmatpush1.bf16.msra.mxu0 %v13365_v51 }
 0x8cd   :  { %9389 = vmatprep.subr.bf16.mxu0 %v13370_v54 }
 0x8d0   :  { %9390 = vmatpush1.bf16.msra.mxu0 %v13368_v14 }
 0x8d1   :  { %9391 = vmatprep.subr.bf16.mxu0 %v13373_v47 }
 0x8d4   :  { %9392 = vmatpush1.bf16.msra.mxu0 %v13371_v44 }
 0x8d5   :  { %9393 = vmatprep.subr.bf16.mxu0 %v13376_v56 }
 0x8d8   :  { %9394 = vmatpush1.bf16.msra.mxu0 %v13374_v1 }
 0x8d9   :  { %9395 = vmatprep.subr.bf16.mxu0 %v13379_v27 }
 0x8dc   :  { %9396 = vmatpush1.bf16.msra.mxu0 %v13377_v16 }
 0x8dd   :  { %9397 = vmatprep.subr.bf16.mxu0 %v13382_v17 }
 0x8e0   :  { %9398 = vmatpush1.bf16.msra.mxu0 %v13380_v30 }
 0x8e1   :  { %9399 = vmatprep.subr.bf16.mxu0 %v13385_v39 }
 0x8e4   :  { %9400 = vmatpush1.bf16.msra.mxu0 %v13383_v57 }
 0x8e5   :  { %9401 = vmatprep.subr.bf16.mxu0 %v13388_v22  ;;  %v13398_v22 = vld [vmem:[%s17779_s9 + $0x100] ss:$8 sps:$4 sm:$0xff]  }
 0x8e8   :  { %9402 = vmatpush1.bf16.msra.mxu0 %v13386_v36 }
 0x8e9   :  { %9403 = vmatprep.subr.bf16.mxu0 %v13391_v61  ;;  %v13403_v61 = vld [vmem:[%s17779_s9 + $0x114] ss:$8 sps:$4 sm:$0xff]  }
 0x8ec   :  { %9404 = vmatpush1.bf16.msra.mxu0 %v13389_v18 }
 0x8ed   :  { %9405 = vmatprep.subr.bf16.mxu0 %v13394_v34  ;;  %v13407_v34 = vld [vmem:[%s17779_s9 + $0x130] ss:$8 sps:$4 sm:$0xff]  }
 0x8f0   :  { %9406 = vmatpush1.bf16.msra.mxu0 %v13392_v5  ;;  %v13409_v5 = vld [vmem:[%s17779_s9 + $0x134] ss:$8 sps:$4 sm:$0xff]  }
 0x8f1   :  { %9407 = vmatprep.subr.bf16.mxu0 %v13397_v26  ;;  %v13410_v26 = vld [vmem:[%s17779_s9 + $0x140] ss:$8 sps:$4 sm:$0xff]  }
 0x8f4   :  { %9408 = vmatpush1.bf16.msra.mxu0 %v13395_v60  ;;  %v13415_v60 = vld [vmem:[%s17779_s9 + $0x154] ss:$8 sps:$4 sm:$0xff]  }
 0x8f5   :  { %9418 = vmatprep.subr.bf16.mxu0 %v13400_v59  ;;  %v13413_v59 = vld [vmem:[%s17779_s9 + $0x150] ss:$8 sps:$4 sm:$0xff]  }
 0x92a   :  { %v7917_v29 = vpop.f32.mrb[40].mxu0  ;;  %v7958_v25 = vpop.f32.mrb[152].mxu1 }
 0x92b   :  { %v7919_v24 = vpop.f32.mrb[41].mxu0  ;;  %v7960_v13 = vpop.f32.mrb[153].mxu1 }
 0x92c   :  { %v7921_v50 = vpop.f32.mrb[42].mxu0  ;;  %v7962_v32 = vpop.f32.mrb[154].mxu1 }
 0x92d   :  { %v7922_v33 = vpop.f32.mrb[43].mxu0  ;;  %v7963_v21 = vpop.f32.mrb[155].mxu1  ;;  %v13421_v50 = vld [vmem:[%s17779_s9 + $0x174] ss:$8 sps:$4 sm:$0xff]  }
 0x94a   :  { %v17390_v3 = vpop.f32.mrb[44].mxu0  ;;  %v17392_v62 = vpop.f32.mrb[156].mxu1 }
 0x94b   :  { %v17394_v11 = vpop.f32.mrb[45].mxu0  ;;  %v17396_v48 = vpop.f32.mrb[157].mxu1 }
 0x94c   :  { %v8003_v6 = vpop.f32.mrb[46].mxu0  ;;  %v8044_v10 = vpop.f32.mrb[158].mxu1 }
 0x94d   :  { %v8004_v53 = vpop.f32.mrb[47].mxu0  ;;  %v8045_v9 = vpop.f32.mrb[159].mxu1 }
 0x96a   :  { %v8401_v52 = vpop.f32.mrb[48].mxu0  ;;  %v8442_v0 = vpop.f32.mrb[160].mxu1 }
 0x96b   :  { %v8402_v8 = vadd.f32 %v8401_v52, %v7917_v29  ;;  %v8443_v19 = vadd.f32 %v8442_v0, %v7958_v25  ;;  %v8403_v45 = vpop.f32.mrb[49].mxu0  ;;  %v8444_v63 = vpop.f32.mrb[161].mxu1  ;;  %v13433_v52 = vld [vmem:[%s17779_s9 + $0x1b4] ss:$8 sps:$4 sm:$0xff]   ;;  %v13431_v0 = vld [vmem:[%s17779_s9 + $0x1b0] ss:$8 sps:$4 sm:$0xff]  }
 0x96c   :  { %v8404_v37 = vadd.f32 %v8403_v45, %v7919_v24  ;;  %v8445_v51 = vadd.f32 %v8444_v63, %v7960_v13  ;;  %v8405_v14 = vpop.f32.mrb[50].mxu0  ;;  %v8446_v54 = vpop.f32.mrb[162].mxu1  ;;  %v13442_v45 = vld [vmem:[%s17779_s9 + $0x1e4] ss:$8 sps:$4 sm:$0xff]   ;;  %v13440_v63 = vld [vmem:[%s17779_s9 + $0x1e0] ss:$8 sps:$4 sm:$0xff]  }
 0x96d   :  { %v8573_v47 = vadd.f32 %v8536_v41, %v8402_v8  ;;  %v17405_v44 = vadd.f32 %v8544_v2, %v8443_v19  ;;  %v8406_v56 = vpop.f32.mrb[51].mxu0  ;;  %v8447_v1 = vpop.f32.mrb[163].mxu1  ;;  %v13412_v2 = vld [vmem:[%s17779_s9 + $0x144] ss:$8 sps:$4 sm:$0xff]   ;;  %v13428_v41 = vld [vmem:[%s17779_s9 + $0x1a0] ss:$8 sps:$4 sm:$0xff]  }
 0x96e   :  { %v8574_v27 = vadd.f32 %v8540_v12, %v8404_v37  ;;  %v8576_v16 = vadd.f32 %v8548_v43, %v8445_v51  ;;  %v13436_v12 = vld [vmem:[%s17779_s9 + $0x1c4] ss:$8 sps:$4 sm:$0xff]   ;;  %v13434_v43 = vld [vmem:[%s17779_s9 + $0x1c0] ss:$8 sps:$4 sm:$0xff]   ;;  %v13439_v8 = vld [vmem:[%s17779_s9 + $0x1d4] ss:$8 sps:$4 sm:$0xff]  }
 0x96f   :  { %v8581_v17 = vmax.f32 %v8573_v47, 0.0  ;;  %v13437_v19 = vld [vmem:[%s17779_s9 + $0x1d0] ss:$8 sps:$4 sm:$0xff]   ;;  %v13445_v37 = vld [vmem:[%s17779_s9 + $0x1f4] ss:$8 sps:$4 sm:$0xff]   ;;  %v8583_v14 = vmax.f32 %v17405_v44, 0.0 }
 0x970   :  { %v8582_v30 = vmax.f32 %v8574_v27, 0.0  ;;  %v8584_v39 = vmax.f32 %v8576_v16, 0.0  ;;  %v13443_v51 = vld [vmem:[%s17779_s9 + $0x1f0] ss:$8 sps:$4 sm:$0xff]   ;;  %v13448_v54 = vld [vmem:[%s17779_s9 + $0x204] ss:$8 sps:$4 sm:$0xff]  }
 0x971   :  { %v8589_v36 = vpack.c.bf16 %v8581_v17, %v8581_v17  ;;  %v13446_v56 = vld [vmem:[%s17779_s9 + $0x200] ss:$8 sps:$4 sm:$0xff]   ;;  %v8591_v1 = vpack.c.bf16 %v8583_v14, %v8583_v14  ;;  %v13451_v27 = vld [vmem:[%s17779_s9 + $0x214] ss:$8 sps:$4 sm:$0xff]   ;;  %v13449_v44 = vld [vmem:[%s17779_s9 + $0x210] ss:$8 sps:$4 sm:$0xff]  }
 0x972   :  { %v8590_v57 = vpack.c.bf16 %v8582_v30, %v8582_v30  ;;  %v8592_v18 = vpack.c.bf16 %v8584_v39, %v8584_v39  ;;  %v13454_v17 = vld [vmem:[%s17779_s9 + $0x224] ss:$8 sps:$4 sm:$0xff]  }
 0x973   :  { %v13542_v30 = vld [vmem:[%s17781_s11 + $0x40] sm:$0xff]  }
 0x974   :  { %9409 = vmatprep.mubr.bf16.mxu0 %v8590_v57  ;;  %v13543_v39 = vld [vmem:[%s17781_s11] sm:$0xff]   ;;  %12192 = vmatprep.subr.bf16.mxu1 %v13542_v30 }
 0x975   :  { %9410 = vmatmul.mubr.bf16.vlgmr.msra.gmra.mrb[56].mxu0 %v8589_v36  ;;  %v13452_v57 = vld [vmem:[%s17779_s9 + $0x220] ss:$8 sps:$4 sm:$0xff]   ;;  %12193 = vmatpush3.bf16.msra.mxu1 %v13543_v39  ;;  %v13508_v14 = vld [vmem:[%s17779_s9 + $0x344] ss:$8 sps:$4 sm:$0xff]   ;;  %v13523_v39 = vld [vmem:[%s17779_s9 + $0x394] ss:$8 sps:$4 sm:$0xff]  }
 0x976   :  { %9419 = vmatpush1.bf16.msra.mxu0 %v13398_v22  ;;  %9450 = vmatprep.mubr.bf16.mxu0 %v8592_v18  ;;  %v13544_v22 = vld [vmem:[%s17781_s11 + $0x48] sm:$0xff]   ;;  %v13457_v18 = vld [vmem:[%s17779_s9 + $0x234] ss:$8 sps:$4 sm:$0xff]  }
 0x977   :  { %9420 = vmatprep.subr.bf16.mxu0 %v13403_v61  ;;  %v13545_v36 = vld [vmem:[%s17781_s11 + $0x8] sm:$0xff]   ;;  %12194 = vmatprep.subr.bf16.mxu1 %v13544_v22  ;;  %v13546_v61 = vld [vmem:[%s17781_s11 + $0x50] sm:$0xff]  }
 0x978   :  { %v13518_v30 = vld [vmem:[%s17779_s9 + $0x380] ss:$8 sps:$4 sm:$0xff]   ;;  %v13526_v22 = vld [vmem:[%s17779_s9 + $0x3a4] ss:$8 sps:$4 sm:$0xff]  }
 0x979   :  { %12195 = vmatpush3.bf16.msra.mxu1 %v13545_v36  ;;  %v13524_v36 = vld [vmem:[%s17779_s9 + $0x3a0] ss:$8 sps:$4 sm:$0xff]  }
 0x97a   :  { %9421 = vmatpush1.bf16.msra.mxu0 %v13401_v58  ;;  %v13455_v58 = vld [vmem:[%s17779_s9 + $0x230] ss:$8 sps:$4 sm:$0xff]   ;;  %12196 = vmatprep.subr.bf16.mxu1 %v13546_v61  ;;  %v13529_v61 = vld [vmem:[%s17779_s9 + $0x3b4] ss:$8 sps:$4 sm:$0xff]  }
 0x97b   :  { %9422 = vmatprep.subr.bf16.mxu0 %v13406_v55  ;;  %v13547_v55 = vld [vmem:[%s17781_s11 + $0x10] sm:$0xff]  }
 0x97d   :  { %12197 = vmatpush3.bf16.msra.mxu1 %v13547_v55  ;;  %v13530_v55 = vld [vmem:[%s17779_s9 + $0x3c0] ss:$8 sps:$4 sm:$0xff]  }
 0x97e   :  { %9423 = vmatpush1.bf16.msra.mxu0 %v13404_v42  ;;  %v13548_v42 = vld [vmem:[%s17781_s11 + $0x58] sm:$0xff]  }
 0x97f   :  { %9424 = vmatprep.subr.bf16.mxu0 %v13409_v5  ;;  %v13460_v5 = vld [vmem:[%s17779_s9 + $0x244] ss:$8 sps:$4 sm:$0xff]   ;;  %12198 = vmatprep.subr.bf16.mxu1 %v13548_v42  ;;  %v13535_v42 = vld [vmem:[%s17779_s9 + $0x3d4] ss:$8 sps:$4 sm:$0xff]  }
 0x982   :  { %9425 = vmatpush1.bf16.msra.mxu0 %v13407_v34  ;;  %v13458_v34 = vld [vmem:[%s17779_s9 + $0x240] ss:$8 sps:$4 sm:$0xff]  }
 0x983   :  { %9426 = vmatprep.subr.bf16.mxu0 %v13412_v2  ;;  %v13463_v2 = vld [vmem:[%s17779_s9 + $0x254] ss:$8 sps:$4 sm:$0xff]  }
 0x986   :  { %9427 = vmatpush1.bf16.msra.mxu0 %v13410_v26  ;;  %v13549_v26 = vld [vmem:[%s17781_s11 + $0x18] sm:$0xff]  }
 0x987   :  { %9428 = vmatprep.subr.bf16.mxu0 %v13415_v60  ;;  %v13550_v60 = vld [vmem:[%s17781_s11 + $0x60] sm:$0xff]   ;;  %12199 = vmatpush3.bf16.msra.mxu1 %v13549_v26  ;;  %v13541_v26 = vld [vmem:[%s17779_s9 + $0x3f4] ss:$8 sps:$4 sm:$0xff]  }
 0x988   :  { %12200 = vmatprep.subr.bf16.mxu1 %v13550_v60  ;;  %v13539_v60 = vld [vmem:[%s17779_s9 + $0x3f0] ss:$8 sps:$4 sm:$0xff]  }
 0x98a   :  { %9429 = vmatpush1.bf16.msra.mxu0 %v13413_v59  ;;  %v8483_v35 = vpop.f32.mrb[52].mxu0  ;;  %v8524_v40 = vpop.f32.mrb[164].mxu1  ;;  %v13551_v59 = vld [vmem:[%s17781_s11 + $0x20] sm:$0xff]  }
 0x98b   :  { %v8484_v29 = vadd.f32 %v8483_v35, %v17390_v3  ;;  %v8525_v25 = vadd.f32 %v8524_v40, %v17392_v62  ;;  %v8485_v24 = vpop.f32.mrb[53].mxu0  ;;  %v8526_v13 = vpop.f32.mrb[165].mxu1  ;;  %9430 = vmatprep.subr.bf16.mxu0 %v13418_v49  ;;  %v13461_v49 = vld [vmem:[%s17779_s9 + $0x250] ss:$8 sps:$4 sm:$0xff]   ;;  %v13552_v35 = vld [vmem:[%s17781_s11 + $0x68] sm:$0xff]   ;;  %12201 = vmatpush3.bf16.msra.mxu1 %v13551_v59 }
 0x98c   :  { %v8486_v32 = vadd.f32 %v8485_v24, %v17394_v11  ;;  %v8527_v33 = vadd.f32 %v8526_v13, %v17396_v48  ;;  %v8487_v21 = vpop.f32.mrb[54].mxu0  ;;  %v8528_v6 = vpop.f32.mrb[166].mxu1  ;;  %v13419_v11 = vld [vmem:[%s17779_s9 + $0x170] ss:$8 sps:$4 sm:$0xff]   ;;  %v13430_v48 = vld [vmem:[%s17779_s9 + $0x1a4] ss:$8 sps:$4 sm:$0xff]   ;;  %12202 = vmatprep.subr.bf16.mxu1 %v13552_v35 }
 0x98d   :  { %v17454_v10 = vadd.f32 %v17379_v28, %v8484_v29  ;;  %v17457_v3 = vadd.f32 %v17384_v23, %v8525_v25  ;;  %v8488_v62 = vpop.f32.mrb[55].mxu0  ;;  %v8529_v53 = vpop.f32.mrb[167].mxu1  ;;  %v13424_v28 = vld [vmem:[%s17779_s9 + $0x184] ss:$8 sps:$4 sm:$0xff]   ;;  %v13422_v23 = vld [vmem:[%s17779_s9 + $0x180] ss:$8 sps:$4 sm:$0xff]  }
 0x98e   :  { %v8578_v9 = vadd.f32 %v17386_v20, %v8486_v32  ;;  %v17461_v4 = vadd.f32 %v17388_v31, %v8527_v33  ;;  %9431 = vmatpush1.bf16.msra.mxu0 %v13416_v15  ;;  %v13427_v20 = vld [vmem:[%s17779_s9 + $0x194] ss:$8 sps:$4 sm:$0xff]   ;;  %v13425_v31 = vld [vmem:[%s17779_s9 + $0x190] ss:$8 sps:$4 sm:$0xff]   ;;  %v13466_v40 = vld [vmem:[%s17779_s9 + $0x264] ss:$8 sps:$4 sm:$0xff]  }
 0x98f   :  { %9432 = vmatprep.subr.bf16.mxu0 %v13421_v50  ;;  %v13553_v15 = vld [vmem:[%s17781_s11 + $0x28] sm:$0xff]   ;;  %v13469_v25 = vld [vmem:[%s17779_s9 + $0x274] ss:$8 sps:$4 sm:$0xff]   ;;  %v13467_v24 = vld [vmem:[%s17779_s9 + $0x270] ss:$8 sps:$4 sm:$0xff]   ;;  %v8587_v59 = vmax.f32 %v17457_v3, 0.0 }
 0x990   :  { %v8586_v47 = vmax.f32 %v8578_v9, 0.0  ;;  %v13464_v29 = vld [vmem:[%s17779_s9 + $0x260] ss:$8 sps:$4 sm:$0xff]   ;;  %12203 = vmatpush3.bf16.msra.mxu1 %v13553_v15  ;;  %v13472_v13 = vld [vmem:[%s17779_s9 + $0x284] ss:$8 sps:$4 sm:$0xff]   ;;  %v13554_v35 = vld [vmem:[%s17781_s11 + $0x70] sm:$0xff]  }
 0x991   :  { %v13470_v50 = vld [vmem:[%s17779_s9 + $0x280] ss:$8 sps:$4 sm:$0xff]   ;;  %v13475_v32 = vld [vmem:[%s17779_s9 + $0x294] ss:$8 sps:$4 sm:$0xff]   ;;  %v13473_v33 = vld [vmem:[%s17779_s9 + $0x290] ss:$8 sps:$4 sm:$0xff]   ;;  %12204 = vmatprep.subr.bf16.mxu1 %v13554_v35 }
 0x992   :  { %9433 = vmatpush1.bf16.msra.mxu0 %v13419_v11  ;;  %v8594_v16 = vpack.c.bf16 %v8586_v47, %v8586_v47  ;;  %v13478_v21 = vld [vmem:[%s17779_s9 + $0x2a4] ss:$8 sps:$4 sm:$0xff]   ;;  %v13476_v6 = vld [vmem:[%s17779_s9 + $0x2a0] ss:$8 sps:$4 sm:$0xff]   ;;  %v13481_v62 = vld [vmem:[%s17779_s9 + $0x2b4] ss:$8 sps:$4 sm:$0xff]  }
 0x993   :  { %9434 = vmatprep.subr.bf16.mxu0 %v13424_v28  ;;  %v13479_v53 = vld [vmem:[%s17779_s9 + $0x2b0] ss:$8 sps:$4 sm:$0xff]   ;;  %v13484_v9 = vld [vmem:[%s17779_s9 + $0x2c4] ss:$8 sps:$4 sm:$0xff]   ;;  %v13482_v11 = vld [vmem:[%s17779_s9 + $0x2c0] ss:$8 sps:$4 sm:$0xff]  }
 0x994   :  { %v13487_v28 = vld [vmem:[%s17779_s9 + $0x2d4] ss:$8 sps:$4 sm:$0xff]  }
 0x995   :  { %v13511_v47 = vld [vmem:[%s17779_s9 + $0x354] ss:$8 sps:$4 sm:$0xff]  }
 0x996   :  { %9435 = vmatpush1.bf16.msra.mxu0 %v13422_v23  ;;  %v13485_v23 = vld [vmem:[%s17779_s9 + $0x2d0] ss:$8 sps:$4 sm:$0xff]  }
 0x997   :  { %9436 = vmatprep.subr.bf16.mxu0 %v13427_v20  ;;  %v13490_v20 = vld [vmem:[%s17779_s9 + $0x2e4] ss:$8 sps:$4 sm:$0xff]   ;;  %v13556_v15 = vld [vmem:[%s17781_s11 + $0x78] sm:$0xff]  }
 0x998   :  { %v13557_v3 = vld [vmem:[%s17781_s11 + $0x38] sm:$0xff]  }
 0x99a   :  { %9437 = vmatpush1.bf16.msra.mxu0 %v13425_v31  ;;  %v13488_v31 = vld [vmem:[%s17779_s9 + $0x2e0] ss:$8 sps:$4 sm:$0xff]  }
 0x99b   :  { %9438 = vmatprep.subr.bf16.mxu0 %v13430_v48  ;;  %v13493_v48 = vld [vmem:[%s17779_s9 + $0x2f4] ss:$8 sps:$4 sm:$0xff]  }
 0x99e   :  { %9439 = vmatpush1.bf16.msra.mxu0 %v13428_v41  ;;  %v13491_v41 = vld [vmem:[%s17779_s9 + $0x2f0] ss:$8 sps:$4 sm:$0xff]  }
 0x99f   :  { %9440 = vmatprep.subr.bf16.mxu0 %v13433_v52  ;;  %v8585_v52 = vmax.f32 %v17454_v10, 0.0  ;;  %v13497_v10 = vld [vmem:[%s17779_s9 + $0x310] ss:$8 sps:$4 sm:$0xff]  }
 0x9a2   :  { %9441 = vmatpush1.bf16.msra.mxu0 %v13431_v0  ;;  %v13496_v0 = vld [vmem:[%s17779_s9 + $0x304] ss:$8 sps:$4 sm:$0xff]  }
 0x9a3   :  { %9442 = vmatprep.subr.bf16.mxu0 %v13436_v12  ;;  %v8588_v12 = vmax.f32 %v17461_v4, 0.0  ;;  %v13502_v4 = vld [vmem:[%s17779_s9 + $0x324] ss:$8 sps:$4 sm:$0xff]  }
 0x9a6   :  { %9443 = vmatpush1.bf16.msra.mxu0 %v13434_v43  ;;  %v13494_v43 = vld [vmem:[%s17779_s9 + $0x300] ss:$8 sps:$4 sm:$0xff]  }
 0x9a7   :  { %9444 = vmatprep.subr.bf16.mxu0 %v13439_v8  ;;  %v8593_v8 = vpack.c.bf16 %v8585_v52, %v8585_v52 }
 0x9aa   :  { %9445 = vmatpush1.bf16.msra.mxu0 %v13437_v19  ;;  %v13499_v19 = vld [vmem:[%s17779_s9 + $0x314] ss:$8 sps:$4 sm:$0xff]  }
 0x9ab   :  { %9446 = vmatprep.subr.bf16.mxu0 %v13442_v45  ;;  %v8596_v45 = vpack.c.bf16 %v8588_v12, %v8588_v12 }
 0x9ae   :  { %9447 = vmatpush1.bf16.msra.mxu0 %v13440_v63  ;;  %v13500_v63 = vld [vmem:[%s17779_s9 + $0x320] ss:$8 sps:$4 sm:$0xff]  }
 0x9af   :  { %9448 = vmatprep.subr.bf16.mxu0 %v13445_v37  ;;  %v13505_v37 = vld [vmem:[%s17779_s9 + $0x334] ss:$8 sps:$4 sm:$0xff]  }
 0x9b2   :  { %9449 = vmatpush1.bf16.msra.mxu0 %v13443_v51  ;;  %v13503_v51 = vld [vmem:[%s17779_s9 + $0x330] ss:$8 sps:$4 sm:$0xff]  }
 0x9b3   :  { %9459 = vmatprep.subr.bf16.mxu0 %v13448_v54  ;;  %v13506_v54 = vld [vmem:[%s17779_s9 + $0x340] ss:$8 sps:$4 sm:$0xff]  }
 0x9b5   :  { %9451 = vmatmul.mubr.bf16.vlgmr.msra.gmra.mrb[56].mxu0 %v8591_v1  ;;  %v13514_v1 = vld [vmem:[%s17779_s9 + $0x364] ss:$8 sps:$4 sm:$0xff]  }
 0x9b6   :  { %9460 = vmatpush1.bf16.msra.mxu0 %v13446_v56  ;;  %9491 = vmatprep.mubr.bf16.mxu0 %v8594_v16  ;;  %v13509_v56 = vld [vmem:[%s17779_s9 + $0x350] ss:$8 sps:$4 sm:$0xff]   ;;  %v13517_v16 = vld [vmem:[%s17779_s9 + $0x374] ss:$8 sps:$4 sm:$0xff]  }
 0x9b7   :  { %9461 = vmatprep.subr.bf16.mxu0 %v13451_v27  ;;  %v13512_v27 = vld [vmem:[%s17779_s9 + $0x360] ss:$8 sps:$4 sm:$0xff]  }
 0x9ba   :  { %9462 = vmatpush1.bf16.msra.mxu0 %v13449_v44  ;;  %v13515_v44 = vld [vmem:[%s17779_s9 + $0x370] ss:$8 sps:$4 sm:$0xff]  }
 0x9bb   :  { %9463 = vmatprep.subr.bf16.mxu0 %v13454_v17  ;;  %v13520_v17 = vld [vmem:[%s17779_s9 + $0x384] ss:$8 sps:$4 sm:$0xff]  }
 0x9be   :  { %9464 = vmatpush1.bf16.msra.mxu0 %v13452_v57  ;;  %v13521_v57 = vld [vmem:[%s17779_s9 + $0x390] ss:$8 sps:$4 sm:$0xff]  }
 0x9bf   :  { %9465 = vmatprep.subr.bf16.mxu0 %v13457_v18  ;;  %v13527_v18 = vld [vmem:[%s17779_s9 + $0x3b0] ss:$8 sps:$4 sm:$0xff]  }
 0x9c2   :  { %9466 = vmatpush1.bf16.msra.mxu0 %v13455_v58  ;;  %v13532_v58 = vld [vmem:[%s17779_s9 + $0x3c4] ss:$8 sps:$4 sm:$0xff]  }
 0x9c3   :  { %9467 = vmatprep.subr.bf16.mxu0 %v13460_v5  ;;  %v13533_v5 = vld [vmem:[%s17779_s9 + $0x3d0] ss:$8 sps:$4 sm:$0xff]  }
 0x9c6   :  { %9468 = vmatpush1.bf16.msra.mxu0 %v13458_v34  ;;  %v13538_v34 = vld [vmem:[%s17779_s9 + $0x3e4] ss:$8 sps:$4 sm:$0xff]  }
 0x9c7   :  { %9469 = vmatprep.subr.bf16.mxu0 %v13463_v2  ;;  %v13536_v2 = vld [vmem:[%s17779_s9 + $0x3e0] ss:$8 sps:$4 sm:$0xff]  }
 0x9ca   :  { %9470 = vmatpush1.bf16.msra.mxu0 %v13461_v49  ;;  %v8595_v49 = vpack.c.bf16 %v8587_v59, %v8587_v59 }
 0x9cb   :  { %9471 = vmatprep.subr.bf16.mxu0 %v13466_v40  ;;  %v13555_v40 = vld [vmem:[%s17781_s11 + $0x30] sm:$0xff]  }
 0x9cc   :  { %12205 = vmatpush3.bf16.msra.mxu1 %v13555_v40 }
 0x9cd   :  { %12206 = vmatprep.subr.bf16.mxu1 %v13556_v15 }
 0x9ce   :  { %9472 = vmatpush1.bf16.msra.mxu0 %v13464_v29  ;;  %v8725_v29 = vld [vmem:[%s17782_s10] sm:$0x3] }
 0x9cf   :  { %9473 = vmatprep.subr.bf16.mxu0 %v13469_v25  ;;  %v8730_v25 = vrot.slane %v8725_v29, %v8535_v38  ;;  %v11179_v38 = vld [vmem:[%s17783_s12] ss:$0 sm:$0xff] }
 0x9d0   :  { %12207 = vmatpush3.bf16.msra.mxu1 %v13557_v3 }
 0x9d2   :  { %9474 = vmatpush1.bf16.msra.mxu0 %v13467_v24  ;;  %v8734_v24 = vrot.slane %v8725_v29, %v8539_v7 }
 0x9d3   :  { %9475 = vmatprep.subr.bf16.mxu0 %v13472_v13 }
 0x9d6   :  { %9476 = vmatpush1.bf16.msra.mxu0 %v13470_v50 }
 0x9d7   :  { %9477 = vmatprep.subr.bf16.mxu0 %v13475_v32 }
 0x9da   :  { %9478 = vmatpush1.bf16.msra.mxu0 %v13473_v33 }
 0x9db   :  { %9479 = vmatprep.subr.bf16.mxu0 %v13478_v21 }
 0x9de   :  { %9480 = vmatpush1.bf16.msra.mxu0 %v13476_v6 }
 0x9df   :  { %9481 = vmatprep.subr.bf16.mxu0 %v13481_v62 }
 0x9e2   :  { %9482 = vmatpush1.bf16.msra.mxu0 %v13479_v53 }
 0x9e3   :  { %9483 = vmatprep.subr.bf16.mxu0 %v13484_v9 }
 0x9e6   :  { %9484 = vmatpush1.bf16.msra.mxu0 %v13482_v11 }
 0x9e7   :  { %9485 = vmatprep.subr.bf16.mxu0 %v13487_v28 }
 0x9ea   :  { %9486 = vmatpush1.bf16.msra.mxu0 %v13485_v23 }
 0x9eb   :  { %9487 = vmatprep.subr.bf16.mxu0 %v13490_v20 }
 0x9ee   :  { %9488 = vmatpush1.bf16.msra.mxu0 %v13488_v31 }
 0x9ef   :  { %9489 = vmatprep.subr.bf16.mxu0 %v13493_v48 }
 0x9f2   :  { %9490 = vmatpush1.bf16.msra.mxu0 %v13491_v41 }
 0x9f3   :  { %9500 = vmatprep.subr.bf16.mxu0 %v13496_v0 }
 0x9f5   :  { %9492 = vmatmul.mubr.bf16.vlgmr.msra.gmra.mrb[56].mxu0 %v8593_v8 }
 0x9f6   :  { %9501 = vmatpush1.bf16.msra.mxu0 %v13494_v43  ;;  %9532 = vmatprep.mubr.bf16.mxu0 %v8596_v45 }
 0x9f7   :  { %9502 = vmatprep.subr.bf16.mxu0 %v13499_v19 }
 0x9fa   :  { %9503 = vmatpush1.bf16.msra.mxu0 %v13497_v10 }
 0x9fb   :  { %9504 = vmatprep.subr.bf16.mxu0 %v13502_v4 }
 0x9fe   :  { %9505 = vmatpush1.bf16.msra.mxu0 %v13500_v63 }
 0x9ff   :  { %9506 = vmatprep.subr.bf16.mxu0 %v13505_v37 }
 0xa02   :  { %9507 = vmatpush1.bf16.msra.mxu0 %v13503_v51 }
 0xa03   :  { %9508 = vmatprep.subr.bf16.mxu0 %v13508_v14 }
 0xa06   :  { %9509 = vmatpush1.bf16.msra.mxu0 %v13506_v54 }
 0xa07   :  { %9510 = vmatprep.subr.bf16.mxu0 %v13511_v47 }
 0xa0a   :  { %9511 = vmatpush1.bf16.msra.mxu0 %v13509_v56 }
 0xa0b   :  { %9512 = vmatprep.subr.bf16.mxu0 %v13514_v1 }
 0xa0e   :  { %9513 = vmatpush1.bf16.msra.mxu0 %v13512_v27 }
 0xa0f   :  { %9514 = vmatprep.subr.bf16.mxu0 %v13517_v16 }
 0xa12   :  { %9515 = vmatpush1.bf16.msra.mxu0 %v13515_v44 }
 0xa13   :  { %9516 = vmatprep.subr.bf16.mxu0 %v13520_v17 }
 0xa16   :  { %9517 = vmatpush1.bf16.msra.mxu0 %v13518_v30 }
 0xa17   :  { %9518 = vmatprep.subr.bf16.mxu0 %v13523_v39 }
 0xa1a   :  { %9519 = vmatpush1.bf16.msra.mxu0 %v13521_v57 }
 0xa1b   :  { %9520 = vmatprep.subr.bf16.mxu0 %v13526_v22 }
 0xa1e   :  { %9521 = vmatpush1.bf16.msra.mxu0 %v13524_v36 }
 0xa1f   :  { %9522 = vmatprep.subr.bf16.mxu0 %v13529_v61 }
 0xa22   :  { %9523 = vmatpush1.bf16.msra.mxu0 %v13527_v18 }
 0xa23   :  { %9524 = vmatprep.subr.bf16.mxu0 %v13532_v58 }
 0xa26   :  { %9525 = vmatpush1.bf16.msra.mxu0 %v13530_v55 }
 0xa27   :  { %9526 = vmatprep.subr.bf16.mxu0 %v13535_v42 }
 0xa2a   :  { %9527 = vmatpush1.bf16.msra.mxu0 %v13533_v5 }
 0xa2b   :  { %9528 = vmatprep.subr.bf16.mxu0 %v13538_v34 }
 0xa2e   :  { %9529 = vmatpush1.bf16.msra.mxu0 %v13536_v2 }
 0xa2f   :  { %9530 = vmatprep.subr.bf16.mxu0 %v13541_v26 }
 0xa32   :  { %9531 = vmatpush1.bf16.msra.mxu0 %v13539_v60 }
 0xa35   :  { %9533 = vmatmul.mubr.bf16.vlgmr.msra.gmra.mrb[56].mxu0 %v8595_v49 }
 0xb08   :  { %v9534_v13 = vpop.f32.mrb[56].mxu0 }
 0xb09   :  { %v12942_v50 = vadd.f32 %v9534_v13, %v8730_v25  ;;  %v9536_v32 = vpop.f32.mrb[57].mxu0 }
 0xb0a   :  { %v12943_v33 = vadd.f32 %v9536_v32, %v8734_v24  ;;  %v9538_v21 = vpop.f32.mrb[58].mxu0 }
 0xb0b   :  { %v9541_v6 = vmax.f32 %v12942_v50, 0.0  ;;  %v9539_v62 = vpop.f32.mrb[59].mxu0 }
 0xb0c   :  { %v9542_v53 = vmax.f32 %v12943_v33, 0.0 }
 0xb0d   :  { %v9543_v11 = vpack.c.bf16 %v9541_v6, %v9541_v6 }
 0xb0e   :  { %v9544_v9 = vpack.c.bf16 %v9542_v53, %v9542_v53 }
 0xb10   :  { %9712 = vmatprep.mubr.bf16.mxu1 %v9544_v9 }
 0xb11   :  { %9713 = vmatmul.mubr.bf16.vlgmr.msra.gmra.mrb[168].mxu1 %v9543_v11 }
 0xbe4   :  { %v12208_v28 = vpop.f32.mrb[168].mxu1 }
 0xbe5   :  { %v12209_v23 = vpop.f32.mrb[169].mxu1 }
 0xbe6   :  { %v12210_v46 = vadd.f32 %v12209_v23, %v12208_v28  ;;  %v12211_v7 = vpop.f32.mrb[170].mxu1 }
 0xbe7   :  { %v12212_v20 = vpop.f32.mrb[171].mxu1 }
 0xbe8   :  { %v9715_v31 = vadd.f32 %v12210_v46, %v11179_v38 }
 0xbea   :  { %9720 = vst [vmem:[%s17784_s13] sm:$0x3] %v9715_v31 }

</bundles_post_ra>
